<compile_context>
chip_gen: v7x
topology: tpu7x:2x2x1
jax: 0.10.0
libtpu: 0.0.40
codegen_flags: <defaults>
</compile_context>

<pallas_src>
import functools

import jax
import jax.numpy as jnp
from jax.experimental import pallas as pl
from jax.experimental.pallas import tpu as pltpu


# ----------------------------- Fused kernel ---------------------------------
def _cbam_kernel(x_ref, w1t_ref, w2_ref, ij_ref, wsa_ref, y_ref, *, H, W, K):
    # x_ref block: (Nb, C, HW) f32 -- HW on the lane axis (lane dense).
    Nb, C, HW = x_ref.shape
    Cr = w1t_ref.shape[1]
    P = K // 2

    # --- constants hoisted out of the per-sample loop ---
    w1t = w1t_ref[...]                                   # (C, Cr) = fc1.T
    w2 = w2_ref[...]                                     # (C, Cr) = fc2
    ij = ij_ref[...]                                     # (2, HW) int32
    i_idx = ij[0:1, :]                                   # (1, HW) row of flat p
    j_idx = ij[1:2, :]                                   # (1, HW) col of flat p
    row_ok = {d: (i_idx + d >= 0) & (i_idx + d < H) for d in range(-P, P + 1)}
    col_ok = {d: (j_idx + d >= 0) & (j_idx + d < W) for d in range(-P, P + 1)}
    col2 = jax.lax.broadcasted_iota(jnp.int32, (C, 2), 1)

    for n in range(Nb):                                  # static unroll, Nb small
        x = x_ref[n]                                     # (C, HW)

        # ---- ChannelAttention: sigmoid(fc(avg_pool) + fc(max_pool)) ----
        avg_c = jnp.mean(x, axis=1, keepdims=True)       # (C, 1)
        max_c = jnp.max(x, axis=1, keepdims=True)        # (C, 1)
        stats = jnp.where(col2 == 0, avg_c, max_c)       # (C, 2) = [avg | max]

        # Tiny MLP on VPU/XLU (no MXU): Cr = C // reduction_ratio is small.
        h_rows = []
        for r in range(Cr):
            h_rows.append(jnp.sum(w1t[:, r:r + 1] * stats,
                                  axis=0, keepdims=True))          # (1, 2)
        h = jnp.concatenate(h_rows, axis=0) if Cr > 1 else h_rows[0]  # (Cr, 2)
        h = jnp.where(h >= 0, h, 0.01 * h)               # LeakyReLU(0.01)
        o = None
        for r in range(Cr):
            term = w2[:, r:r + 1] * h[r:r + 1, :]        # (C,1)*(1,2) -> (C,2)
            o = term if o is None else o + term
        ca = jax.nn.sigmoid(o[:, 0:1] + o[:, 1:2])       # fc(avg)+fc(max), (C,1)
        x1 = x * ca                                      # (C, HW)

        # ---- SpatialAttention: sigmoid(conv7x7([avg_c(x1); max_c(x1)])) ----
        avg_s = jnp.mean(x1, axis=0, keepdims=True)      # (1, HW)
        max_s = jnp.max(x1, axis=0, keepdims=True)       # (1, HW)
        pooled = jnp.concatenate([avg_s, max_s], axis=0)  # (2, HW): row0=avg row1=max

        # Zero-padded 7x7 cross-correlation as 49 masked lane rotations:
        #   out[p] += w[ki,kj] * in[p + di*W + dj],  di=ki-P, dj=kj-P.
        # Row/col validity masks implement the zero padding AND kill the
        # wrap-around of the rotation, so no halo handling is needed.
        acc = None
        for ki in range(K):
            for kj in range(K):
                di, dj = ki - P, kj - P
                off = di * W + dj
                rolled = (pooled if off == 0 else
                          pltpu.roll(pooled, shift=(-off) % HW, axis=1))
                masked = jnp.where(row_ok[di] & col_ok[dj], rolled, 0.0)
                t = ki * K + kj
                term = (wsa_ref[t] * masked[0:1, :] +          # avg channel
                        wsa_ref[K * K + t] * masked[1:2, :])   # max channel
                acc = term if acc is None else acc + term
        sa = jax.nn.sigmoid(acc)                         # (1, HW)

        y_ref[n] = (x1 * sa).astype(y_ref.dtype)


# ----------------------------- Wrapper --------------------------------------
@jax.jit
def cbam_forward(x_nchw, w1, w2, wsa):
    N, C, H, W = x_nchw.shape
    Cr = w1.shape[0]
    K = wsa.shape[-1]
    HW = H * W

    x_flat = x_nchw.reshape(N, C, HW).astype(jnp.float32)   # free reshape

    # Samples per grid step: whole (small) batch in one step to amortize the
    # fixed per-step cost, capped so the unrolled body and the double-buffered
    # I/O blocks stay small.  Large N => multiple "parallel" steps (megacore).
    per_sample_bytes = C * HW * 4
    Nb = max(1, min(N, 8, (8 * 1024 * 1024) // (4 * per_sample_bytes)))
    while N % Nb:            # keep the grid exactly covering the batch
        Nb -= 1
    grid = (pl.cdiv(N, Nb),)

    # Flat-position -> (row, col) index map: lets the kernel build the 49
    # stencil masks with plain integer compares (no in-kernel div/mod).
    pos = jnp.arange(HW, dtype=jnp.int32)
    ij = jnp.stack([pos // W, pos % W], axis=0)               # (2, HW) int32

    # 7x7 conv weights flattened for scalar SMEM reads: [avg taps | max taps].
    wsa_flat = wsa.reshape(2 * K * K).astype(jnp.float32)

    # VMEM limit sized from the actual footprint (I/O double-buffered + temps).
    block_bytes = Nb * C * HW * 4
    const_bytes = (2 * C * Cr + 2 * HW + 2 * K * K) * 4
    vmem_limit = int(min(100 * 2 ** 20,
                         max(8 * 2 ** 20, 8 * block_bytes + 2 * const_bytes)))

    kernel = functools.partial(_cbam_kernel, H=H, W=W, K=K)

    y_flat = pl.pallas_call(
        kernel,
        out_shape=jax.ShapeDtypeStruct((N, C, HW), jnp.float32),
        grid=grid,
        in_specs=[
            pl.BlockSpec((Nb, C, HW), lambda n: (n, 0, 0)),   # x, lane dense
            pl.BlockSpec((C, Cr), lambda n: (0, 0)),          # fc1 weight^T
            pl.BlockSpec((C, Cr), lambda n: (0, 0)),          # fc2 weight
            pl.BlockSpec((2, HW), lambda n: (0, 0)),          # (row, col) index map
            pl.BlockSpec(memory_space=pltpu.MemorySpace.SMEM),  # 7x7 conv weights
        ],
        out_specs=pl.BlockSpec((Nb, C, HW), lambda n: (n, 0, 0)),
        compiler_params=pltpu.CompilerParams(
            dimension_semantics=("parallel",),
            vmem_limit_bytes=vmem_limit,
        ),
    )(x_flat, w1.T.astype(jnp.float32), w2.astype(jnp.float32), ij, wsa_flat)

    return y_flat.reshape(N, C, H, W)


# ----------------------------- Pure-JAX reference ---------------------------
def cbam_reference(x, w1, w2, wsa):
    hp = jax.lax.Precision.HIGHEST
    avg_c = jnp.mean(x, axis=(2, 3), keepdims=True)
    max_c = jnp.max(x, axis=(2, 3), keepdims=True)

    def fc(v):
        v2 = v[:, :, 0, 0]                                   # (N, C)
        h = jnp.dot(v2, w1.T, precision=hp)
        h = jnp.where(h >= 0, h, 0.01 * h)
        return jnp.dot(h, w2.T, precision=hp)[:, :, None, None]

    ca = jax.nn.sigmoid(fc(avg_c) + fc(max_c))
    x1 = x * ca
    avg_s = jnp.mean(x1, axis=1, keepdims=True)
    max_s = jnp.max(x1, axis=1, keepdims=True)
    s = jnp.concatenate([avg_s, max_s], axis=1)              # (N, 2, H, W)
    conv = jax.lax.conv_general_dilated(
        s, wsa, window_strides=(1, 1), padding=((3, 3), (3, 3)),
        dimension_numbers=("NCHW", "OIHW", "NCHW"), precision=hp)
    return x1 * jax.nn.sigmoid(conv)


if __name__ == "__main__":
    N, C, H, W = 2, 32, 16, 16
    reduction_ratio = 16
    Cr = C // reduction_ratio
    ksize = 7

    key = jax.random.PRNGKey(0)
    k1, k2, k3, k4 = jax.random.split(key, 4)
    x = jax.random.normal(k1, (N, C, H, W), jnp.float32)
    # Conv2d(C, Cr, 1, bias=False).weight -> (Cr, C, 1, 1), squeezed to (Cr, C)
    w1 = jax.random.normal(k2, (Cr, C), jnp.float32) * 0.1
    # Conv2d(Cr, C, 1, bias=False).weight -> (C, Cr, 1, 1), squeezed to (C, Cr)
    w2 = jax.random.normal(k3, (C, Cr), jnp.float32) * 0.1
    # Conv2d(2, 1, 7, padding=3, bias=False).weight -> (1, 2, 7, 7)
    wsa = jax.random.normal(k4, (1, 2, ksize, ksize), jnp.float32) * 0.1

    y = jax.block_until_ready(cbam_forward(x, w1, w2, wsa))
    y_ref = jax.block_until_ready(cbam_reference(x, w1, w2, wsa))

    assert y.shape == (N, C, H, W)
    if not jnp.allclose(y, y_ref, atol=1e-3, rtol=1e-3):
        max_err = jnp.max(jnp.abs(y - y_ref))
        raise AssertionError(f"Pallas CBAM mismatch, max abs err = {max_err}")
    print("KERNEL_OK")
</pallas_src>

<mosaic_0001>
module attributes {stable_mosaic.version = 11 : i64} {
  func.func @_cbam_kernel(%arg0: i32, %arg1: memref<2x32x256xf32, #tpu.memory_space<vmem>>, %arg2: memref<32x2xf32, #tpu.memory_space<vmem>>, %arg3: memref<32x2xf32, #tpu.memory_space<vmem>>, %arg4: memref<2x256xi32, #tpu.memory_space<vmem>>, %arg5: memref<98xf32, #tpu.memory_space<smem>>, %arg6: memref<2x32x256xf32, #tpu.memory_space<vmem>>) attributes {dimension_semantics = [#tpu.dimension_semantics<parallel>], iteration_bounds = array<i64: 1>, scalar_prefetch = 0 : i64, scratch_operands = 0 : i64, tpu.core_type = #tpu.core_type<tc>, window_params = [{transform_indices = @transform_0, window_bounds = array<i64: 2, 32, 256>}, {pipeline_mode = #tpu.pipeline_mode<synchronous>, transform_indices = @transform_1, window_bounds = array<i64: 32, 2>}, {pipeline_mode = #tpu.pipeline_mode<synchronous>, transform_indices = @transform_2, window_bounds = array<i64: 32, 2>}, {pipeline_mode = #tpu.pipeline_mode<synchronous>, transform_indices = @transform_3, window_bounds = array<i64: 2, 256>}, {transform_indices = @transform_4, window_bounds = array<i64: 98>}, {transform_indices = @transform_5, window_bounds = array<i64: 2, 32, 256>}]} {
    %c0 = arith.constant 0 : index
    %c0_0 = arith.constant 0 : index
    %0 = vector.load %arg2[%c0, %c0_0] : memref<32x2xf32, #tpu.memory_space<vmem>>, vector<32x2xf32>
    %c0_1 = arith.constant 0 : index
    %c0_2 = arith.constant 0 : index
    %1 = vector.load %arg3[%c0_1, %c0_2] : memref<32x2xf32, #tpu.memory_space<vmem>>, vector<32x2xf32>
    %c0_3 = arith.constant 0 : index
    %c0_4 = arith.constant 0 : index
    %2 = vector.load %arg4[%c0_3, %c0_4] : memref<2x256xi32, #tpu.memory_space<vmem>>, vector<2x256xi32>
    %3 = vector.extract_strided_slice %2 {offsets = [0, 0], sizes = [1, 256], strides = [1, 1]} : vector<2x256xi32> to vector<1x256xi32>
    %4 = vector.extract_strided_slice %2 {offsets = [1, 0], sizes = [1, 256], strides = [1, 1]} : vector<2x256xi32> to vector<1x256xi32>
    %c-3_i32 = arith.constant -3 : i32
    %5 = vector.broadcast %c-3_i32 : i32 to vector<1x256xi32>
    %6 = arith.addi %3, %5 : vector<1x256xi32>
    %c0_i32 = arith.constant 0 : i32
    %7 = vector.broadcast %c0_i32 : i32 to vector<1x256xi32>
    %8 = arith.cmpi sge, %6, %7 : vector<1x256xi32>
    %c-3_i32_5 = arith.constant -3 : i32
    %9 = vector.broadcast %c-3_i32_5 : i32 to vector<1x256xi32>
    %10 = arith.addi %3, %9 : vector<1x256xi32>
    %c16_i32 = arith.constant 16 : i32
    %11 = vector.broadcast %c16_i32 : i32 to vector<1x256xi32>
    %12 = arith.cmpi slt, %10, %11 : vector<1x256xi32>
    %13 = arith.andi %8, %12 : vector<1x256xi1>
    %c-2_i32 = arith.constant -2 : i32
    %14 = vector.broadcast %c-2_i32 : i32 to vector<1x256xi32>
    %15 = arith.addi %3, %14 : vector<1x256xi32>
    %c0_i32_6 = arith.constant 0 : i32
    %16 = vector.broadcast %c0_i32_6 : i32 to vector<1x256xi32>
    %17 = arith.cmpi sge, %15, %16 : vector<1x256xi32>
    %c-2_i32_7 = arith.constant -2 : i32
    %18 = vector.broadcast %c-2_i32_7 : i32 to vector<1x256xi32>
    %19 = arith.addi %3, %18 : vector<1x256xi32>
    %c16_i32_8 = arith.constant 16 : i32
    %20 = vector.broadcast %c16_i32_8 : i32 to vector<1x256xi32>
    %21 = arith.cmpi slt, %19, %20 : vector<1x256xi32>
    %22 = arith.andi %17, %21 : vector<1x256xi1>
    %c-1_i32 = arith.constant -1 : i32
    %23 = vector.broadcast %c-1_i32 : i32 to vector<1x256xi32>
    %24 = arith.addi %3, %23 : vector<1x256xi32>
    %c0_i32_9 = arith.constant 0 : i32
    %25 = vector.broadcast %c0_i32_9 : i32 to vector<1x256xi32>
    %26 = arith.cmpi sge, %24, %25 : vector<1x256xi32>
    %c-1_i32_10 = arith.constant -1 : i32
    %27 = vector.broadcast %c-1_i32_10 : i32 to vector<1x256xi32>
    %28 = arith.addi %3, %27 : vector<1x256xi32>
    %c16_i32_11 = arith.constant 16 : i32
    %29 = vector.broadcast %c16_i32_11 : i32 to vector<1x256xi32>
    %30 = arith.cmpi slt, %28, %29 : vector<1x256xi32>
    %31 = arith.andi %26, %30 : vector<1x256xi1>
    %c0_i32_12 = arith.constant 0 : i32
    %32 = vector.broadcast %c0_i32_12 : i32 to vector<1x256xi32>
    %33 = arith.addi %3, %32 : vector<1x256xi32>
    %c0_i32_13 = arith.constant 0 : i32
    %34 = vector.broadcast %c0_i32_13 : i32 to vector<1x256xi32>
    %35 = arith.cmpi sge, %33, %34 : vector<1x256xi32>
    %c0_i32_14 = arith.constant 0 : i32
    %36 = vector.broadcast %c0_i32_14 : i32 to vector<1x256xi32>
    %37 = arith.addi %3, %36 : vector<1x256xi32>
    %c16_i32_15 = arith.constant 16 : i32
    %38 = vector.broadcast %c16_i32_15 : i32 to vector<1x256xi32>
    %39 = arith.cmpi slt, %37, %38 : vector<1x256xi32>
    %40 = arith.andi %35, %39 : vector<1x256xi1>
    %c1_i32 = arith.constant 1 : i32
    %41 = vector.broadcast %c1_i32 : i32 to vector<1x256xi32>
    %42 = arith.addi %3, %41 : vector<1x256xi32>
    %c0_i32_16 = arith.constant 0 : i32
    %43 = vector.broadcast %c0_i32_16 : i32 to vector<1x256xi32>
    %44 = arith.cmpi sge, %42, %43 : vector<1x256xi32>
    %c1_i32_17 = arith.constant 1 : i32
    %45 = vector.broadcast %c1_i32_17 : i32 to vector<1x256xi32>
    %46 = arith.addi %3, %45 : vector<1x256xi32>
    %c16_i32_18 = arith.constant 16 : i32
    %47 = vector.broadcast %c16_i32_18 : i32 to vector<1x256xi32>
    %48 = arith.cmpi slt, %46, %47 : vector<1x256xi32>
    %49 = arith.andi %44, %48 : vector<1x256xi1>
    %c2_i32 = arith.constant 2 : i32
    %50 = vector.broadcast %c2_i32 : i32 to vector<1x256xi32>
    %51 = arith.addi %3, %50 : vector<1x256xi32>
    %c0_i32_19 = arith.constant 0 : i32
    %52 = vector.broadcast %c0_i32_19 : i32 to vector<1x256xi32>
    %53 = arith.cmpi sge, %51, %52 : vector<1x256xi32>
    %c2_i32_20 = arith.constant 2 : i32
    %54 = vector.broadcast %c2_i32_20 : i32 to vector<1x256xi32>
    %55 = arith.addi %3, %54 : vector<1x256xi32>
    %c16_i32_21 = arith.constant 16 : i32
    %56 = vector.broadcast %c16_i32_21 : i32 to vector<1x256xi32>
    %57 = arith.cmpi slt, %55, %56 : vector<1x256xi32>
    %58 = arith.andi %53, %57 : vector<1x256xi1>
    %c3_i32 = arith.constant 3 : i32
    %59 = vector.broadcast %c3_i32 : i32 to vector<1x256xi32>
    %60 = arith.addi %3, %59 : vector<1x256xi32>
    %c0_i32_22 = arith.constant 0 : i32
    %61 = vector.broadcast %c0_i32_22 : i32 to vector<1x256xi32>
    %62 = arith.cmpi sge, %60, %61 : vector<1x256xi32>
    %c3_i32_23 = arith.constant 3 : i32
    %63 = vector.broadcast %c3_i32_23 : i32 to vector<1x256xi32>
    %64 = arith.addi %3, %63 : vector<1x256xi32>
    %c16_i32_24 = arith.constant 16 : i32
    %65 = vector.broadcast %c16_i32_24 : i32 to vector<1x256xi32>
    %66 = arith.cmpi slt, %64, %65 : vector<1x256xi32>
    %67 = arith.andi %62, %66 : vector<1x256xi1>
    %c-3_i32_25 = arith.constant -3 : i32
    %68 = vector.broadcast %c-3_i32_25 : i32 to vector<1x256xi32>
    %69 = arith.addi %4, %68 : vector<1x256xi32>
    %c0_i32_26 = arith.constant 0 : i32
    %70 = vector.broadcast %c0_i32_26 : i32 to vector<1x256xi32>
    %71 = arith.cmpi sge, %69, %70 : vector<1x256xi32>
    %c-3_i32_27 = arith.constant -3 : i32
    %72 = vector.broadcast %c-3_i32_27 : i32 to vector<1x256xi32>
    %73 = arith.addi %4, %72 : vector<1x256xi32>
    %c16_i32_28 = arith.constant 16 : i32
    %74 = vector.broadcast %c16_i32_28 : i32 to vector<1x256xi32>
    %75 = arith.cmpi slt, %73, %74 : vector<1x256xi32>
    %76 = arith.andi %71, %75 : vector<1x256xi1>
    %c-2_i32_29 = arith.constant -2 : i32
    %77 = vector.broadcast %c-2_i32_29 : i32 to vector<1x256xi32>
    %78 = arith.addi %4, %77 : vector<1x256xi32>
    %c0_i32_30 = arith.constant 0 : i32
    %79 = vector.broadcast %c0_i32_30 : i32 to vector<1x256xi32>
    %80 = arith.cmpi sge, %78, %79 : vector<1x256xi32>
    %c-2_i32_31 = arith.constant -2 : i32
    %81 = vector.broadcast %c-2_i32_31 : i32 to vector<1x256xi32>
    %82 = arith.addi %4, %81 : vector<1x256xi32>
    %c16_i32_32 = arith.constant 16 : i32
    %83 = vector.broadcast %c16_i32_32 : i32 to vector<1x256xi32>
    %84 = arith.cmpi slt, %82, %83 : vector<1x256xi32>
    %85 = arith.andi %80, %84 : vector<1x256xi1>
    %c-1_i32_33 = arith.constant -1 : i32
    %86 = vector.broadcast %c-1_i32_33 : i32 to vector<1x256xi32>
    %87 = arith.addi %4, %86 : vector<1x256xi32>
    %c0_i32_34 = arith.constant 0 : i32
    %88 = vector.broadcast %c0_i32_34 : i32 to vector<1x256xi32>
    %89 = arith.cmpi sge, %87, %88 : vector<1x256xi32>
    %c-1_i32_35 = arith.constant -1 : i32
    %90 = vector.broadcast %c-1_i32_35 : i32 to vector<1x256xi32>
    %91 = arith.addi %4, %90 : vector<1x256xi32>
    %c16_i32_36 = arith.constant 16 : i32
    %92 = vector.broadcast %c16_i32_36 : i32 to vector<1x256xi32>
    %93 = arith.cmpi slt, %91, %92 : vector<1x256xi32>
    %94 = arith.andi %89, %93 : vector<1x256xi1>
    %c0_i32_37 = arith.constant 0 : i32
    %95 = vector.broadcast %c0_i32_37 : i32 to vector<1x256xi32>
    %96 = arith.addi %4, %95 : vector<1x256xi32>
    %c0_i32_38 = arith.constant 0 : i32
    %97 = vector.broadcast %c0_i32_38 : i32 to vector<1x256xi32>
    %98 = arith.cmpi sge, %96, %97 : vector<1x256xi32>
    %c0_i32_39 = arith.constant 0 : i32
    %99 = vector.broadcast %c0_i32_39 : i32 to vector<1x256xi32>
    %100 = arith.addi %4, %99 : vector<1x256xi32>
    %c16_i32_40 = arith.constant 16 : i32
    %101 = vector.broadcast %c16_i32_40 : i32 to vector<1x256xi32>
    %102 = arith.cmpi slt, %100, %101 : vector<1x256xi32>
    %103 = arith.andi %98, %102 : vector<1x256xi1>
    %c1_i32_41 = arith.constant 1 : i32
    %104 = vector.broadcast %c1_i32_41 : i32 to vector<1x256xi32>
    %105 = arith.addi %4, %104 : vector<1x256xi32>
    %c0_i32_42 = arith.constant 0 : i32
    %106 = vector.broadcast %c0_i32_42 : i32 to vector<1x256xi32>
    %107 = arith.cmpi sge, %105, %106 : vector<1x256xi32>
    %c1_i32_43 = arith.constant 1 : i32
    %108 = vector.broadcast %c1_i32_43 : i32 to vector<1x256xi32>
    %109 = arith.addi %4, %108 : vector<1x256xi32>
    %c16_i32_44 = arith.constant 16 : i32
    %110 = vector.broadcast %c16_i32_44 : i32 to vector<1x256xi32>
    %111 = arith.cmpi slt, %109, %110 : vector<1x256xi32>
    %112 = arith.andi %107, %111 : vector<1x256xi1>
    %c2_i32_45 = arith.constant 2 : i32
    %113 = vector.broadcast %c2_i32_45 : i32 to vector<1x256xi32>
    %114 = arith.addi %4, %113 : vector<1x256xi32>
    %c0_i32_46 = arith.constant 0 : i32
    %115 = vector.broadcast %c0_i32_46 : i32 to vector<1x256xi32>
    %116 = arith.cmpi sge, %114, %115 : vector<1x256xi32>
    %c2_i32_47 = arith.constant 2 : i32
    %117 = vector.broadcast %c2_i32_47 : i32 to vector<1x256xi32>
    %118 = arith.addi %4, %117 : vector<1x256xi32>
    %c16_i32_48 = arith.constant 16 : i32
    %119 = vector.broadcast %c16_i32_48 : i32 to vector<1x256xi32>
    %120 = arith.cmpi slt, %118, %119 : vector<1x256xi32>
    %121 = arith.andi %116, %120 : vector<1x256xi1>
    %c3_i32_49 = arith.constant 3 : i32
    %122 = vector.broadcast %c3_i32_49 : i32 to vector<1x256xi32>
    %123 = arith.addi %4, %122 : vector<1x256xi32>
    %c0_i32_50 = arith.constant 0 : i32
    %124 = vector.broadcast %c0_i32_50 : i32 to vector<1x256xi32>
    %125 = arith.cmpi sge, %123, %124 : vector<1x256xi32>
    %c3_i32_51 = arith.constant 3 : i32
    %126 = vector.broadcast %c3_i32_51 : i32 to vector<1x256xi32>
    %127 = arith.addi %4, %126 : vector<1x256xi32>
    %c16_i32_52 = arith.constant 16 : i32
    %128 = vector.broadcast %c16_i32_52 : i32 to vector<1x256xi32>
    %129 = arith.cmpi slt, %127, %128 : vector<1x256xi32>
    %130 = arith.andi %125, %129 : vector<1x256xi1>
    %131 = tpu.iota {dimensions = array<i32: 1>} : vector<32x2xi32>
    %c0_53 = arith.constant 0 : index
    %c0_54 = arith.constant 0 : index
    %c0_55 = arith.constant 0 : index
    %132 = vector.load %arg1[%c0_53, %c0_54, %c0_55] : memref<2x32x256xf32, #tpu.memory_space<vmem>>, vector<1x32x256xf32>
    %133 = vector.shape_cast %132 : vector<1x32x256xf32> to vector<32x256xf32>
    %cst = arith.constant dense<0.000000e+00> : vector<32xf32>
    %134 = vector.multi_reduction <add>, %133, %cst [1] : vector<32x256xf32> to vector<32xf32>
    %135 = vector.shape_cast %134 : vector<32xf32> to vector<32x1xf32>
    %cst_56 = arith.constant 2.560000e+02 : f32
    %136 = vector.broadcast %cst_56 : f32 to vector<32x1xf32>
    %137 = arith.divf %135, %136 : vector<32x1xf32>
    %cst_57 = arith.constant dense<0xFF800000> : vector<32xf32>
    %138 = vector.multi_reduction <maximumf>, %133, %cst_57 [1] : vector<32x256xf32> to vector<32xf32>
    %139 = vector.shape_cast %138 : vector<32xf32> to vector<32x1xf32>
    %c0_i32_58 = arith.constant 0 : i32
    %140 = vector.broadcast %c0_i32_58 : i32 to vector<32x2xi32>
    %141 = arith.cmpi eq, %131, %140 : vector<32x2xi32>
    %142 = vector.shape_cast %137 : vector<32x1xf32> to vector<32x1xf32>
    %143 = vector.broadcast %142 : vector<32x1xf32> to vector<32x2xf32>
    %144 = vector.shape_cast %139 : vector<32x1xf32> to vector<32x1xf32>
    %145 = vector.broadcast %144 : vector<32x1xf32> to vector<32x2xf32>
    %146 = arith.select %141, %143, %145 : vector<32x2xi1>, vector<32x2xf32>
    %147 = vector.extract_strided_slice %0 {offsets = [0, 0], sizes = [32, 1], strides = [1, 1]} : vector<32x2xf32> to vector<32x1xf32>
    %148 = vector.broadcast %147 : vector<32x1xf32> to vector<32x2xf32>
    %149 = arith.mulf %148, %146 : vector<32x2xf32>
    %cst_59 = arith.constant dense<0.000000e+00> : vector<2xf32>
    %150 = vector.multi_reduction <add>, %149, %cst_59 [0] : vector<32x2xf32> to vector<2xf32>
    %151 = vector.shape_cast %150 : vector<2xf32> to vector<1x2xf32>
    %152 = vector.extract_strided_slice %0 {offsets = [0, 1], sizes = [32, 1], strides = [1, 1]} : vector<32x2xf32> to vector<32x1xf32>
    %153 = vector.broadcast %152 : vector<32x1xf32> to vector<32x2xf32>
    %154 = arith.mulf %153, %146 : vector<32x2xf32>
    %cst_60 = arith.constant dense<0.000000e+00> : vector<2xf32>
    %155 = vector.multi_reduction <add>, %154, %cst_60 [0] : vector<32x2xf32> to vector<2xf32>
    %156 = vector.shape_cast %155 : vector<2xf32> to vector<1x2xf32>
    %157 = tpu.concatenate %151, %156 in 0 : vector<1x2xf32>, vector<1x2xf32> -> vector<2x2xf32>
    %cst_61 = arith.constant 0.000000e+00 : f32
    %158 = vector.broadcast %cst_61 : f32 to vector<2x2xf32>
    %159 = arith.cmpf oge, %157, %158 : vector<2x2xf32>
    %cst_62 = arith.constant 0.00999999977 : f32
    %160 = vector.broadcast %cst_62 : f32 to vector<2x2xf32>
    %161 = arith.mulf %160, %157 : vector<2x2xf32>
    %162 = arith.select %159, %157, %161 : vector<2x2xi1>, vector<2x2xf32>
    %163 = vector.extract_strided_slice %1 {offsets = [0, 0], sizes = [32, 1], strides = [1, 1]} : vector<32x2xf32> to vector<32x1xf32>
    %164 = vector.extract_strided_slice %162 {offsets = [0, 0], sizes = [1, 2], strides = [1, 1]} : vector<2x2xf32> to vector<1x2xf32>
    %165 = vector.broadcast %163 : vector<32x1xf32> to vector<32x2xf32>
    %166 = vector.broadcast %164 : vector<1x2xf32> to vector<32x2xf32>
    %167 = arith.mulf %165, %166 : vector<32x2xf32>
    %168 = vector.extract_strided_slice %1 {offsets = [0, 1], sizes = [32, 1], strides = [1, 1]} : vector<32x2xf32> to vector<32x1xf32>
    %169 = vector.extract_strided_slice %162 {offsets = [1, 0], sizes = [1, 2], strides = [1, 1]} : vector<2x2xf32> to vector<1x2xf32>
    %170 = vector.broadcast %168 : vector<32x1xf32> to vector<32x2xf32>
    %171 = vector.broadcast %169 : vector<1x2xf32> to vector<32x2xf32>
    %172 = arith.mulf %170, %171 : vector<32x2xf32>
    %173 = arith.addf %167, %172 : vector<32x2xf32>
    %174 = vector.extract_strided_slice %173 {offsets = [0, 0], sizes = [32, 1], strides = [1, 1]} : vector<32x2xf32> to vector<32x1xf32>
    %175 = vector.extract_strided_slice %173 {offsets = [0, 1], sizes = [32, 1], strides = [1, 1]} : vector<32x2xf32> to vector<32x1xf32>
    %176 = arith.addf %174, %175 : vector<32x1xf32>
    %177 = arith.negf %176 : vector<32x1xf32>
    %178 = math.exp %177 : vector<32x1xf32>
    %cst_63 = arith.constant 1.000000e+00 : f32
    %179 = vector.broadcast %cst_63 : f32 to vector<32x1xf32>
    %180 = arith.addf %179, %178 : vector<32x1xf32>
    %181 = arith.divf %179, %180 : vector<32x1xf32>
    %182 = vector.broadcast %181 : vector<32x1xf32> to vector<32x256xf32>
    %183 = arith.mulf %133, %182 : vector<32x256xf32>
    %cst_64 = arith.constant dense<0.000000e+00> : vector<256xf32>
    %184 = vector.multi_reduction <add>, %183, %cst_64 [0] : vector<32x256xf32> to vector<256xf32>
    %185 = vector.shape_cast %184 : vector<256xf32> to vector<1x256xf32>
    %cst_65 = arith.constant 3.200000e+01 : f32
    %186 = vector.broadcast %cst_65 : f32 to vector<1x256xf32>
    %187 = arith.divf %185, %186 : vector<1x256xf32>
    %cst_66 = arith.constant dense<0xFF800000> : vector<256xf32>
    %188 = vector.multi_reduction <maximumf>, %183, %cst_66 [0] : vector<32x256xf32> to vector<256xf32>
    %189 = vector.shape_cast %188 : vector<256xf32> to vector<1x256xf32>
    %190 = tpu.concatenate %187, %189 in 0 : vector<1x256xf32>, vector<1x256xf32> -> vector<2x256xf32>
    %c51_i32 = arith.constant 51 : i32
    %191 = tpu.dynamic_rotate %190 by %c51_i32 dim 1 : vector<2x256xf32>, i32 -> vector<2x256xf32>
    %192 = arith.andi %13, %76 : vector<1x256xi1>
    %cst_67 = arith.constant 0.000000e+00 : f32
    %193 = vector.shape_cast %192 : vector<1x256xi1> to vector<1x256xi1>
    %194 = vector.broadcast %193 : vector<1x256xi1> to vector<2x256xi1>
    %195 = vector.broadcast %cst_67 : f32 to vector<2x256xf32>
    %196 = arith.select %194, %191, %195 : vector<2x256xi1>, vector<2x256xf32>
    %c0_68 = arith.constant 0 : index
    %197 = memref.load %arg5[%c0_68] : memref<98xf32, #tpu.memory_space<smem>>
    %198 = vector.extract_strided_slice %196 {offsets = [0, 0], sizes = [1, 256], strides = [1, 1]} : vector<2x256xf32> to vector<1x256xf32>
    %199 = vector.broadcast %197 : f32 to vector<1x256xf32>
    %200 = arith.mulf %199, %198 : vector<1x256xf32>
    %c49 = arith.constant 49 : index
    %201 = memref.load %arg5[%c49] : memref<98xf32, #tpu.memory_space<smem>>
    %202 = vector.extract_strided_slice %196 {offsets = [1, 0], sizes = [1, 256], strides = [1, 1]} : vector<2x256xf32> to vector<1x256xf32>
    %203 = vector.broadcast %201 : f32 to vector<1x256xf32>
    %204 = arith.mulf %203, %202 : vector<1x256xf32>
    %205 = arith.addf %200, %204 : vector<1x256xf32>
    %c50_i32 = arith.constant 50 : i32
    %206 = tpu.dynamic_rotate %190 by %c50_i32 dim 1 : vector<2x256xf32>, i32 -> vector<2x256xf32>
    %207 = arith.andi %13, %85 : vector<1x256xi1>
    %cst_69 = arith.constant 0.000000e+00 : f32
    %208 = vector.shape_cast %207 : vector<1x256xi1> to vector<1x256xi1>
    %209 = vector.broadcast %208 : vector<1x256xi1> to vector<2x256xi1>
    %210 = vector.broadcast %cst_69 : f32 to vector<2x256xf32>
    %211 = arith.select %209, %206, %210 : vector<2x256xi1>, vector<2x256xf32>
    %c1 = arith.constant 1 : index
    %212 = memref.load %arg5[%c1] : memref<98xf32, #tpu.memory_space<smem>>
    %213 = vector.extract_strided_slice %211 {offsets = [0, 0], sizes = [1, 256], strides = [1, 1]} : vector<2x256xf32> to vector<1x256xf32>
    %214 = vector.broadcast %212 : f32 to vector<1x256xf32>
    %215 = arith.mulf %214, %213 : vector<1x256xf32>
    %c50 = arith.constant 50 : index
    %216 = memref.load %arg5[%c50] : memref<98xf32, #tpu.memory_space<smem>>
    %217 = vector.extract_strided_slice %211 {offsets = [1, 0], sizes = [1, 256], strides = [1, 1]} : vector<2x256xf32> to vector<1x256xf32>
    %218 = vector.broadcast %216 : f32 to vector<1x256xf32>
    %219 = arith.mulf %218, %217 : vector<1x256xf32>
    %220 = arith.addf %215, %219 : vector<1x256xf32>
    %221 = arith.addf %205, %220 : vector<1x256xf32>
    %c49_i32 = arith.constant 49 : i32
    %222 = tpu.dynamic_rotate %190 by %c49_i32 dim 1 : vector<2x256xf32>, i32 -> vector<2x256xf32>
    %223 = arith.andi %13, %94 : vector<1x256xi1>
    %cst_70 = arith.constant 0.000000e+00 : f32
    %224 = vector.shape_cast %223 : vector<1x256xi1> to vector<1x256xi1>
    %225 = vector.broadcast %224 : vector<1x256xi1> to vector<2x256xi1>
    %226 = vector.broadcast %cst_70 : f32 to vector<2x256xf32>
    %227 = arith.select %225, %222, %226 : vector<2x256xi1>, vector<2x256xf32>
    %c2 = arith.constant 2 : index
    %228 = memref.load %arg5[%c2] : memref<98xf32, #tpu.memory_space<smem>>
    %229 = vector.extract_strided_slice %227 {offsets = [0, 0], sizes = [1, 256], strides = [1, 1]} : vector<2x256xf32> to vector<1x256xf32>
    %230 = vector.broadcast %228 : f32 to vector<1x256xf32>
    %231 = arith.mulf %230, %229 : vector<1x256xf32>
    %c51 = arith.constant 51 : index
    %232 = memref.load %arg5[%c51] : memref<98xf32, #tpu.memory_space<smem>>
    %233 = vector.extract_strided_slice %227 {offsets = [1, 0], sizes = [1, 256], strides = [1, 1]} : vector<2x256xf32> to vector<1x256xf32>
    %234 = vector.broadcast %232 : f32 to vector<1x256xf32>
    %235 = arith.mulf %234, %233 : vector<1x256xf32>
    %236 = arith.addf %231, %235 : vector<1x256xf32>
    %237 = arith.addf %221, %236 : vector<1x256xf32>
    %c48_i32 = arith.constant 48 : i32
    %238 = tpu.dynamic_rotate %190 by %c48_i32 dim 1 : vector<2x256xf32>, i32 -> vector<2x256xf32>
    %239 = arith.andi %13, %103 : vector<1x256xi1>
    %cst_71 = arith.constant 0.000000e+00 : f32
    %240 = vector.shape_cast %239 : vector<1x256xi1> to vector<1x256xi1>
    %241 = vector.broadcast %240 : vector<1x256xi1> to vector<2x256xi1>
    %242 = vector.broadcast %cst_71 : f32 to vector<2x256xf32>
    %243 = arith.select %241, %238, %242 : vector<2x256xi1>, vector<2x256xf32>
    %c3 = arith.constant 3 : index
    %244 = memref.load %arg5[%c3] : memref<98xf32, #tpu.memory_space<smem>>
    %245 = vector.extract_strided_slice %243 {offsets = [0, 0], sizes = [1, 256], strides = [1, 1]} : vector<2x256xf32> to vector<1x256xf32>
    %246 = vector.broadcast %244 : f32 to vector<1x256xf32>
    %247 = arith.mulf %246, %245 : vector<1x256xf32>
    %c52 = arith.constant 52 : index
    %248 = memref.load %arg5[%c52] : memref<98xf32, #tpu.memory_space<smem>>
    %249 = vector.extract_strided_slice %243 {offsets = [1, 0], sizes = [1, 256], strides = [1, 1]} : vector<2x256xf32> to vector<1x256xf32>
    %250 = vector.broadcast %248 : f32 to vector<1x256xf32>
    %251 = arith.mulf %250, %249 : vector<1x256xf32>
    %252 = arith.addf %247, %251 : vector<1x256xf32>
    %253 = arith.addf %237, %252 : vector<1x256xf32>
    %c47_i32 = arith.constant 47 : i32
    %254 = tpu.dynamic_rotate %190 by %c47_i32 dim 1 : vector<2x256xf32>, i32 -> vector<2x256xf32>
    %255 = arith.andi %13, %112 : vector<1x256xi1>
    %cst_72 = arith.constant 0.000000e+00 : f32
    %256 = vector.shape_cast %255 : vector<1x256xi1> to vector<1x256xi1>
    %257 = vector.broadcast %256 : vector<1x256xi1> to vector<2x256xi1>
    %258 = vector.broadcast %cst_72 : f32 to vector<2x256xf32>
    %259 = arith.select %257, %254, %258 : vector<2x256xi1>, vector<2x256xf32>
    %c4 = arith.constant 4 : index
    %260 = memref.load %arg5[%c4] : memref<98xf32, #tpu.memory_space<smem>>
    %261 = vector.extract_strided_slice %259 {offsets = [0, 0], sizes = [1, 256], strides = [1, 1]} : vector<2x256xf32> to vector<1x256xf32>
    %262 = vector.broadcast %260 : f32 to vector<1x256xf32>
    %263 = arith.mulf %262, %261 : vector<1x256xf32>
    %c53 = arith.constant 53 : index
    %264 = memref.load %arg5[%c53] : memref<98xf32, #tpu.memory_space<smem>>
    %265 = vector.extract_strided_slice %259 {offsets = [1, 0], sizes = [1, 256], strides = [1, 1]} : vector<2x256xf32> to vector<1x256xf32>
    %266 = vector.broadcast %264 : f32 to vector<1x256xf32>
    %267 = arith.mulf %266, %265 : vector<1x256xf32>
    %268 = arith.addf %263, %267 : vector<1x256xf32>
    %269 = arith.addf %253, %268 : vector<1x256xf32>
    %c46_i32 = arith.constant 46 : i32
    %270 = tpu.dynamic_rotate %190 by %c46_i32 dim 1 : vector<2x256xf32>, i32 -> vector<2x256xf32>
    %271 = arith.andi %13, %121 : vector<1x256xi1>
    %cst_73 = arith.constant 0.000000e+00 : f32
    %272 = vector.shape_cast %271 : vector<1x256xi1> to vector<1x256xi1>
    %273 = vector.broadcast %272 : vector<1x256xi1> to vector<2x256xi1>
    %274 = vector.broadcast %cst_73 : f32 to vector<2x256xf32>
    %275 = arith.select %273, %270, %274 : vector<2x256xi1>, vector<2x256xf32>
    %c5 = arith.constant 5 : index
    %276 = memref.load %arg5[%c5] : memref<98xf32, #tpu.memory_space<smem>>
    %277 = vector.extract_strided_slice %275 {offsets = [0, 0], sizes = [1, 256], strides = [1, 1]} : vector<2x256xf32> to vector<1x256xf32>
    %278 = vector.broadcast %276 : f32 to vector<1x256xf32>
    %279 = arith.mulf %278, %277 : vector<1x256xf32>
    %c54 = arith.constant 54 : index
    %280 = memref.load %arg5[%c54] : memref<98xf32, #tpu.memory_space<smem>>
    %281 = vector.extract_strided_slice %275 {offsets = [1, 0], sizes = [1, 256], strides = [1, 1]} : vector<2x256xf32> to vector<1x256xf32>
    %282 = vector.broadcast %280 : f32 to vector<1x256xf32>
    %283 = arith.mulf %282, %281 : vector<1x256xf32>
    %284 = arith.addf %279, %283 : vector<1x256xf32>
    %285 = arith.addf %269, %284 : vector<1x256xf32>
    %c45_i32 = arith.constant 45 : i32
    %286 = tpu.dynamic_rotate %190 by %c45_i32 dim 1 : vector<2x256xf32>, i32 -> vector<2x256xf32>
    %287 = arith.andi %13, %130 : vector<1x256xi1>
    %cst_74 = arith.constant 0.000000e+00 : f32
    %288 = vector.shape_cast %287 : vector<1x256xi1> to vector<1x256xi1>
    %289 = vector.broadcast %288 : vector<1x256xi1> to vector<2x256xi1>
    %290 = vector.broadcast %cst_74 : f32 to vector<2x256xf32>
    %291 = arith.select %289, %286, %290 : vector<2x256xi1>, vector<2x256xf32>
    %c6 = arith.constant 6 : index
    %292 = memref.load %arg5[%c6] : memref<98xf32, #tpu.memory_space<smem>>
    %293 = vector.extract_strided_slice %291 {offsets = [0, 0], sizes = [1, 256], strides = [1, 1]} : vector<2x256xf32> to vector<1x256xf32>
    %294 = vector.broadcast %292 : f32 to vector<1x256xf32>
    %295 = arith.mulf %294, %293 : vector<1x256xf32>
    %c55 = arith.constant 55 : index
    %296 = memref.load %arg5[%c55] : memref<98xf32, #tpu.memory_space<smem>>
    %297 = vector.extract_strided_slice %291 {offsets = [1, 0], sizes = [1, 256], strides = [1, 1]} : vector<2x256xf32> to vector<1x256xf32>
    %298 = vector.broadcast %296 : f32 to vector<1x256xf32>
    %299 = arith.mulf %298, %297 : vector<1x256xf32>
    %300 = arith.addf %295, %299 : vector<1x256xf32>
    %301 = arith.addf %285, %300 : vector<1x256xf32>
    %c35_i32 = arith.constant 35 : i32
    %302 = tpu.dynamic_rotate %190 by %c35_i32 dim 1 : vector<2x256xf32>, i32 -> vector<2x256xf32>
    %303 = arith.andi %22, %76 : vector<1x256xi1>
    %cst_75 = arith.constant 0.000000e+00 : f32
    %304 = vector.shape_cast %303 : vector<1x256xi1> to vector<1x256xi1>
    %305 = vector.broadcast %304 : vector<1x256xi1> to vector<2x256xi1>
    %306 = vector.broadcast %cst_75 : f32 to vector<2x256xf32>
    %307 = arith.select %305, %302, %306 : vector<2x256xi1>, vector<2x256xf32>
    %c7 = arith.constant 7 : index
    %308 = memref.load %arg5[%c7] : memref<98xf32, #tpu.memory_space<smem>>
    %309 = vector.extract_strided_slice %307 {offsets = [0, 0], sizes = [1, 256], strides = [1, 1]} : vector<2x256xf32> to vector<1x256xf32>
    %310 = vector.broadcast %308 : f32 to vector<1x256xf32>
    %311 = arith.mulf %310, %309 : vector<1x256xf32>
    %c56 = arith.constant 56 : index
    %312 = memref.load %arg5[%c56] : memref<98xf32, #tpu.memory_space<smem>>
    %313 = vector.extract_strided_slice %307 {offsets = [1, 0], sizes = [1, 256], strides = [1, 1]} : vector<2x256xf32> to vector<1x256xf32>
    %314 = vector.broadcast %312 : f32 to vector<1x256xf32>
    %315 = arith.mulf %314, %313 : vector<1x256xf32>
    %316 = arith.addf %311, %315 : vector<1x256xf32>
    %317 = arith.addf %301, %316 : vector<1x256xf32>
    %c34_i32 = arith.constant 34 : i32
    %318 = tpu.dynamic_rotate %190 by %c34_i32 dim 1 : vector<2x256xf32>, i32 -> vector<2x256xf32>
    %319 = arith.andi %22, %85 : vector<1x256xi1>
    %cst_76 = arith.constant 0.000000e+00 : f32
    %320 = vector.shape_cast %319 : vector<1x256xi1> to vector<1x256xi1>
    %321 = vector.broadcast %320 : vector<1x256xi1> to vector<2x256xi1>
    %322 = vector.broadcast %cst_76 : f32 to vector<2x256xf32>
    %323 = arith.select %321, %318, %322 : vector<2x256xi1>, vector<2x256xf32>
    %c8 = arith.constant 8 : index
    %324 = memref.load %arg5[%c8] : memref<98xf32, #tpu.memory_space<smem>>
    %325 = vector.extract_strided_slice %323 {offsets = [0, 0], sizes = [1, 256], strides = [1, 1]} : vector<2x256xf32> to vector<1x256xf32>
    %326 = vector.broadcast %324 : f32 to vector<1x256xf32>
    %327 = arith.mulf %326, %325 : vector<1x256xf32>
    %c57 = arith.constant 57 : index
    %328 = memref.load %arg5[%c57] : memref<98xf32, #tpu.memory_space<smem>>
    %329 = vector.extract_strided_slice %323 {offsets = [1, 0], sizes = [1, 256], strides = [1, 1]} : vector<2x256xf32> to vector<1x256xf32>
    %330 = vector.broadcast %328 : f32 to vector<1x256xf32>
    %331 = arith.mulf %330, %329 : vector<1x256xf32>
    %332 = arith.addf %327, %331 : vector<1x256xf32>
    %333 = arith.addf %317, %332 : vector<1x256xf32>
    %c33_i32 = arith.constant 33 : i32
    %334 = tpu.dynamic_rotate %190 by %c33_i32 dim 1 : vector<2x256xf32>, i32 -> vector<2x256xf32>
    %335 = arith.andi %22, %94 : vector<1x256xi1>
    %cst_77 = arith.constant 0.000000e+00 : f32
    %336 = vector.shape_cast %335 : vector<1x256xi1> to vector<1x256xi1>
    %337 = vector.broadcast %336 : vector<1x256xi1> to vector<2x256xi1>
    %338 = vector.broadcast %cst_77 : f32 to vector<2x256xf32>
    %339 = arith.select %337, %334, %338 : vector<2x256xi1>, vector<2x256xf32>
    %c9 = arith.constant 9 : index
    %340 = memref.load %arg5[%c9] : memref<98xf32, #tpu.memory_space<smem>>
    %341 = vector.extract_strided_slice %339 {offsets = [0, 0], sizes = [1, 256], strides = [1, 1]} : vector<2x256xf32> to vector<1x256xf32>
    %342 = vector.broadcast %340 : f32 to vector<1x256xf32>
    %343 = arith.mulf %342, %341 : vector<1x256xf32>
    %c58 = arith.constant 58 : index
    %344 = memref.load %arg5[%c58] : memref<98xf32, #tpu.memory_space<smem>>
    %345 = vector.extract_strided_slice %339 {offsets = [1, 0], sizes = [1, 256], strides = [1, 1]} : vector<2x256xf32> to vector<1x256xf32>
    %346 = vector.broadcast %344 : f32 to vector<1x256xf32>
    %347 = arith.mulf %346, %345 : vector<1x256xf32>
    %348 = arith.addf %343, %347 : vector<1x256xf32>
    %349 = arith.addf %333, %348 : vector<1x256xf32>
    %c32_i32 = arith.constant 32 : i32
    %350 = tpu.dynamic_rotate %190 by %c32_i32 dim 1 : vector<2x256xf32>, i32 -> vector<2x256xf32>
    %351 = arith.andi %22, %103 : vector<1x256xi1>
    %cst_78 = arith.constant 0.000000e+00 : f32
    %352 = vector.shape_cast %351 : vector<1x256xi1> to vector<1x256xi1>
    %353 = vector.broadcast %352 : vector<1x256xi1> to vector<2x256xi1>
    %354 = vector.broadcast %cst_78 : f32 to vector<2x256xf32>
    %355 = arith.select %353, %350, %354 : vector<2x256xi1>, vector<2x256xf32>
    %c10 = arith.constant 10 : index
    %356 = memref.load %arg5[%c10] : memref<98xf32, #tpu.memory_space<smem>>
    %357 = vector.extract_strided_slice %355 {offsets = [0, 0], sizes = [1, 256], strides = [1, 1]} : vector<2x256xf32> to vector<1x256xf32>
    %358 = vector.broadcast %356 : f32 to vector<1x256xf32>
    %359 = arith.mulf %358, %357 : vector<1x256xf32>
    %c59 = arith.constant 59 : index
    %360 = memref.load %arg5[%c59] : memref<98xf32, #tpu.memory_space<smem>>
    %361 = vector.extract_strided_slice %355 {offsets = [1, 0], sizes = [1, 256], strides = [1, 1]} : vector<2x256xf32> to vector<1x256xf32>
    %362 = vector.broadcast %360 : f32 to vector<1x256xf32>
    %363 = arith.mulf %362, %361 : vector<1x256xf32>
    %364 = arith.addf %359, %363 : vector<1x256xf32>
    %365 = arith.addf %349, %364 : vector<1x256xf32>
    %c31_i32 = arith.constant 31 : i32
    %366 = tpu.dynamic_rotate %190 by %c31_i32 dim 1 : vector<2x256xf32>, i32 -> vector<2x256xf32>
    %367 = arith.andi %22, %112 : vector<1x256xi1>
    %cst_79 = arith.constant 0.000000e+00 : f32
    %368 = vector.shape_cast %367 : vector<1x256xi1> to vector<1x256xi1>
    %369 = vector.broadcast %368 : vector<1x256xi1> to vector<2x256xi1>
    %370 = vector.broadcast %cst_79 : f32 to vector<2x256xf32>
    %371 = arith.select %369, %366, %370 : vector<2x256xi1>, vector<2x256xf32>
    %c11 = arith.constant 11 : index
    %372 = memref.load %arg5[%c11] : memref<98xf32, #tpu.memory_space<smem>>
    %373 = vector.extract_strided_slice %371 {offsets = [0, 0], sizes = [1, 256], strides = [1, 1]} : vector<2x256xf32> to vector<1x256xf32>
    %374 = vector.broadcast %372 : f32 to vector<1x256xf32>
    %375 = arith.mulf %374, %373 : vector<1x256xf32>
    %c60 = arith.constant 60 : index
    %376 = memref.load %arg5[%c60] : memref<98xf32, #tpu.memory_space<smem>>
    %377 = vector.extract_strided_slice %371 {offsets = [1, 0], sizes = [1, 256], strides = [1, 1]} : vector<2x256xf32> to vector<1x256xf32>
    %378 = vector.broadcast %376 : f32 to vector<1x256xf32>
    %379 = arith.mulf %378, %377 : vector<1x256xf32>
    %380 = arith.addf %375, %379 : vector<1x256xf32>
    %381 = arith.addf %365, %380 : vector<1x256xf32>
    %c30_i32 = arith.constant 30 : i32
    %382 = tpu.dynamic_rotate %190 by %c30_i32 dim 1 : vector<2x256xf32>, i32 -> vector<2x256xf32>
    %383 = arith.andi %22, %121 : vector<1x256xi1>
    %cst_80 = arith.constant 0.000000e+00 : f32
    %384 = vector.shape_cast %383 : vector<1x256xi1> to vector<1x256xi1>
    %385 = vector.broadcast %384 : vector<1x256xi1> to vector<2x256xi1>
    %386 = vector.broadcast %cst_80 : f32 to vector<2x256xf32>
    %387 = arith.select %385, %382, %386 : vector<2x256xi1>, vector<2x256xf32>
    %c12 = arith.constant 12 : index
    %388 = memref.load %arg5[%c12] : memref<98xf32, #tpu.memory_space<smem>>
    %389 = vector.extract_strided_slice %387 {offsets = [0, 0], sizes = [1, 256], strides = [1, 1]} : vector<2x256xf32> to vector<1x256xf32>
    %390 = vector.broadcast %388 : f32 to vector<1x256xf32>
    %391 = arith.mulf %390, %389 : vector<1x256xf32>
    %c61 = arith.constant 61 : index
    %392 = memref.load %arg5[%c61] : memref<98xf32, #tpu.memory_space<smem>>
    %393 = vector.extract_strided_slice %387 {offsets = [1, 0], sizes = [1, 256], strides = [1, 1]} : vector<2x256xf32> to vector<1x256xf32>
    %394 = vector.broadcast %392 : f32 to vector<1x256xf32>
    %395 = arith.mulf %394, %393 : vector<1x256xf32>
    %396 = arith.addf %391, %395 : vector<1x256xf32>
    %397 = arith.addf %381, %396 : vector<1x256xf32>
    %c29_i32 = arith.constant 29 : i32
    %398 = tpu.dynamic_rotate %190 by %c29_i32 dim 1 : vector<2x256xf32>, i32 -> vector<2x256xf32>
    %399 = arith.andi %22, %130 : vector<1x256xi1>
    %cst_81 = arith.constant 0.000000e+00 : f32
    %400 = vector.shape_cast %399 : vector<1x256xi1> to vector<1x256xi1>
    %401 = vector.broadcast %400 : vector<1x256xi1> to vector<2x256xi1>
    %402 = vector.broadcast %cst_81 : f32 to vector<2x256xf32>
    %403 = arith.select %401, %398, %402 : vector<2x256xi1>, vector<2x256xf32>
    %c13 = arith.constant 13 : index
    %404 = memref.load %arg5[%c13] : memref<98xf32, #tpu.memory_space<smem>>
    %405 = vector.extract_strided_slice %403 {offsets = [0, 0], sizes = [1, 256], strides = [1, 1]} : vector<2x256xf32> to vector<1x256xf32>
    %406 = vector.broadcast %404 : f32 to vector<1x256xf32>
    %407 = arith.mulf %406, %405 : vector<1x256xf32>
    %c62 = arith.constant 62 : index
    %408 = memref.load %arg5[%c62] : memref<98xf32, #tpu.memory_space<smem>>
    %409 = vector.extract_strided_slice %403 {offsets = [1, 0], sizes = [1, 256], strides = [1, 1]} : vector<2x256xf32> to vector<1x256xf32>
    %410 = vector.broadcast %408 : f32 to vector<1x256xf32>
    %411 = arith.mulf %410, %409 : vector<1x256xf32>
    %412 = arith.addf %407, %411 : vector<1x256xf32>
    %413 = arith.addf %397, %412 : vector<1x256xf32>
    %c19_i32 = arith.constant 19 : i32
    %414 = tpu.dynamic_rotate %190 by %c19_i32 dim 1 : vector<2x256xf32>, i32 -> vector<2x256xf32>
    %415 = arith.andi %31, %76 : vector<1x256xi1>
    %cst_82 = arith.constant 0.000000e+00 : f32
    %416 = vector.shape_cast %415 : vector<1x256xi1> to vector<1x256xi1>
    %417 = vector.broadcast %416 : vector<1x256xi1> to vector<2x256xi1>
    %418 = vector.broadcast %cst_82 : f32 to vector<2x256xf32>
    %419 = arith.select %417, %414, %418 : vector<2x256xi1>, vector<2x256xf32>
    %c14 = arith.constant 14 : index
    %420 = memref.load %arg5[%c14] : memref<98xf32, #tpu.memory_space<smem>>
    %421 = vector.extract_strided_slice %419 {offsets = [0, 0], sizes = [1, 256], strides = [1, 1]} : vector<2x256xf32> to vector<1x256xf32>
    %422 = vector.broadcast %420 : f32 to vector<1x256xf32>
    %423 = arith.mulf %422, %421 : vector<1x256xf32>
    %c63 = arith.constant 63 : index
    %424 = memref.load %arg5[%c63] : memref<98xf32, #tpu.memory_space<smem>>
    %425 = vector.extract_strided_slice %419 {offsets = [1, 0], sizes = [1, 256], strides = [1, 1]} : vector<2x256xf32> to vector<1x256xf32>
    %426 = vector.broadcast %424 : f32 to vector<1x256xf32>
    %427 = arith.mulf %426, %425 : vector<1x256xf32>
    %428 = arith.addf %423, %427 : vector<1x256xf32>
    %429 = arith.addf %413, %428 : vector<1x256xf32>
    %c18_i32 = arith.constant 18 : i32
    %430 = tpu.dynamic_rotate %190 by %c18_i32 dim 1 : vector<2x256xf32>, i32 -> vector<2x256xf32>
    %431 = arith.andi %31, %85 : vector<1x256xi1>
    %cst_83 = arith.constant 0.000000e+00 : f32
    %432 = vector.shape_cast %431 : vector<1x256xi1> to vector<1x256xi1>
    %433 = vector.broadcast %432 : vector<1x256xi1> to vector<2x256xi1>
    %434 = vector.broadcast %cst_83 : f32 to vector<2x256xf32>
    %435 = arith.select %433, %430, %434 : vector<2x256xi1>, vector<2x256xf32>
    %c15 = arith.constant 15 : index
    %436 = memref.load %arg5[%c15] : memref<98xf32, #tpu.memory_space<smem>>
    %437 = vector.extract_strided_slice %435 {offsets = [0, 0], sizes = [1, 256], strides = [1, 1]} : vector<2x256xf32> to vector<1x256xf32>
    %438 = vector.broadcast %436 : f32 to vector<1x256xf32>
    %439 = arith.mulf %438, %437 : vector<1x256xf32>
    %c64 = arith.constant 64 : index
    %440 = memref.load %arg5[%c64] : memref<98xf32, #tpu.memory_space<smem>>
    %441 = vector.extract_strided_slice %435 {offsets = [1, 0], sizes = [1, 256], strides = [1, 1]} : vector<2x256xf32> to vector<1x256xf32>
    %442 = vector.broadcast %440 : f32 to vector<1x256xf32>
    %443 = arith.mulf %442, %441 : vector<1x256xf32>
    %444 = arith.addf %439, %443 : vector<1x256xf32>
    %445 = arith.addf %429, %444 : vector<1x256xf32>
    %c17_i32 = arith.constant 17 : i32
    %446 = tpu.dynamic_rotate %190 by %c17_i32 dim 1 : vector<2x256xf32>, i32 -> vector<2x256xf32>
    %447 = arith.andi %31, %94 : vector<1x256xi1>
    %cst_84 = arith.constant 0.000000e+00 : f32
    %448 = vector.shape_cast %447 : vector<1x256xi1> to vector<1x256xi1>
    %449 = vector.broadcast %448 : vector<1x256xi1> to vector<2x256xi1>
    %450 = vector.broadcast %cst_84 : f32 to vector<2x256xf32>
    %451 = arith.select %449, %446, %450 : vector<2x256xi1>, vector<2x256xf32>
    %c16 = arith.constant 16 : index
    %452 = memref.load %arg5[%c16] : memref<98xf32, #tpu.memory_space<smem>>
    %453 = vector.extract_strided_slice %451 {offsets = [0, 0], sizes = [1, 256], strides = [1, 1]} : vector<2x256xf32> to vector<1x256xf32>
    %454 = vector.broadcast %452 : f32 to vector<1x256xf32>
    %455 = arith.mulf %454, %453 : vector<1x256xf32>
    %c65 = arith.constant 65 : index
    %456 = memref.load %arg5[%c65] : memref<98xf32, #tpu.memory_space<smem>>
    %457 = vector.extract_strided_slice %451 {offsets = [1, 0], sizes = [1, 256], strides = [1, 1]} : vector<2x256xf32> to vector<1x256xf32>
    %458 = vector.broadcast %456 : f32 to vector<1x256xf32>
    %459 = arith.mulf %458, %457 : vector<1x256xf32>
    %460 = arith.addf %455, %459 : vector<1x256xf32>
    %461 = arith.addf %445, %460 : vector<1x256xf32>
    %c16_i32_85 = arith.constant 16 : i32
    %462 = tpu.dynamic_rotate %190 by %c16_i32_85 dim 1 : vector<2x256xf32>, i32 -> vector<2x256xf32>
    %463 = arith.andi %31, %103 : vector<1x256xi1>
    %cst_86 = arith.constant 0.000000e+00 : f32
    %464 = vector.shape_cast %463 : vector<1x256xi1> to vector<1x256xi1>
    %465 = vector.broadcast %464 : vector<1x256xi1> to vector<2x256xi1>
    %466 = vector.broadcast %cst_86 : f32 to vector<2x256xf32>
    %467 = arith.select %465, %462, %466 : vector<2x256xi1>, vector<2x256xf32>
    %c17 = arith.constant 17 : index
    %468 = memref.load %arg5[%c17] : memref<98xf32, #tpu.memory_space<smem>>
    %469 = vector.extract_strided_slice %467 {offsets = [0, 0], sizes = [1, 256], strides = [1, 1]} : vector<2x256xf32> to vector<1x256xf32>
    %470 = vector.broadcast %468 : f32 to vector<1x256xf32>
    %471 = arith.mulf %470, %469 : vector<1x256xf32>
    %c66 = arith.constant 66 : index
    %472 = memref.load %arg5[%c66] : memref<98xf32, #tpu.memory_space<smem>>
    %473 = vector.extract_strided_slice %467 {offsets = [1, 0], sizes = [1, 256], strides = [1, 1]} : vector<2x256xf32> to vector<1x256xf32>
    %474 = vector.broadcast %472 : f32 to vector<1x256xf32>
    %475 = arith.mulf %474, %473 : vector<1x256xf32>
    %476 = arith.addf %471, %475 : vector<1x256xf32>
    %477 = arith.addf %461, %476 : vector<1x256xf32>
    %c15_i32 = arith.constant 15 : i32
    %478 = tpu.dynamic_rotate %190 by %c15_i32 dim 1 : vector<2x256xf32>, i32 -> vector<2x256xf32>
    %479 = arith.andi %31, %112 : vector<1x256xi1>
    %cst_87 = arith.constant 0.000000e+00 : f32
    %480 = vector.shape_cast %479 : vector<1x256xi1> to vector<1x256xi1>
    %481 = vector.broadcast %480 : vector<1x256xi1> to vector<2x256xi1>
    %482 = vector.broadcast %cst_87 : f32 to vector<2x256xf32>
    %483 = arith.select %481, %478, %482 : vector<2x256xi1>, vector<2x256xf32>
    %c18 = arith.constant 18 : index
    %484 = memref.load %arg5[%c18] : memref<98xf32, #tpu.memory_space<smem>>
    %485 = vector.extract_strided_slice %483 {offsets = [0, 0], sizes = [1, 256], strides = [1, 1]} : vector<2x256xf32> to vector<1x256xf32>
    %486 = vector.broadcast %484 : f32 to vector<1x256xf32>
    %487 = arith.mulf %486, %485 : vector<1x256xf32>
    %c67 = arith.constant 67 : index
    %488 = memref.load %arg5[%c67] : memref<98xf32, #tpu.memory_space<smem>>
    %489 = vector.extract_strided_slice %483 {offsets = [1, 0], sizes = [1, 256], strides = [1, 1]} : vector<2x256xf32> to vector<1x256xf32>
    %490 = vector.broadcast %488 : f32 to vector<1x256xf32>
    %491 = arith.mulf %490, %489 : vector<1x256xf32>
    %492 = arith.addf %487, %491 : vector<1x256xf32>
    %493 = arith.addf %477, %492 : vector<1x256xf32>
    %c14_i32 = arith.constant 14 : i32
    %494 = tpu.dynamic_rotate %190 by %c14_i32 dim 1 : vector<2x256xf32>, i32 -> vector<2x256xf32>
    %495 = arith.andi %31, %121 : vector<1x256xi1>
    %cst_88 = arith.constant 0.000000e+00 : f32
    %496 = vector.shape_cast %495 : vector<1x256xi1> to vector<1x256xi1>
    %497 = vector.broadcast %496 : vector<1x256xi1> to vector<2x256xi1>
    %498 = vector.broadcast %cst_88 : f32 to vector<2x256xf32>
    %499 = arith.select %497, %494, %498 : vector<2x256xi1>, vector<2x256xf32>
    %c19 = arith.constant 19 : index
    %500 = memref.load %arg5[%c19] : memref<98xf32, #tpu.memory_space<smem>>
    %501 = vector.extract_strided_slice %499 {offsets = [0, 0], sizes = [1, 256], strides = [1, 1]} : vector<2x256xf32> to vector<1x256xf32>
    %502 = vector.broadcast %500 : f32 to vector<1x256xf32>
    %503 = arith.mulf %502, %501 : vector<1x256xf32>
    %c68 = arith.constant 68 : index
    %504 = memref.load %arg5[%c68] : memref<98xf32, #tpu.memory_space<smem>>
    %505 = vector.extract_strided_slice %499 {offsets = [1, 0], sizes = [1, 256], strides = [1, 1]} : vector<2x256xf32> to vector<1x256xf32>
    %506 = vector.broadcast %504 : f32 to vector<1x256xf32>
    %507 = arith.mulf %506, %505 : vector<1x256xf32>
    %508 = arith.addf %503, %507 : vector<1x256xf32>
    %509 = arith.addf %493, %508 : vector<1x256xf32>
    %c13_i32 = arith.constant 13 : i32
    %510 = tpu.dynamic_rotate %190 by %c13_i32 dim 1 : vector<2x256xf32>, i32 -> vector<2x256xf32>
    %511 = arith.andi %31, %130 : vector<1x256xi1>
    %cst_89 = arith.constant 0.000000e+00 : f32
    %512 = vector.shape_cast %511 : vector<1x256xi1> to vector<1x256xi1>
    %513 = vector.broadcast %512 : vector<1x256xi1> to vector<2x256xi1>
    %514 = vector.broadcast %cst_89 : f32 to vector<2x256xf32>
    %515 = arith.select %513, %510, %514 : vector<2x256xi1>, vector<2x256xf32>
    %c20 = arith.constant 20 : index
    %516 = memref.load %arg5[%c20] : memref<98xf32, #tpu.memory_space<smem>>
    %517 = vector.extract_strided_slice %515 {offsets = [0, 0], sizes = [1, 256], strides = [1, 1]} : vector<2x256xf32> to vector<1x256xf32>
    %518 = vector.broadcast %516 : f32 to vector<1x256xf32>
    %519 = arith.mulf %518, %517 : vector<1x256xf32>
    %c69 = arith.constant 69 : index
    %520 = memref.load %arg5[%c69] : memref<98xf32, #tpu.memory_space<smem>>
    %521 = vector.extract_strided_slice %515 {offsets = [1, 0], sizes = [1, 256], strides = [1, 1]} : vector<2x256xf32> to vector<1x256xf32>
    %522 = vector.broadcast %520 : f32 to vector<1x256xf32>
    %523 = arith.mulf %522, %521 : vector<1x256xf32>
    %524 = arith.addf %519, %523 : vector<1x256xf32>
    %525 = arith.addf %509, %524 : vector<1x256xf32>
    %c3_i32_90 = arith.constant 3 : i32
    %526 = tpu.dynamic_rotate %190 by %c3_i32_90 dim 1 : vector<2x256xf32>, i32 -> vector<2x256xf32>
    %527 = arith.andi %40, %76 : vector<1x256xi1>
    %cst_91 = arith.constant 0.000000e+00 : f32
    %528 = vector.shape_cast %527 : vector<1x256xi1> to vector<1x256xi1>
    %529 = vector.broadcast %528 : vector<1x256xi1> to vector<2x256xi1>
    %530 = vector.broadcast %cst_91 : f32 to vector<2x256xf32>
    %531 = arith.select %529, %526, %530 : vector<2x256xi1>, vector<2x256xf32>
    %c21 = arith.constant 21 : index
    %532 = memref.load %arg5[%c21] : memref<98xf32, #tpu.memory_space<smem>>
    %533 = vector.extract_strided_slice %531 {offsets = [0, 0], sizes = [1, 256], strides = [1, 1]} : vector<2x256xf32> to vector<1x256xf32>
    %534 = vector.broadcast %532 : f32 to vector<1x256xf32>
    %535 = arith.mulf %534, %533 : vector<1x256xf32>
    %c70 = arith.constant 70 : index
    %536 = memref.load %arg5[%c70] : memref<98xf32, #tpu.memory_space<smem>>
    %537 = vector.extract_strided_slice %531 {offsets = [1, 0], sizes = [1, 256], strides = [1, 1]} : vector<2x256xf32> to vector<1x256xf32>
    %538 = vector.broadcast %536 : f32 to vector<1x256xf32>
    %539 = arith.mulf %538, %537 : vector<1x256xf32>
    %540 = arith.addf %535, %539 : vector<1x256xf32>
    %541 = arith.addf %525, %540 : vector<1x256xf32>
    %c2_i32_92 = arith.constant 2 : i32
    %542 = tpu.dynamic_rotate %190 by %c2_i32_92 dim 1 : vector<2x256xf32>, i32 -> vector<2x256xf32>
    %543 = arith.andi %40, %85 : vector<1x256xi1>
    %cst_93 = arith.constant 0.000000e+00 : f32
    %544 = vector.shape_cast %543 : vector<1x256xi1> to vector<1x256xi1>
    %545 = vector.broadcast %544 : vector<1x256xi1> to vector<2x256xi1>
    %546 = vector.broadcast %cst_93 : f32 to vector<2x256xf32>
    %547 = arith.select %545, %542, %546 : vector<2x256xi1>, vector<2x256xf32>
    %c22 = arith.constant 22 : index
    %548 = memref.load %arg5[%c22] : memref<98xf32, #tpu.memory_space<smem>>
    %549 = vector.extract_strided_slice %547 {offsets = [0, 0], sizes = [1, 256], strides = [1, 1]} : vector<2x256xf32> to vector<1x256xf32>
    %550 = vector.broadcast %548 : f32 to vector<1x256xf32>
    %551 = arith.mulf %550, %549 : vector<1x256xf32>
    %c71 = arith.constant 71 : index
    %552 = memref.load %arg5[%c71] : memref<98xf32, #tpu.memory_space<smem>>
    %553 = vector.extract_strided_slice %547 {offsets = [1, 0], sizes = [1, 256], strides = [1, 1]} : vector<2x256xf32> to vector<1x256xf32>
    %554 = vector.broadcast %552 : f32 to vector<1x256xf32>
    %555 = arith.mulf %554, %553 : vector<1x256xf32>
    %556 = arith.addf %551, %555 : vector<1x256xf32>
    %557 = arith.addf %541, %556 : vector<1x256xf32>
    %c1_i32_94 = arith.constant 1 : i32
    %558 = tpu.dynamic_rotate %190 by %c1_i32_94 dim 1 : vector<2x256xf32>, i32 -> vector<2x256xf32>
    %559 = arith.andi %40, %94 : vector<1x256xi1>
    %cst_95 = arith.constant 0.000000e+00 : f32
    %560 = vector.shape_cast %559 : vector<1x256xi1> to vector<1x256xi1>
    %561 = vector.broadcast %560 : vector<1x256xi1> to vector<2x256xi1>
    %562 = vector.broadcast %cst_95 : f32 to vector<2x256xf32>
    %563 = arith.select %561, %558, %562 : vector<2x256xi1>, vector<2x256xf32>
    %c23 = arith.constant 23 : index
    %564 = memref.load %arg5[%c23] : memref<98xf32, #tpu.memory_space<smem>>
    %565 = vector.extract_strided_slice %563 {offsets = [0, 0], sizes = [1, 256], strides = [1, 1]} : vector<2x256xf32> to vector<1x256xf32>
    %566 = vector.broadcast %564 : f32 to vector<1x256xf32>
    %567 = arith.mulf %566, %565 : vector<1x256xf32>
    %c72 = arith.constant 72 : index
    %568 = memref.load %arg5[%c72] : memref<98xf32, #tpu.memory_space<smem>>
    %569 = vector.extract_strided_slice %563 {offsets = [1, 0], sizes = [1, 256], strides = [1, 1]} : vector<2x256xf32> to vector<1x256xf32>
    %570 = vector.broadcast %568 : f32 to vector<1x256xf32>
    %571 = arith.mulf %570, %569 : vector<1x256xf32>
    %572 = arith.addf %567, %571 : vector<1x256xf32>
    %573 = arith.addf %557, %572 : vector<1x256xf32>
    %574 = arith.andi %40, %103 : vector<1x256xi1>
    %cst_96 = arith.constant 0.000000e+00 : f32
    %575 = vector.shape_cast %574 : vector<1x256xi1> to vector<1x256xi1>
    %576 = vector.broadcast %575 : vector<1x256xi1> to vector<2x256xi1>
    %577 = vector.broadcast %cst_96 : f32 to vector<2x256xf32>
    %578 = arith.select %576, %190, %577 : vector<2x256xi1>, vector<2x256xf32>
    %c24 = arith.constant 24 : index
    %579 = memref.load %arg5[%c24] : memref<98xf32, #tpu.memory_space<smem>>
    %580 = vector.extract_strided_slice %578 {offsets = [0, 0], sizes = [1, 256], strides = [1, 1]} : vector<2x256xf32> to vector<1x256xf32>
    %581 = vector.broadcast %579 : f32 to vector<1x256xf32>
    %582 = arith.mulf %581, %580 : vector<1x256xf32>
    %c73 = arith.constant 73 : index
    %583 = memref.load %arg5[%c73] : memref<98xf32, #tpu.memory_space<smem>>
    %584 = vector.extract_strided_slice %578 {offsets = [1, 0], sizes = [1, 256], strides = [1, 1]} : vector<2x256xf32> to vector<1x256xf32>
    %585 = vector.broadcast %583 : f32 to vector<1x256xf32>
    %586 = arith.mulf %585, %584 : vector<1x256xf32>
    %587 = arith.addf %582, %586 : vector<1x256xf32>
    %588 = arith.addf %573, %587 : vector<1x256xf32>
    %c255_i32 = arith.constant 255 : i32
    %589 = tpu.dynamic_rotate %190 by %c255_i32 dim 1 : vector<2x256xf32>, i32 -> vector<2x256xf32>
    %590 = arith.andi %40, %112 : vector<1x256xi1>
    %cst_97 = arith.constant 0.000000e+00 : f32
    %591 = vector.shape_cast %590 : vector<1x256xi1> to vector<1x256xi1>
    %592 = vector.broadcast %591 : vector<1x256xi1> to vector<2x256xi1>
    %593 = vector.broadcast %cst_97 : f32 to vector<2x256xf32>
    %594 = arith.select %592, %589, %593 : vector<2x256xi1>, vector<2x256xf32>
    %c25 = arith.constant 25 : index
    %595 = memref.load %arg5[%c25] : memref<98xf32, #tpu.memory_space<smem>>
    %596 = vector.extract_strided_slice %594 {offsets = [0, 0], sizes = [1, 256], strides = [1, 1]} : vector<2x256xf32> to vector<1x256xf32>
    %597 = vector.broadcast %595 : f32 to vector<1x256xf32>
    %598 = arith.mulf %597, %596 : vector<1x256xf32>
    %c74 = arith.constant 74 : index
    %599 = memref.load %arg5[%c74] : memref<98xf32, #tpu.memory_space<smem>>
    %600 = vector.extract_strided_slice %594 {offsets = [1, 0], sizes = [1, 256], strides = [1, 1]} : vector<2x256xf32> to vector<1x256xf32>
    %601 = vector.broadcast %599 : f32 to vector<1x256xf32>
    %602 = arith.mulf %601, %600 : vector<1x256xf32>
    %603 = arith.addf %598, %602 : vector<1x256xf32>
    %604 = arith.addf %588, %603 : vector<1x256xf32>
    %c254_i32 = arith.constant 254 : i32
    %605 = tpu.dynamic_rotate %190 by %c254_i32 dim 1 : vector<2x256xf32>, i32 -> vector<2x256xf32>
    %606 = arith.andi %40, %121 : vector<1x256xi1>
    %cst_98 = arith.constant 0.000000e+00 : f32
    %607 = vector.shape_cast %606 : vector<1x256xi1> to vector<1x256xi1>
    %608 = vector.broadcast %607 : vector<1x256xi1> to vector<2x256xi1>
    %609 = vector.broadcast %cst_98 : f32 to vector<2x256xf32>
    %610 = arith.select %608, %605, %609 : vector<2x256xi1>, vector<2x256xf32>
    %c26 = arith.constant 26 : index
    %611 = memref.load %arg5[%c26] : memref<98xf32, #tpu.memory_space<smem>>
    %612 = vector.extract_strided_slice %610 {offsets = [0, 0], sizes = [1, 256], strides = [1, 1]} : vector<2x256xf32> to vector<1x256xf32>
    %613 = vector.broadcast %611 : f32 to vector<1x256xf32>
    %614 = arith.mulf %613, %612 : vector<1x256xf32>
    %c75 = arith.constant 75 : index
    %615 = memref.load %arg5[%c75] : memref<98xf32, #tpu.memory_space<smem>>
    %616 = vector.extract_strided_slice %610 {offsets = [1, 0], sizes = [1, 256], strides = [1, 1]} : vector<2x256xf32> to vector<1x256xf32>
    %617 = vector.broadcast %615 : f32 to vector<1x256xf32>
    %618 = arith.mulf %617, %616 : vector<1x256xf32>
    %619 = arith.addf %614, %618 : vector<1x256xf32>
    %620 = arith.addf %604, %619 : vector<1x256xf32>
    %c253_i32 = arith.constant 253 : i32
    %621 = tpu.dynamic_rotate %190 by %c253_i32 dim 1 : vector<2x256xf32>, i32 -> vector<2x256xf32>
    %622 = arith.andi %40, %130 : vector<1x256xi1>
    %cst_99 = arith.constant 0.000000e+00 : f32
    %623 = vector.shape_cast %622 : vector<1x256xi1> to vector<1x256xi1>
    %624 = vector.broadcast %623 : vector<1x256xi1> to vector<2x256xi1>
    %625 = vector.broadcast %cst_99 : f32 to vector<2x256xf32>
    %626 = arith.select %624, %621, %625 : vector<2x256xi1>, vector<2x256xf32>
    %c27 = arith.constant 27 : index
    %627 = memref.load %arg5[%c27] : memref<98xf32, #tpu.memory_space<smem>>
    %628 = vector.extract_strided_slice %626 {offsets = [0, 0], sizes = [1, 256], strides = [1, 1]} : vector<2x256xf32> to vector<1x256xf32>
    %629 = vector.broadcast %627 : f32 to vector<1x256xf32>
    %630 = arith.mulf %629, %628 : vector<1x256xf32>
    %c76 = arith.constant 76 : index
    %631 = memref.load %arg5[%c76] : memref<98xf32, #tpu.memory_space<smem>>
    %632 = vector.extract_strided_slice %626 {offsets = [1, 0], sizes = [1, 256], strides = [1, 1]} : vector<2x256xf32> to vector<1x256xf32>
    %633 = vector.broadcast %631 : f32 to vector<1x256xf32>
    %634 = arith.mulf %633, %632 : vector<1x256xf32>
    %635 = arith.addf %630, %634 : vector<1x256xf32>
    %636 = arith.addf %620, %635 : vector<1x256xf32>
    %c243_i32 = arith.constant 243 : i32
    %637 = tpu.dynamic_rotate %190 by %c243_i32 dim 1 : vector<2x256xf32>, i32 -> vector<2x256xf32>
    %638 = arith.andi %49, %76 : vector<1x256xi1>
    %cst_100 = arith.constant 0.000000e+00 : f32
    %639 = vector.shape_cast %638 : vector<1x256xi1> to vector<1x256xi1>
    %640 = vector.broadcast %639 : vector<1x256xi1> to vector<2x256xi1>
    %641 = vector.broadcast %cst_100 : f32 to vector<2x256xf32>
    %642 = arith.select %640, %637, %641 : vector<2x256xi1>, vector<2x256xf32>
    %c28 = arith.constant 28 : index
    %643 = memref.load %arg5[%c28] : memref<98xf32, #tpu.memory_space<smem>>
    %644 = vector.extract_strided_slice %642 {offsets = [0, 0], sizes = [1, 256], strides = [1, 1]} : vector<2x256xf32> to vector<1x256xf32>
    %645 = vector.broadcast %643 : f32 to vector<1x256xf32>
    %646 = arith.mulf %645, %644 : vector<1x256xf32>
    %c77 = arith.constant 77 : index
    %647 = memref.load %arg5[%c77] : memref<98xf32, #tpu.memory_space<smem>>
    %648 = vector.extract_strided_slice %642 {offsets = [1, 0], sizes = [1, 256], strides = [1, 1]} : vector<2x256xf32> to vector<1x256xf32>
    %649 = vector.broadcast %647 : f32 to vector<1x256xf32>
    %650 = arith.mulf %649, %648 : vector<1x256xf32>
    %651 = arith.addf %646, %650 : vector<1x256xf32>
    %652 = arith.addf %636, %651 : vector<1x256xf32>
    %c242_i32 = arith.constant 242 : i32
    %653 = tpu.dynamic_rotate %190 by %c242_i32 dim 1 : vector<2x256xf32>, i32 -> vector<2x256xf32>
    %654 = arith.andi %49, %85 : vector<1x256xi1>
    %cst_101 = arith.constant 0.000000e+00 : f32
    %655 = vector.shape_cast %654 : vector<1x256xi1> to vector<1x256xi1>
    %656 = vector.broadcast %655 : vector<1x256xi1> to vector<2x256xi1>
    %657 = vector.broadcast %cst_101 : f32 to vector<2x256xf32>
    %658 = arith.select %656, %653, %657 : vector<2x256xi1>, vector<2x256xf32>
    %c29 = arith.constant 29 : index
    %659 = memref.load %arg5[%c29] : memref<98xf32, #tpu.memory_space<smem>>
    %660 = vector.extract_strided_slice %658 {offsets = [0, 0], sizes = [1, 256], strides = [1, 1]} : vector<2x256xf32> to vector<1x256xf32>
    %661 = vector.broadcast %659 : f32 to vector<1x256xf32>
    %662 = arith.mulf %661, %660 : vector<1x256xf32>
    %c78 = arith.constant 78 : index
    %663 = memref.load %arg5[%c78] : memref<98xf32, #tpu.memory_space<smem>>
    %664 = vector.extract_strided_slice %658 {offsets = [1, 0], sizes = [1, 256], strides = [1, 1]} : vector<2x256xf32> to vector<1x256xf32>
    %665 = vector.broadcast %663 : f32 to vector<1x256xf32>
    %666 = arith.mulf %665, %664 : vector<1x256xf32>
    %667 = arith.addf %662, %666 : vector<1x256xf32>
    %668 = arith.addf %652, %667 : vector<1x256xf32>
    %c241_i32 = arith.constant 241 : i32
    %669 = tpu.dynamic_rotate %190 by %c241_i32 dim 1 : vector<2x256xf32>, i32 -> vector<2x256xf32>
    %670 = arith.andi %49, %94 : vector<1x256xi1>
    %cst_102 = arith.constant 0.000000e+00 : f32
    %671 = vector.shape_cast %670 : vector<1x256xi1> to vector<1x256xi1>
    %672 = vector.broadcast %671 : vector<1x256xi1> to vector<2x256xi1>
    %673 = vector.broadcast %cst_102 : f32 to vector<2x256xf32>
    %674 = arith.select %672, %669, %673 : vector<2x256xi1>, vector<2x256xf32>
    %c30 = arith.constant 30 : index
    %675 = memref.load %arg5[%c30] : memref<98xf32, #tpu.memory_space<smem>>
    %676 = vector.extract_strided_slice %674 {offsets = [0, 0], sizes = [1, 256], strides = [1, 1]} : vector<2x256xf32> to vector<1x256xf32>
    %677 = vector.broadcast %675 : f32 to vector<1x256xf32>
    %678 = arith.mulf %677, %676 : vector<1x256xf32>
    %c79 = arith.constant 79 : index
    %679 = memref.load %arg5[%c79] : memref<98xf32, #tpu.memory_space<smem>>
    %680 = vector.extract_strided_slice %674 {offsets = [1, 0], sizes = [1, 256], strides = [1, 1]} : vector<2x256xf32> to vector<1x256xf32>
    %681 = vector.broadcast %679 : f32 to vector<1x256xf32>
    %682 = arith.mulf %681, %680 : vector<1x256xf32>
    %683 = arith.addf %678, %682 : vector<1x256xf32>
    %684 = arith.addf %668, %683 : vector<1x256xf32>
    %c240_i32 = arith.constant 240 : i32
    %685 = tpu.dynamic_rotate %190 by %c240_i32 dim 1 : vector<2x256xf32>, i32 -> vector<2x256xf32>
    %686 = arith.andi %49, %103 : vector<1x256xi1>
    %cst_103 = arith.constant 0.000000e+00 : f32
    %687 = vector.shape_cast %686 : vector<1x256xi1> to vector<1x256xi1>
    %688 = vector.broadcast %687 : vector<1x256xi1> to vector<2x256xi1>
    %689 = vector.broadcast %cst_103 : f32 to vector<2x256xf32>
    %690 = arith.select %688, %685, %689 : vector<2x256xi1>, vector<2x256xf32>
    %c31 = arith.constant 31 : index
    %691 = memref.load %arg5[%c31] : memref<98xf32, #tpu.memory_space<smem>>
    %692 = vector.extract_strided_slice %690 {offsets = [0, 0], sizes = [1, 256], strides = [1, 1]} : vector<2x256xf32> to vector<1x256xf32>
    %693 = vector.broadcast %691 : f32 to vector<1x256xf32>
    %694 = arith.mulf %693, %692 : vector<1x256xf32>
    %c80 = arith.constant 80 : index
    %695 = memref.load %arg5[%c80] : memref<98xf32, #tpu.memory_space<smem>>
    %696 = vector.extract_strided_slice %690 {offsets = [1, 0], sizes = [1, 256], strides = [1, 1]} : vector<2x256xf32> to vector<1x256xf32>
    %697 = vector.broadcast %695 : f32 to vector<1x256xf32>
    %698 = arith.mulf %697, %696 : vector<1x256xf32>
    %699 = arith.addf %694, %698 : vector<1x256xf32>
    %700 = arith.addf %684, %699 : vector<1x256xf32>
    %c239_i32 = arith.constant 239 : i32
    %701 = tpu.dynamic_rotate %190 by %c239_i32 dim 1 : vector<2x256xf32>, i32 -> vector<2x256xf32>
    %702 = arith.andi %49, %112 : vector<1x256xi1>
    %cst_104 = arith.constant 0.000000e+00 : f32
    %703 = vector.shape_cast %702 : vector<1x256xi1> to vector<1x256xi1>
    %704 = vector.broadcast %703 : vector<1x256xi1> to vector<2x256xi1>
    %705 = vector.broadcast %cst_104 : f32 to vector<2x256xf32>
    %706 = arith.select %704, %701, %705 : vector<2x256xi1>, vector<2x256xf32>
    %c32 = arith.constant 32 : index
    %707 = memref.load %arg5[%c32] : memref<98xf32, #tpu.memory_space<smem>>
    %708 = vector.extract_strided_slice %706 {offsets = [0, 0], sizes = [1, 256], strides = [1, 1]} : vector<2x256xf32> to vector<1x256xf32>
    %709 = vector.broadcast %707 : f32 to vector<1x256xf32>
    %710 = arith.mulf %709, %708 : vector<1x256xf32>
    %c81 = arith.constant 81 : index
    %711 = memref.load %arg5[%c81] : memref<98xf32, #tpu.memory_space<smem>>
    %712 = vector.extract_strided_slice %706 {offsets = [1, 0], sizes = [1, 256], strides = [1, 1]} : vector<2x256xf32> to vector<1x256xf32>
    %713 = vector.broadcast %711 : f32 to vector<1x256xf32>
    %714 = arith.mulf %713, %712 : vector<1x256xf32>
    %715 = arith.addf %710, %714 : vector<1x256xf32>
    %716 = arith.addf %700, %715 : vector<1x256xf32>
    %c238_i32 = arith.constant 238 : i32
    %717 = tpu.dynamic_rotate %190 by %c238_i32 dim 1 : vector<2x256xf32>, i32 -> vector<2x256xf32>
    %718 = arith.andi %49, %121 : vector<1x256xi1>
    %cst_105 = arith.constant 0.000000e+00 : f32
    %719 = vector.shape_cast %718 : vector<1x256xi1> to vector<1x256xi1>
    %720 = vector.broadcast %719 : vector<1x256xi1> to vector<2x256xi1>
    %721 = vector.broadcast %cst_105 : f32 to vector<2x256xf32>
    %722 = arith.select %720, %717, %721 : vector<2x256xi1>, vector<2x256xf32>
    %c33 = arith.constant 33 : index
    %723 = memref.load %arg5[%c33] : memref<98xf32, #tpu.memory_space<smem>>
    %724 = vector.extract_strided_slice %722 {offsets = [0, 0], sizes = [1, 256], strides = [1, 1]} : vector<2x256xf32> to vector<1x256xf32>
    %725 = vector.broadcast %723 : f32 to vector<1x256xf32>
    %726 = arith.mulf %725, %724 : vector<1x256xf32>
    %c82 = arith.constant 82 : index
    %727 = memref.load %arg5[%c82] : memref<98xf32, #tpu.memory_space<smem>>
    %728 = vector.extract_strided_slice %722 {offsets = [1, 0], sizes = [1, 256], strides = [1, 1]} : vector<2x256xf32> to vector<1x256xf32>
    %729 = vector.broadcast %727 : f32 to vector<1x256xf32>
    %730 = arith.mulf %729, %728 : vector<1x256xf32>
    %731 = arith.addf %726, %730 : vector<1x256xf32>
    %732 = arith.addf %716, %731 : vector<1x256xf32>
    %c237_i32 = arith.constant 237 : i32
    %733 = tpu.dynamic_rotate %190 by %c237_i32 dim 1 : vector<2x256xf32>, i32 -> vector<2x256xf32>
    %734 = arith.andi %49, %130 : vector<1x256xi1>
    %cst_106 = arith.constant 0.000000e+00 : f32
    %735 = vector.shape_cast %734 : vector<1x256xi1> to vector<1x256xi1>
    %736 = vector.broadcast %735 : vector<1x256xi1> to vector<2x256xi1>
    %737 = vector.broadcast %cst_106 : f32 to vector<2x256xf32>
    %738 = arith.select %736, %733, %737 : vector<2x256xi1>, vector<2x256xf32>
    %c34 = arith.constant 34 : index
    %739 = memref.load %arg5[%c34] : memref<98xf32, #tpu.memory_space<smem>>
    %740 = vector.extract_strided_slice %738 {offsets = [0, 0], sizes = [1, 256], strides = [1, 1]} : vector<2x256xf32> to vector<1x256xf32>
    %741 = vector.broadcast %739 : f32 to vector<1x256xf32>
    %742 = arith.mulf %741, %740 : vector<1x256xf32>
    %c83 = arith.constant 83 : index
    %743 = memref.load %arg5[%c83] : memref<98xf32, #tpu.memory_space<smem>>
    %744 = vector.extract_strided_slice %738 {offsets = [1, 0], sizes = [1, 256], strides = [1, 1]} : vector<2x256xf32> to vector<1x256xf32>
    %745 = vector.broadcast %743 : f32 to vector<1x256xf32>
    %746 = arith.mulf %745, %744 : vector<1x256xf32>
    %747 = arith.addf %742, %746 : vector<1x256xf32>
    %748 = arith.addf %732, %747 : vector<1x256xf32>
    %c227_i32 = arith.constant 227 : i32
    %749 = tpu.dynamic_rotate %190 by %c227_i32 dim 1 : vector<2x256xf32>, i32 -> vector<2x256xf32>
    %750 = arith.andi %58, %76 : vector<1x256xi1>
    %cst_107 = arith.constant 0.000000e+00 : f32
    %751 = vector.shape_cast %750 : vector<1x256xi1> to vector<1x256xi1>
    %752 = vector.broadcast %751 : vector<1x256xi1> to vector<2x256xi1>
    %753 = vector.broadcast %cst_107 : f32 to vector<2x256xf32>
    %754 = arith.select %752, %749, %753 : vector<2x256xi1>, vector<2x256xf32>
    %c35 = arith.constant 35 : index
    %755 = memref.load %arg5[%c35] : memref<98xf32, #tpu.memory_space<smem>>
    %756 = vector.extract_strided_slice %754 {offsets = [0, 0], sizes = [1, 256], strides = [1, 1]} : vector<2x256xf32> to vector<1x256xf32>
    %757 = vector.broadcast %755 : f32 to vector<1x256xf32>
    %758 = arith.mulf %757, %756 : vector<1x256xf32>
    %c84 = arith.constant 84 : index
    %759 = memref.load %arg5[%c84] : memref<98xf32, #tpu.memory_space<smem>>
    %760 = vector.extract_strided_slice %754 {offsets = [1, 0], sizes = [1, 256], strides = [1, 1]} : vector<2x256xf32> to vector<1x256xf32>
    %761 = vector.broadcast %759 : f32 to vector<1x256xf32>
    %762 = arith.mulf %761, %760 : vector<1x256xf32>
    %763 = arith.addf %758, %762 : vector<1x256xf32>
    %764 = arith.addf %748, %763 : vector<1x256xf32>
    %c226_i32 = arith.constant 226 : i32
    %765 = tpu.dynamic_rotate %190 by %c226_i32 dim 1 : vector<2x256xf32>, i32 -> vector<2x256xf32>
    %766 = arith.andi %58, %85 : vector<1x256xi1>
    %cst_108 = arith.constant 0.000000e+00 : f32
    %767 = vector.shape_cast %766 : vector<1x256xi1> to vector<1x256xi1>
    %768 = vector.broadcast %767 : vector<1x256xi1> to vector<2x256xi1>
    %769 = vector.broadcast %cst_108 : f32 to vector<2x256xf32>
    %770 = arith.select %768, %765, %769 : vector<2x256xi1>, vector<2x256xf32>
    %c36 = arith.constant 36 : index
    %771 = memref.load %arg5[%c36] : memref<98xf32, #tpu.memory_space<smem>>
    %772 = vector.extract_strided_slice %770 {offsets = [0, 0], sizes = [1, 256], strides = [1, 1]} : vector<2x256xf32> to vector<1x256xf32>
    %773 = vector.broadcast %771 : f32 to vector<1x256xf32>
    %774 = arith.mulf %773, %772 : vector<1x256xf32>
    %c85 = arith.constant 85 : index
    %775 = memref.load %arg5[%c85] : memref<98xf32, #tpu.memory_space<smem>>
    %776 = vector.extract_strided_slice %770 {offsets = [1, 0], sizes = [1, 256], strides = [1, 1]} : vector<2x256xf32> to vector<1x256xf32>
    %777 = vector.broadcast %775 : f32 to vector<1x256xf32>
    %778 = arith.mulf %777, %776 : vector<1x256xf32>
    %779 = arith.addf %774, %778 : vector<1x256xf32>
    %780 = arith.addf %764, %779 : vector<1x256xf32>
    %c225_i32 = arith.constant 225 : i32
    %781 = tpu.dynamic_rotate %190 by %c225_i32 dim 1 : vector<2x256xf32>, i32 -> vector<2x256xf32>
    %782 = arith.andi %58, %94 : vector<1x256xi1>
    %cst_109 = arith.constant 0.000000e+00 : f32
    %783 = vector.shape_cast %782 : vector<1x256xi1> to vector<1x256xi1>
    %784 = vector.broadcast %783 : vector<1x256xi1> to vector<2x256xi1>
    %785 = vector.broadcast %cst_109 : f32 to vector<2x256xf32>
    %786 = arith.select %784, %781, %785 : vector<2x256xi1>, vector<2x256xf32>
    %c37 = arith.constant 37 : index
    %787 = memref.load %arg5[%c37] : memref<98xf32, #tpu.memory_space<smem>>
    %788 = vector.extract_strided_slice %786 {offsets = [0, 0], sizes = [1, 256], strides = [1, 1]} : vector<2x256xf32> to vector<1x256xf32>
    %789 = vector.broadcast %787 : f32 to vector<1x256xf32>
    %790 = arith.mulf %789, %788 : vector<1x256xf32>
    %c86 = arith.constant 86 : index
    %791 = memref.load %arg5[%c86] : memref<98xf32, #tpu.memory_space<smem>>
    %792 = vector.extract_strided_slice %786 {offsets = [1, 0], sizes = [1, 256], strides = [1, 1]} : vector<2x256xf32> to vector<1x256xf32>
    %793 = vector.broadcast %791 : f32 to vector<1x256xf32>
    %794 = arith.mulf %793, %792 : vector<1x256xf32>
    %795 = arith.addf %790, %794 : vector<1x256xf32>
    %796 = arith.addf %780, %795 : vector<1x256xf32>
    %c224_i32 = arith.constant 224 : i32
    %797 = tpu.dynamic_rotate %190 by %c224_i32 dim 1 : vector<2x256xf32>, i32 -> vector<2x256xf32>
    %798 = arith.andi %58, %103 : vector<1x256xi1>
    %cst_110 = arith.constant 0.000000e+00 : f32
    %799 = vector.shape_cast %798 : vector<1x256xi1> to vector<1x256xi1>
    %800 = vector.broadcast %799 : vector<1x256xi1> to vector<2x256xi1>
    %801 = vector.broadcast %cst_110 : f32 to vector<2x256xf32>
    %802 = arith.select %800, %797, %801 : vector<2x256xi1>, vector<2x256xf32>
    %c38 = arith.constant 38 : index
    %803 = memref.load %arg5[%c38] : memref<98xf32, #tpu.memory_space<smem>>
    %804 = vector.extract_strided_slice %802 {offsets = [0, 0], sizes = [1, 256], strides = [1, 1]} : vector<2x256xf32> to vector<1x256xf32>
    %805 = vector.broadcast %803 : f32 to vector<1x256xf32>
    %806 = arith.mulf %805, %804 : vector<1x256xf32>
    %c87 = arith.constant 87 : index
    %807 = memref.load %arg5[%c87] : memref<98xf32, #tpu.memory_space<smem>>
    %808 = vector.extract_strided_slice %802 {offsets = [1, 0], sizes = [1, 256], strides = [1, 1]} : vector<2x256xf32> to vector<1x256xf32>
    %809 = vector.broadcast %807 : f32 to vector<1x256xf32>
    %810 = arith.mulf %809, %808 : vector<1x256xf32>
    %811 = arith.addf %806, %810 : vector<1x256xf32>
    %812 = arith.addf %796, %811 : vector<1x256xf32>
    %c223_i32 = arith.constant 223 : i32
    %813 = tpu.dynamic_rotate %190 by %c223_i32 dim 1 : vector<2x256xf32>, i32 -> vector<2x256xf32>
    %814 = arith.andi %58, %112 : vector<1x256xi1>
    %cst_111 = arith.constant 0.000000e+00 : f32
    %815 = vector.shape_cast %814 : vector<1x256xi1> to vector<1x256xi1>
    %816 = vector.broadcast %815 : vector<1x256xi1> to vector<2x256xi1>
    %817 = vector.broadcast %cst_111 : f32 to vector<2x256xf32>
    %818 = arith.select %816, %813, %817 : vector<2x256xi1>, vector<2x256xf32>
    %c39 = arith.constant 39 : index
    %819 = memref.load %arg5[%c39] : memref<98xf32, #tpu.memory_space<smem>>
    %820 = vector.extract_strided_slice %818 {offsets = [0, 0], sizes = [1, 256], strides = [1, 1]} : vector<2x256xf32> to vector<1x256xf32>
    %821 = vector.broadcast %819 : f32 to vector<1x256xf32>
    %822 = arith.mulf %821, %820 : vector<1x256xf32>
    %c88 = arith.constant 88 : index
    %823 = memref.load %arg5[%c88] : memref<98xf32, #tpu.memory_space<smem>>
    %824 = vector.extract_strided_slice %818 {offsets = [1, 0], sizes = [1, 256], strides = [1, 1]} : vector<2x256xf32> to vector<1x256xf32>
    %825 = vector.broadcast %823 : f32 to vector<1x256xf32>
    %826 = arith.mulf %825, %824 : vector<1x256xf32>
    %827 = arith.addf %822, %826 : vector<1x256xf32>
    %828 = arith.addf %812, %827 : vector<1x256xf32>
    %c222_i32 = arith.constant 222 : i32
    %829 = tpu.dynamic_rotate %190 by %c222_i32 dim 1 : vector<2x256xf32>, i32 -> vector<2x256xf32>
    %830 = arith.andi %58, %121 : vector<1x256xi1>
    %cst_112 = arith.constant 0.000000e+00 : f32
    %831 = vector.shape_cast %830 : vector<1x256xi1> to vector<1x256xi1>
    %832 = vector.broadcast %831 : vector<1x256xi1> to vector<2x256xi1>
    %833 = vector.broadcast %cst_112 : f32 to vector<2x256xf32>
    %834 = arith.select %832, %829, %833 : vector<2x256xi1>, vector<2x256xf32>
    %c40 = arith.constant 40 : index
    %835 = memref.load %arg5[%c40] : memref<98xf32, #tpu.memory_space<smem>>
    %836 = vector.extract_strided_slice %834 {offsets = [0, 0], sizes = [1, 256], strides = [1, 1]} : vector<2x256xf32> to vector<1x256xf32>
    %837 = vector.broadcast %835 : f32 to vector<1x256xf32>
    %838 = arith.mulf %837, %836 : vector<1x256xf32>
    %c89 = arith.constant 89 : index
    %839 = memref.load %arg5[%c89] : memref<98xf32, #tpu.memory_space<smem>>
    %840 = vector.extract_strided_slice %834 {offsets = [1, 0], sizes = [1, 256], strides = [1, 1]} : vector<2x256xf32> to vector<1x256xf32>
    %841 = vector.broadcast %839 : f32 to vector<1x256xf32>
    %842 = arith.mulf %841, %840 : vector<1x256xf32>
    %843 = arith.addf %838, %842 : vector<1x256xf32>
    %844 = arith.addf %828, %843 : vector<1x256xf32>
    %c221_i32 = arith.constant 221 : i32
    %845 = tpu.dynamic_rotate %190 by %c221_i32 dim 1 : vector<2x256xf32>, i32 -> vector<2x256xf32>
    %846 = arith.andi %58, %130 : vector<1x256xi1>
    %cst_113 = arith.constant 0.000000e+00 : f32
    %847 = vector.shape_cast %846 : vector<1x256xi1> to vector<1x256xi1>
    %848 = vector.broadcast %847 : vector<1x256xi1> to vector<2x256xi1>
    %849 = vector.broadcast %cst_113 : f32 to vector<2x256xf32>
    %850 = arith.select %848, %845, %849 : vector<2x256xi1>, vector<2x256xf32>
    %c41 = arith.constant 41 : index
    %851 = memref.load %arg5[%c41] : memref<98xf32, #tpu.memory_space<smem>>
    %852 = vector.extract_strided_slice %850 {offsets = [0, 0], sizes = [1, 256], strides = [1, 1]} : vector<2x256xf32> to vector<1x256xf32>
    %853 = vector.broadcast %851 : f32 to vector<1x256xf32>
    %854 = arith.mulf %853, %852 : vector<1x256xf32>
    %c90 = arith.constant 90 : index
    %855 = memref.load %arg5[%c90] : memref<98xf32, #tpu.memory_space<smem>>
    %856 = vector.extract_strided_slice %850 {offsets = [1, 0], sizes = [1, 256], strides = [1, 1]} : vector<2x256xf32> to vector<1x256xf32>
    %857 = vector.broadcast %855 : f32 to vector<1x256xf32>
    %858 = arith.mulf %857, %856 : vector<1x256xf32>
    %859 = arith.addf %854, %858 : vector<1x256xf32>
    %860 = arith.addf %844, %859 : vector<1x256xf32>
    %c211_i32 = arith.constant 211 : i32
    %861 = tpu.dynamic_rotate %190 by %c211_i32 dim 1 : vector<2x256xf32>, i32 -> vector<2x256xf32>
    %862 = arith.andi %67, %76 : vector<1x256xi1>
    %cst_114 = arith.constant 0.000000e+00 : f32
    %863 = vector.shape_cast %862 : vector<1x256xi1> to vector<1x256xi1>
    %864 = vector.broadcast %863 : vector<1x256xi1> to vector<2x256xi1>
    %865 = vector.broadcast %cst_114 : f32 to vector<2x256xf32>
    %866 = arith.select %864, %861, %865 : vector<2x256xi1>, vector<2x256xf32>
    %c42 = arith.constant 42 : index
    %867 = memref.load %arg5[%c42] : memref<98xf32, #tpu.memory_space<smem>>
    %868 = vector.extract_strided_slice %866 {offsets = [0, 0], sizes = [1, 256], strides = [1, 1]} : vector<2x256xf32> to vector<1x256xf32>
    %869 = vector.broadcast %867 : f32 to vector<1x256xf32>
    %870 = arith.mulf %869, %868 : vector<1x256xf32>
    %c91 = arith.constant 91 : index
    %871 = memref.load %arg5[%c91] : memref<98xf32, #tpu.memory_space<smem>>
    %872 = vector.extract_strided_slice %866 {offsets = [1, 0], sizes = [1, 256], strides = [1, 1]} : vector<2x256xf32> to vector<1x256xf32>
    %873 = vector.broadcast %871 : f32 to vector<1x256xf32>
    %874 = arith.mulf %873, %872 : vector<1x256xf32>
    %875 = arith.addf %870, %874 : vector<1x256xf32>
    %876 = arith.addf %860, %875 : vector<1x256xf32>
    %c210_i32 = arith.constant 210 : i32
    %877 = tpu.dynamic_rotate %190 by %c210_i32 dim 1 : vector<2x256xf32>, i32 -> vector<2x256xf32>
    %878 = arith.andi %67, %85 : vector<1x256xi1>
    %cst_115 = arith.constant 0.000000e+00 : f32
    %879 = vector.shape_cast %878 : vector<1x256xi1> to vector<1x256xi1>
    %880 = vector.broadcast %879 : vector<1x256xi1> to vector<2x256xi1>
    %881 = vector.broadcast %cst_115 : f32 to vector<2x256xf32>
    %882 = arith.select %880, %877, %881 : vector<2x256xi1>, vector<2x256xf32>
    %c43 = arith.constant 43 : index
    %883 = memref.load %arg5[%c43] : memref<98xf32, #tpu.memory_space<smem>>
    %884 = vector.extract_strided_slice %882 {offsets = [0, 0], sizes = [1, 256], strides = [1, 1]} : vector<2x256xf32> to vector<1x256xf32>
    %885 = vector.broadcast %883 : f32 to vector<1x256xf32>
    %886 = arith.mulf %885, %884 : vector<1x256xf32>
    %c92 = arith.constant 92 : index
    %887 = memref.load %arg5[%c92] : memref<98xf32, #tpu.memory_space<smem>>
    %888 = vector.extract_strided_slice %882 {offsets = [1, 0], sizes = [1, 256], strides = [1, 1]} : vector<2x256xf32> to vector<1x256xf32>
    %889 = vector.broadcast %887 : f32 to vector<1x256xf32>
    %890 = arith.mulf %889, %888 : vector<1x256xf32>
    %891 = arith.addf %886, %890 : vector<1x256xf32>
    %892 = arith.addf %876, %891 : vector<1x256xf32>
    %c209_i32 = arith.constant 209 : i32
    %893 = tpu.dynamic_rotate %190 by %c209_i32 dim 1 : vector<2x256xf32>, i32 -> vector<2x256xf32>
    %894 = arith.andi %67, %94 : vector<1x256xi1>
    %cst_116 = arith.constant 0.000000e+00 : f32
    %895 = vector.shape_cast %894 : vector<1x256xi1> to vector<1x256xi1>
    %896 = vector.broadcast %895 : vector<1x256xi1> to vector<2x256xi1>
    %897 = vector.broadcast %cst_116 : f32 to vector<2x256xf32>
    %898 = arith.select %896, %893, %897 : vector<2x256xi1>, vector<2x256xf32>
    %c44 = arith.constant 44 : index
    %899 = memref.load %arg5[%c44] : memref<98xf32, #tpu.memory_space<smem>>
    %900 = vector.extract_strided_slice %898 {offsets = [0, 0], sizes = [1, 256], strides = [1, 1]} : vector<2x256xf32> to vector<1x256xf32>
    %901 = vector.broadcast %899 : f32 to vector<1x256xf32>
    %902 = arith.mulf %901, %900 : vector<1x256xf32>
    %c93 = arith.constant 93 : index
    %903 = memref.load %arg5[%c93] : memref<98xf32, #tpu.memory_space<smem>>
    %904 = vector.extract_strided_slice %898 {offsets = [1, 0], sizes = [1, 256], strides = [1, 1]} : vector<2x256xf32> to vector<1x256xf32>
    %905 = vector.broadcast %903 : f32 to vector<1x256xf32>
    %906 = arith.mulf %905, %904 : vector<1x256xf32>
    %907 = arith.addf %902, %906 : vector<1x256xf32>
    %908 = arith.addf %892, %907 : vector<1x256xf32>
    %c208_i32 = arith.constant 208 : i32
    %909 = tpu.dynamic_rotate %190 by %c208_i32 dim 1 : vector<2x256xf32>, i32 -> vector<2x256xf32>
    %910 = arith.andi %67, %103 : vector<1x256xi1>
    %cst_117 = arith.constant 0.000000e+00 : f32
    %911 = vector.shape_cast %910 : vector<1x256xi1> to vector<1x256xi1>
    %912 = vector.broadcast %911 : vector<1x256xi1> to vector<2x256xi1>
    %913 = vector.broadcast %cst_117 : f32 to vector<2x256xf32>
    %914 = arith.select %912, %909, %913 : vector<2x256xi1>, vector<2x256xf32>
    %c45 = arith.constant 45 : index
    %915 = memref.load %arg5[%c45] : memref<98xf32, #tpu.memory_space<smem>>
    %916 = vector.extract_strided_slice %914 {offsets = [0, 0], sizes = [1, 256], strides = [1, 1]} : vector<2x256xf32> to vector<1x256xf32>
    %917 = vector.broadcast %915 : f32 to vector<1x256xf32>
    %918 = arith.mulf %917, %916 : vector<1x256xf32>
    %c94 = arith.constant 94 : index
    %919 = memref.load %arg5[%c94] : memref<98xf32, #tpu.memory_space<smem>>
    %920 = vector.extract_strided_slice %914 {offsets = [1, 0], sizes = [1, 256], strides = [1, 1]} : vector<2x256xf32> to vector<1x256xf32>
    %921 = vector.broadcast %919 : f32 to vector<1x256xf32>
    %922 = arith.mulf %921, %920 : vector<1x256xf32>
    %923 = arith.addf %918, %922 : vector<1x256xf32>
    %924 = arith.addf %908, %923 : vector<1x256xf32>
    %c207_i32 = arith.constant 207 : i32
    %925 = tpu.dynamic_rotate %190 by %c207_i32 dim 1 : vector<2x256xf32>, i32 -> vector<2x256xf32>
    %926 = arith.andi %67, %112 : vector<1x256xi1>
    %cst_118 = arith.constant 0.000000e+00 : f32
    %927 = vector.shape_cast %926 : vector<1x256xi1> to vector<1x256xi1>
    %928 = vector.broadcast %927 : vector<1x256xi1> to vector<2x256xi1>
    %929 = vector.broadcast %cst_118 : f32 to vector<2x256xf32>
    %930 = arith.select %928, %925, %929 : vector<2x256xi1>, vector<2x256xf32>
    %c46 = arith.constant 46 : index
    %931 = memref.load %arg5[%c46] : memref<98xf32, #tpu.memory_space<smem>>
    %932 = vector.extract_strided_slice %930 {offsets = [0, 0], sizes = [1, 256], strides = [1, 1]} : vector<2x256xf32> to vector<1x256xf32>
    %933 = vector.broadcast %931 : f32 to vector<1x256xf32>
    %934 = arith.mulf %933, %932 : vector<1x256xf32>
    %c95 = arith.constant 95 : index
    %935 = memref.load %arg5[%c95] : memref<98xf32, #tpu.memory_space<smem>>
    %936 = vector.extract_strided_slice %930 {offsets = [1, 0], sizes = [1, 256], strides = [1, 1]} : vector<2x256xf32> to vector<1x256xf32>
    %937 = vector.broadcast %935 : f32 to vector<1x256xf32>
    %938 = arith.mulf %937, %936 : vector<1x256xf32>
    %939 = arith.addf %934, %938 : vector<1x256xf32>
    %940 = arith.addf %924, %939 : vector<1x256xf32>
    %c206_i32 = arith.constant 206 : i32
    %941 = tpu.dynamic_rotate %190 by %c206_i32 dim 1 : vector<2x256xf32>, i32 -> vector<2x256xf32>
    %942 = arith.andi %67, %121 : vector<1x256xi1>
    %cst_119 = arith.constant 0.000000e+00 : f32
    %943 = vector.shape_cast %942 : vector<1x256xi1> to vector<1x256xi1>
    %944 = vector.broadcast %943 : vector<1x256xi1> to vector<2x256xi1>
    %945 = vector.broadcast %cst_119 : f32 to vector<2x256xf32>
    %946 = arith.select %944, %941, %945 : vector<2x256xi1>, vector<2x256xf32>
    %c47 = arith.constant 47 : index
    %947 = memref.load %arg5[%c47] : memref<98xf32, #tpu.memory_space<smem>>
    %948 = vector.extract_strided_slice %946 {offsets = [0, 0], sizes = [1, 256], strides = [1, 1]} : vector<2x256xf32> to vector<1x256xf32>
    %949 = vector.broadcast %947 : f32 to vector<1x256xf32>
    %950 = arith.mulf %949, %948 : vector<1x256xf32>
    %c96 = arith.constant 96 : index
    %951 = memref.load %arg5[%c96] : memref<98xf32, #tpu.memory_space<smem>>
    %952 = vector.extract_strided_slice %946 {offsets = [1, 0], sizes = [1, 256], strides = [1, 1]} : vector<2x256xf32> to vector<1x256xf32>
    %953 = vector.broadcast %951 : f32 to vector<1x256xf32>
    %954 = arith.mulf %953, %952 : vector<1x256xf32>
    %955 = arith.addf %950, %954 : vector<1x256xf32>
    %956 = arith.addf %940, %955 : vector<1x256xf32>
    %c205_i32 = arith.constant 205 : i32
    %957 = tpu.dynamic_rotate %190 by %c205_i32 dim 1 : vector<2x256xf32>, i32 -> vector<2x256xf32>
    %958 = arith.andi %67, %130 : vector<1x256xi1>
    %cst_120 = arith.constant 0.000000e+00 : f32
    %959 = vector.shape_cast %958 : vector<1x256xi1> to vector<1x256xi1>
    %960 = vector.broadcast %959 : vector<1x256xi1> to vector<2x256xi1>
    %961 = vector.broadcast %cst_120 : f32 to vector<2x256xf32>
    %962 = arith.select %960, %957, %961 : vector<2x256xi1>, vector<2x256xf32>
    %c48 = arith.constant 48 : index
    %963 = memref.load %arg5[%c48] : memref<98xf32, #tpu.memory_space<smem>>
    %964 = vector.extract_strided_slice %962 {offsets = [0, 0], sizes = [1, 256], strides = [1, 1]} : vector<2x256xf32> to vector<1x256xf32>
    %965 = vector.broadcast %963 : f32 to vector<1x256xf32>
    %966 = arith.mulf %965, %964 : vector<1x256xf32>
    %c97 = arith.constant 97 : index
    %967 = memref.load %arg5[%c97] : memref<98xf32, #tpu.memory_space<smem>>
    %968 = vector.extract_strided_slice %962 {offsets = [1, 0], sizes = [1, 256], strides = [1, 1]} : vector<2x256xf32> to vector<1x256xf32>
    %969 = vector.broadcast %967 : f32 to vector<1x256xf32>
    %970 = arith.mulf %969, %968 : vector<1x256xf32>
    %971 = arith.addf %966, %970 : vector<1x256xf32>
    %972 = arith.addf %956, %971 : vector<1x256xf32>
    %973 = arith.negf %972 : vector<1x256xf32>
    %974 = math.exp %973 : vector<1x256xf32>
    %cst_121 = arith.constant 1.000000e+00 : f32
    %975 = vector.broadcast %cst_121 : f32 to vector<1x256xf32>
    %976 = arith.addf %975, %974 : vector<1x256xf32>
    %977 = arith.divf %975, %976 : vector<1x256xf32>
    %978 = vector.broadcast %977 : vector<1x256xf32> to vector<32x256xf32>
    %979 = arith.mulf %183, %978 : vector<32x256xf32>
    %c0_122 = arith.constant 0 : index
    %c0_123 = arith.constant 0 : index
    %c0_124 = arith.constant 0 : index
    %980 = vector.load %arg6[%c0_122, %c0_123, %c0_124] : memref<2x32x256xf32, #tpu.memory_space<vmem>>, vector<1x32x256xf32>
    %981 = vector.shape_cast %980 : vector<1x32x256xf32> to vector<32x256xf32>
    %982 = vector.shape_cast %979 : vector<32x256xf32> to vector<1x32x256xf32>
    tpu.vector_store %arg6[%c0_122, %c0_123, %c0_124], %982 {strides = array<i32>} : memref<2x32x256xf32, #tpu.memory_space<vmem>>, vector<1x32x256xf32>,
    %c1_125 = arith.constant 1 : index
    %c0_126 = arith.constant 0 : index
    %c0_127 = arith.constant 0 : index
    %983 = vector.load %arg1[%c1_125, %c0_126, %c0_127] : memref<2x32x256xf32, #tpu.memory_space<vmem>>, vector<1x32x256xf32>
    %984 = vector.shape_cast %983 : vector<1x32x256xf32> to vector<32x256xf32>
    %cst_128 = arith.constant dense<0.000000e+00> : vector<32xf32>
    %985 = vector.multi_reduction <add>, %984, %cst_128 [1] : vector<32x256xf32> to vector<32xf32>
    %986 = vector.shape_cast %985 : vector<32xf32> to vector<32x1xf32>
    %cst_129 = arith.constant 2.560000e+02 : f32
    %987 = vector.broadcast %cst_129 : f32 to vector<32x1xf32>
    %988 = arith.divf %986, %987 : vector<32x1xf32>
    %cst_130 = arith.constant dense<0xFF800000> : vector<32xf32>
    %989 = vector.multi_reduction <maximumf>, %984, %cst_130 [1] : vector<32x256xf32> to vector<32xf32>
    %990 = vector.shape_cast %989 : vector<32xf32> to vector<32x1xf32>
    %c0_i32_131 = arith.constant 0 : i32
    %991 = vector.broadcast %c0_i32_131 : i32 to vector<32x2xi32>
    %992 = arith.cmpi eq, %131, %991 : vector<32x2xi32>
    %993 = vector.shape_cast %988 : vector<32x1xf32> to vector<32x1xf32>
    %994 = vector.broadcast %993 : vector<32x1xf32> to vector<32x2xf32>
    %995 = vector.shape_cast %990 : vector<32x1xf32> to vector<32x1xf32>
    %996 = vector.broadcast %995 : vector<32x1xf32> to vector<32x2xf32>
    %997 = arith.select %992, %994, %996 : vector<32x2xi1>, vector<32x2xf32>
    %998 = vector.extract_strided_slice %0 {offsets = [0, 0], sizes = [32, 1], strides = [1, 1]} : vector<32x2xf32> to vector<32x1xf32>
    %999 = vector.broadcast %998 : vector<32x1xf32> to vector<32x2xf32>
    %1000 = arith.mulf %999, %997 : vector<32x2xf32>
    %cst_132 = arith.constant dense<0.000000e+00> : vector<2xf32>
    %1001 = vector.multi_reduction <add>, %1000, %cst_132 [0] : vector<32x2xf32> to vector<2xf32>
    %1002 = vector.shape_cast %1001 : vector<2xf32> to vector<1x2xf32>
    %1003 = vector.extract_strided_slice %0 {offsets = [0, 1], sizes = [32, 1], strides = [1, 1]} : vector<32x2xf32> to vector<32x1xf32>
    %1004 = vector.broadcast %1003 : vector<32x1xf32> to vector<32x2xf32>
    %1005 = arith.mulf %1004, %997 : vector<32x2xf32>
    %cst_133 = arith.constant dense<0.000000e+00> : vector<2xf32>
    %1006 = vector.multi_reduction <add>, %1005, %cst_133 [0] : vector<32x2xf32> to vector<2xf32>
    %1007 = vector.shape_cast %1006 : vector<2xf32> to vector<1x2xf32>
    %1008 = tpu.concatenate %1002, %1007 in 0 : vector<1x2xf32>, vector<1x2xf32> -> vector<2x2xf32>
    %cst_134 = arith.constant 0.000000e+00 : f32
    %1009 = vector.broadcast %cst_134 : f32 to vector<2x2xf32>
    %1010 = arith.cmpf oge, %1008, %1009 : vector<2x2xf32>
    %cst_135 = arith.constant 0.00999999977 : f32
    %1011 = vector.broadcast %cst_135 : f32 to vector<2x2xf32>
    %1012 = arith.mulf %1011, %1008 : vector<2x2xf32>
    %1013 = arith.select %1010, %1008, %1012 : vector<2x2xi1>, vector<2x2xf32>
    %1014 = vector.extract_strided_slice %1 {offsets = [0, 0], sizes = [32, 1], strides = [1, 1]} : vector<32x2xf32> to vector<32x1xf32>
    %1015 = vector.extract_strided_slice %1013 {offsets = [0, 0], sizes = [1, 2], strides = [1, 1]} : vector<2x2xf32> to vector<1x2xf32>
    %1016 = vector.broadcast %1014 : vector<32x1xf32> to vector<32x2xf32>
    %1017 = vector.broadcast %1015 : vector<1x2xf32> to vector<32x2xf32>
    %1018 = arith.mulf %1016, %1017 : vector<32x2xf32>
    %1019 = vector.extract_strided_slice %1 {offsets = [0, 1], sizes = [32, 1], strides = [1, 1]} : vector<32x2xf32> to vector<32x1xf32>
    %1020 = vector.extract_strided_slice %1013 {offsets = [1, 0], sizes = [1, 2], strides = [1, 1]} : vector<2x2xf32> to vector<1x2xf32>
    %1021 = vector.broadcast %1019 : vector<32x1xf32> to vector<32x2xf32>
    %1022 = vector.broadcast %1020 : vector<1x2xf32> to vector<32x2xf32>
    %1023 = arith.mulf %1021, %1022 : vector<32x2xf32>
    %1024 = arith.addf %1018, %1023 : vector<32x2xf32>
    %1025 = vector.extract_strided_slice %1024 {offsets = [0, 0], sizes = [32, 1], strides = [1, 1]} : vector<32x2xf32> to vector<32x1xf32>
    %1026 = vector.extract_strided_slice %1024 {offsets = [0, 1], sizes = [32, 1], strides = [1, 1]} : vector<32x2xf32> to vector<32x1xf32>
    %1027 = arith.addf %1025, %1026 : vector<32x1xf32>
    %1028 = arith.negf %1027 : vector<32x1xf32>
    %1029 = math.exp %1028 : vector<32x1xf32>
    %cst_136 = arith.constant 1.000000e+00 : f32
    %1030 = vector.broadcast %cst_136 : f32 to vector<32x1xf32>
    %1031 = arith.addf %1030, %1029 : vector<32x1xf32>
    %1032 = arith.divf %1030, %1031 : vector<32x1xf32>
    %1033 = vector.broadcast %1032 : vector<32x1xf32> to vector<32x256xf32>
    %1034 = arith.mulf %984, %1033 : vector<32x256xf32>
    %cst_137 = arith.constant dense<0.000000e+00> : vector<256xf32>
    %1035 = vector.multi_reduction <add>, %1034, %cst_137 [0] : vector<32x256xf32> to vector<256xf32>
    %1036 = vector.shape_cast %1035 : vector<256xf32> to vector<1x256xf32>
    %cst_138 = arith.constant 3.200000e+01 : f32
    %1037 = vector.broadcast %cst_138 : f32 to vector<1x256xf32>
    %1038 = arith.divf %1036, %1037 : vector<1x256xf32>
    %cst_139 = arith.constant dense<0xFF800000> : vector<256xf32>
    %1039 = vector.multi_reduction <maximumf>, %1034, %cst_139 [0] : vector<32x256xf32> to vector<256xf32>
    %1040 = vector.shape_cast %1039 : vector<256xf32> to vector<1x256xf32>
    %1041 = tpu.concatenate %1038, %1040 in 0 : vector<1x256xf32>, vector<1x256xf32> -> vector<2x256xf32>
    %c51_i32_140 = arith.constant 51 : i32
    %1042 = tpu.dynamic_rotate %1041 by %c51_i32_140 dim 1 : vector<2x256xf32>, i32 -> vector<2x256xf32>
    %1043 = arith.andi %13, %76 : vector<1x256xi1>
    %cst_141 = arith.constant 0.000000e+00 : f32
    %1044 = vector.shape_cast %1043 : vector<1x256xi1> to vector<1x256xi1>
    %1045 = vector.broadcast %1044 : vector<1x256xi1> to vector<2x256xi1>
    %1046 = vector.broadcast %cst_141 : f32 to vector<2x256xf32>
    %1047 = arith.select %1045, %1042, %1046 : vector<2x256xi1>, vector<2x256xf32>
    %c0_142 = arith.constant 0 : index
    %1048 = memref.load %arg5[%c0_142] : memref<98xf32, #tpu.memory_space<smem>>
    %1049 = vector.extract_strided_slice %1047 {offsets = [0, 0], sizes = [1, 256], strides = [1, 1]} : vector<2x256xf32> to vector<1x256xf32>
    %1050 = vector.broadcast %1048 : f32 to vector<1x256xf32>
    %1051 = arith.mulf %1050, %1049 : vector<1x256xf32>
    %c49_143 = arith.constant 49 : index
    %1052 = memref.load %arg5[%c49_143] : memref<98xf32, #tpu.memory_space<smem>>
    %1053 = vector.extract_strided_slice %1047 {offsets = [1, 0], sizes = [1, 256], strides = [1, 1]} : vector<2x256xf32> to vector<1x256xf32>
    %1054 = vector.broadcast %1052 : f32 to vector<1x256xf32>
    %1055 = arith.mulf %1054, %1053 : vector<1x256xf32>
    %1056 = arith.addf %1051, %1055 : vector<1x256xf32>
    %c50_i32_144 = arith.constant 50 : i32
    %1057 = tpu.dynamic_rotate %1041 by %c50_i32_144 dim 1 : vector<2x256xf32>, i32 -> vector<2x256xf32>
    %1058 = arith.andi %13, %85 : vector<1x256xi1>
    %cst_145 = arith.constant 0.000000e+00 : f32
    %1059 = vector.shape_cast %1058 : vector<1x256xi1> to vector<1x256xi1>
    %1060 = vector.broadcast %1059 : vector<1x256xi1> to vector<2x256xi1>
    %1061 = vector.broadcast %cst_145 : f32 to vector<2x256xf32>
    %1062 = arith.select %1060, %1057, %1061 : vector<2x256xi1>, vector<2x256xf32>
    %c1_146 = arith.constant 1 : index
    %1063 = memref.load %arg5[%c1_146] : memref<98xf32, #tpu.memory_space<smem>>
    %1064 = vector.extract_strided_slice %1062 {offsets = [0, 0], sizes = [1, 256], strides = [1, 1]} : vector<2x256xf32> to vector<1x256xf32>
    %1065 = vector.broadcast %1063 : f32 to vector<1x256xf32>
    %1066 = arith.mulf %1065, %1064 : vector<1x256xf32>
    %c50_147 = arith.constant 50 : index
    %1067 = memref.load %arg5[%c50_147] : memref<98xf32, #tpu.memory_space<smem>>
    %1068 = vector.extract_strided_slice %1062 {offsets = [1, 0], sizes = [1, 256], strides = [1, 1]} : vector<2x256xf32> to vector<1x256xf32>
    %1069 = vector.broadcast %1067 : f32 to vector<1x256xf32>
    %1070 = arith.mulf %1069, %1068 : vector<1x256xf32>
    %1071 = arith.addf %1066, %1070 : vector<1x256xf32>
    %1072 = arith.addf %1056, %1071 : vector<1x256xf32>
    %c49_i32_148 = arith.constant 49 : i32
    %1073 = tpu.dynamic_rotate %1041 by %c49_i32_148 dim 1 : vector<2x256xf32>, i32 -> vector<2x256xf32>
    %1074 = arith.andi %13, %94 : vector<1x256xi1>
    %cst_149 = arith.constant 0.000000e+00 : f32
    %1075 = vector.shape_cast %1074 : vector<1x256xi1> to vector<1x256xi1>
    %1076 = vector.broadcast %1075 : vector<1x256xi1> to vector<2x256xi1>
    %1077 = vector.broadcast %cst_149 : f32 to vector<2x256xf32>
    %1078 = arith.select %1076, %1073, %1077 : vector<2x256xi1>, vector<2x256xf32>
    %c2_150 = arith.constant 2 : index
    %1079 = memref.load %arg5[%c2_150] : memref<98xf32, #tpu.memory_space<smem>>
    %1080 = vector.extract_strided_slice %1078 {offsets = [0, 0], sizes = [1, 256], strides = [1, 1]} : vector<2x256xf32> to vector<1x256xf32>
    %1081 = vector.broadcast %1079 : f32 to vector<1x256xf32>
    %1082 = arith.mulf %1081, %1080 : vector<1x256xf32>
    %c51_151 = arith.constant 51 : index
    %1083 = memref.load %arg5[%c51_151] : memref<98xf32, #tpu.memory_space<smem>>
    %1084 = vector.extract_strided_slice %1078 {offsets = [1, 0], sizes = [1, 256], strides = [1, 1]} : vector<2x256xf32> to vector<1x256xf32>
    %1085 = vector.broadcast %1083 : f32 to vector<1x256xf32>
    %1086 = arith.mulf %1085, %1084 : vector<1x256xf32>
    %1087 = arith.addf %1082, %1086 : vector<1x256xf32>
    %1088 = arith.addf %1072, %1087 : vector<1x256xf32>
    %c48_i32_152 = arith.constant 48 : i32
    %1089 = tpu.dynamic_rotate %1041 by %c48_i32_152 dim 1 : vector<2x256xf32>, i32 -> vector<2x256xf32>
    %1090 = arith.andi %13, %103 : vector<1x256xi1>
    %cst_153 = arith.constant 0.000000e+00 : f32
    %1091 = vector.shape_cast %1090 : vector<1x256xi1> to vector<1x256xi1>
    %1092 = vector.broadcast %1091 : vector<1x256xi1> to vector<2x256xi1>
    %1093 = vector.broadcast %cst_153 : f32 to vector<2x256xf32>
    %1094 = arith.select %1092, %1089, %1093 : vector<2x256xi1>, vector<2x256xf32>
    %c3_154 = arith.constant 3 : index
    %1095 = memref.load %arg5[%c3_154] : memref<98xf32, #tpu.memory_space<smem>>
    %1096 = vector.extract_strided_slice %1094 {offsets = [0, 0], sizes = [1, 256], strides = [1, 1]} : vector<2x256xf32> to vector<1x256xf32>
    %1097 = vector.broadcast %1095 : f32 to vector<1x256xf32>
    %1098 = arith.mulf %1097, %1096 : vector<1x256xf32>
    %c52_155 = arith.constant 52 : index
    %1099 = memref.load %arg5[%c52_155] : memref<98xf32, #tpu.memory_space<smem>>
    %1100 = vector.extract_strided_slice %1094 {offsets = [1, 0], sizes = [1, 256], strides = [1, 1]} : vector<2x256xf32> to vector<1x256xf32>
    %1101 = vector.broadcast %1099 : f32 to vector<1x256xf32>
    %1102 = arith.mulf %1101, %1100 : vector<1x256xf32>
    %1103 = arith.addf %1098, %1102 : vector<1x256xf32>
    %1104 = arith.addf %1088, %1103 : vector<1x256xf32>
    %c47_i32_156 = arith.constant 47 : i32
    %1105 = tpu.dynamic_rotate %1041 by %c47_i32_156 dim 1 : vector<2x256xf32>, i32 -> vector<2x256xf32>
    %1106 = arith.andi %13, %112 : vector<1x256xi1>
    %cst_157 = arith.constant 0.000000e+00 : f32
    %1107 = vector.shape_cast %1106 : vector<1x256xi1> to vector<1x256xi1>
    %1108 = vector.broadcast %1107 : vector<1x256xi1> to vector<2x256xi1>
    %1109 = vector.broadcast %cst_157 : f32 to vector<2x256xf32>
    %1110 = arith.select %1108, %1105, %1109 : vector<2x256xi1>, vector<2x256xf32>
    %c4_158 = arith.constant 4 : index
    %1111 = memref.load %arg5[%c4_158] : memref<98xf32, #tpu.memory_space<smem>>
    %1112 = vector.extract_strided_slice %1110 {offsets = [0, 0], sizes = [1, 256], strides = [1, 1]} : vector<2x256xf32> to vector<1x256xf32>
    %1113 = vector.broadcast %1111 : f32 to vector<1x256xf32>
    %1114 = arith.mulf %1113, %1112 : vector<1x256xf32>
    %c53_159 = arith.constant 53 : index
    %1115 = memref.load %arg5[%c53_159] : memref<98xf32, #tpu.memory_space<smem>>
    %1116 = vector.extract_strided_slice %1110 {offsets = [1, 0], sizes = [1, 256], strides = [1, 1]} : vector<2x256xf32> to vector<1x256xf32>
    %1117 = vector.broadcast %1115 : f32 to vector<1x256xf32>
    %1118 = arith.mulf %1117, %1116 : vector<1x256xf32>
    %1119 = arith.addf %1114, %1118 : vector<1x256xf32>
    %1120 = arith.addf %1104, %1119 : vector<1x256xf32>
    %c46_i32_160 = arith.constant 46 : i32
    %1121 = tpu.dynamic_rotate %1041 by %c46_i32_160 dim 1 : vector<2x256xf32>, i32 -> vector<2x256xf32>
    %1122 = arith.andi %13, %121 : vector<1x256xi1>
    %cst_161 = arith.constant 0.000000e+00 : f32
    %1123 = vector.shape_cast %1122 : vector<1x256xi1> to vector<1x256xi1>
    %1124 = vector.broadcast %1123 : vector<1x256xi1> to vector<2x256xi1>
    %1125 = vector.broadcast %cst_161 : f32 to vector<2x256xf32>
    %1126 = arith.select %1124, %1121, %1125 : vector<2x256xi1>, vector<2x256xf32>
    %c5_162 = arith.constant 5 : index
    %1127 = memref.load %arg5[%c5_162] : memref<98xf32, #tpu.memory_space<smem>>
    %1128 = vector.extract_strided_slice %1126 {offsets = [0, 0], sizes = [1, 256], strides = [1, 1]} : vector<2x256xf32> to vector<1x256xf32>
    %1129 = vector.broadcast %1127 : f32 to vector<1x256xf32>
    %1130 = arith.mulf %1129, %1128 : vector<1x256xf32>
    %c54_163 = arith.constant 54 : index
    %1131 = memref.load %arg5[%c54_163] : memref<98xf32, #tpu.memory_space<smem>>
    %1132 = vector.extract_strided_slice %1126 {offsets = [1, 0], sizes = [1, 256], strides = [1, 1]} : vector<2x256xf32> to vector<1x256xf32>
    %1133 = vector.broadcast %1131 : f32 to vector<1x256xf32>
    %1134 = arith.mulf %1133, %1132 : vector<1x256xf32>
    %1135 = arith.addf %1130, %1134 : vector<1x256xf32>
    %1136 = arith.addf %1120, %1135 : vector<1x256xf32>
    %c45_i32_164 = arith.constant 45 : i32
    %1137 = tpu.dynamic_rotate %1041 by %c45_i32_164 dim 1 : vector<2x256xf32>, i32 -> vector<2x256xf32>
    %1138 = arith.andi %13, %130 : vector<1x256xi1>
    %cst_165 = arith.constant 0.000000e+00 : f32
    %1139 = vector.shape_cast %1138 : vector<1x256xi1> to vector<1x256xi1>
    %1140 = vector.broadcast %1139 : vector<1x256xi1> to vector<2x256xi1>
    %1141 = vector.broadcast %cst_165 : f32 to vector<2x256xf32>
    %1142 = arith.select %1140, %1137, %1141 : vector<2x256xi1>, vector<2x256xf32>
    %c6_166 = arith.constant 6 : index
    %1143 = memref.load %arg5[%c6_166] : memref<98xf32, #tpu.memory_space<smem>>
    %1144 = vector.extract_strided_slice %1142 {offsets = [0, 0], sizes = [1, 256], strides = [1, 1]} : vector<2x256xf32> to vector<1x256xf32>
    %1145 = vector.broadcast %1143 : f32 to vector<1x256xf32>
    %1146 = arith.mulf %1145, %1144 : vector<1x256xf32>
    %c55_167 = arith.constant 55 : index
    %1147 = memref.load %arg5[%c55_167] : memref<98xf32, #tpu.memory_space<smem>>
    %1148 = vector.extract_strided_slice %1142 {offsets = [1, 0], sizes = [1, 256], strides = [1, 1]} : vector<2x256xf32> to vector<1x256xf32>
    %1149 = vector.broadcast %1147 : f32 to vector<1x256xf32>
    %1150 = arith.mulf %1149, %1148 : vector<1x256xf32>
    %1151 = arith.addf %1146, %1150 : vector<1x256xf32>
    %1152 = arith.addf %1136, %1151 : vector<1x256xf32>
    %c35_i32_168 = arith.constant 35 : i32
    %1153 = tpu.dynamic_rotate %1041 by %c35_i32_168 dim 1 : vector<2x256xf32>, i32 -> vector<2x256xf32>
    %1154 = arith.andi %22, %76 : vector<1x256xi1>
    %cst_169 = arith.constant 0.000000e+00 : f32
    %1155 = vector.shape_cast %1154 : vector<1x256xi1> to vector<1x256xi1>
    %1156 = vector.broadcast %1155 : vector<1x256xi1> to vector<2x256xi1>
    %1157 = vector.broadcast %cst_169 : f32 to vector<2x256xf32>
    %1158 = arith.select %1156, %1153, %1157 : vector<2x256xi1>, vector<2x256xf32>
    %c7_170 = arith.constant 7 : index
    %1159 = memref.load %arg5[%c7_170] : memref<98xf32, #tpu.memory_space<smem>>
    %1160 = vector.extract_strided_slice %1158 {offsets = [0, 0], sizes = [1, 256], strides = [1, 1]} : vector<2x256xf32> to vector<1x256xf32>
    %1161 = vector.broadcast %1159 : f32 to vector<1x256xf32>
    %1162 = arith.mulf %1161, %1160 : vector<1x256xf32>
    %c56_171 = arith.constant 56 : index
    %1163 = memref.load %arg5[%c56_171] : memref<98xf32, #tpu.memory_space<smem>>
    %1164 = vector.extract_strided_slice %1158 {offsets = [1, 0], sizes = [1, 256], strides = [1, 1]} : vector<2x256xf32> to vector<1x256xf32>
    %1165 = vector.broadcast %1163 : f32 to vector<1x256xf32>
    %1166 = arith.mulf %1165, %1164 : vector<1x256xf32>
    %1167 = arith.addf %1162, %1166 : vector<1x256xf32>
    %1168 = arith.addf %1152, %1167 : vector<1x256xf32>
    %c34_i32_172 = arith.constant 34 : i32
    %1169 = tpu.dynamic_rotate %1041 by %c34_i32_172 dim 1 : vector<2x256xf32>, i32 -> vector<2x256xf32>
    %1170 = arith.andi %22, %85 : vector<1x256xi1>
    %cst_173 = arith.constant 0.000000e+00 : f32
    %1171 = vector.shape_cast %1170 : vector<1x256xi1> to vector<1x256xi1>
    %1172 = vector.broadcast %1171 : vector<1x256xi1> to vector<2x256xi1>
    %1173 = vector.broadcast %cst_173 : f32 to vector<2x256xf32>
    %1174 = arith.select %1172, %1169, %1173 : vector<2x256xi1>, vector<2x256xf32>
    %c8_174 = arith.constant 8 : index
    %1175 = memref.load %arg5[%c8_174] : memref<98xf32, #tpu.memory_space<smem>>
    %1176 = vector.extract_strided_slice %1174 {offsets = [0, 0], sizes = [1, 256], strides = [1, 1]} : vector<2x256xf32> to vector<1x256xf32>
    %1177 = vector.broadcast %1175 : f32 to vector<1x256xf32>
    %1178 = arith.mulf %1177, %1176 : vector<1x256xf32>
    %c57_175 = arith.constant 57 : index
    %1179 = memref.load %arg5[%c57_175] : memref<98xf32, #tpu.memory_space<smem>>
    %1180 = vector.extract_strided_slice %1174 {offsets = [1, 0], sizes = [1, 256], strides = [1, 1]} : vector<2x256xf32> to vector<1x256xf32>
    %1181 = vector.broadcast %1179 : f32 to vector<1x256xf32>
    %1182 = arith.mulf %1181, %1180 : vector<1x256xf32>
    %1183 = arith.addf %1178, %1182 : vector<1x256xf32>
    %1184 = arith.addf %1168, %1183 : vector<1x256xf32>
    %c33_i32_176 = arith.constant 33 : i32
    %1185 = tpu.dynamic_rotate %1041 by %c33_i32_176 dim 1 : vector<2x256xf32>, i32 -> vector<2x256xf32>
    %1186 = arith.andi %22, %94 : vector<1x256xi1>
    %cst_177 = arith.constant 0.000000e+00 : f32
    %1187 = vector.shape_cast %1186 : vector<1x256xi1> to vector<1x256xi1>
    %1188 = vector.broadcast %1187 : vector<1x256xi1> to vector<2x256xi1>
    %1189 = vector.broadcast %cst_177 : f32 to vector<2x256xf32>
    %1190 = arith.select %1188, %1185, %1189 : vector<2x256xi1>, vector<2x256xf32>
    %c9_178 = arith.constant 9 : index
    %1191 = memref.load %arg5[%c9_178] : memref<98xf32, #tpu.memory_space<smem>>
    %1192 = vector.extract_strided_slice %1190 {offsets = [0, 0], sizes = [1, 256], strides = [1, 1]} : vector<2x256xf32> to vector<1x256xf32>
    %1193 = vector.broadcast %1191 : f32 to vector<1x256xf32>
    %1194 = arith.mulf %1193, %1192 : vector<1x256xf32>
    %c58_179 = arith.constant 58 : index
    %1195 = memref.load %arg5[%c58_179] : memref<98xf32, #tpu.memory_space<smem>>
    %1196 = vector.extract_strided_slice %1190 {offsets = [1, 0], sizes = [1, 256], strides = [1, 1]} : vector<2x256xf32> to vector<1x256xf32>
    %1197 = vector.broadcast %1195 : f32 to vector<1x256xf32>
    %1198 = arith.mulf %1197, %1196 : vector<1x256xf32>
    %1199 = arith.addf %1194, %1198 : vector<1x256xf32>
    %1200 = arith.addf %1184, %1199 : vector<1x256xf32>
    %c32_i32_180 = arith.constant 32 : i32
    %1201 = tpu.dynamic_rotate %1041 by %c32_i32_180 dim 1 : vector<2x256xf32>, i32 -> vector<2x256xf32>
    %1202 = arith.andi %22, %103 : vector<1x256xi1>
    %cst_181 = arith.constant 0.000000e+00 : f32
    %1203 = vector.shape_cast %1202 : vector<1x256xi1> to vector<1x256xi1>
    %1204 = vector.broadcast %1203 : vector<1x256xi1> to vector<2x256xi1>
    %1205 = vector.broadcast %cst_181 : f32 to vector<2x256xf32>
    %1206 = arith.select %1204, %1201, %1205 : vector<2x256xi1>, vector<2x256xf32>
    %c10_182 = arith.constant 10 : index
    %1207 = memref.load %arg5[%c10_182] : memref<98xf32, #tpu.memory_space<smem>>
    %1208 = vector.extract_strided_slice %1206 {offsets = [0, 0], sizes = [1, 256], strides = [1, 1]} : vector<2x256xf32> to vector<1x256xf32>
    %1209 = vector.broadcast %1207 : f32 to vector<1x256xf32>
    %1210 = arith.mulf %1209, %1208 : vector<1x256xf32>
    %c59_183 = arith.constant 59 : index
    %1211 = memref.load %arg5[%c59_183] : memref<98xf32, #tpu.memory_space<smem>>
    %1212 = vector.extract_strided_slice %1206 {offsets = [1, 0], sizes = [1, 256], strides = [1, 1]} : vector<2x256xf32> to vector<1x256xf32>
    %1213 = vector.broadcast %1211 : f32 to vector<1x256xf32>
    %1214 = arith.mulf %1213, %1212 : vector<1x256xf32>
    %1215 = arith.addf %1210, %1214 : vector<1x256xf32>
    %1216 = arith.addf %1200, %1215 : vector<1x256xf32>
    %c31_i32_184 = arith.constant 31 : i32
    %1217 = tpu.dynamic_rotate %1041 by %c31_i32_184 dim 1 : vector<2x256xf32>, i32 -> vector<2x256xf32>
    %1218 = arith.andi %22, %112 : vector<1x256xi1>
    %cst_185 = arith.constant 0.000000e+00 : f32
    %1219 = vector.shape_cast %1218 : vector<1x256xi1> to vector<1x256xi1>
    %1220 = vector.broadcast %1219 : vector<1x256xi1> to vector<2x256xi1>
    %1221 = vector.broadcast %cst_185 : f32 to vector<2x256xf32>
    %1222 = arith.select %1220, %1217, %1221 : vector<2x256xi1>, vector<2x256xf32>
    %c11_186 = arith.constant 11 : index
    %1223 = memref.load %arg5[%c11_186] : memref<98xf32, #tpu.memory_space<smem>>
    %1224 = vector.extract_strided_slice %1222 {offsets = [0, 0], sizes = [1, 256], strides = [1, 1]} : vector<2x256xf32> to vector<1x256xf32>
    %1225 = vector.broadcast %1223 : f32 to vector<1x256xf32>
    %1226 = arith.mulf %1225, %1224 : vector<1x256xf32>
    %c60_187 = arith.constant 60 : index
    %1227 = memref.load %arg5[%c60_187] : memref<98xf32, #tpu.memory_space<smem>>
    %1228 = vector.extract_strided_slice %1222 {offsets = [1, 0], sizes = [1, 256], strides = [1, 1]} : vector<2x256xf32> to vector<1x256xf32>
    %1229 = vector.broadcast %1227 : f32 to vector<1x256xf32>
    %1230 = arith.mulf %1229, %1228 : vector<1x256xf32>
    %1231 = arith.addf %1226, %1230 : vector<1x256xf32>
    %1232 = arith.addf %1216, %1231 : vector<1x256xf32>
    %c30_i32_188 = arith.constant 30 : i32
    %1233 = tpu.dynamic_rotate %1041 by %c30_i32_188 dim 1 : vector<2x256xf32>, i32 -> vector<2x256xf32>
    %1234 = arith.andi %22, %121 : vector<1x256xi1>
    %cst_189 = arith.constant 0.000000e+00 : f32
    %1235 = vector.shape_cast %1234 : vector<1x256xi1> to vector<1x256xi1>
    %1236 = vector.broadcast %1235 : vector<1x256xi1> to vector<2x256xi1>
    %1237 = vector.broadcast %cst_189 : f32 to vector<2x256xf32>
    %1238 = arith.select %1236, %1233, %1237 : vector<2x256xi1>, vector<2x256xf32>
    %c12_190 = arith.constant 12 : index
    %1239 = memref.load %arg5[%c12_190] : memref<98xf32, #tpu.memory_space<smem>>
    %1240 = vector.extract_strided_slice %1238 {offsets = [0, 0], sizes = [1, 256], strides = [1, 1]} : vector<2x256xf32> to vector<1x256xf32>
    %1241 = vector.broadcast %1239 : f32 to vector<1x256xf32>
    %1242 = arith.mulf %1241, %1240 : vector<1x256xf32>
    %c61_191 = arith.constant 61 : index
    %1243 = memref.load %arg5[%c61_191] : memref<98xf32, #tpu.memory_space<smem>>
    %1244 = vector.extract_strided_slice %1238 {offsets = [1, 0], sizes = [1, 256], strides = [1, 1]} : vector<2x256xf32> to vector<1x256xf32>
    %1245 = vector.broadcast %1243 : f32 to vector<1x256xf32>
    %1246 = arith.mulf %1245, %1244 : vector<1x256xf32>
    %1247 = arith.addf %1242, %1246 : vector<1x256xf32>
    %1248 = arith.addf %1232, %1247 : vector<1x256xf32>
    %c29_i32_192 = arith.constant 29 : i32
    %1249 = tpu.dynamic_rotate %1041 by %c29_i32_192 dim 1 : vector<2x256xf32>, i32 -> vector<2x256xf32>
    %1250 = arith.andi %22, %130 : vector<1x256xi1>
    %cst_193 = arith.constant 0.000000e+00 : f32
    %1251 = vector.shape_cast %1250 : vector<1x256xi1> to vector<1x256xi1>
    %1252 = vector.broadcast %1251 : vector<1x256xi1> to vector<2x256xi1>
    %1253 = vector.broadcast %cst_193 : f32 to vector<2x256xf32>
    %1254 = arith.select %1252, %1249, %1253 : vector<2x256xi1>, vector<2x256xf32>
    %c13_194 = arith.constant 13 : index
    %1255 = memref.load %arg5[%c13_194] : memref<98xf32, #tpu.memory_space<smem>>
    %1256 = vector.extract_strided_slice %1254 {offsets = [0, 0], sizes = [1, 256], strides = [1, 1]} : vector<2x256xf32> to vector<1x256xf32>
    %1257 = vector.broadcast %1255 : f32 to vector<1x256xf32>
    %1258 = arith.mulf %1257, %1256 : vector<1x256xf32>
    %c62_195 = arith.constant 62 : index
    %1259 = memref.load %arg5[%c62_195] : memref<98xf32, #tpu.memory_space<smem>>
    %1260 = vector.extract_strided_slice %1254 {offsets = [1, 0], sizes = [1, 256], strides = [1, 1]} : vector<2x256xf32> to vector<1x256xf32>
    %1261 = vector.broadcast %1259 : f32 to vector<1x256xf32>
    %1262 = arith.mulf %1261, %1260 : vector<1x256xf32>
    %1263 = arith.addf %1258, %1262 : vector<1x256xf32>
    %1264 = arith.addf %1248, %1263 : vector<1x256xf32>
    %c19_i32_196 = arith.constant 19 : i32
    %1265 = tpu.dynamic_rotate %1041 by %c19_i32_196 dim 1 : vector<2x256xf32>, i32 -> vector<2x256xf32>
    %1266 = arith.andi %31, %76 : vector<1x256xi1>
    %cst_197 = arith.constant 0.000000e+00 : f32
    %1267 = vector.shape_cast %1266 : vector<1x256xi1> to vector<1x256xi1>
    %1268 = vector.broadcast %1267 : vector<1x256xi1> to vector<2x256xi1>
    %1269 = vector.broadcast %cst_197 : f32 to vector<2x256xf32>
    %1270 = arith.select %1268, %1265, %1269 : vector<2x256xi1>, vector<2x256xf32>
    %c14_198 = arith.constant 14 : index
    %1271 = memref.load %arg5[%c14_198] : memref<98xf32, #tpu.memory_space<smem>>
    %1272 = vector.extract_strided_slice %1270 {offsets = [0, 0], sizes = [1, 256], strides = [1, 1]} : vector<2x256xf32> to vector<1x256xf32>
    %1273 = vector.broadcast %1271 : f32 to vector<1x256xf32>
    %1274 = arith.mulf %1273, %1272 : vector<1x256xf32>
    %c63_199 = arith.constant 63 : index
    %1275 = memref.load %arg5[%c63_199] : memref<98xf32, #tpu.memory_space<smem>>
    %1276 = vector.extract_strided_slice %1270 {offsets = [1, 0], sizes = [1, 256], strides = [1, 1]} : vector<2x256xf32> to vector<1x256xf32>
    %1277 = vector.broadcast %1275 : f32 to vector<1x256xf32>
    %1278 = arith.mulf %1277, %1276 : vector<1x256xf32>
    %1279 = arith.addf %1274, %1278 : vector<1x256xf32>
    %1280 = arith.addf %1264, %1279 : vector<1x256xf32>
    %c18_i32_200 = arith.constant 18 : i32
    %1281 = tpu.dynamic_rotate %1041 by %c18_i32_200 dim 1 : vector<2x256xf32>, i32 -> vector<2x256xf32>
    %1282 = arith.andi %31, %85 : vector<1x256xi1>
    %cst_201 = arith.constant 0.000000e+00 : f32
    %1283 = vector.shape_cast %1282 : vector<1x256xi1> to vector<1x256xi1>
    %1284 = vector.broadcast %1283 : vector<1x256xi1> to vector<2x256xi1>
    %1285 = vector.broadcast %cst_201 : f32 to vector<2x256xf32>
    %1286 = arith.select %1284, %1281, %1285 : vector<2x256xi1>, vector<2x256xf32>
    %c15_202 = arith.constant 15 : index
    %1287 = memref.load %arg5[%c15_202] : memref<98xf32, #tpu.memory_space<smem>>
    %1288 = vector.extract_strided_slice %1286 {offsets = [0, 0], sizes = [1, 256], strides = [1, 1]} : vector<2x256xf32> to vector<1x256xf32>
    %1289 = vector.broadcast %1287 : f32 to vector<1x256xf32>
    %1290 = arith.mulf %1289, %1288 : vector<1x256xf32>
    %c64_203 = arith.constant 64 : index
    %1291 = memref.load %arg5[%c64_203] : memref<98xf32, #tpu.memory_space<smem>>
    %1292 = vector.extract_strided_slice %1286 {offsets = [1, 0], sizes = [1, 256], strides = [1, 1]} : vector<2x256xf32> to vector<1x256xf32>
    %1293 = vector.broadcast %1291 : f32 to vector<1x256xf32>
    %1294 = arith.mulf %1293, %1292 : vector<1x256xf32>
    %1295 = arith.addf %1290, %1294 : vector<1x256xf32>
    %1296 = arith.addf %1280, %1295 : vector<1x256xf32>
    %c17_i32_204 = arith.constant 17 : i32
    %1297 = tpu.dynamic_rotate %1041 by %c17_i32_204 dim 1 : vector<2x256xf32>, i32 -> vector<2x256xf32>
    %1298 = arith.andi %31, %94 : vector<1x256xi1>
    %cst_205 = arith.constant 0.000000e+00 : f32
    %1299 = vector.shape_cast %1298 : vector<1x256xi1> to vector<1x256xi1>
    %1300 = vector.broadcast %1299 : vector<1x256xi1> to vector<2x256xi1>
    %1301 = vector.broadcast %cst_205 : f32 to vector<2x256xf32>
    %1302 = arith.select %1300, %1297, %1301 : vector<2x256xi1>, vector<2x256xf32>
    %c16_206 = arith.constant 16 : index
    %1303 = memref.load %arg5[%c16_206] : memref<98xf32, #tpu.memory_space<smem>>
    %1304 = vector.extract_strided_slice %1302 {offsets = [0, 0], sizes = [1, 256], strides = [1, 1]} : vector<2x256xf32> to vector<1x256xf32>
    %1305 = vector.broadcast %1303 : f32 to vector<1x256xf32>
    %1306 = arith.mulf %1305, %1304 : vector<1x256xf32>
    %c65_207 = arith.constant 65 : index
    %1307 = memref.load %arg5[%c65_207] : memref<98xf32, #tpu.memory_space<smem>>
    %1308 = vector.extract_strided_slice %1302 {offsets = [1, 0], sizes = [1, 256], strides = [1, 1]} : vector<2x256xf32> to vector<1x256xf32>
    %1309 = vector.broadcast %1307 : f32 to vector<1x256xf32>
    %1310 = arith.mulf %1309, %1308 : vector<1x256xf32>
    %1311 = arith.addf %1306, %1310 : vector<1x256xf32>
    %1312 = arith.addf %1296, %1311 : vector<1x256xf32>
    %c16_i32_208 = arith.constant 16 : i32
    %1313 = tpu.dynamic_rotate %1041 by %c16_i32_208 dim 1 : vector<2x256xf32>, i32 -> vector<2x256xf32>
    %1314 = arith.andi %31, %103 : vector<1x256xi1>
    %cst_209 = arith.constant 0.000000e+00 : f32
    %1315 = vector.shape_cast %1314 : vector<1x256xi1> to vector<1x256xi1>
    %1316 = vector.broadcast %1315 : vector<1x256xi1> to vector<2x256xi1>
    %1317 = vector.broadcast %cst_209 : f32 to vector<2x256xf32>
    %1318 = arith.select %1316, %1313, %1317 : vector<2x256xi1>, vector<2x256xf32>
    %c17_210 = arith.constant 17 : index
    %1319 = memref.load %arg5[%c17_210] : memref<98xf32, #tpu.memory_space<smem>>
    %1320 = vector.extract_strided_slice %1318 {offsets = [0, 0], sizes = [1, 256], strides = [1, 1]} : vector<2x256xf32> to vector<1x256xf32>
    %1321 = vector.broadcast %1319 : f32 to vector<1x256xf32>
    %1322 = arith.mulf %1321, %1320 : vector<1x256xf32>
    %c66_211 = arith.constant 66 : index
    %1323 = memref.load %arg5[%c66_211] : memref<98xf32, #tpu.memory_space<smem>>
    %1324 = vector.extract_strided_slice %1318 {offsets = [1, 0], sizes = [1, 256], strides = [1, 1]} : vector<2x256xf32> to vector<1x256xf32>
    %1325 = vector.broadcast %1323 : f32 to vector<1x256xf32>
    %1326 = arith.mulf %1325, %1324 : vector<1x256xf32>
    %1327 = arith.addf %1322, %1326 : vector<1x256xf32>
    %1328 = arith.addf %1312, %1327 : vector<1x256xf32>
    %c15_i32_212 = arith.constant 15 : i32
    %1329 = tpu.dynamic_rotate %1041 by %c15_i32_212 dim 1 : vector<2x256xf32>, i32 -> vector<2x256xf32>
    %1330 = arith.andi %31, %112 : vector<1x256xi1>
    %cst_213 = arith.constant 0.000000e+00 : f32
    %1331 = vector.shape_cast %1330 : vector<1x256xi1> to vector<1x256xi1>
    %1332 = vector.broadcast %1331 : vector<1x256xi1> to vector<2x256xi1>
    %1333 = vector.broadcast %cst_213 : f32 to vector<2x256xf32>
    %1334 = arith.select %1332, %1329, %1333 : vector<2x256xi1>, vector<2x256xf32>
    %c18_214 = arith.constant 18 : index
    %1335 = memref.load %arg5[%c18_214] : memref<98xf32, #tpu.memory_space<smem>>
    %1336 = vector.extract_strided_slice %1334 {offsets = [0, 0], sizes = [1, 256], strides = [1, 1]} : vector<2x256xf32> to vector<1x256xf32>
    %1337 = vector.broadcast %1335 : f32 to vector<1x256xf32>
    %1338 = arith.mulf %1337, %1336 : vector<1x256xf32>
    %c67_215 = arith.constant 67 : index
    %1339 = memref.load %arg5[%c67_215] : memref<98xf32, #tpu.memory_space<smem>>
    %1340 = vector.extract_strided_slice %1334 {offsets = [1, 0], sizes = [1, 256], strides = [1, 1]} : vector<2x256xf32> to vector<1x256xf32>
    %1341 = vector.broadcast %1339 : f32 to vector<1x256xf32>
    %1342 = arith.mulf %1341, %1340 : vector<1x256xf32>
    %1343 = arith.addf %1338, %1342 : vector<1x256xf32>
    %1344 = arith.addf %1328, %1343 : vector<1x256xf32>
    %c14_i32_216 = arith.constant 14 : i32
    %1345 = tpu.dynamic_rotate %1041 by %c14_i32_216 dim 1 : vector<2x256xf32>, i32 -> vector<2x256xf32>
    %1346 = arith.andi %31, %121 : vector<1x256xi1>
    %cst_217 = arith.constant 0.000000e+00 : f32
    %1347 = vector.shape_cast %1346 : vector<1x256xi1> to vector<1x256xi1>
    %1348 = vector.broadcast %1347 : vector<1x256xi1> to vector<2x256xi1>
    %1349 = vector.broadcast %cst_217 : f32 to vector<2x256xf32>
    %1350 = arith.select %1348, %1345, %1349 : vector<2x256xi1>, vector<2x256xf32>
    %c19_218 = arith.constant 19 : index
    %1351 = memref.load %arg5[%c19_218] : memref<98xf32, #tpu.memory_space<smem>>
    %1352 = vector.extract_strided_slice %1350 {offsets = [0, 0], sizes = [1, 256], strides = [1, 1]} : vector<2x256xf32> to vector<1x256xf32>
    %1353 = vector.broadcast %1351 : f32 to vector<1x256xf32>
    %1354 = arith.mulf %1353, %1352 : vector<1x256xf32>
    %c68_219 = arith.constant 68 : index
    %1355 = memref.load %arg5[%c68_219] : memref<98xf32, #tpu.memory_space<smem>>
    %1356 = vector.extract_strided_slice %1350 {offsets = [1, 0], sizes = [1, 256], strides = [1, 1]} : vector<2x256xf32> to vector<1x256xf32>
    %1357 = vector.broadcast %1355 : f32 to vector<1x256xf32>
    %1358 = arith.mulf %1357, %1356 : vector<1x256xf32>
    %1359 = arith.addf %1354, %1358 : vector<1x256xf32>
    %1360 = arith.addf %1344, %1359 : vector<1x256xf32>
    %c13_i32_220 = arith.constant 13 : i32
    %1361 = tpu.dynamic_rotate %1041 by %c13_i32_220 dim 1 : vector<2x256xf32>, i32 -> vector<2x256xf32>
    %1362 = arith.andi %31, %130 : vector<1x256xi1>
    %cst_221 = arith.constant 0.000000e+00 : f32
    %1363 = vector.shape_cast %1362 : vector<1x256xi1> to vector<1x256xi1>
    %1364 = vector.broadcast %1363 : vector<1x256xi1> to vector<2x256xi1>
    %1365 = vector.broadcast %cst_221 : f32 to vector<2x256xf32>
    %1366 = arith.select %1364, %1361, %1365 : vector<2x256xi1>, vector<2x256xf32>
    %c20_222 = arith.constant 20 : index
    %1367 = memref.load %arg5[%c20_222] : memref<98xf32, #tpu.memory_space<smem>>
    %1368 = vector.extract_strided_slice %1366 {offsets = [0, 0], sizes = [1, 256], strides = [1, 1]} : vector<2x256xf32> to vector<1x256xf32>
    %1369 = vector.broadcast %1367 : f32 to vector<1x256xf32>
    %1370 = arith.mulf %1369, %1368 : vector<1x256xf32>
    %c69_223 = arith.constant 69 : index
    %1371 = memref.load %arg5[%c69_223] : memref<98xf32, #tpu.memory_space<smem>>
    %1372 = vector.extract_strided_slice %1366 {offsets = [1, 0], sizes = [1, 256], strides = [1, 1]} : vector<2x256xf32> to vector<1x256xf32>
    %1373 = vector.broadcast %1371 : f32 to vector<1x256xf32>
    %1374 = arith.mulf %1373, %1372 : vector<1x256xf32>
    %1375 = arith.addf %1370, %1374 : vector<1x256xf32>
    %1376 = arith.addf %1360, %1375 : vector<1x256xf32>
    %c3_i32_224 = arith.constant 3 : i32
    %1377 = tpu.dynamic_rotate %1041 by %c3_i32_224 dim 1 : vector<2x256xf32>, i32 -> vector<2x256xf32>
    %1378 = arith.andi %40, %76 : vector<1x256xi1>
    %cst_225 = arith.constant 0.000000e+00 : f32
    %1379 = vector.shape_cast %1378 : vector<1x256xi1> to vector<1x256xi1>
    %1380 = vector.broadcast %1379 : vector<1x256xi1> to vector<2x256xi1>
    %1381 = vector.broadcast %cst_225 : f32 to vector<2x256xf32>
    %1382 = arith.select %1380, %1377, %1381 : vector<2x256xi1>, vector<2x256xf32>
    %c21_226 = arith.constant 21 : index
    %1383 = memref.load %arg5[%c21_226] : memref<98xf32, #tpu.memory_space<smem>>
    %1384 = vector.extract_strided_slice %1382 {offsets = [0, 0], sizes = [1, 256], strides = [1, 1]} : vector<2x256xf32> to vector<1x256xf32>
    %1385 = vector.broadcast %1383 : f32 to vector<1x256xf32>
    %1386 = arith.mulf %1385, %1384 : vector<1x256xf32>
    %c70_227 = arith.constant 70 : index
    %1387 = memref.load %arg5[%c70_227] : memref<98xf32, #tpu.memory_space<smem>>
    %1388 = vector.extract_strided_slice %1382 {offsets = [1, 0], sizes = [1, 256], strides = [1, 1]} : vector<2x256xf32> to vector<1x256xf32>
    %1389 = vector.broadcast %1387 : f32 to vector<1x256xf32>
    %1390 = arith.mulf %1389, %1388 : vector<1x256xf32>
    %1391 = arith.addf %1386, %1390 : vector<1x256xf32>
    %1392 = arith.addf %1376, %1391 : vector<1x256xf32>
    %c2_i32_228 = arith.constant 2 : i32
    %1393 = tpu.dynamic_rotate %1041 by %c2_i32_228 dim 1 : vector<2x256xf32>, i32 -> vector<2x256xf32>
    %1394 = arith.andi %40, %85 : vector<1x256xi1>
    %cst_229 = arith.constant 0.000000e+00 : f32
    %1395 = vector.shape_cast %1394 : vector<1x256xi1> to vector<1x256xi1>
    %1396 = vector.broadcast %1395 : vector<1x256xi1> to vector<2x256xi1>
    %1397 = vector.broadcast %cst_229 : f32 to vector<2x256xf32>
    %1398 = arith.select %1396, %1393, %1397 : vector<2x256xi1>, vector<2x256xf32>
    %c22_230 = arith.constant 22 : index
    %1399 = memref.load %arg5[%c22_230] : memref<98xf32, #tpu.memory_space<smem>>
    %1400 = vector.extract_strided_slice %1398 {offsets = [0, 0], sizes = [1, 256], strides = [1, 1]} : vector<2x256xf32> to vector<1x256xf32>
    %1401 = vector.broadcast %1399 : f32 to vector<1x256xf32>
    %1402 = arith.mulf %1401, %1400 : vector<1x256xf32>
    %c71_231 = arith.constant 71 : index
    %1403 = memref.load %arg5[%c71_231] : memref<98xf32, #tpu.memory_space<smem>>
    %1404 = vector.extract_strided_slice %1398 {offsets = [1, 0], sizes = [1, 256], strides = [1, 1]} : vector<2x256xf32> to vector<1x256xf32>
    %1405 = vector.broadcast %1403 : f32 to vector<1x256xf32>
    %1406 = arith.mulf %1405, %1404 : vector<1x256xf32>
    %1407 = arith.addf %1402, %1406 : vector<1x256xf32>
    %1408 = arith.addf %1392, %1407 : vector<1x256xf32>
    %c1_i32_232 = arith.constant 1 : i32
    %1409 = tpu.dynamic_rotate %1041 by %c1_i32_232 dim 1 : vector<2x256xf32>, i32 -> vector<2x256xf32>
    %1410 = arith.andi %40, %94 : vector<1x256xi1>
    %cst_233 = arith.constant 0.000000e+00 : f32
    %1411 = vector.shape_cast %1410 : vector<1x256xi1> to vector<1x256xi1>
    %1412 = vector.broadcast %1411 : vector<1x256xi1> to vector<2x256xi1>
    %1413 = vector.broadcast %cst_233 : f32 to vector<2x256xf32>
    %1414 = arith.select %1412, %1409, %1413 : vector<2x256xi1>, vector<2x256xf32>
    %c23_234 = arith.constant 23 : index
    %1415 = memref.load %arg5[%c23_234] : memref<98xf32, #tpu.memory_space<smem>>
    %1416 = vector.extract_strided_slice %1414 {offsets = [0, 0], sizes = [1, 256], strides = [1, 1]} : vector<2x256xf32> to vector<1x256xf32>
    %1417 = vector.broadcast %1415 : f32 to vector<1x256xf32>
    %1418 = arith.mulf %1417, %1416 : vector<1x256xf32>
    %c72_235 = arith.constant 72 : index
    %1419 = memref.load %arg5[%c72_235] : memref<98xf32, #tpu.memory_space<smem>>
    %1420 = vector.extract_strided_slice %1414 {offsets = [1, 0], sizes = [1, 256], strides = [1, 1]} : vector<2x256xf32> to vector<1x256xf32>
    %1421 = vector.broadcast %1419 : f32 to vector<1x256xf32>
    %1422 = arith.mulf %1421, %1420 : vector<1x256xf32>
    %1423 = arith.addf %1418, %1422 : vector<1x256xf32>
    %1424 = arith.addf %1408, %1423 : vector<1x256xf32>
    %1425 = arith.andi %40, %103 : vector<1x256xi1>
    %cst_236 = arith.constant 0.000000e+00 : f32
    %1426 = vector.shape_cast %1425 : vector<1x256xi1> to vector<1x256xi1>
    %1427 = vector.broadcast %1426 : vector<1x256xi1> to vector<2x256xi1>
    %1428 = vector.broadcast %cst_236 : f32 to vector<2x256xf32>
    %1429 = arith.select %1427, %1041, %1428 : vector<2x256xi1>, vector<2x256xf32>
    %c24_237 = arith.constant 24 : index
    %1430 = memref.load %arg5[%c24_237] : memref<98xf32, #tpu.memory_space<smem>>
    %1431 = vector.extract_strided_slice %1429 {offsets = [0, 0], sizes = [1, 256], strides = [1, 1]} : vector<2x256xf32> to vector<1x256xf32>
    %1432 = vector.broadcast %1430 : f32 to vector<1x256xf32>
    %1433 = arith.mulf %1432, %1431 : vector<1x256xf32>
    %c73_238 = arith.constant 73 : index
    %1434 = memref.load %arg5[%c73_238] : memref<98xf32, #tpu.memory_space<smem>>
    %1435 = vector.extract_strided_slice %1429 {offsets = [1, 0], sizes = [1, 256], strides = [1, 1]} : vector<2x256xf32> to vector<1x256xf32>
    %1436 = vector.broadcast %1434 : f32 to vector<1x256xf32>
    %1437 = arith.mulf %1436, %1435 : vector<1x256xf32>
    %1438 = arith.addf %1433, %1437 : vector<1x256xf32>
    %1439 = arith.addf %1424, %1438 : vector<1x256xf32>
    %c255_i32_239 = arith.constant 255 : i32
    %1440 = tpu.dynamic_rotate %1041 by %c255_i32_239 dim 1 : vector<2x256xf32>, i32 -> vector<2x256xf32>
    %1441 = arith.andi %40, %112 : vector<1x256xi1>
    %cst_240 = arith.constant 0.000000e+00 : f32
    %1442 = vector.shape_cast %1441 : vector<1x256xi1> to vector<1x256xi1>
    %1443 = vector.broadcast %1442 : vector<1x256xi1> to vector<2x256xi1>
    %1444 = vector.broadcast %cst_240 : f32 to vector<2x256xf32>
    %1445 = arith.select %1443, %1440, %1444 : vector<2x256xi1>, vector<2x256xf32>
    %c25_241 = arith.constant 25 : index
    %1446 = memref.load %arg5[%c25_241] : memref<98xf32, #tpu.memory_space<smem>>
    %1447 = vector.extract_strided_slice %1445 {offsets = [0, 0], sizes = [1, 256], strides = [1, 1]} : vector<2x256xf32> to vector<1x256xf32>
    %1448 = vector.broadcast %1446 : f32 to vector<1x256xf32>
    %1449 = arith.mulf %1448, %1447 : vector<1x256xf32>
    %c74_242 = arith.constant 74 : index
    %1450 = memref.load %arg5[%c74_242] : memref<98xf32, #tpu.memory_space<smem>>
    %1451 = vector.extract_strided_slice %1445 {offsets = [1, 0], sizes = [1, 256], strides = [1, 1]} : vector<2x256xf32> to vector<1x256xf32>
    %1452 = vector.broadcast %1450 : f32 to vector<1x256xf32>
    %1453 = arith.mulf %1452, %1451 : vector<1x256xf32>
    %1454 = arith.addf %1449, %1453 : vector<1x256xf32>
    %1455 = arith.addf %1439, %1454 : vector<1x256xf32>
    %c254_i32_243 = arith.constant 254 : i32
    %1456 = tpu.dynamic_rotate %1041 by %c254_i32_243 dim 1 : vector<2x256xf32>, i32 -> vector<2x256xf32>
    %1457 = arith.andi %40, %121 : vector<1x256xi1>
    %cst_244 = arith.constant 0.000000e+00 : f32
    %1458 = vector.shape_cast %1457 : vector<1x256xi1> to vector<1x256xi1>
    %1459 = vector.broadcast %1458 : vector<1x256xi1> to vector<2x256xi1>
    %1460 = vector.broadcast %cst_244 : f32 to vector<2x256xf32>
    %1461 = arith.select %1459, %1456, %1460 : vector<2x256xi1>, vector<2x256xf32>
    %c26_245 = arith.constant 26 : index
    %1462 = memref.load %arg5[%c26_245] : memref<98xf32, #tpu.memory_space<smem>>
    %1463 = vector.extract_strided_slice %1461 {offsets = [0, 0], sizes = [1, 256], strides = [1, 1]} : vector<2x256xf32> to vector<1x256xf32>
    %1464 = vector.broadcast %1462 : f32 to vector<1x256xf32>
    %1465 = arith.mulf %1464, %1463 : vector<1x256xf32>
    %c75_246 = arith.constant 75 : index
    %1466 = memref.load %arg5[%c75_246] : memref<98xf32, #tpu.memory_space<smem>>
    %1467 = vector.extract_strided_slice %1461 {offsets = [1, 0], sizes = [1, 256], strides = [1, 1]} : vector<2x256xf32> to vector<1x256xf32>
    %1468 = vector.broadcast %1466 : f32 to vector<1x256xf32>
    %1469 = arith.mulf %1468, %1467 : vector<1x256xf32>
    %1470 = arith.addf %1465, %1469 : vector<1x256xf32>
    %1471 = arith.addf %1455, %1470 : vector<1x256xf32>
    %c253_i32_247 = arith.constant 253 : i32
    %1472 = tpu.dynamic_rotate %1041 by %c253_i32_247 dim 1 : vector<2x256xf32>, i32 -> vector<2x256xf32>
    %1473 = arith.andi %40, %130 : vector<1x256xi1>
    %cst_248 = arith.constant 0.000000e+00 : f32
    %1474 = vector.shape_cast %1473 : vector<1x256xi1> to vector<1x256xi1>
    %1475 = vector.broadcast %1474 : vector<1x256xi1> to vector<2x256xi1>
    %1476 = vector.broadcast %cst_248 : f32 to vector<2x256xf32>
    %1477 = arith.select %1475, %1472, %1476 : vector<2x256xi1>, vector<2x256xf32>
    %c27_249 = arith.constant 27 : index
    %1478 = memref.load %arg5[%c27_249] : memref<98xf32, #tpu.memory_space<smem>>
    %1479 = vector.extract_strided_slice %1477 {offsets = [0, 0], sizes = [1, 256], strides = [1, 1]} : vector<2x256xf32> to vector<1x256xf32>
    %1480 = vector.broadcast %1478 : f32 to vector<1x256xf32>
    %1481 = arith.mulf %1480, %1479 : vector<1x256xf32>
    %c76_250 = arith.constant 76 : index
    %1482 = memref.load %arg5[%c76_250] : memref<98xf32, #tpu.memory_space<smem>>
    %1483 = vector.extract_strided_slice %1477 {offsets = [1, 0], sizes = [1, 256], strides = [1, 1]} : vector<2x256xf32> to vector<1x256xf32>
    %1484 = vector.broadcast %1482 : f32 to vector<1x256xf32>
    %1485 = arith.mulf %1484, %1483 : vector<1x256xf32>
    %1486 = arith.addf %1481, %1485 : vector<1x256xf32>
    %1487 = arith.addf %1471, %1486 : vector<1x256xf32>
    %c243_i32_251 = arith.constant 243 : i32
    %1488 = tpu.dynamic_rotate %1041 by %c243_i32_251 dim 1 : vector<2x256xf32>, i32 -> vector<2x256xf32>
    %1489 = arith.andi %49, %76 : vector<1x256xi1>
    %cst_252 = arith.constant 0.000000e+00 : f32
    %1490 = vector.shape_cast %1489 : vector<1x256xi1> to vector<1x256xi1>
    %1491 = vector.broadcast %1490 : vector<1x256xi1> to vector<2x256xi1>
    %1492 = vector.broadcast %cst_252 : f32 to vector<2x256xf32>
    %1493 = arith.select %1491, %1488, %1492 : vector<2x256xi1>, vector<2x256xf32>
    %c28_253 = arith.constant 28 : index
    %1494 = memref.load %arg5[%c28_253] : memref<98xf32, #tpu.memory_space<smem>>
    %1495 = vector.extract_strided_slice %1493 {offsets = [0, 0], sizes = [1, 256], strides = [1, 1]} : vector<2x256xf32> to vector<1x256xf32>
    %1496 = vector.broadcast %1494 : f32 to vector<1x256xf32>
    %1497 = arith.mulf %1496, %1495 : vector<1x256xf32>
    %c77_254 = arith.constant 77 : index
    %1498 = memref.load %arg5[%c77_254] : memref<98xf32, #tpu.memory_space<smem>>
    %1499 = vector.extract_strided_slice %1493 {offsets = [1, 0], sizes = [1, 256], strides = [1, 1]} : vector<2x256xf32> to vector<1x256xf32>
    %1500 = vector.broadcast %1498 : f32 to vector<1x256xf32>
    %1501 = arith.mulf %1500, %1499 : vector<1x256xf32>
    %1502 = arith.addf %1497, %1501 : vector<1x256xf32>
    %1503 = arith.addf %1487, %1502 : vector<1x256xf32>
    %c242_i32_255 = arith.constant 242 : i32
    %1504 = tpu.dynamic_rotate %1041 by %c242_i32_255 dim 1 : vector<2x256xf32>, i32 -> vector<2x256xf32>
    %1505 = arith.andi %49, %85 : vector<1x256xi1>
    %cst_256 = arith.constant 0.000000e+00 : f32
    %1506 = vector.shape_cast %1505 : vector<1x256xi1> to vector<1x256xi1>
    %1507 = vector.broadcast %1506 : vector<1x256xi1> to vector<2x256xi1>
    %1508 = vector.broadcast %cst_256 : f32 to vector<2x256xf32>
    %1509 = arith.select %1507, %1504, %1508 : vector<2x256xi1>, vector<2x256xf32>
    %c29_257 = arith.constant 29 : index
    %1510 = memref.load %arg5[%c29_257] : memref<98xf32, #tpu.memory_space<smem>>
    %1511 = vector.extract_strided_slice %1509 {offsets = [0, 0], sizes = [1, 256], strides = [1, 1]} : vector<2x256xf32> to vector<1x256xf32>
    %1512 = vector.broadcast %1510 : f32 to vector<1x256xf32>
    %1513 = arith.mulf %1512, %1511 : vector<1x256xf32>
    %c78_258 = arith.constant 78 : index
    %1514 = memref.load %arg5[%c78_258] : memref<98xf32, #tpu.memory_space<smem>>
    %1515 = vector.extract_strided_slice %1509 {offsets = [1, 0], sizes = [1, 256], strides = [1, 1]} : vector<2x256xf32> to vector<1x256xf32>
    %1516 = vector.broadcast %1514 : f32 to vector<1x256xf32>
    %1517 = arith.mulf %1516, %1515 : vector<1x256xf32>
    %1518 = arith.addf %1513, %1517 : vector<1x256xf32>
    %1519 = arith.addf %1503, %1518 : vector<1x256xf32>
    %c241_i32_259 = arith.constant 241 : i32
    %1520 = tpu.dynamic_rotate %1041 by %c241_i32_259 dim 1 : vector<2x256xf32>, i32 -> vector<2x256xf32>
    %1521 = arith.andi %49, %94 : vector<1x256xi1>
    %cst_260 = arith.constant 0.000000e+00 : f32
    %1522 = vector.shape_cast %1521 : vector<1x256xi1> to vector<1x256xi1>
    %1523 = vector.broadcast %1522 : vector<1x256xi1> to vector<2x256xi1>
    %1524 = vector.broadcast %cst_260 : f32 to vector<2x256xf32>
    %1525 = arith.select %1523, %1520, %1524 : vector<2x256xi1>, vector<2x256xf32>
    %c30_261 = arith.constant 30 : index
    %1526 = memref.load %arg5[%c30_261] : memref<98xf32, #tpu.memory_space<smem>>
    %1527 = vector.extract_strided_slice %1525 {offsets = [0, 0], sizes = [1, 256], strides = [1, 1]} : vector<2x256xf32> to vector<1x256xf32>
    %1528 = vector.broadcast %1526 : f32 to vector<1x256xf32>
    %1529 = arith.mulf %1528, %1527 : vector<1x256xf32>
    %c79_262 = arith.constant 79 : index
    %1530 = memref.load %arg5[%c79_262] : memref<98xf32, #tpu.memory_space<smem>>
    %1531 = vector.extract_strided_slice %1525 {offsets = [1, 0], sizes = [1, 256], strides = [1, 1]} : vector<2x256xf32> to vector<1x256xf32>
    %1532 = vector.broadcast %1530 : f32 to vector<1x256xf32>
    %1533 = arith.mulf %1532, %1531 : vector<1x256xf32>
    %1534 = arith.addf %1529, %1533 : vector<1x256xf32>
    %1535 = arith.addf %1519, %1534 : vector<1x256xf32>
    %c240_i32_263 = arith.constant 240 : i32
    %1536 = tpu.dynamic_rotate %1041 by %c240_i32_263 dim 1 : vector<2x256xf32>, i32 -> vector<2x256xf32>
    %1537 = arith.andi %49, %103 : vector<1x256xi1>
    %cst_264 = arith.constant 0.000000e+00 : f32
    %1538 = vector.shape_cast %1537 : vector<1x256xi1> to vector<1x256xi1>
    %1539 = vector.broadcast %1538 : vector<1x256xi1> to vector<2x256xi1>
    %1540 = vector.broadcast %cst_264 : f32 to vector<2x256xf32>
    %1541 = arith.select %1539, %1536, %1540 : vector<2x256xi1>, vector<2x256xf32>
    %c31_265 = arith.constant 31 : index
    %1542 = memref.load %arg5[%c31_265] : memref<98xf32, #tpu.memory_space<smem>>
    %1543 = vector.extract_strided_slice %1541 {offsets = [0, 0], sizes = [1, 256], strides = [1, 1]} : vector<2x256xf32> to vector<1x256xf32>
    %1544 = vector.broadcast %1542 : f32 to vector<1x256xf32>
    %1545 = arith.mulf %1544, %1543 : vector<1x256xf32>
    %c80_266 = arith.constant 80 : index
    %1546 = memref.load %arg5[%c80_266] : memref<98xf32, #tpu.memory_space<smem>>
    %1547 = vector.extract_strided_slice %1541 {offsets = [1, 0], sizes = [1, 256], strides = [1, 1]} : vector<2x256xf32> to vector<1x256xf32>
    %1548 = vector.broadcast %1546 : f32 to vector<1x256xf32>
    %1549 = arith.mulf %1548, %1547 : vector<1x256xf32>
    %1550 = arith.addf %1545, %1549 : vector<1x256xf32>
    %1551 = arith.addf %1535, %1550 : vector<1x256xf32>
    %c239_i32_267 = arith.constant 239 : i32
    %1552 = tpu.dynamic_rotate %1041 by %c239_i32_267 dim 1 : vector<2x256xf32>, i32 -> vector<2x256xf32>
    %1553 = arith.andi %49, %112 : vector<1x256xi1>
    %cst_268 = arith.constant 0.000000e+00 : f32
    %1554 = vector.shape_cast %1553 : vector<1x256xi1> to vector<1x256xi1>
    %1555 = vector.broadcast %1554 : vector<1x256xi1> to vector<2x256xi1>
    %1556 = vector.broadcast %cst_268 : f32 to vector<2x256xf32>
    %1557 = arith.select %1555, %1552, %1556 : vector<2x256xi1>, vector<2x256xf32>
    %c32_269 = arith.constant 32 : index
    %1558 = memref.load %arg5[%c32_269] : memref<98xf32, #tpu.memory_space<smem>>
    %1559 = vector.extract_strided_slice %1557 {offsets = [0, 0], sizes = [1, 256], strides = [1, 1]} : vector<2x256xf32> to vector<1x256xf32>
    %1560 = vector.broadcast %1558 : f32 to vector<1x256xf32>
    %1561 = arith.mulf %1560, %1559 : vector<1x256xf32>
    %c81_270 = arith.constant 81 : index
    %1562 = memref.load %arg5[%c81_270] : memref<98xf32, #tpu.memory_space<smem>>
    %1563 = vector.extract_strided_slice %1557 {offsets = [1, 0], sizes = [1, 256], strides = [1, 1]} : vector<2x256xf32> to vector<1x256xf32>
    %1564 = vector.broadcast %1562 : f32 to vector<1x256xf32>
    %1565 = arith.mulf %1564, %1563 : vector<1x256xf32>
    %1566 = arith.addf %1561, %1565 : vector<1x256xf32>
    %1567 = arith.addf %1551, %1566 : vector<1x256xf32>
    %c238_i32_271 = arith.constant 238 : i32
    %1568 = tpu.dynamic_rotate %1041 by %c238_i32_271 dim 1 : vector<2x256xf32>, i32 -> vector<2x256xf32>
    %1569 = arith.andi %49, %121 : vector<1x256xi1>
    %cst_272 = arith.constant 0.000000e+00 : f32
    %1570 = vector.shape_cast %1569 : vector<1x256xi1> to vector<1x256xi1>
    %1571 = vector.broadcast %1570 : vector<1x256xi1> to vector<2x256xi1>
    %1572 = vector.broadcast %cst_272 : f32 to vector<2x256xf32>
    %1573 = arith.select %1571, %1568, %1572 : vector<2x256xi1>, vector<2x256xf32>
    %c33_273 = arith.constant 33 : index
    %1574 = memref.load %arg5[%c33_273] : memref<98xf32, #tpu.memory_space<smem>>
    %1575 = vector.extract_strided_slice %1573 {offsets = [0, 0], sizes = [1, 256], strides = [1, 1]} : vector<2x256xf32> to vector<1x256xf32>
    %1576 = vector.broadcast %1574 : f32 to vector<1x256xf32>
    %1577 = arith.mulf %1576, %1575 : vector<1x256xf32>
    %c82_274 = arith.constant 82 : index
    %1578 = memref.load %arg5[%c82_274] : memref<98xf32, #tpu.memory_space<smem>>
    %1579 = vector.extract_strided_slice %1573 {offsets = [1, 0], sizes = [1, 256], strides = [1, 1]} : vector<2x256xf32> to vector<1x256xf32>
    %1580 = vector.broadcast %1578 : f32 to vector<1x256xf32>
    %1581 = arith.mulf %1580, %1579 : vector<1x256xf32>
    %1582 = arith.addf %1577, %1581 : vector<1x256xf32>
    %1583 = arith.addf %1567, %1582 : vector<1x256xf32>
    %c237_i32_275 = arith.constant 237 : i32
    %1584 = tpu.dynamic_rotate %1041 by %c237_i32_275 dim 1 : vector<2x256xf32>, i32 -> vector<2x256xf32>
    %1585 = arith.andi %49, %130 : vector<1x256xi1>
    %cst_276 = arith.constant 0.000000e+00 : f32
    %1586 = vector.shape_cast %1585 : vector<1x256xi1> to vector<1x256xi1>
    %1587 = vector.broadcast %1586 : vector<1x256xi1> to vector<2x256xi1>
    %1588 = vector.broadcast %cst_276 : f32 to vector<2x256xf32>
    %1589 = arith.select %1587, %1584, %1588 : vector<2x256xi1>, vector<2x256xf32>
    %c34_277 = arith.constant 34 : index
    %1590 = memref.load %arg5[%c34_277] : memref<98xf32, #tpu.memory_space<smem>>
    %1591 = vector.extract_strided_slice %1589 {offsets = [0, 0], sizes = [1, 256], strides = [1, 1]} : vector<2x256xf32> to vector<1x256xf32>
    %1592 = vector.broadcast %1590 : f32 to vector<1x256xf32>
    %1593 = arith.mulf %1592, %1591 : vector<1x256xf32>
    %c83_278 = arith.constant 83 : index
    %1594 = memref.load %arg5[%c83_278] : memref<98xf32, #tpu.memory_space<smem>>
    %1595 = vector.extract_strided_slice %1589 {offsets = [1, 0], sizes = [1, 256], strides = [1, 1]} : vector<2x256xf32> to vector<1x256xf32>
    %1596 = vector.broadcast %1594 : f32 to vector<1x256xf32>
    %1597 = arith.mulf %1596, %1595 : vector<1x256xf32>
    %1598 = arith.addf %1593, %1597 : vector<1x256xf32>
    %1599 = arith.addf %1583, %1598 : vector<1x256xf32>
    %c227_i32_279 = arith.constant 227 : i32
    %1600 = tpu.dynamic_rotate %1041 by %c227_i32_279 dim 1 : vector<2x256xf32>, i32 -> vector<2x256xf32>
    %1601 = arith.andi %58, %76 : vector<1x256xi1>
    %cst_280 = arith.constant 0.000000e+00 : f32
    %1602 = vector.shape_cast %1601 : vector<1x256xi1> to vector<1x256xi1>
    %1603 = vector.broadcast %1602 : vector<1x256xi1> to vector<2x256xi1>
    %1604 = vector.broadcast %cst_280 : f32 to vector<2x256xf32>
    %1605 = arith.select %1603, %1600, %1604 : vector<2x256xi1>, vector<2x256xf32>
    %c35_281 = arith.constant 35 : index
    %1606 = memref.load %arg5[%c35_281] : memref<98xf32, #tpu.memory_space<smem>>
    %1607 = vector.extract_strided_slice %1605 {offsets = [0, 0], sizes = [1, 256], strides = [1, 1]} : vector<2x256xf32> to vector<1x256xf32>
    %1608 = vector.broadcast %1606 : f32 to vector<1x256xf32>
    %1609 = arith.mulf %1608, %1607 : vector<1x256xf32>
    %c84_282 = arith.constant 84 : index
    %1610 = memref.load %arg5[%c84_282] : memref<98xf32, #tpu.memory_space<smem>>
    %1611 = vector.extract_strided_slice %1605 {offsets = [1, 0], sizes = [1, 256], strides = [1, 1]} : vector<2x256xf32> to vector<1x256xf32>
    %1612 = vector.broadcast %1610 : f32 to vector<1x256xf32>
    %1613 = arith.mulf %1612, %1611 : vector<1x256xf32>
    %1614 = arith.addf %1609, %1613 : vector<1x256xf32>
    %1615 = arith.addf %1599, %1614 : vector<1x256xf32>
    %c226_i32_283 = arith.constant 226 : i32
    %1616 = tpu.dynamic_rotate %1041 by %c226_i32_283 dim 1 : vector<2x256xf32>, i32 -> vector<2x256xf32>
    %1617 = arith.andi %58, %85 : vector<1x256xi1>
    %cst_284 = arith.constant 0.000000e+00 : f32
    %1618 = vector.shape_cast %1617 : vector<1x256xi1> to vector<1x256xi1>
    %1619 = vector.broadcast %1618 : vector<1x256xi1> to vector<2x256xi1>
    %1620 = vector.broadcast %cst_284 : f32 to vector<2x256xf32>
    %1621 = arith.select %1619, %1616, %1620 : vector<2x256xi1>, vector<2x256xf32>
    %c36_285 = arith.constant 36 : index
    %1622 = memref.load %arg5[%c36_285] : memref<98xf32, #tpu.memory_space<smem>>
    %1623 = vector.extract_strided_slice %1621 {offsets = [0, 0], sizes = [1, 256], strides = [1, 1]} : vector<2x256xf32> to vector<1x256xf32>
    %1624 = vector.broadcast %1622 : f32 to vector<1x256xf32>
    %1625 = arith.mulf %1624, %1623 : vector<1x256xf32>
    %c85_286 = arith.constant 85 : index
    %1626 = memref.load %arg5[%c85_286] : memref<98xf32, #tpu.memory_space<smem>>
    %1627 = vector.extract_strided_slice %1621 {offsets = [1, 0], sizes = [1, 256], strides = [1, 1]} : vector<2x256xf32> to vector<1x256xf32>
    %1628 = vector.broadcast %1626 : f32 to vector<1x256xf32>
    %1629 = arith.mulf %1628, %1627 : vector<1x256xf32>
    %1630 = arith.addf %1625, %1629 : vector<1x256xf32>
    %1631 = arith.addf %1615, %1630 : vector<1x256xf32>
    %c225_i32_287 = arith.constant 225 : i32
    %1632 = tpu.dynamic_rotate %1041 by %c225_i32_287 dim 1 : vector<2x256xf32>, i32 -> vector<2x256xf32>
    %1633 = arith.andi %58, %94 : vector<1x256xi1>
    %cst_288 = arith.constant 0.000000e+00 : f32
    %1634 = vector.shape_cast %1633 : vector<1x256xi1> to vector<1x256xi1>
    %1635 = vector.broadcast %1634 : vector<1x256xi1> to vector<2x256xi1>
    %1636 = vector.broadcast %cst_288 : f32 to vector<2x256xf32>
    %1637 = arith.select %1635, %1632, %1636 : vector<2x256xi1>, vector<2x256xf32>
    %c37_289 = arith.constant 37 : index
    %1638 = memref.load %arg5[%c37_289] : memref<98xf32, #tpu.memory_space<smem>>
    %1639 = vector.extract_strided_slice %1637 {offsets = [0, 0], sizes = [1, 256], strides = [1, 1]} : vector<2x256xf32> to vector<1x256xf32>
    %1640 = vector.broadcast %1638 : f32 to vector<1x256xf32>
    %1641 = arith.mulf %1640, %1639 : vector<1x256xf32>
    %c86_290 = arith.constant 86 : index
    %1642 = memref.load %arg5[%c86_290] : memref<98xf32, #tpu.memory_space<smem>>
    %1643 = vector.extract_strided_slice %1637 {offsets = [1, 0], sizes = [1, 256], strides = [1, 1]} : vector<2x256xf32> to vector<1x256xf32>
    %1644 = vector.broadcast %1642 : f32 to vector<1x256xf32>
    %1645 = arith.mulf %1644, %1643 : vector<1x256xf32>
    %1646 = arith.addf %1641, %1645 : vector<1x256xf32>
    %1647 = arith.addf %1631, %1646 : vector<1x256xf32>
    %c224_i32_291 = arith.constant 224 : i32
    %1648 = tpu.dynamic_rotate %1041 by %c224_i32_291 dim 1 : vector<2x256xf32>, i32 -> vector<2x256xf32>
    %1649 = arith.andi %58, %103 : vector<1x256xi1>
    %cst_292 = arith.constant 0.000000e+00 : f32
    %1650 = vector.shape_cast %1649 : vector<1x256xi1> to vector<1x256xi1>
    %1651 = vector.broadcast %1650 : vector<1x256xi1> to vector<2x256xi1>
    %1652 = vector.broadcast %cst_292 : f32 to vector<2x256xf32>
    %1653 = arith.select %1651, %1648, %1652 : vector<2x256xi1>, vector<2x256xf32>
    %c38_293 = arith.constant 38 : index
    %1654 = memref.load %arg5[%c38_293] : memref<98xf32, #tpu.memory_space<smem>>
    %1655 = vector.extract_strided_slice %1653 {offsets = [0, 0], sizes = [1, 256], strides = [1, 1]} : vector<2x256xf32> to vector<1x256xf32>
    %1656 = vector.broadcast %1654 : f32 to vector<1x256xf32>
    %1657 = arith.mulf %1656, %1655 : vector<1x256xf32>
    %c87_294 = arith.constant 87 : index
    %1658 = memref.load %arg5[%c87_294] : memref<98xf32, #tpu.memory_space<smem>>
    %1659 = vector.extract_strided_slice %1653 {offsets = [1, 0], sizes = [1, 256], strides = [1, 1]} : vector<2x256xf32> to vector<1x256xf32>
    %1660 = vector.broadcast %1658 : f32 to vector<1x256xf32>
    %1661 = arith.mulf %1660, %1659 : vector<1x256xf32>
    %1662 = arith.addf %1657, %1661 : vector<1x256xf32>
    %1663 = arith.addf %1647, %1662 : vector<1x256xf32>
    %c223_i32_295 = arith.constant 223 : i32
    %1664 = tpu.dynamic_rotate %1041 by %c223_i32_295 dim 1 : vector<2x256xf32>, i32 -> vector<2x256xf32>
    %1665 = arith.andi %58, %112 : vector<1x256xi1>
    %cst_296 = arith.constant 0.000000e+00 : f32
    %1666 = vector.shape_cast %1665 : vector<1x256xi1> to vector<1x256xi1>
    %1667 = vector.broadcast %1666 : vector<1x256xi1> to vector<2x256xi1>
    %1668 = vector.broadcast %cst_296 : f32 to vector<2x256xf32>
    %1669 = arith.select %1667, %1664, %1668 : vector<2x256xi1>, vector<2x256xf32>
    %c39_297 = arith.constant 39 : index
    %1670 = memref.load %arg5[%c39_297] : memref<98xf32, #tpu.memory_space<smem>>
    %1671 = vector.extract_strided_slice %1669 {offsets = [0, 0], sizes = [1, 256], strides = [1, 1]} : vector<2x256xf32> to vector<1x256xf32>
    %1672 = vector.broadcast %1670 : f32 to vector<1x256xf32>
    %1673 = arith.mulf %1672, %1671 : vector<1x256xf32>
    %c88_298 = arith.constant 88 : index
    %1674 = memref.load %arg5[%c88_298] : memref<98xf32, #tpu.memory_space<smem>>
    %1675 = vector.extract_strided_slice %1669 {offsets = [1, 0], sizes = [1, 256], strides = [1, 1]} : vector<2x256xf32> to vector<1x256xf32>
    %1676 = vector.broadcast %1674 : f32 to vector<1x256xf32>
    %1677 = arith.mulf %1676, %1675 : vector<1x256xf32>
    %1678 = arith.addf %1673, %1677 : vector<1x256xf32>
    %1679 = arith.addf %1663, %1678 : vector<1x256xf32>
    %c222_i32_299 = arith.constant 222 : i32
    %1680 = tpu.dynamic_rotate %1041 by %c222_i32_299 dim 1 : vector<2x256xf32>, i32 -> vector<2x256xf32>
    %1681 = arith.andi %58, %121 : vector<1x256xi1>
    %cst_300 = arith.constant 0.000000e+00 : f32
    %1682 = vector.shape_cast %1681 : vector<1x256xi1> to vector<1x256xi1>
    %1683 = vector.broadcast %1682 : vector<1x256xi1> to vector<2x256xi1>
    %1684 = vector.broadcast %cst_300 : f32 to vector<2x256xf32>
    %1685 = arith.select %1683, %1680, %1684 : vector<2x256xi1>, vector<2x256xf32>
    %c40_301 = arith.constant 40 : index
    %1686 = memref.load %arg5[%c40_301] : memref<98xf32, #tpu.memory_space<smem>>
    %1687 = vector.extract_strided_slice %1685 {offsets = [0, 0], sizes = [1, 256], strides = [1, 1]} : vector<2x256xf32> to vector<1x256xf32>
    %1688 = vector.broadcast %1686 : f32 to vector<1x256xf32>
    %1689 = arith.mulf %1688, %1687 : vector<1x256xf32>
    %c89_302 = arith.constant 89 : index
    %1690 = memref.load %arg5[%c89_302] : memref<98xf32, #tpu.memory_space<smem>>
    %1691 = vector.extract_strided_slice %1685 {offsets = [1, 0], sizes = [1, 256], strides = [1, 1]} : vector<2x256xf32> to vector<1x256xf32>
    %1692 = vector.broadcast %1690 : f32 to vector<1x256xf32>
    %1693 = arith.mulf %1692, %1691 : vector<1x256xf32>
    %1694 = arith.addf %1689, %1693 : vector<1x256xf32>
    %1695 = arith.addf %1679, %1694 : vector<1x256xf32>
    %c221_i32_303 = arith.constant 221 : i32
    %1696 = tpu.dynamic_rotate %1041 by %c221_i32_303 dim 1 : vector<2x256xf32>, i32 -> vector<2x256xf32>
    %1697 = arith.andi %58, %130 : vector<1x256xi1>
    %cst_304 = arith.constant 0.000000e+00 : f32
    %1698 = vector.shape_cast %1697 : vector<1x256xi1> to vector<1x256xi1>
    %1699 = vector.broadcast %1698 : vector<1x256xi1> to vector<2x256xi1>
    %1700 = vector.broadcast %cst_304 : f32 to vector<2x256xf32>
    %1701 = arith.select %1699, %1696, %1700 : vector<2x256xi1>, vector<2x256xf32>
    %c41_305 = arith.constant 41 : index
    %1702 = memref.load %arg5[%c41_305] : memref<98xf32, #tpu.memory_space<smem>>
    %1703 = vector.extract_strided_slice %1701 {offsets = [0, 0], sizes = [1, 256], strides = [1, 1]} : vector<2x256xf32> to vector<1x256xf32>
    %1704 = vector.broadcast %1702 : f32 to vector<1x256xf32>
    %1705 = arith.mulf %1704, %1703 : vector<1x256xf32>
    %c90_306 = arith.constant 90 : index
    %1706 = memref.load %arg5[%c90_306] : memref<98xf32, #tpu.memory_space<smem>>
    %1707 = vector.extract_strided_slice %1701 {offsets = [1, 0], sizes = [1, 256], strides = [1, 1]} : vector<2x256xf32> to vector<1x256xf32>
    %1708 = vector.broadcast %1706 : f32 to vector<1x256xf32>
    %1709 = arith.mulf %1708, %1707 : vector<1x256xf32>
    %1710 = arith.addf %1705, %1709 : vector<1x256xf32>
    %1711 = arith.addf %1695, %1710 : vector<1x256xf32>
    %c211_i32_307 = arith.constant 211 : i32
    %1712 = tpu.dynamic_rotate %1041 by %c211_i32_307 dim 1 : vector<2x256xf32>, i32 -> vector<2x256xf32>
    %1713 = arith.andi %67, %76 : vector<1x256xi1>
    %cst_308 = arith.constant 0.000000e+00 : f32
    %1714 = vector.shape_cast %1713 : vector<1x256xi1> to vector<1x256xi1>
    %1715 = vector.broadcast %1714 : vector<1x256xi1> to vector<2x256xi1>
    %1716 = vector.broadcast %cst_308 : f32 to vector<2x256xf32>
    %1717 = arith.select %1715, %1712, %1716 : vector<2x256xi1>, vector<2x256xf32>
    %c42_309 = arith.constant 42 : index
    %1718 = memref.load %arg5[%c42_309] : memref<98xf32, #tpu.memory_space<smem>>
    %1719 = vector.extract_strided_slice %1717 {offsets = [0, 0], sizes = [1, 256], strides = [1, 1]} : vector<2x256xf32> to vector<1x256xf32>
    %1720 = vector.broadcast %1718 : f32 to vector<1x256xf32>
    %1721 = arith.mulf %1720, %1719 : vector<1x256xf32>
    %c91_310 = arith.constant 91 : index
    %1722 = memref.load %arg5[%c91_310] : memref<98xf32, #tpu.memory_space<smem>>
    %1723 = vector.extract_strided_slice %1717 {offsets = [1, 0], sizes = [1, 256], strides = [1, 1]} : vector<2x256xf32> to vector<1x256xf32>
    %1724 = vector.broadcast %1722 : f32 to vector<1x256xf32>
    %1725 = arith.mulf %1724, %1723 : vector<1x256xf32>
    %1726 = arith.addf %1721, %1725 : vector<1x256xf32>
    %1727 = arith.addf %1711, %1726 : vector<1x256xf32>
    %c210_i32_311 = arith.constant 210 : i32
    %1728 = tpu.dynamic_rotate %1041 by %c210_i32_311 dim 1 : vector<2x256xf32>, i32 -> vector<2x256xf32>
    %1729 = arith.andi %67, %85 : vector<1x256xi1>
    %cst_312 = arith.constant 0.000000e+00 : f32
    %1730 = vector.shape_cast %1729 : vector<1x256xi1> to vector<1x256xi1>
    %1731 = vector.broadcast %1730 : vector<1x256xi1> to vector<2x256xi1>
    %1732 = vector.broadcast %cst_312 : f32 to vector<2x256xf32>
    %1733 = arith.select %1731, %1728, %1732 : vector<2x256xi1>, vector<2x256xf32>
    %c43_313 = arith.constant 43 : index
    %1734 = memref.load %arg5[%c43_313] : memref<98xf32, #tpu.memory_space<smem>>
    %1735 = vector.extract_strided_slice %1733 {offsets = [0, 0], sizes = [1, 256], strides = [1, 1]} : vector<2x256xf32> to vector<1x256xf32>
    %1736 = vector.broadcast %1734 : f32 to vector<1x256xf32>
    %1737 = arith.mulf %1736, %1735 : vector<1x256xf32>
    %c92_314 = arith.constant 92 : index
    %1738 = memref.load %arg5[%c92_314] : memref<98xf32, #tpu.memory_space<smem>>
    %1739 = vector.extract_strided_slice %1733 {offsets = [1, 0], sizes = [1, 256], strides = [1, 1]} : vector<2x256xf32> to vector<1x256xf32>
    %1740 = vector.broadcast %1738 : f32 to vector<1x256xf32>
    %1741 = arith.mulf %1740, %1739 : vector<1x256xf32>
    %1742 = arith.addf %1737, %1741 : vector<1x256xf32>
    %1743 = arith.addf %1727, %1742 : vector<1x256xf32>
    %c209_i32_315 = arith.constant 209 : i32
    %1744 = tpu.dynamic_rotate %1041 by %c209_i32_315 dim 1 : vector<2x256xf32>, i32 -> vector<2x256xf32>
    %1745 = arith.andi %67, %94 : vector<1x256xi1>
    %cst_316 = arith.constant 0.000000e+00 : f32
    %1746 = vector.shape_cast %1745 : vector<1x256xi1> to vector<1x256xi1>
    %1747 = vector.broadcast %1746 : vector<1x256xi1> to vector<2x256xi1>
    %1748 = vector.broadcast %cst_316 : f32 to vector<2x256xf32>
    %1749 = arith.select %1747, %1744, %1748 : vector<2x256xi1>, vector<2x256xf32>
    %c44_317 = arith.constant 44 : index
    %1750 = memref.load %arg5[%c44_317] : memref<98xf32, #tpu.memory_space<smem>>
    %1751 = vector.extract_strided_slice %1749 {offsets = [0, 0], sizes = [1, 256], strides = [1, 1]} : vector<2x256xf32> to vector<1x256xf32>
    %1752 = vector.broadcast %1750 : f32 to vector<1x256xf32>
    %1753 = arith.mulf %1752, %1751 : vector<1x256xf32>
    %c93_318 = arith.constant 93 : index
    %1754 = memref.load %arg5[%c93_318] : memref<98xf32, #tpu.memory_space<smem>>
    %1755 = vector.extract_strided_slice %1749 {offsets = [1, 0], sizes = [1, 256], strides = [1, 1]} : vector<2x256xf32> to vector<1x256xf32>
    %1756 = vector.broadcast %1754 : f32 to vector<1x256xf32>
    %1757 = arith.mulf %1756, %1755 : vector<1x256xf32>
    %1758 = arith.addf %1753, %1757 : vector<1x256xf32>
    %1759 = arith.addf %1743, %1758 : vector<1x256xf32>
    %c208_i32_319 = arith.constant 208 : i32
    %1760 = tpu.dynamic_rotate %1041 by %c208_i32_319 dim 1 : vector<2x256xf32>, i32 -> vector<2x256xf32>
    %1761 = arith.andi %67, %103 : vector<1x256xi1>
    %cst_320 = arith.constant 0.000000e+00 : f32
    %1762 = vector.shape_cast %1761 : vector<1x256xi1> to vector<1x256xi1>
    %1763 = vector.broadcast %1762 : vector<1x256xi1> to vector<2x256xi1>
    %1764 = vector.broadcast %cst_320 : f32 to vector<2x256xf32>
    %1765 = arith.select %1763, %1760, %1764 : vector<2x256xi1>, vector<2x256xf32>
    %c45_321 = arith.constant 45 : index
    %1766 = memref.load %arg5[%c45_321] : memref<98xf32, #tpu.memory_space<smem>>
    %1767 = vector.extract_strided_slice %1765 {offsets = [0, 0], sizes = [1, 256], strides = [1, 1]} : vector<2x256xf32> to vector<1x256xf32>
    %1768 = vector.broadcast %1766 : f32 to vector<1x256xf32>
    %1769 = arith.mulf %1768, %1767 : vector<1x256xf32>
    %c94_322 = arith.constant 94 : index
    %1770 = memref.load %arg5[%c94_322] : memref<98xf32, #tpu.memory_space<smem>>
    %1771 = vector.extract_strided_slice %1765 {offsets = [1, 0], sizes = [1, 256], strides = [1, 1]} : vector<2x256xf32> to vector<1x256xf32>
    %1772 = vector.broadcast %1770 : f32 to vector<1x256xf32>
    %1773 = arith.mulf %1772, %1771 : vector<1x256xf32>
    %1774 = arith.addf %1769, %1773 : vector<1x256xf32>
    %1775 = arith.addf %1759, %1774 : vector<1x256xf32>
    %c207_i32_323 = arith.constant 207 : i32
    %1776 = tpu.dynamic_rotate %1041 by %c207_i32_323 dim 1 : vector<2x256xf32>, i32 -> vector<2x256xf32>
    %1777 = arith.andi %67, %112 : vector<1x256xi1>
    %cst_324 = arith.constant 0.000000e+00 : f32
    %1778 = vector.shape_cast %1777 : vector<1x256xi1> to vector<1x256xi1>
    %1779 = vector.broadcast %1778 : vector<1x256xi1> to vector<2x256xi1>
    %1780 = vector.broadcast %cst_324 : f32 to vector<2x256xf32>
    %1781 = arith.select %1779, %1776, %1780 : vector<2x256xi1>, vector<2x256xf32>
    %c46_325 = arith.constant 46 : index
    %1782 = memref.load %arg5[%c46_325] : memref<98xf32, #tpu.memory_space<smem>>
    %1783 = vector.extract_strided_slice %1781 {offsets = [0, 0], sizes = [1, 256], strides = [1, 1]} : vector<2x256xf32> to vector<1x256xf32>
    %1784 = vector.broadcast %1782 : f32 to vector<1x256xf32>
    %1785 = arith.mulf %1784, %1783 : vector<1x256xf32>
    %c95_326 = arith.constant 95 : index
    %1786 = memref.load %arg5[%c95_326] : memref<98xf32, #tpu.memory_space<smem>>
    %1787 = vector.extract_strided_slice %1781 {offsets = [1, 0], sizes = [1, 256], strides = [1, 1]} : vector<2x256xf32> to vector<1x256xf32>
    %1788 = vector.broadcast %1786 : f32 to vector<1x256xf32>
    %1789 = arith.mulf %1788, %1787 : vector<1x256xf32>
    %1790 = arith.addf %1785, %1789 : vector<1x256xf32>
    %1791 = arith.addf %1775, %1790 : vector<1x256xf32>
    %c206_i32_327 = arith.constant 206 : i32
    %1792 = tpu.dynamic_rotate %1041 by %c206_i32_327 dim 1 : vector<2x256xf32>, i32 -> vector<2x256xf32>
    %1793 = arith.andi %67, %121 : vector<1x256xi1>
    %cst_328 = arith.constant 0.000000e+00 : f32
    %1794 = vector.shape_cast %1793 : vector<1x256xi1> to vector<1x256xi1>
    %1795 = vector.broadcast %1794 : vector<1x256xi1> to vector<2x256xi1>
    %1796 = vector.broadcast %cst_328 : f32 to vector<2x256xf32>
    %1797 = arith.select %1795, %1792, %1796 : vector<2x256xi1>, vector<2x256xf32>
    %c47_329 = arith.constant 47 : index
    %1798 = memref.load %arg5[%c47_329] : memref<98xf32, #tpu.memory_space<smem>>
    %1799 = vector.extract_strided_slice %1797 {offsets = [0, 0], sizes = [1, 256], strides = [1, 1]} : vector<2x256xf32> to vector<1x256xf32>
    %1800 = vector.broadcast %1798 : f32 to vector<1x256xf32>
    %1801 = arith.mulf %1800, %1799 : vector<1x256xf32>
    %c96_330 = arith.constant 96 : index
    %1802 = memref.load %arg5[%c96_330] : memref<98xf32, #tpu.memory_space<smem>>
    %1803 = vector.extract_strided_slice %1797 {offsets = [1, 0], sizes = [1, 256], strides = [1, 1]} : vector<2x256xf32> to vector<1x256xf32>
    %1804 = vector.broadcast %1802 : f32 to vector<1x256xf32>
    %1805 = arith.mulf %1804, %1803 : vector<1x256xf32>
    %1806 = arith.addf %1801, %1805 : vector<1x256xf32>
    %1807 = arith.addf %1791, %1806 : vector<1x256xf32>
    %c205_i32_331 = arith.constant 205 : i32
    %1808 = tpu.dynamic_rotate %1041 by %c205_i32_331 dim 1 : vector<2x256xf32>, i32 -> vector<2x256xf32>
    %1809 = arith.andi %67, %130 : vector<1x256xi1>
    %cst_332 = arith.constant 0.000000e+00 : f32
    %1810 = vector.shape_cast %1809 : vector<1x256xi1> to vector<1x256xi1>
    %1811 = vector.broadcast %1810 : vector<1x256xi1> to vector<2x256xi1>
    %1812 = vector.broadcast %cst_332 : f32 to vector<2x256xf32>
    %1813 = arith.select %1811, %1808, %1812 : vector<2x256xi1>, vector<2x256xf32>
    %c48_333 = arith.constant 48 : index
    %1814 = memref.load %arg5[%c48_333] : memref<98xf32, #tpu.memory_space<smem>>
    %1815 = vector.extract_strided_slice %1813 {offsets = [0, 0], sizes = [1, 256], strides = [1, 1]} : vector<2x256xf32> to vector<1x256xf32>
    %1816 = vector.broadcast %1814 : f32 to vector<1x256xf32>
    %1817 = arith.mulf %1816, %1815 : vector<1x256xf32>
    %c97_334 = arith.constant 97 : index
    %1818 = memref.load %arg5[%c97_334] : memref<98xf32, #tpu.memory_space<smem>>
    %1819 = vector.extract_strided_slice %1813 {offsets = [1, 0], sizes = [1, 256], strides = [1, 1]} : vector<2x256xf32> to vector<1x256xf32>
    %1820 = vector.broadcast %1818 : f32 to vector<1x256xf32>
    %1821 = arith.mulf %1820, %1819 : vector<1x256xf32>
    %1822 = arith.addf %1817, %1821 : vector<1x256xf32>
    %1823 = arith.addf %1807, %1822 : vector<1x256xf32>
    %1824 = arith.negf %1823 : vector<1x256xf32>
    %1825 = math.exp %1824 : vector<1x256xf32>
    %cst_335 = arith.constant 1.000000e+00 : f32
    %1826 = vector.broadcast %cst_335 : f32 to vector<1x256xf32>
    %1827 = arith.addf %1826, %1825 : vector<1x256xf32>
    %1828 = arith.divf %1826, %1827 : vector<1x256xf32>
    %1829 = vector.broadcast %1828 : vector<1x256xf32> to vector<32x256xf32>
    %1830 = arith.mulf %1034, %1829 : vector<32x256xf32>
    %c1_336 = arith.constant 1 : index
    %c0_337 = arith.constant 0 : index
    %c0_338 = arith.constant 0 : index
    %1831 = vector.load %arg6[%c1_336, %c0_337, %c0_338] : memref<2x32x256xf32, #tpu.memory_space<vmem>>, vector<1x32x256xf32>
    %1832 = vector.shape_cast %1831 : vector<1x32x256xf32> to vector<32x256xf32>
    %1833 = vector.shape_cast %1830 : vector<32x256xf32> to vector<1x32x256xf32>
    tpu.vector_store %arg6[%c1_336, %c0_337, %c0_338], %1833 {strides = array<i32>} : memref<2x32x256xf32, #tpu.memory_space<vmem>>, vector<1x32x256xf32>,
    return
  }
  func.func @transform_0(%arg0: i32) -> (i32, i32, i32) {
    %c0_i32 = arith.constant 0 : i32
    %c0_i32_0 = arith.constant 0 : i32
    %c0_i32_1 = arith.constant 0 : i32
    return %arg0, %c0_i32, %c0_i32_0 : i32, i32, i32
  }
  func.func @transform_1(%arg0: i32) -> (i32, i32) {
    %c0_i32 = arith.constant 0 : i32
    %c0_i32_0 = arith.constant 0 : i32
    %c0_i32_1 = arith.constant 0 : i32
    return %c0_i32, %c0_i32_0 : i32, i32
  }
  func.func @transform_2(%arg0: i32) -> (i32, i32) {
    %c0_i32 = arith.constant 0 : i32
    %c0_i32_0 = arith.constant 0 : i32
    %c0_i32_1 = arith.constant 0 : i32
    return %c0_i32, %c0_i32_0 : i32, i32
  }
  func.func @transform_3(%arg0: i32) -> (i32, i32) {
    %c0_i32 = arith.constant 0 : i32
    %c0_i32_0 = arith.constant 0 : i32
    %c0_i32_1 = arith.constant 0 : i32
    return %c0_i32, %c0_i32_0 : i32, i32
  }
  func.func @transform_4(%arg0: i32) -> i32 {
    %c0_i32 = arith.constant 0 : i32
    %c0_i32_0 = arith.constant 0 : i32
    return %c0_i32 : i32
  }
  func.func @transform_5(%arg0: i32) -> (i32, i32, i32) {
    %c0_i32 = arith.constant 0 : i32
    %c0_i32_0 = arith.constant 0 : i32
    %c0_i32_1 = arith.constant 0 : i32
    return %arg0, %c0_i32, %c0_i32_0 : i32, i32, i32
  }
}

</mosaic_0001>

<bundles_post_ra>
// kernel: cbam_forward.1
= control target key start
LH: loop header
LB: loop body
LE: loop exit
PB: predicated region body
PF: predicated region fallthrough
CT: control target
= control target key end

     0   :  { %10 = vsyncpa [#allocation3], 0  ;;  %s8280_s0 = inlined_call_operand.vmem [shape: f32[2,32,256], index: 0, kind: input, shape index: {}]   ;;  %s8281_s1 = inlined_call_operand.vmem [shape: f32[32,2], index: 1, kind: input, shape index: {}]   ;;  %s8282_s2 = inlined_call_operand.vmem [shape: f32[32,2], index: 2, kind: input, shape index: {}]   ;;  %s8283_s3 = inlined_call_operand.vmem [shape: s32[2,256], index: 3, kind: input, shape index: {}]   ;;  %s8284_s4 = inlined_call_operand.vmem [shape: f32[98], index: 4, kind: input, shape index: {}]   ;;  %s8285_s5 = inlined_call_operand.vmem [shape: f32[2,32,256], index: 5, kind: output, shape index: {}]  }
   0x1   :  { %s25_s20 = sshll.u32 %s8284_s4, 4  ;;  %s26_s20 = int_to_ptr.vmem [resolvable:$true] %s25_s20 }
   0x2   :  { %s4567_s21 = scalar_lea.vmem %s26_s20, 16  ;;  %p4572_p1 = scmp.lt.s32.totalorder %s26_s20, %s26_s20 }
   0x3   :  { %p4568_p0 = scmp.ne.s32.totalorder %s26_s20, %s4567_s21  ;;  %p4573_p2 = scmp.lt.s32.totalorder %s4567_s21, %s4567_s21 }
   0x5   :  { %p4574_p3 = por %p4573_p2, %p4572_p1 }
   0x7   :  { %p4575_p4 = pnand %p4574_p3, %p4568_p0 }
   0x9   :  { %4578 = shalt.err (!%p4575_p4)
}
   0xa   :  { %s4581_s22 = smov [#allocation2]  }
   0xb   :  { %28 = dma.vmem_to_smem %s26_s20, 16, %s4581_s22, [#allocation3]  }
   0xc   :  { %4579 = dma.done.wait [#allocation3], 16  }
   0xd   :  { %4580 = vsyncadd [#allocation3], 4294967280 }
   0xe   :  { %32 = sfence }
   0xf   :  { %v4668_v0 = vld [vmem:[%s8280_s0 + $0x20] sm:$0xff]  ;;  %v4673_v1 = vld [vmem:[%s8280_s0 + $0x28] sm:$0xff]  ;;  %v4690_v5 = vld [vmem:[%s8280_s0 + $0x30] sm:$0xff]  ;;  %v4582_v7 = vmov 1   ;;  %v8307_v22 = vmov 0   ;;  %v69_v58 = vlaneseq  ;;  %vm137_vm1 = vcmask 15360  }
  0x10   :  { %v4678_v2 = vld [vmem:[%s8280_s0] sm:$0xff]  ;;  %v85_v3 = vadd.f32 %v4673_v1, %v4668_v0  ;;  %v4685_v4 = vld [vmem:[%s8280_s0 + $0x8] sm:$0xff]  ;;  %v4695_v6 = vld [vmem:[%s8280_s0 + $0x38] sm:$0xff]  ;;  %4515 = vset.pattern.permute.xlu1 %v4582_v7  ;;  %4516 = vset.pattern.permute.xlu0 %v4582_v7  ;;  %v102_v16 = vmax.f32 %v4668_v0, %v4673_v1  ;;  %vm8286_vm2 = vcmask 1040384   ;;  %s4585_s17 = smov 51   ;;  %s4586_s18 = smov 50  }
  0x11   :  { %v79_v8 = vadd.f32 %v4685_v4, %v4678_v2  ;;  %v4702_v9 = vld [vmem:[%s8280_s0 + $0x10] sm:$0xff]  ;;  %v4707_v10 = vld [vmem:[%s8280_s0 + $0x18] sm:$0xff]  ;;  %v88_v11 = vadd.f32 %v4695_v6, %v4690_v5  ;;  %v96_v14 = vmax.f32 %v4678_v2, %v4685_v4  ;;  %v105_v15 = vmax.f32 %v4690_v5, %v4695_v6  ;;  %v33_v17 = vld [vmem:[%s8281_s1] sm:$0xff]  ;;  %s4587_s19 = smov 49   ;;  %s4588_s20 = smov 48  }
  0x12   :  { %86 = vadd.xlane.f32.xlu1 %v85_v3  ;;  %v82_v12 = vadd.f32 %v4707_v10, %v4702_v9  ;;  %v99_v13 = vmax.f32 %v4702_v9, %v4707_v10  ;;  %v34_v18 = vld [vmem:[%s8281_s1 + $0x8] sm:$0xff]  ;;  %v35_v20 = vld [vmem:[%s8281_s1 + $0x10] sm:$0xff]  ;;  %v36_v21 = vld [vmem:[%s8281_s1 + $0x18] sm:$0xff]  ;;  %v4810_v61 = vand.u32 127, %v69_v58  ;;  %s4589_s21 = smov 47   ;;  %s4590_s22 = smov 46  }
  0x13   :  { %80 = vadd.xlane.f32.xlu0 %v79_v8  ;;  %v38_v19 = vld [vmem:[%s8282_s2 + $0x8] sm:$0xff]  ;;  %v37_v23 = vld [vmem:[%s8282_s2] sm:$0xff]  ;;  %v39_v24 = vld [vmem:[%s8282_s2 + $0x10] sm:$0xff]  ;;  %s4591_s23 = smov 45   ;;  %s4592_s24 = smov 35  }
  0x14   :  { %v40_v25 = vld [vmem:[%s8282_s2 + $0x18] sm:$0xff]  ;;  %v4750_v26 = vld [vmem:[%s8280_s0 + $0x40] sm:$0xff]  ;;  %v4755_v27 = vld [vmem:[%s8280_s0 + $0x48] sm:$0xff]  ;;  %vm108_vm0 = vcmp.eq.s32.totalorder %v4810_v61, 0  ;;  %s4593_s25 = smov 34   ;;  %s4594_s4 = smov 33  }
  0x15   :  { %v2725_v28 = vadd.f32 %v4755_v27, %v4750_v26  ;;  %v4762_v29 = vld [vmem:[%s8280_s0 + $0x60] sm:$0xff]  ;;  %v4767_v30 = vld [vmem:[%s8280_s0 + $0x68] sm:$0xff]  ;;  %v2741_v32 = vmax.f32 %v4750_v26, %v4755_v27  ;;  %v4776_v33 = vld [vmem:[%s8280_s0 + $0x70] sm:$0xff]  ;;  %s4595_s26 = smov 32   ;;  %s4596_s28 = smov 31  }
  0x16   :  { %89 = vadd.xlane.f32.xlu1 %v88_v11  ;;  %v2731_v31 = vadd.f32 %v4767_v30, %v4762_v29  ;;  %v4781_v34 = vld [vmem:[%s8280_s0 + $0x78] sm:$0xff]  ;;  %v4790_v37 = vld [vmem:[%s8280_s0 + $0x50] sm:$0xff]  ;;  %v2747_v41 = vmax.f32 %v4762_v29, %v4767_v30  ;;  %s4598_s29 = smov 29   ;;  %s4599_s30 = smov 19  }
  0x17   :  { %83 = vadd.xlane.f32.xlu0 %v82_v12  ;;  %v2734_v35 = vadd.f32 %v4781_v34, %v4776_v33  ;;  %v2750_v36 = vmax.f32 %v4776_v33, %v4781_v34  ;;  %v4795_v38 = vld [vmem:[%s8280_s0 + $0x58] sm:$0xff]  ;;  %s4584_s0 = smov 127   ;;  %s8295_s6 = smov 18  }
  0x18   :  { %v2728_v39 = vadd.f32 %v4795_v38, %v4790_v37  ;;  %v2744_v40 = vmax.f32 %v4790_v37, %v4795_v38  ;;  %s8293_s7 = smov 17   ;;  %s8291_s2 = smov 16  }
  0x19   :  { %s5099_s8 = sld [smem:[#allocation2 + $0x18]]  ;;  %s5107_s9 = sld [smem:[#allocation2 + $0x49]] }
  0x1a   :  { %100 = vmax.xlane.f32.xlu1 %v99_v13  ;;  %s5115_s10 = sld [smem:[#allocation2]]  ;;  %s5125_s11 = sld [smem:[#allocation2 + $0x31]] }
  0x1b   :  { %97 = vmax.xlane.f32.xlu0 %v96_v14  ;;  %s8287_s12 = smov 15   ;;  %s5137_s13 = sld [smem:[#allocation2 + $0x1]] }
  0x1c   :  { %s5139_s14 = sld [smem:[#allocation2 + $0x32]]  ;;  %s5151_s16 = sld [smem:[#allocation2 + $0x33]] }
  0x1d   :  { %s5149_s15 = sld [smem:[#allocation2 + $0x2]]  ;;  %s5156_s27 = sld [smem:[#allocation2 + $0x3]] }
  0x1e   :  { %106 = vmax.xlane.f32.xlu1 %v105_v15  ;;  %s5158_s1 = sld [smem:[#allocation2 + $0x34]] }
  0x1f   :  { %103 = vmax.xlane.f32.xlu0 %v102_v16 }
  0x2f   :  { %152 = vperm.xlu1 %4515, %v33_v17  }
  0x33   :  { %156 = vperm.xlu1 %4515, %v34_v18  }
  0x35   :  { %222 = vperm.xlu0 %4516, %v38_v19  }
  0x37   :  { %160 = vperm.xlu1 %4515, %v35_v20  }
  0x39   :  { %4518 = vset.pattern.permute.xlu0 %v8307_v22 }
  0x3b   :  { %164 = vperm.xlu1 %4515, %v36_v21  }
  0x3f   :  { %218 = vperm.xlu1 %4515, %v37_v23  }
  0x43   :  { %226 = vperm.xlu1 %4515, %v39_v24  }
  0x47   :  { %230 = vperm.xlu1 %4515, %v40_v25  }
  0x4b   :  { %4517 = vset.pattern.permute.xlu1 %v8307_v22 }
  0x54   :  { %2726 = vadd.xlane.f32.xlu0 %v2725_v28 }
  0x58   :  { %2732 = vadd.xlane.f32.xlu0 %v2731_v31 }
  0x5c   :  { %2742 = vmax.xlane.f32.xlu0 %v2741_v32 }
  0x60   :  { %2735 = vadd.xlane.f32.xlu0 %v2734_v35 }
  0x64   :  { %2751 = vmax.xlane.f32.xlu0 %v2750_v36 }
  0x6b   :  { %2729 = vadd.xlane.f32.xlu1 %v2728_v39 }
  0x6f   :  { %2745 = vmax.xlane.f32.xlu1 %v2744_v40 }
  0x73   :  { %2748 = vmax.xlane.f32.xlu1 %v2747_v41 }
  0x7a   :  { %115 = vperm.xlu0 %4518, %v33_v17  }
  0x7e   :  { %196 = vperm.xlu0 %4518, %v38_v19  }
  0x82   :  { %206 = vperm.xlu0 %4518, %v40_v25  }
  0x84   :  { %120 = vperm.xlu1 %4517, %v34_v18  }
  0x88   :  { %125 = vperm.xlu1 %4517, %v35_v20  }
  0x8c   :  { %130 = vperm.xlu1 %4517, %v36_v21  }
  0x90   :  { %191 = vperm.xlu1 %4517, %v37_v23  }
  0x94   :  { %201 = vperm.xlu1 %4517, %v39_v24  }
  0x9f   :  { %v87_v42 = vpop.xlane.xlu1 %86 }
  0xa0   :  { %v81_v45 = vpop.xlane.xlu0 %80  ;;  %v94_v12 = vmul.f32 0.00390625, %v87_v42 }
  0xa1   :  { %v92_v62 = vmul.f32 0.00390625, %v81_v45 }
  0xa3   :  { %v90_v43 = vpop.xlane.xlu1 %89 }
  0xa4   :  { %v84_v47 = vpop.xlane.xlu0 %83  ;;  %v95_v16 = vmul.f32 0.00390625, %v90_v43 }
  0xa5   :  { %v93_v63 = vmul.f32 0.00390625, %v84_v47 }
  0xa7   :  { %v101_v44 = vpop.xlane.xlu1 %100 }
  0xa8   :  { %v98_v49 = vpop.xlane.xlu0 %97  ;;  %v110_v13 = vsel %vm108_vm0, %v93_v63, %v101_v44 }
  0xa9   :  { %v109_v8 = vsel %vm108_vm0, %v92_v62, %v98_v49 }
  0xab   :  { %v107_v46 = vpop.xlane.xlu1 %106 }
  0xac   :  { %v104_v51 = vpop.xlane.xlu0 %103  ;;  %v112_v24 = vsel %vm108_vm0, %v95_v16, %v107_v46 }
  0xad   :  { %v111_v17 = vsel %vm108_vm0, %v94_v12, %v104_v51 }
  0xaf   :  { %v153_v48 = vpop.permute.xlu1 %152 }
  0xb0   :  { %v167_v18 = vmul.f32 %v153_v48, %v109_v8 }
  0xb2   :  { %v171_v40 = vsel %vm137_vm1, %v167_v18, 0.0 }
  0xb3   :  { %v157_v50 = vpop.permute.xlu1 %156 }
  0xb4   :  { %v4803_v53 = vpop.permute.xlu0 %222  ;;  %v168_v15 = vmul.f32 %v157_v50, %v110_v13 }
  0xb6   :  { %v172_v31 = vsel %vm137_vm1, %v168_v15, 0.0 }
  0xb7   :  { %v161_v52 = vpop.permute.xlu1 %160  ;;  %v173_v44 = vadd.f32 %v172_v31, %v171_v40 }
  0xb8   :  { %v169_v19 = vmul.f32 %v161_v52, %v111_v17 }
  0xba   :  { %v174_v41 = vsel %vm137_vm1, %v169_v19, 0.0 }
  0xbb   :  { %v165_v54 = vpop.permute.xlu1 %164  ;;  %v175_v51 = vadd.f32 %v174_v41, %v173_v44 }
  0xbc   :  { %v170_v32 = vmul.f32 %v165_v54, %v112_v24 }
  0xbe   :  { %v176_v47 = vsel %vm137_vm1, %v170_v32, 0.0 }
  0xbf   :  { %v4805_v56 = vpop.permute.xlu1 %218  ;;  %v177_v62 = vadd.f32 %v176_v47, %v175_v51 }
  0xc3   :  { %v4807_v59 = vpop.permute.xlu1 %226 }
  0xc7   :  { %v4812_v3 = vpop.permute.xlu1 %230 }
  0xe1   :  { %v2727_v55 = vpop.xlane.xlu0 %2726 }
  0xe2   :  { %v2737_v11 = vmul.f32 0.00390625, %v2727_v55 }
  0xe5   :  { %v2733_v57 = vpop.xlane.xlu0 %2732 }
  0xe6   :  { %v2739_v42 = vmul.f32 0.00390625, %v2733_v57 }
  0xe9   :  { %v2743_v60 = vpop.xlane.xlu0 %2742 }
  0xea   :  { %v2753_v20 = vsel %vm108_vm0, %v2737_v11, %v2743_v60 }
  0xeb   :  { %v2774_v36 = vmul.f32 %v2753_v20, %v153_v48 }
  0xed   :  { %v2736_v7 = vpop.xlane.xlu0 %2735  ;;  %v2778_v48 = vsel %vm137_vm1, %v2774_v36, 0.0 }
  0xee   :  { %v2740_v21 = vmul.f32 0.00390625, %v2736_v7 }
  0xf1   :  { %v2752_v25 = vpop.xlane.xlu0 %2751 }
  0xf2   :  { %v2756_v43 = vsel %vm108_vm0, %v2740_v21, %v2752_v25  ;;  %v178_v21 = vrot.slane %v177_v62, 4 }
  0xf8   :  { %v2730_v14 = vpop.xlane.xlu1 %2729 }
  0xf9   :  { %v2738_v23 = vmul.f32 0.00390625, %v2730_v14  ;;  %v116_v57 = vpop.permute.xlu0 %115 }
  0xfa   :  { %v133_v16 = vmul.f32 %v116_v57, %v109_v8  ;;  %v2757_v18 = vmul.f32 %v2753_v20, %v116_v57  ;;  %v179_v8 = vadd.f32 %v178_v21, %v177_v62 }
  0xfc   :  { %v2746_v28 = vpop.xlane.xlu1 %2745  ;;  %v138_v32 = vsel %vm137_vm1, %v133_v16, 0.0  ;;  %v2761_v36 = vsel %vm137_vm1, %v2757_v18, 0.0 }
  0xfd   :  { %v2754_v35 = vsel %vm108_vm0, %v2738_v23, %v2746_v28 }
  0xfe   :  { %v2775_v39 = vmul.f32 %v2754_v35, %v157_v50  ;;  %v2777_v50 = vmul.f32 %v2756_v43, %v165_v54 }
 0x100   :  { %v2779_v45 = vsel %vm137_vm1, %v2775_v39, 0.0  ;;  %v2749_v46 = vpop.xlane.xlu1 %2748  ;;  %v2783_v15 = vsel %vm137_vm1, %v2777_v50, 0.0 }
 0x101   :  { %v2755_v49 = vsel %vm108_vm0, %v2739_v42, %v2749_v46  ;;  %v2780_v60 = vadd.f32 %v2779_v45, %v2778_v48 }
 0x102   :  { %v2776_v55 = vmul.f32 %v2755_v49, %v161_v52 }
 0x104   :  { %v2781_v63 = vsel %vm137_vm1, %v2776_v55, 0.0  ;;  %v121_v7 = vpop.permute.xlu1 %120 }
 0x105   :  { %v2782_v11 = vadd.f32 %v2781_v63, %v2780_v60  ;;  %v134_v12 = vmul.f32 %v121_v7, %v110_v13  ;;  %v2758_v14 = vmul.f32 %v2754_v35, %v121_v7 }
 0x107   :  { %v2784_v19 = vadd.f32 %v2783_v15, %v2782_v11  ;;  %v139_v23 = vsel %vm137_vm1, %v134_v12, 0.0  ;;  %v2762_v52 = vsel %vm137_vm1, %v2758_v14, 0.0 }
 0x108   :  { %v126_v25 = vpop.permute.xlu1 %125  ;;  %v140_v39 = vadd.f32 %v139_v23, %v138_v32  ;;  %v2763_v40 = vadd.f32 %v2762_v52, %v2761_v36 }
 0x109   :  { %v2785_v54 = vrot.slane %v2784_v19, 4  ;;  %v135_v28 = vmul.f32 %v126_v25, %v111_v17  ;;  %v2759_v31 = vmul.f32 %v2755_v49, %v126_v25  ;;  %v180_v49 = vrot.slane %v179_v8, 2 }
 0x10b   :  { %v141_v13 = vsel %vm137_vm1, %v135_v28, 0.0  ;;  %v2764_v35 = vsel %vm137_vm1, %v2759_v31, 0.0  ;;  %v2786_v20 = vadd.f32 %v2785_v54, %v2784_v19  ;;  %v181_v57 = vadd.f32 %v180_v49, %v179_v8 }
 0x10c   :  { %v131_v41 = vpop.permute.xlu1 %130  ;;  %v142_v45 = vadd.f32 %v141_v13, %v140_v39  ;;  %v2765_v46 = vadd.f32 %v2764_v35, %v2763_v40  ;;  %v4848_v19 = vshrl.u32 %v69_v58, 7 }
 0x10d   :  { %v136_v42 = vmul.f32 %v131_v41, %v112_v24  ;;  %v2760_v44 = vmul.f32 %v2756_v43, %v131_v41  ;;  %v2787_v51 = vrot.slane %v2786_v20, 2  ;;  %v182_v24 = vrot.slane %v181_v57, 1 }
 0x10e   :  { %v4852_v28 = vsub.s32 0, %v4848_v19  ;;  %v235_v31 = vsub.s32 1, %v4848_v19 }
 0x10f   :  { %v143_v17 = vsel %vm137_vm1, %v136_v42, 0.0  ;;  %v2766_v47 = vsel %vm137_vm1, %v2760_v44, 0.0  ;;  %v2788_v62 = vadd.f32 %v2787_v51, %v2786_v20  ;;  %v183_v21 = vadd.f32 %v182_v24, %v181_v57  ;;  %v197_v42 = vpop.permute.xlu0 %196 }
 0x110   :  { %v144_v48 = vadd.f32 %v143_v17, %v142_v45  ;;  %v2767_v50 = vadd.f32 %v2766_v47, %v2765_v46  ;;  %v192_v58 = vpop.permute.xlu1 %191 }
 0x111   :  { %v2789_v43 = vrot.slane %v2788_v62, 1 }
 0x112   :  { %v145_v55 = vrot.slane %v144_v48, 4  ;;  %v2768_v60 = vrot.slane %v2767_v50, 4 }
 0x113   :  { %v2790_v23 = vadd.f32 %v2789_v43, %v2788_v62  ;;  %v207_v57 = vpop.permute.xlu0 %206 }
 0x114   :  { %v146_v63 = vadd.f32 %v145_v55, %v144_v48  ;;  %v2769_v7 = vadd.f32 %v2768_v60, %v2767_v50  ;;  %v202_v45 = vpop.permute.xlu1 %201 }
 0x116   :  { %v147_v11 = vrot.slane %v146_v63, 2  ;;  %v2770_v12 = vrot.slane %v2769_v7, 2 }
 0x118   :  { %v148_v14 = vadd.f32 %v147_v11, %v146_v63  ;;  %v2771_v15 = vadd.f32 %v2770_v12, %v2769_v7 }
 0x11a   :  { %v149_v16 = vrot.slane %v148_v14, 1  ;;  %v2772_v18 = vrot.slane %v2771_v15, 1 }
 0x11c   :  { %v150_v25 = vadd.f32 %v149_v16, %v148_v14  ;;  %v2773_v54 = vadd.f32 %v2772_v18, %v2771_v15 }
 0x11e   :  { %v185_v52 = vsel %vm8286_vm2, %v150_v25, %v183_v21  ;;  %v2791_v32 = vsel %vm8286_vm2, %v2773_v54, %v2790_v23 }
 0x11f   :  { %vm186_vm3 = vcmp.ge.f32.partialorder %v185_v52, 0.0  ;;  %v187_v36 = vmul.f32 0.01, %v185_v52  ;;  %vm2792_vm4 = vcmp.ge.f32.partialorder %v2791_v32, 0.0  ;;  %v2793_v13 = vmul.f32 0.01, %v2791_v32 }
 0x121   :  { %v188_v35 = vsel %vm186_vm3, %v185_v52, %v187_v36  ;;  %v2794_v8 = vsel %vm2792_vm4, %v2791_v32, %v2793_v13 }
 0x122   :  { %v212_v20 = vrot.slane %v188_v35, %v4852_v28  ;;  %v236_v39 = vrot.slane %v188_v35, %v235_v31  ;;  %v2798_v40 = vrot.slane %v2794_v8, %v4852_v28  ;;  %v2806_v41 = vrot.slane %v2794_v8, %v235_v31 }
 0x124   :  { %v213_v44 = vmul.f32 %v212_v20, %v192_v58  ;;  %v214_v46 = vmul.f32 %v212_v20, %v197_v42  ;;  %v238_v17 = vmul.f32 %v236_v39, %v4803_v53  ;;  %v237_v47 = vmul.f32 %v236_v39, %v4805_v56 }
 0x125   :  { %v2799_v49 = vmul.f32 %v2798_v40, %v192_v58  ;;  %v215_v51 = vmul.f32 %v212_v20, %v202_v45  ;;  %v2807_v55 = vmul.f32 %v2806_v41, %v4805_v56  ;;  %v239_v60 = vmul.f32 %v236_v39, %v4807_v59 }
 0x126   :  { %v242_v48 = vadd.f32 %v238_v17, %v214_v46  ;;  %v241_v50 = vadd.f32 %v237_v47, %v213_v44  ;;  %v2801_v62 = vmul.f32 %v2798_v40, %v202_v45  ;;  %v2809_v63 = vmul.f32 %v2806_v41, %v4807_v59 }
 0x127   :  { %v2811_v7 = vadd.f32 %v2807_v55, %v2799_v49  ;;  %v243_v11 = vadd.f32 %v239_v60, %v215_v51  ;;  %v216_v12 = vmul.f32 %v212_v20, %v207_v57  ;;  %v240_v24 = vmul.f32 %v236_v39, %v4812_v3 }
 0x128   :  { %251 = vrot.lane.b32.xlu0 %v242_v48, %s4584_s0  ;;  %249 = vrot.lane.b32.xlu1 %v241_v50, %s4584_s0  ;;  %v2813_v56 = vadd.f32 %v2809_v63, %v2801_v62  ;;  %v2800_v14 = vmul.f32 %v2798_v40, %v197_v42  ;;  %v2808_v15 = vmul.f32 %v2806_v41, %v4803_v53 }
 0x129   :  { %v244_v43 = vadd.f32 %v240_v24, %v216_v12  ;;  %v2802_v59 = vmul.f32 %v2798_v40, %v207_v57  ;;  %v2810_v18 = vmul.f32 %v2806_v41, %v4812_v3 }
 0x12a   :  { %v2812_v16 = vadd.f32 %v2808_v15, %v2800_v14 }
 0x12b   :  { %v2814_v21 = vadd.f32 %v2810_v18, %v2802_v59 }
 0x12c   :  { %2819 = vrot.lane.b32.xlu0 %v2811_v7, %s4584_s0  ;;  %253 = vrot.lane.b32.xlu1 %v243_v11, %s4584_s0 }
 0x130   :  { %2823 = vrot.lane.b32.xlu0 %v2813_v56, %s4584_s0  ;;  %255 = vrot.lane.b32.xlu1 %v244_v43, %s4584_s0 }
 0x134   :  { %2821 = vrot.lane.b32.xlu1 %v2812_v16, %s4584_s0 }
 0x138   :  { %2825 = vrot.lane.b32.xlu1 %v2814_v21, %s4584_s0 }
 0x19a   :  { %v252_v23 = vpop.permute.xlu0 %251  ;;  %v250_v25 = vpop.permute.xlu1 %249 }
 0x19b   :  { %v262_v54 = vadd.f32 %v252_v23, %v242_v48  ;;  %v261_v52 = vadd.f32 %v250_v25, %v241_v50 }
 0x19d   :  { %v4236_v31 = vmul.f32 -1.442695, %v262_v54  ;;  %v4235_v32 = vmul.f32 -1.442695, %v261_v52 }
 0x19e   :  { %v2820_v53 = vpop.permute.xlu0 %2819  ;;  %v254_v36 = vpop.permute.xlu1 %253 }
 0x19f   :  { %4519 = vpow2.f32 %v4236_v31  ;;  %v2831_v13 = vadd.f32 %v2820_v53, %v2811_v7  ;;  %v263_v58 = vadd.f32 %v254_v36, %v243_v11 }
 0x1a0   :  { %4521 = vpow2.f32 %v4235_v32 }
 0x1a1   :  { %v4353_v35 = vmul.f32 -1.442695, %v2831_v13  ;;  %v4237_v8 = vmul.f32 -1.442695, %v263_v58 }
 0x1a2   :  { %v2824_v3 = vpop.permute.xlu0 %2823  ;;  %v256_v20 = vpop.permute.xlu1 %255 }
 0x1a3   :  { %4523 = vpow2.f32 %v4353_v35  ;;  %v2833_v39 = vadd.f32 %v2824_v3, %v2813_v56  ;;  %v264_v40 = vadd.f32 %v256_v20, %v244_v43 }
 0x1a4   :  { %4525 = vpow2.f32 %v4237_v8 }
 0x1a5   :  { %v4355_v41 = vmul.f32 -1.442695, %v2833_v39  ;;  %v4238_v42 = vmul.f32 -1.442695, %v264_v40 }
 0x1a6   :  { %v2822_v44 = vpop.permute.xlu1 %2821 }
 0x1a7   :  { %4527 = vpow2.f32 %v4355_v41  ;;  %v2832_v45 = vadd.f32 %v2822_v44, %v2812_v16 }
 0x1a8   :  { %4529 = vpow2.f32 %v4238_v42 }
 0x1a9   :  { %v4520_v46 = vpop.eup %4519  ;;  %v4354_v17 = vmul.f32 -1.442695, %v2832_v45 }
 0x1aa   :  { %v4522_v47 = vpop.eup %4521  ;;  %v278_v49 = vadd.f32 1.0, %v4520_v46  ;;  %v2826_v51 = vpop.permute.xlu1 %2825 }
 0x1ab   :  { %v277_v48 = vadd.f32 1.0, %v4522_v47  ;;  %4531 = vpow2.f32 %v4354_v17  ;;  %v2834_v50 = vadd.f32 %v2826_v51, %v2814_v21 }
 0x1ac   :  { %4533 = vrcp.f32 %v278_v49 }
 0x1ad   :  { %v4524_v55 = vpop.eup %4523  ;;  %4535 = vrcp.f32 %v277_v48  ;;  %v4356_v60 = vmul.f32 -1.442695, %v2834_v50 }
 0x1ae   :  { %v4526_v57 = vpop.eup %4525  ;;  %v2847_v63 = vadd.f32 1.0, %v4524_v55 }
 0x1af   :  { %v279_v62 = vadd.f32 1.0, %v4526_v57  ;;  %4537 = vpow2.f32 %v4356_v60 }
 0x1b1   :  { %v4528_v7 = vpop.eup %4527  ;;  %4539 = vrcp.f32 %v279_v62 }
 0x1b2   :  { %v4530_v11 = vpop.eup %4529  ;;  %4541 = vrcp.f32 %v2847_v63  ;;  %v2849_v56 = vadd.f32 1.0, %v4528_v7 }
 0x1b3   :  { %v280_v12 = vadd.f32 1.0, %v4530_v11 }
 0x1b5   :  { %v4532_v24 = vpop.eup %4531  ;;  %4543 = vrcp.f32 %v280_v12 }
 0x1b6   :  { %v4534_v43 = vpop.eup %4533  ;;  %v2848_v14 = vadd.f32 1.0, %v4532_v24 }
 0x1b7   :  { %v4536_v15 = vpop.eup %4535  ;;  %296 = vperm.xlu1 %4517, %v4534_v43  }
 0x1b8   :  { %4545 = vrcp.f32 %v2848_v14  ;;  %291 = vperm.xlu0 %4518, %v4536_v15  }
 0x1b9   :  { %v4538_v16 = vpop.eup %4537  ;;  %4547 = vrcp.f32 %v2849_v56 }
 0x1ba   :  { %v2850_v59 = vadd.f32 1.0, %v4538_v16 }
 0x1bb   :  { %v4540_v18 = vpop.eup %4539 }
 0x1bc   :  { %4549 = vrcp.f32 %v2850_v59  ;;  %301 = vperm.xlu1 %4517, %v4540_v18   ;;  %v4542_v21 = vpop.eup %4541 }
 0x1bf   :  { %v4544_v23 = vpop.eup %4543 }
 0x1c0   :  { %2861 = vperm.xlu1 %4517, %v4542_v21   ;;  %306 = vperm.xlu0 %4518, %v4544_v23  }
 0x1c2   :  { %v4546_v25 = vpop.eup %4545 }
 0x1c3   :  { %v4548_v54 = vpop.eup %4547 }
 0x1c4   :  { %2871 = vperm.xlu1 %4517, %v4548_v54   ;;  %2866 = vperm.xlu0 %4518, %v4546_v25  }
 0x1c6   :  { %v4550_v52 = vpop.eup %4549 }
 0x1c8   :  { %2876 = vperm.xlu0 %4518, %v4550_v52  }
 0x236   :  { %v297_v31 = vpop.permute.xlu1 %296 }
 0x237   :  { %v292_v32 = vpop.permute.xlu0 %291  ;;  %v4881_v13 = vmul.f32 %v297_v31, %v4702_v9  ;;  %v4884_v58 = vmul.f32 %v297_v31, %v4707_v10 }
 0x238   :  { %v4875_v53 = vmul.f32 %v292_v32, %v4678_v2  ;;  %v4878_v36 = vmul.f32 %v292_v32, %v4685_v4 }
 0x239   :  { %8682 = vst [vmem:[#allocation7_spill] sm:$0xff] %v4881_v13  ;;  %8683 = vst [vmem:[#allocation8_spill] sm:$0xff] %v4884_v58 }
 0x23a   :  { %8680 = vst [vmem:[#allocation5_spill] sm:$0xff] %v4875_v53  ;;  %8681 = vst [vmem:[#allocation6_spill] sm:$0xff] %v4878_v36  ;;  %v317_v2 = vadd.f32 %v4881_v13, %v4875_v53  ;;  %v326_v4 = vadd.f32 %v4884_v58, %v4878_v36 }
 0x23b   :  { %v302_v35 = vpop.permute.xlu1 %301 }
 0x23c   :  { %v4887_v8 = vmul.f32 %v302_v35, %v4668_v0  ;;  %v4890_v3 = vmul.f32 %v302_v35, %v4673_v1 }
 0x23e   :  { %8684 = vst [vmem:[#allocation9_spill] sm:$0xff] %v4887_v8  ;;  %8685 = vst [vmem:[#allocation10_spill] sm:$0xff] %v4890_v3  ;;  %v318_v9 = vadd.f32 %v317_v2, %v4887_v8  ;;  %v327_v39 = vadd.f32 %v326_v4, %v4890_v3  ;;  %v338_v1 = vmax.f32 %v4875_v53, %v4887_v8 }
 0x23f   :  { %v307_v20 = vpop.permute.xlu0 %306  ;;  %v347_v40 = vmax.f32 %v4878_v36, %v4890_v3  ;;  %v2862_v31 = vpop.permute.xlu1 %2861  ;;  %v8759_v36 = vmov 0  }
 0x240   :  { %v4899_v10 = vmul.f32 %v307_v20, %v4690_v5  ;;  %v4902_v0 = vmul.f32 %v307_v20, %v4695_v6  ;;  %v4963_v4 = vmul.f32 %v4750_v26, %v2862_v31  ;;  %v4970_v20 = vmul.f32 %v4755_v27, %v2862_v31 }
 0x242   :  { %8686 = vst [vmem:[#allocation11_spill] sm:$0xff] %v4899_v10  ;;  %8687 = vst [vmem:[#allocation12_spill] sm:$0xff] %v4902_v0  ;;  %v319_v41 = vadd.f32 %v318_v9, %v4899_v10  ;;  %v328_v42 = vadd.f32 %v327_v39, %v4902_v0  ;;  %v339_v44 = vmax.f32 %v4881_v13, %v4899_v10 }
 0x243   :  { %v348_v5 = vmax.f32 %v4884_v58, %v4902_v0  ;;  %v2867_v32 = vpop.permute.xlu0 %2866  ;;  %8690 = vst [vmem:[#allocation15_spill] sm:$0xff] %v4963_v4  ;;  %8691 = vst [vmem:[#allocation16_spill] sm:$0xff] %v4970_v20  ;;  %v2872_v9 = vpop.permute.xlu1 %2871 }
 0x244   :  { %v320_v45 = vrot.slane %v319_v41, 4  ;;  %v329_v46 = vrot.slane %v328_v42, 4  ;;  %v340_v6 = vmax.f32 %v338_v1, %v339_v44  ;;  %v4957_v35 = vmul.f32 %v4790_v37, %v2867_v32 }
 0x245   :  { %v349_v17 = vmax.f32 %v347_v40, %v348_v5  ;;  %v4960_v2 = vmul.f32 %v4795_v38, %v2867_v32  ;;  %v4977_v26 = vmul.f32 %v4762_v29, %v2872_v9  ;;  %v4984_v27 = vmul.f32 %v4767_v30, %v2872_v9 }
 0x246   :  { %v321_v47 = vadd.f32 %v320_v45, %v319_v41  ;;  %v330_v49 = vadd.f32 %v329_v46, %v328_v42  ;;  %v341_v51 = vrot.slane %v340_v6, 4  ;;  %8688 = vst [vmem:[#allocation13_spill] sm:$0xff] %v4957_v35  ;;  %v2887_v37 = vadd.f32 %v4957_v35, %v4963_v4  ;;  %v4997_v42 = vld [vmem:[%s8283_s3] sm:$0xf]  ;;  %s4597_s3 = smov 30  }
 0x247   :  { %v350_v48 = vrot.slane %v349_v17, 4  ;;  %8689 = vst [vmem:[#allocation14_spill] sm:$0xff] %v4960_v2  ;;  %v2896_v38 = vadd.f32 %v4960_v2, %v4970_v20  ;;  %v2877_v39 = vpop.permute.xlu0 %2876  ;;  %8692 = vst [vmem:[#allocation17_spill] sm:$0xff] %v4977_v26  ;;  %v42_v30 = vadd.s32 4294967293, %v4997_v42  ;;  %vm54_vm5 = vcmp.ge.s32.totalorder %v4997_v42, 0 }
 0x248   :  { %v322_v50 = vrot.slane %v321_v47, 2  ;;  %v331_v55 = vrot.slane %v330_v49, 2  ;;  %v342_v60 = vmax.f32 %v340_v6, %v341_v51  ;;  %8693 = vst [vmem:[#allocation18_spill] sm:$0xff] %v4984_v27  ;;  %v2888_v1 = vadd.f32 %v2887_v37, %v4977_v26 }
 0x249   :  { %v351_v57 = vmax.f32 %v349_v17, %v350_v48  ;;  %v4988_v40 = vmul.f32 %v4776_v33, %v2877_v39  ;;  %v2897_v41 = vadd.f32 %v2896_v38, %v4984_v27  ;;  %v4992_v29 = vmul.f32 %v4781_v34, %v2877_v39 }
 0x24a   :  { %v323_v62 = vadd.f32 %v322_v50, %v321_v47  ;;  %v332_v63 = vadd.f32 %v331_v55, %v330_v49  ;;  %v343_v7 = vrot.slane %v342_v60, 2  ;;  %vm55_vm6 = vcmp.lt.s32.totalorder %v4997_v42, 16 }
 0x24b   :  { %v352_v11 = vrot.slane %v351_v57, 2  ;;  %8694 = vst [vmem:[#allocation19_spill] sm:$0xff] %v4988_v40  ;;  %8695 = vst [vmem:[#allocation20_spill] sm:$0xff] %v4992_v29  ;;  %v2889_v33 = vadd.f32 %v2888_v1, %v4988_v40  ;;  %v2898_v44 = vadd.f32 %v2897_v41, %v4992_v29  ;;  %v2908_v34 = vmax.f32 %v4957_v35, %v4988_v40 }
 0x24c   :  { %v324_v12 = vrot.slane %v323_v62, 1  ;;  %v333_v24 = vrot.slane %v332_v63, 1  ;;  %v344_v56 = vmax.f32 %v342_v60, %v343_v7  ;;  %v2917_v5 = vmax.f32 %v4960_v2, %v4992_v29  ;;  %vm5020_vm9 = vmand %vm54_vm5, %vm55_vm6 }
 0x24d   :  { %v353_v43 = vmax.f32 %v351_v57, %v352_v11  ;;  %vm43_vm7 = vcmp.ge.s32.totalorder %v42_v30, 0  ;;  %vm44_vm8 = vcmp.lt.s32.totalorder %v42_v30, 16  ;;  %v2907_v45 = vmax.f32 %v4963_v4, %v4977_v26 }
 0x24e   :  { %v325_v14 = vadd.f32 %v324_v12, %v323_v62  ;;  %v334_v15 = vadd.f32 %v333_v24, %v332_v63  ;;  %v345_v16 = vrot.slane %v344_v56, 1  ;;  %v2916_v46 = vmax.f32 %v4970_v20, %v4984_v27  ;;  %vm5024_vm10 = vmand %vm43_vm7, %vm44_vm8 }
 0x24f   :  { %v354_v59 = vrot.slane %v353_v43, 1  ;;  %v2890_v6 = vrot.slane %v2889_v33, 4  ;;  %v2899_v47 = vrot.slane %v2898_v44, 4  ;;  %v2909_v49 = vmax.f32 %v2907_v45, %v2908_v34 }
 0x250   :  { %v336_v18 = vmul.f32 0.03125, %v325_v14  ;;  %v337_v21 = vmul.f32 0.03125, %v334_v15  ;;  %v346_v23 = vmax.f32 %v344_v56, %v345_v16  ;;  %v2918_v48 = vmax.f32 %v2916_v46, %v2917_v5 }
 0x251   :  { %v355_v25 = vmax.f32 %v353_v43, %v354_v59  ;;  %v46_v50 = vadd.s32 4294967294, %v4997_v42  ;;  %v516_v55 = vsel %vm5020_vm9, 1, %v8307_v22  ;;  %v2891_v60 = vadd.f32 %v2890_v6, %v2889_v33 }
 0x252   :  { %v4915_v54 = vsel %vm8286_vm2, %v336_v18, %v346_v23  ;;  %v365_v57 = vsel %vm5024_vm10, 1, %v8307_v22  ;;  %v2900_v62 = vadd.f32 %v2899_v47, %v2898_v44  ;;  %v2910_v63 = vrot.slane %v2909_v49, 4 }
 0x253   :  { %v4918_v52 = vsel %vm8286_vm2, %v337_v21, %v355_v25  ;;  %358 = vrot.lane.b32.xlu1 %v4915_v54, %s4585_s17  ;;  %v2919_v7 = vrot.slane %v2918_v48, 4  ;;  %vm47_vm11 = vcmp.ge.s32.totalorder %v46_v50, 0  ;;  %vm48_vm12 = vcmp.lt.s32.totalorder %v46_v50, 16 }
 0x254   :  { %360 = vrot.lane.b32.xlu0 %v4918_v52, %s4585_s17  ;;  %v4247_v11 = vrot.slane %v516_v55, 9  ;;  %v4239_v12 = vrot.slane %v365_v57, 9  ;;  %v2892_v24 = vrot.slane %v2891_v60, 2  ;;  %v50_v56 = vadd.s32 4294967295, %v4997_v42  ;;  %vm5045_vm13 = vmand %vm47_vm11, %vm48_vm12 }
 0x255   :  { %v2901_v43 = vrot.slane %v2900_v62, 2  ;;  %v2911_v14 = vmax.f32 %v2909_v49, %v2910_v63  ;;  %v65_v15 = vadd.s32 3, %v4997_v42  ;;  %v2920_v59 = vmax.f32 %v2918_v48, %v2919_v7 }
 0x256   :  { %vm5053_vm14 = vcmp.ne.s32.totalorder %v4247_v11, 0  ;;  %v8702_v18 = vmov 0  ;;  %v57_v21 = vadd.s32 1, %v4997_v42  ;;  %vm5058_vm15 = vcmp.ne.s32.totalorder %v4239_v12, 0 }
 0x257   :  { %407 = vrot.lane.b32.xlu1 %v4915_v54, %s4586_s18  ;;  %v8703_v18 = vsel %vm5053_vm14, 4294967295, %v8702_v18  ;;  %v8705_v23 = vmov 0  ;;  %v2893_v25 = vadd.f32 %v2892_v24, %v2891_v60  ;;  %v414_v31 = vsel %vm5045_vm13, 1, %v8307_v22  ;;  %vm1512_vm5 = vmand %vm5020_vm9, %vm5053_vm14 }
 0x258   :  { %409 = vrot.lane.b32.xlu0 %v4918_v52, %s4586_s18  ;;  %8704 = vst [vmem:[#allocation21_spill] sm:$0xff] %v8703_v18  ;;  %v8706_v23 = vsel %vm5058_vm15, 4294967295, %v8705_v23  ;;  %vm51_vm0 = vcmp.ge.s32.totalorder %v50_v56, 0  ;;  %vm52_vm1 = vcmp.lt.s32.totalorder %v50_v56, 16  ;;  %v2902_v32 = vadd.f32 %v2901_v43, %v2900_v62  ;;  %vm369_vm6 = vmand %vm5024_vm10, %vm5058_vm15 }
 0x259   :  { %8707 = vst [vmem:[#allocation22_spill] sm:$0xff] %v8706_v23  ;;  %v2912_v9 = vrot.slane %v2911_v14, 2  ;;  %vm66_vm3 = vcmp.ge.s32.totalorder %v65_v15, 0  ;;  %vm67_vm4 = vcmp.lt.s32.totalorder %v65_v15, 16  ;;  %v2921_v37 = vrot.slane %v2920_v59, 2  ;;  %vm5079_vm11 = vmand %vm51_vm0, %vm52_vm1 }
 0x25a   :  { %vm58_vm7 = vcmp.ge.s32.totalorder %v57_v21, 0  ;;  %vm59_vm8 = vcmp.lt.s32.totalorder %v57_v21, 16  ;;  %v61_v38 = vadd.s32 2, %v4997_v42  ;;  %vm5083_vm12 = vmand %vm66_vm3, %vm67_vm4  ;;  %v8710_v1 = vmov 0 }
 0x25b   :  { %458 = vrot.lane.b32.xlu1 %v4915_v54, %s4587_s19  ;;  %v8711_v1 = vsel %vm5083_vm12, 4294967295, %v8710_v1  ;;  %v4241_v41 = vrot.slane %v414_v31, 9  ;;  %v2894_v30 = vrot.slane %v2893_v25, 1  ;;  %v2903_v33 = vrot.slane %v2902_v32, 1  ;;  %vm5088_vm2 = vmand %vm58_vm7, %vm59_vm8 }
 0x25c   :  { %460 = vrot.lane.b32.xlu0 %v4918_v52, %s4587_s19  ;;  %8712 = vst [vmem:[#allocation23_spill] sm:$0xff] %v8711_v1  ;;  %v2913_v44 = vmax.f32 %v2911_v14, %v2912_v9  ;;  %v1513_v34 = vsel %vm1512_vm5, 1, %v8307_v22  ;;  %v8713_v5 = vmov 0  ;;  %v2922_v42 = vmax.f32 %v2920_v59, %v2921_v37  ;;  %vm520_vm5 = vmand %vm5024_vm10, %vm5053_vm14 }
 0x25d   :  { %v8714_v5 = vsel %vm5088_vm2, 4294967295, %v8713_v5  ;;  %v465_v45 = vsel %vm5079_vm11, 1, %v8307_v22  ;;  %vm62_vm0 = vcmp.ge.s32.totalorder %v61_v38, 0  ;;  %vm63_vm1 = vcmp.lt.s32.totalorder %v61_v38, 16 }
 0x25e   :  { %8715 = vst [vmem:[#allocation24_spill] sm:$0xff] %v8714_v5  ;;  %v5102_v46 = vsub.s32 2, %v4848_v19  ;;  %v669_v6 = vsel %vm5083_vm12, 1, %v8307_v22  ;;  %v370_v47 = vsel %vm369_vm6, 1, %v8307_v22  ;;  %vm5117_vm3 = vcmp.ne.s32.totalorder %v4241_v41, 0  ;;  %vm5129_vm4 = vmand %vm62_vm0, %vm63_vm1 }
 0x25f   :  { %509 = vrot.lane.b32.xlu1 %v4915_v54, %s4588_s20  ;;  %v8716_v49 = vmov 0  ;;  %v567_v19 = vsel %vm5088_vm2, 1, %v8307_v22  ;;  %v1517_v48 = vrot.slane %v1513_v34, %v4852_v28  ;;  %v2895_v50 = vadd.f32 %v2894_v30, %v2893_v25  ;;  %vm418_vm6 = vmand %vm5024_vm10, %vm5117_vm3 }
 0x260   :  { %511 = vrot.lane.b32.xlu0 %v4918_v52, %s4588_s20  ;;  %v8717_v49 = vsel %vm5117_vm3, 4294967295, %v8716_v49  ;;  %v2904_v55 = vadd.f32 %v2903_v33, %v2902_v32  ;;  %v2914_v60 = vrot.slane %v2913_v44, 1  ;;  %v4244_v57 = vrot.slane %v465_v45, 9 }
 0x261   :  { %8718 = vst [vmem:[#allocation25_spill] sm:$0xff] %v8717_v49  ;;  %v8719_v62 = vmov 0  ;;  %v2923_v63 = vrot.slane %v2922_v42, 1  ;;  %v4256_v7 = vrot.slane %v669_v6, 9  ;;  %v4250_v11 = vrot.slane %v567_v19, 9 }
 0x262   :  { %v8720_v62 = vsel %vm5129_vm4, 4294967295, %v8719_v62  ;;  %v1521_v12 = vrot.slane %v1513_v34, %v5102_v46  ;;  %v374_v24 = vrot.slane %v370_v47, %v4852_v28  ;;  %v378_v56 = vrot.slane %v370_v47, %v5102_v46 }
 0x263   :  { %560 = vrot.lane.b32.xlu1 %v4915_v54, %s4589_s21  ;;  %8721 = vst [vmem:[#allocation26_spill] sm:$0xff] %v8720_v62  ;;  %v618_v43 = vsel %vm5129_vm4, 1, %v8307_v22  ;;  %v5164_v14 = vrot.slane %v1517_v48, %v4852_v28  ;;  %v2905_v15 = vmul.f32 0.03125, %v2895_v50  ;;  %v2906_v59 = vmul.f32 0.03125, %v2904_v55  ;;  %vm767_vm4 = vmand %vm5045_vm13, %vm5117_vm3 }
 0x264   :  { %562 = vrot.lane.b32.xlu0 %v4918_v52, %s4589_s21  ;;  %v2915_v21 = vmax.f32 %v2913_v44, %v2914_v60  ;;  %vm5166_vm7 = vcmp.ne.s32.totalorder %v4244_v57, 0  ;;  %v8722_v25 = vmov 0  ;;  %v2924_v31 = vmax.f32 %v2922_v42, %v2923_v63 }
 0x265   :  { %v8723_v25 = vsel %vm5166_vm7, 4294967295, %v8722_v25  ;;  %vm5174_vm8 = vcmp.ne.s32.totalorder %v4256_v7, 0  ;;  %v8725_v32 = vmov 0  ;;  %v419_v9 = vsel %vm418_vm6, 1, %v8307_v22 }
 0x266   :  { %8724 = vst [vmem:[#allocation27_spill] sm:$0xff] %v8723_v25  ;;  %v8726_v32 = vsel %vm5174_vm8, 4294967295, %v8725_v32  ;;  %v521_v37 = vsel %vm520_vm5, 1, %v8307_v22  ;;  %vm5192_vm0 = vcmp.ne.s32.totalorder %v4250_v11, 0  ;;  %v8728_v38 = vmov 0 }
 0x267   :  { %611 = vrot.lane.b32.xlu1 %v4915_v54, %s4590_s22  ;;  %8727 = vst [vmem:[#allocation28_spill] sm:$0xff] %v8726_v32  ;;  %v8729_v38 = vsel %vm5192_vm0, 4294967295, %v8728_v38  ;;  %v4253_v41 = vrot.slane %v618_v43, 9  ;;  %v5201_v30 = vrot.slane %v1521_v12, %v4852_v28  ;;  %v5204_v33 = vstv %s5099_s8  ;;  %s4605_s8 = smov 13  }
 0x268   :  { %613 = vrot.lane.b32.xlu0 %v4918_v52, %s4590_s22  ;;  %8730 = vst [vmem:[#allocation29_spill] sm:$0xff] %v8729_v38  ;;  %v5207_v44 = vrot.slane %v374_v24, %v4852_v28  ;;  %v5210_v34 = vrot.slane %v378_v56, %v4852_v28  ;;  %v5213_v42 = vstv %s5115_s10  ;;  %v5222_v45 = vstv %s5107_s9  ;;  %s5252_s9 = sld [smem:[#allocation2 + $0x6]]  ;;  %s5254_s10 = sld [smem:[#allocation2 + $0x37]] }
 0x269   :  { %vm8733_vm5 = vcmask 1040384   ;;  %v423_v47 = vrot.slane %v419_v9, %v4852_v28  ;;  %v525_v19 = vrot.slane %v521_v37, %v4852_v28  ;;  %v529_v48 = vrot.slane %v521_v37, %v5102_v46 }
 0x26a   :  { %8731 = vst [vmem:[#allocation30_spill] sm:$0xff] %v5207_v44  ;;  %8732 = vst [vmem:[#allocation31_spill] sm:$0xff] %v5210_v34  ;;  %v5225_v6 = vsel %vm8733_vm5, %v2905_v15, %v2915_v21  ;;  %v5242_v55 = vstv %s5125_s11  ;;  %v427_v60 = vrot.slane %v419_v9, %v5102_v46  ;;  %v5246_v57 = vstv %s5137_s13  ;;  %s4606_s11 = smov 3   ;;  %s5324_s13 = sld [smem:[#allocation2 + $0x7]] }
 0x26b   :  { %662 = vrot.lane.b32.xlu1 %v4915_v54, %s4591_s23  ;;  %8734 = vst [vmem:[#allocation32_spill] sm:$0xff] %v5225_v6  ;;  %vm8735_vm1 = vmmov %vm8733_vm5  ;;  %v5257_v63 = vstv %s5139_s14  ;;  %v5266_v11 = vstv %s5149_s15  ;;  %vm5268_vm6 = vcmp.ne.s32.totalorder %v4253_v41, 0  ;;  %v8740_v12 = vmov 0  ;;  %s5326_s14 = sld [smem:[#allocation2 + $0x38]]  ;;  %s5388_s15 = sld [smem:[#allocation2 + $0x3a]] }
 0x26c   :  { %664 = vrot.lane.b32.xlu0 %v4918_v52, %s4591_s23  ;;  %v5235_v50 = vsel %vm8735_vm1, %v2906_v59, %v2924_v31  ;;  %8737 = vst [vmem:[#allocation34_spill] sm:$0xff] %v5242_v55  ;;  %vm571_vm1 = vmand %vm5024_vm10, %vm5192_vm0  ;;  %v8741_v12 = vsel %vm5268_vm6, 4294967295, %v8740_v12  ;;  %v5277_v24 = vstv %s5151_s16  ;;  %v5280_v56 = vstv %s5156_s27  ;;  %s5401_s16 = sld [smem:[#allocation2 + $0xa]]  ;;  %s5403_s27 = sld [smem:[#allocation2 + $0x3b]] }
 0x26d   :  { %8736 = vst [vmem:[#allocation33_spill] sm:$0xff] %v5235_v50  ;;  %8738 = vst [vmem:[#allocation35_spill] sm:$0xff] %v5257_v63  ;;  %v5283_v43 = vstv %s5158_s1  ;;  %v5292_v59 = vrot.slane %v423_v47, %v4852_v28  ;;  %v5295_v21 = vrot.slane %v525_v19, %v4852_v28  ;;  %v5298_v31 = vrot.slane %v529_v48, %v4852_v28  ;;  %s5433_s1 = sld [smem:[#allocation2 + $0xb]] }
 0x26e   :  { %vm8739_vm5 = vmand %vm5024_vm10, %vm5166_vm7  ;;  %8742 = vst [vmem:[#allocation36_spill] sm:$0xff] %v8741_v12  ;;  %v572_v9 = vsel %vm571_vm1, 1, %v8307_v22  ;;  %v5310_v37 = vrot.slane %v427_v60, %v4852_v28  ;;  %v768_v2 = vsel %vm767_vm4, 1, %v8307_v22 }
 0x26f   :  { %713 = vrot.lane.b32.xlu1 %v4915_v54, %s4592_s24  ;;  %v470_v7 = vsel %vm8739_vm5, 1, %v8307_v22  ;;  %8743 = vst [vmem:[#allocation37_spill] sm:$0xff] %v5277_v24  ;;  %vm8744_vm5 = vmand %vm5024_vm10, %vm5174_vm8  ;;  %v576_v40 = vrot.slane %v572_v9, %v4852_v28  ;;  %v772_v3 = vrot.slane %v768_v2, %v4852_v28  ;;  %v776_v58 = vrot.slane %v768_v2, %v5102_v46 }
 0x270   :  { %715 = vrot.lane.b32.xlu0 %v4918_v52, %s4592_s24  ;;  %v674_v15 = vsel %vm8744_vm5, 1, %v8307_v22  ;;  %8745 = vst [vmem:[#allocation38_spill] sm:$0xff] %v5292_v59  ;;  %8746 = vst [vmem:[#allocation39_spill] sm:$0xff] %v5295_v21  ;;  %v474_v41 = vrot.slane %v470_v7, %v4852_v28  ;;  %v478_v47 = vrot.slane %v470_v7, %v5102_v46 }
 0x271   :  { %8747 = vst [vmem:[#allocation40_spill] sm:$0xff] %v5298_v31  ;;  %8748 = vst [vmem:[#allocation41_spill] sm:$0xff] %v5310_v37  ;;  %v678_v29 = vrot.slane %v674_v15, %v4852_v28  ;;  %v682_v26 = vrot.slane %v674_v15, %v5102_v46  ;;  %v580_v15 = vrot.slane %v572_v9, %v5102_v46 }
 0x272   :  { %vm622_vm1 = vmand %vm5024_vm10, %vm5268_vm6  ;;  %v5377_v51 = vrot.slane %v474_v41, %v4852_v28  ;;  %v5380_v9 = vrot.slane %v478_v47, %v4852_v28  ;;  %v5411_v2 = vrot.slane %v576_v40, %v4852_v28  ;;  %v5465_v62 = vrot.slane %v776_v58, %v4852_v28 }
 0x273   :  { %760 = vrot.lane.b32.xlu1 %v4915_v54, %s4593_s25  ;;  %vm8749_vm5 = vmand %vm5045_vm13, %vm5058_vm15  ;;  %v623_v35 = vsel %vm622_vm1, 1, %v8307_v22  ;;  %v5391_v0 = vrot.slane %v678_v29, %v4852_v28  ;;  %vm1530_vm1 = vcmp.eq.s32.totalorder %v5164_v14, 1  ;;  %v5415_v47 = vrot.slane %v682_v26, %v4852_v28 }
 0x274   :  { %762 = vrot.lane.b32.xlu0 %v4918_v52, %s4593_s25  ;;  %v721_v19 = vsel %vm8749_vm5, 1, %v8307_v22  ;;  %vm814_vm5 = vmand %vm5045_vm13, %vm5166_vm7  ;;  %8754 = vst [vmem:[#allocation46_spill] sm:$0xff] %v5377_v51  ;;  %v5386_v22 = vstv %s5254_s10  ;;  %v627_v29 = vrot.slane %v623_v35, %v4852_v28  ;;  %v5424_v8 = vrot.slane %v580_v15, %v4852_v28  ;;  %s5452_s10 = sld [smem:[#allocation2 + $0x3c]] }
 0x275   :  { %v725_v20 = vrot.slane %v721_v19, %v4852_v28  ;;  %v729_v4 = vrot.slane %v721_v19, %v5102_v46  ;;  %vm861_vm4 = vmand %vm5045_vm13, %vm5053_vm14  ;;  %8755 = vst [vmem:[#allocation47_spill] sm:$0xff] %v5380_v9  ;;  %v5383_v19 = vstv %s5252_s9  ;;  %v815_v41 = vsel %vm814_vm5, 1, %v8759_v36  ;;  %s8325_s9 = smov 1  }
 0x276   :  { %8756 = vst [vmem:[#allocation48_spill] sm:$0xff] %v5383_v19  ;;  %8757 = vst [vmem:[#allocation49_spill] sm:$0xff] %v5386_v22  ;;  %v862_v10 = vsel %vm861_vm4, 1, %v8759_v36  ;;  %v631_v13 = vrot.slane %v623_v35, %v5102_v46  ;;  %v5440_v26 = vstv %s5324_s13  ;;  %v5443_v35 = vstv %s5326_s14  ;;  %s5458_s13 = sld [smem:[#allocation2 + $0xc]]  ;;  %s5469_s14 = sld [smem:[#allocation2 + $0x3d]] }
 0x277   :  { %807 = vrot.lane.b32.xlu1 %v4915_v54, %s4594_s4  ;;  %8758 = vst [vmem:[#allocation50_spill] sm:$0xff] %v5391_v0  ;;  %vm908_vm10 = vmand %vm5045_vm13, %vm5192_vm0  ;;  %v5428_v40 = vrot.slane %v725_v20, %v4852_v28  ;;  %v5431_v53 = vrot.slane %v729_v4, %v4852_v28  ;;  %v819_v20 = vrot.slane %v815_v41, %v4852_v28  ;;  %v5530_v22 = vstv %s5401_s16  ;;  %s5588_s16 = sld [smem:[#allocation2 + $0xf]] }
 0x278   :  { %809 = vrot.lane.b32.xlu0 %v4918_v52, %s4594_s4  ;;  %8760 = vst [vmem:[#allocation51_spill] sm:$0xff] %v5415_v47  ;;  %8763 = vst [vmem:[#allocation54_spill] sm:$0xff] %v5440_v26  ;;  %v909_v4 = vsel %vm908_vm10, 1, %v8759_v36  ;;  %v5462_v15 = vrot.slane %v772_v3, %v4852_v28  ;;  %v823_v5 = vrot.slane %v815_v41, %v5102_v46 }
 0x279   :  { %8761 = vst [vmem:[#allocation52_spill] sm:$0xff] %v5428_v40  ;;  %8762 = vst [vmem:[#allocation53_spill] sm:$0xff] %v5431_v53  ;;  %v866_v1 = vrot.slane %v862_v10, %v4852_v28  ;;  %v5476_v26 = vrot.slane %v627_v29, %v4852_v28  ;;  %v870_v58 = vrot.slane %v862_v10, %v5102_v46  ;;  %v5512_v10 = vstv %s5388_s15  ;;  %s4609_s15 = smov 126  }
 0x27a   :  { %8764 = vst [vmem:[#allocation55_spill] sm:$0xff] %v5443_v35  ;;  %vm955_vm5 = vmand %vm5045_vm13, %vm5268_vm6  ;;  %v5488_v41 = vrot.slane %v631_v13, %v4852_v28  ;;  %v5509_v13 = vrot.slane %v819_v20, %v4852_v28 }
 0x27b   :  { %854 = vrot.lane.b32.xlu1 %v4915_v54, %s4595_s26  ;;  %8765 = vst [vmem:[#allocation56_spill] sm:$0xff] %v5462_v15  ;;  %8766 = vst [vmem:[#allocation57_spill] sm:$0xff] %v5465_v62  ;;  %v956_v29 = vsel %vm955_vm5, 1, %v8759_v36  ;;  %v5527_v20 = vrot.slane %v866_v1, %v4852_v28 }
 0x27c   :  { %856 = vrot.lane.b32.xlu0 %v4918_v52, %s4595_s26  ;;  %vm1002_vm10 = vmand %vm5045_vm13, %vm5174_vm8  ;;  %8767 = vst [vmem:[#allocation58_spill] sm:$0xff] %v5476_v26  ;;  %v960_v16 = vrot.slane %v956_v29, %v4852_v28 }
 0x27d   :  { %8770 = vst [vmem:[#allocation61_spill] sm:$0xff] %v5488_v41  ;;  %vm1049_vm4 = vmand %vm5079_vm11, %vm5058_vm15 }
 0x27e   :  { %8772 = vst [vmem:[#allocation63_spill] sm:$0xff] %v5509_v13  ;;  %8773 = vst [vmem:[#allocation64_spill] sm:$0xff] %v5512_v10  ;;  %v5533_v10 = vstv %s5403_s27  ;;  %v964_v13 = vrot.slane %v956_v29, %v5102_v46  ;;  %s5590_s27 = sld [smem:[#allocation2 + $0x40]] }
 0x27f   :  { %901 = vrot.lane.b32.xlu1 %v4915_v54, %s4596_s28  ;;  %8775 = vst [vmem:[#allocation66_spill] sm:$0xff] %v5527_v20  ;;  %8776 = vst [vmem:[#allocation67_spill] sm:$0xff] %v5530_v22  ;;  %v5572_v22 = vstv %s5458_s13  ;;  %s5661_s13 = sld [smem:[#allocation2 + $0x11]] }
 0x280   :  { %903 = vrot.lane.b32.xlu0 %v4918_v52, %s4596_s28  ;;  %8777 = vst [vmem:[#allocation68_spill] sm:$0xff] %v5533_v10  ;;  %vm1096_vm13 = vmand %vm5079_vm11, %vm5117_vm3  ;;  %v5578_v10 = vstv %s5469_s14  ;;  %s8366_s14 = smov 115  }
 0x281   :  { %vm1143_vm5 = vmand %vm5079_vm11, %vm5166_vm7  ;;  %8783 = vst [vmem:[#allocation74_spill] sm:$0xff] %v5572_v22  ;;  %v5593_v22 = vrot.slane %v960_v16, %v4852_v28 }
 0x282   :  { %8784 = vst [vmem:[#allocation75_spill] sm:$0xff] %v5578_v10  ;;  %v5596_v10 = vrot.slane %v964_v13, %v4852_v28 }
 0x283   :  { %948 = vrot.lane.b32.xlu1 %v4915_v54, %s4597_s3  ;;  %8785 = vst [vmem:[#allocation76_spill] sm:$0xff] %v5593_v22 }
 0x284   :  { %950 = vrot.lane.b32.xlu0 %v4918_v52, %s4597_s3  ;;  %8786 = vst [vmem:[#allocation77_spill] sm:$0xff] %v5596_v10 }
 0x287   :  { %995 = vrot.lane.b32.xlu1 %v4915_v54, %s4598_s29 }
 0x288   :  { %997 = vrot.lane.b32.xlu0 %v4918_v52, %s4598_s29 }
 0x28b   :  { %1042 = vrot.lane.b32.xlu1 %v4915_v54, %s4599_s30 }
 0x28c   :  { %1044 = vrot.lane.b32.xlu0 %v4918_v52, %s4599_s30 }
 0x28f   :  { %1089 = vrot.lane.b32.xlu1 %v4915_v54, %s8295_s6 }
 0x290   :  { %1091 = vrot.lane.b32.xlu0 %v4918_v52, %s8295_s6  ;;  %s5219_s6 = sld [smem:[#allocation2 + $0x36]] }
 0x293   :  { %1136 = vrot.lane.b32.xlu1 %v4915_v54, %s8293_s7 }
 0x294   :  { %1138 = vrot.lane.b32.xlu0 %v4918_v52, %s8293_s7  ;;  %s5198_s7 = sld [smem:[#allocation2 + $0x5]] }
 0x296   :  { %v5340_v27 = vstv %s5219_s6  ;;  %s5366_s6 = sld [smem:[#allocation2 + $0x9]] }
 0x297   :  { %1183 = vrot.lane.b32.xlu1 %v4915_v54, %s8291_s2  ;;  %8753 = vst [vmem:[#allocation45_spill] sm:$0xff] %v5340_v27 }
 0x298   :  { %1185 = vrot.lane.b32.xlu0 %v4918_v52, %s8291_s2  ;;  %s5196_s2 = sld [smem:[#allocation2 + $0x35]] }
 0x29a   :  { %v5335_v7 = vstv %s5198_s7  ;;  %s5351_s7 = sld [smem:[#allocation2 + $0x39]] }
 0x29b   :  { %1230 = vrot.lane.b32.xlu1 %v4915_v54, %s8287_s12  ;;  %8752 = vst [vmem:[#allocation44_spill] sm:$0xff] %v5335_v7  ;;  %v913_v7 = vrot.slane %v909_v4, %v4852_v28 }
 0x29c   :  { %1232 = vrot.lane.b32.xlu0 %v4918_v52, %s8287_s12  ;;  %s8289_s12 = smov 14   ;;  %v5491_v19 = vstv %s5366_s6  ;;  %s5543_s6 = sld [smem:[#allocation2 + $0x3f]] }
 0x29d   :  { %8771 = vst [vmem:[#allocation62_spill] sm:$0xff] %v5491_v19  ;;  %v917_v19 = vrot.slane %v909_v4, %v5102_v46  ;;  %v5536_v4 = vrot.slane %v870_v58, %v4852_v28  ;;  %v5550_v1 = vrot.slane %v913_v7, %v4852_v28 }
 0x29e   :  { %v5332_v60 = vstv %s5196_s2  ;;  %s5349_s2 = sld [smem:[#allocation2 + $0x8]] }
 0x29f   :  { %1277 = vrot.lane.b32.xlu1 %v4915_v54, %s8289_s12  ;;  %8751 = vst [vmem:[#allocation43_spill] sm:$0xff] %v5332_v60  ;;  %8778 = vst [vmem:[#allocation69_spill] sm:$0xff] %v5536_v4  ;;  %v5566_v7 = vrot.slane %v917_v19, %v4852_v28  ;;  %v1097_v19 = vsel %vm1096_vm13, 1, %v8759_v36 }
 0x2a0   :  { %1279 = vrot.lane.b32.xlu0 %v4918_v52, %s8289_s12  ;;  %s5190_s12 = sld [smem:[#allocation2 + $0x4]]  ;;  %v5482_v35 = vstv %s5351_s7  ;;  %s5541_s7 = sld [smem:[#allocation2 + $0xe]]  ;;  %8779 = vst [vmem:[#allocation70_spill] sm:$0xff] %v5550_v1  ;;  %vm1237_vm13 = vmand %vm5079_vm11, %vm5192_vm0 }
 0x2a1   :  { %8769 = vst [vmem:[#allocation60_spill] sm:$0xff] %v5482_v35  ;;  %v5524_v35 = vrot.slane %v823_v5, %v4852_v28  ;;  %v5553_v5 = vstv %s5433_s1  ;;  %8781 = vst [vmem:[#allocation72_spill] sm:$0xff] %v5566_v7  ;;  %s8368_s1 = smov 125  }
 0x2a2   :  { %8780 = vst [vmem:[#allocation71_spill] sm:$0xff] %v5553_v5  ;;  %v5569_v5 = vstv %s5452_s10  ;;  %s5628_s10 = sld [smem:[#allocation2 + $0x41]] }
 0x2a3   :  { %1324 = vrot.lane.b32.xlu1 %v4915_v54, %s4605_s8  ;;  %8774 = vst [vmem:[#allocation65_spill] sm:$0xff] %v5524_v35  ;;  %8782 = vst [vmem:[#allocation73_spill] sm:$0xff] %v5569_v5 }
 0x2a4   :  { %1326 = vrot.lane.b32.xlu0 %v4918_v52, %s4605_s8  ;;  %v5479_v3 = vstv %s5349_s2  ;;  %s5521_s2 = sld [smem:[#allocation2 + $0x3e]] }
 0x2a5   :  { %8768 = vst [vmem:[#allocation59_spill] sm:$0xff] %v5479_v3  ;;  %v1003_v3 = vsel %vm1002_vm10, 1, %v8759_v36  ;;  %vm1190_vm10 = vmand %vm5079_vm11, %vm5053_vm14 }
 0x2a6   :  { %v5329_v48 = vstv %s5190_s12  ;;  %s4607_s12 = smov 2   ;;  %v1007_v58 = vrot.slane %v1003_v3, %v4852_v28  ;;  %v1011_v29 = vrot.slane %v1003_v3, %v5102_v46  ;;  %v1532_v3 = vsel %vm1530_vm1, %v4915_v54, 0.0 }
 0x2a7   :  { %1371 = vrot.lane.b32.xlu1 %v4915_v54, %s4606_s11  ;;  %8750 = vst [vmem:[#allocation42_spill] sm:$0xff] %v5329_v48  ;;  %v1050_v48 = vsel %vm1049_vm4, 1, %v8759_v36  ;;  %vm8790_vm4 = vcmp.eq.s32.totalorder %v5201_v30, 1  ;;  %v1540_v16 = vmul.f32 %v5222_v45, %v1532_v3  ;;  %v5650_v18 = vstv %s5541_s7  ;;  %s5698_s7 = sld [smem:[#allocation2 + $0x12]] }
 0x2a8   :  { %1373 = vrot.lane.b32.xlu0 %v4918_v52, %s4606_s11  ;;  %v1054_v1 = vrot.slane %v1050_v48, %v4852_v28  ;;  %v1058_v4 = vrot.slane %v1050_v48, %v5102_v46  ;;  %v1144_v48 = vsel %vm1143_vm5, 1, %v8759_v36  ;;  %v5608_v7 = vrot.slane %v1007_v58, %v4852_v28  ;;  %8794 = vst [vmem:[#allocation84_spill] sm:$0xff] %v5650_v18  ;;  %vm8796_vm5 = vmmov %vm8790_vm4 }
 0x2a9   :  { %v5611_v20 = vrot.slane %v1011_v29, %v4852_v28  ;;  %v1533_v13 = vsel %vm8790_vm4, %v4918_v52, 0.0  ;;  %v1101_v29 = vrot.slane %v1097_v19, %v4852_v28  ;;  %v1148_v10 = vrot.slane %v1144_v48, %v4852_v28 }
 0x2aa   :  { %8788 = vst [vmem:[#allocation79_spill] sm:$0xff] %v5608_v7  ;;  %v5622_v58 = vstv %s5521_s2  ;;  %v5636_v7 = vrot.slane %v1054_v1, %v4852_v28  ;;  %v1541_v1 = vmul.f32 %v5222_v45, %v1533_v13  ;;  %v1537_v14 = vmul.f32 %v5204_v33, %v1533_v13  ;;  %s5680_s2 = sld [smem:[#allocation2 + $0x42]] }
 0x2ab   :  { %1418 = vrot.lane.b32.xlu1 %v4915_v54, %s4607_s12  ;;  %8789 = vst [vmem:[#allocation80_spill] sm:$0xff] %v5611_v20  ;;  %8791 = vst [vmem:[#allocation81_spill] sm:$0xff] %v5622_v58  ;;  %v1536_v20 = vmul.f32 %v5204_v33, %v1532_v3  ;;  %v5639_v58 = vrot.slane %v1058_v4, %v4852_v28  ;;  %v5653_v3 = vstv %s5543_s6  ;;  %v3550_v4 = vsel %vm8796_vm5, %v5235_v50, 0.0  ;;  %s5700_s6 = sld [smem:[#allocation2 + $0x43]] }
 0x2ac   :  { %1420 = vrot.lane.b32.xlu0 %v4918_v52, %s4607_s12  ;;  %8792 = vst [vmem:[#allocation82_spill] sm:$0xff] %v5636_v7  ;;  %8795 = vst [vmem:[#allocation85_spill] sm:$0xff] %v5653_v3  ;;  %v1191_v7 = vsel %vm1190_vm10, 1, %v8759_v36  ;;  %v5675_v30 = vrot.slane %v1101_v29, %v4852_v28  ;;  %v1238_v13 = vsel %vm1237_vm13, 1, %v8759_v36  ;;  %v5690_v50 = vstv %s5588_s16  ;;  %s5712_s16 = sld [smem:[#allocation2 + $0x13]] }
 0x2ad   :  { %8793 = vst [vmem:[#allocation83_spill] sm:$0xff] %v5639_v58  ;;  %v1152_v58 = vrot.slane %v1144_v48, %v5102_v46  ;;  %8799 = vst [vmem:[#allocation88_spill] sm:$0xff] %v5690_v50  ;;  %v5693_v18 = vstv %s5590_s27  ;;  %v5696_v29 = vrot.slane %v1148_v10, %v4852_v28  ;;  %v1195_v3 = vrot.slane %v1191_v7, %v4852_v28  ;;  %s5714_s27 = sld [smem:[#allocation2 + $0x44]] }
 0x2ae   :  { %8797 = vst [vmem:[#allocation86_spill] sm:$0xff] %v5675_v30  ;;  %8800 = vst [vmem:[#allocation89_spill] sm:$0xff] %v5693_v18  ;;  %v1242_v18 = vrot.slane %v1238_v13, %v4852_v28  ;;  %v1246_v50 = vrot.slane %v1238_v13, %v5102_v46  ;;  %v5769_v30 = vstv %s5661_s13  ;;  %s5811_s13 = sld [smem:[#allocation2 + $0x46]]  ;;  %vm8822_vm5 = vcmp.lt.s32.totalorder %v4810_v61, 50 }
 0x2af   :  { %1465 = vrot.lane.b32.xlu1 %v4915_v54, %s8325_s9  ;;  %8801 = vst [vmem:[#allocation90_spill] sm:$0xff] %v5696_v29  ;;  %vm1331_vm13 = vmand %vm5079_vm11, %vm5174_vm8  ;;  %vm8419_vm4 = vcmp.eq.s32.totalorder %v5295_v21, 1 }
 0x2b0   :  { %1467 = vrot.lane.b32.xlu0 %v4918_v52, %s8325_s9  ;;  %s5485_s9 = sld [smem:[#allocation2 + $0xd]]  ;;  %vm1378_vm10 = vmand %vm5020_vm9, %vm5058_vm15  ;;  %8809 = vst [vmem:[#allocation98_spill] sm:$0xff] %v5769_v30 }
 0x2b2   :  { %v5819_v30 = vstv %s5712_s16  ;;  %s4615_s16 = smov 111  }
 0x2b3   :  { %1552 = vrot.lane.b32.xlu1 %v4915_v54, %s4584_s0  ;;  %8819 = vst [vmem:[#allocation108_spill] sm:$0xff] %v5819_v30 }
 0x2b4   :  { %1554 = vrot.lane.b32.xlu0 %v4918_v52, %s4584_s0 }
 0x2b6   :  { %v5599_v5 = vstv %s5485_s9  ;;  %s5626_s9 = sld [smem:[#allocation2 + $0x10]] }
 0x2b7   :  { %1599 = vrot.lane.b32.xlu1 %v4915_v54, %s4609_s15  ;;  %8787 = vst [vmem:[#allocation78_spill] sm:$0xff] %v5599_v5  ;;  %v1105_v5 = vrot.slane %v1097_v19, %v5102_v46  ;;  %v3549_v19 = vsel %vm1530_vm1, %v5225_v6, 0.0  ;;  %vm1284_vm1 = vmand %vm5079_vm11, %vm5268_vm6  ;;  %v1544_v6 = vrot.slane %v1540_v16, 1  ;;  %vm8821_vm11 = vcmp.lt.s32.totalorder %v4810_v61, 51 }
 0x2b8   :  { %1601 = vrot.lane.b32.xlu0 %v4918_v52, %s4609_s15  ;;  %v3557_v16 = vmul.f32 %v3549_v19, %v5222_v45  ;;  %v1285_v10 = vsel %vm1284_vm1, 1, %v8759_v36  ;;  %vm8411_vm1 = vcmp.eq.s32.totalorder %v5298_v31, 1 }
 0x2b9   :  { %v5678_v48 = vrot.slane %v1105_v5, %v4852_v28  ;;  %v3558_v5 = vmul.f32 %v3550_v4, %v5222_v45  ;;  %v1545_v45 = vrot.slane %v1541_v1, 1  ;;  %v5726_v12 = vadd.f32 %v1544_v6, %v1536_v20 }
 0x2ba   :  { %v3553_v6 = vmul.f32 %v3549_v19, %v5204_v33  ;;  %v3561_v20 = vrot.slane %v3557_v16, 1  ;;  %v1289_v13 = vrot.slane %v1285_v10, %v4852_v28  ;;  %v5760_v19 = vrot.slane %v1195_v3, %v4852_v28 }
 0x2bb   :  { %1646 = vrot.lane.b32.xlu1 %v4915_v54, %s8368_s1  ;;  %8798 = vst [vmem:[#allocation87_spill] sm:$0xff] %v5678_v48  ;;  %v1199_v48 = vrot.slane %v1191_v7, %v5102_v46  ;;  %v5722_v7 = vrot.slane %v1152_v58, %v4852_v28  ;;  %8803 = vst [vmem:[#allocation92_spill] sm:$0xff] %v5726_v12  ;;  %v5738_v58 = vstv %s5628_s10  ;;  %v1332_v12 = vsel %vm1331_vm13, 1, %v8759_v36  ;;  %s5783_s10 = sld [smem:[#allocation2 + $0x15]] }
 0x2bc   :  { %1648 = vrot.lane.b32.xlu0 %v4918_v52, %s8368_s1  ;;  %v5735_v1 = vstv %s5626_s9  ;;  %8805 = vst [vmem:[#allocation94_spill] sm:$0xff] %v5738_v58  ;;  %s5740_s1 = sld [smem:[#allocation2 + $0x14]]  ;;  %s5755_s9 = sld [smem:[#allocation2 + $0x45]]  ;;  %v3554_v58 = vmul.f32 %v3550_v4, %v5204_v33  ;;  %8806 = vst [vmem:[#allocation95_spill] sm:$0xff] %v5760_v19  ;;  %v1293_v39 = vrot.slane %v1285_v10, %v5102_v46  ;;  %v1379_v3 = vsel %vm1378_vm10, 1, %v8759_v36 }
 0x2bd   :  { %8802 = vst [vmem:[#allocation91_spill] sm:$0xff] %v5722_v7  ;;  %8804 = vst [vmem:[#allocation93_spill] sm:$0xff] %v5735_v1  ;;  %v3562_v1 = vrot.slane %v3558_v5, 1  ;;  %v5763_v16 = vrot.slane %v1199_v48, %v4852_v28  ;;  %v5766_v32 = vadd.f32 %v1545_v45, %v1537_v14  ;;  %v5772_v33 = vrot.slane %v1242_v18, %v4852_v28 }
 0x2be   :  { %v5775_v4 = vrot.slane %v1246_v50, %v4852_v28  ;;  %v5792_v18 = vstv %s5680_s2  ;;  %v1336_v50 = vrot.slane %v1332_v12, %v4852_v28  ;;  %v1340_v14 = vrot.slane %v1332_v12, %v5102_v46  ;;  %vm1425_vm10 = vmand %vm5020_vm9, %vm5117_vm3  ;;  %s5825_s2 = sld [smem:[#allocation2 + $0x16]] }
 0x2bf   :  { %1693 = vrot.lane.b32.xlu1 %v4915_v54, %s8366_s14  ;;  %8807 = vst [vmem:[#allocation96_spill] sm:$0xff] %v5763_v16  ;;  %8808 = vst [vmem:[#allocation97_spill] sm:$0xff] %v5766_v32  ;;  %v5800_v48 = vadd.f32 %v3561_v20, %v3553_v6  ;;  %v5803_v5 = vstv %s5698_s7  ;;  %v5806_v10 = vstv %s5700_s6  ;;  %v5809_v45 = vrot.slane %v1289_v13, %v4852_v28  ;;  %s4614_s7 = smov 112   ;;  %s5860_s6 = sld [smem:[#allocation2 + $0x47]] }
 0x2c0   :  { %1695 = vrot.lane.b32.xlu0 %v4918_v52, %s8366_s14  ;;  %s8377_s14 = smov 114   ;;  %8810 = vst [vmem:[#allocation99_spill] sm:$0xff] %v5772_v33  ;;  %8811 = vst [vmem:[#allocation100_spill] sm:$0xff] %v5775_v4  ;;  %v5813_v23 = vadd.f32 %v3562_v1, %v3554_v58  ;;  %v5822_v6 = vstv %s5714_s27  ;;  %v1383_v20 = vrot.slane %v1379_v3, %v4852_v28  ;;  %s4616_s27 = smov 110  }
 0x2c1   :  { %8812 = vst [vmem:[#allocation101_spill] sm:$0xff] %v5792_v18  ;;  %8813 = vst [vmem:[#allocation102_spill] sm:$0xff] %v5800_v48  ;;  %v5816_v18 = vrot.slane %v1293_v39, %v4852_v28  ;;  %v1387_v13 = vrot.slane %v1379_v3, %v5102_v46  ;;  %v1426_v39 = vsel %vm1425_vm10, 1, %v8759_v36  ;;  %v5852_v3 = vrot.slane %v1336_v50, %v4852_v28 }
 0x2c2   :  { %8814 = vst [vmem:[#allocation103_spill] sm:$0xff] %v5803_v5  ;;  %8815 = vst [vmem:[#allocation104_spill] sm:$0xff] %v5806_v10  ;;  %v5855_v48 = vrot.slane %v1340_v14, %v4852_v28  ;;  %v5858_v49 = vstv %s5740_s1  ;;  %v5868_v30 = vstv %s5755_s9  ;;  %s5876_s1 = sld [smem:[#allocation2 + $0x17]]  ;;  %vm8833_vm10 = vcmp.eq.s32.totalorder %v5310_v37, 1  ;;  %s4617_s9 = smov 109  }
 0x2c3   :  { %1740 = vrot.lane.b32.xlu1 %v4915_v54, %s8377_s14  ;;  %8816 = vst [vmem:[#allocation105_spill] sm:$0xff] %v5809_v45  ;;  %8817 = vst [vmem:[#allocation106_spill] sm:$0xff] %v5813_v23 }
 0x2c4   :  { %1742 = vrot.lane.b32.xlu0 %v4918_v52, %s8377_s14  ;;  %s4613_s14 = smov 113   ;;  %8818 = vst [vmem:[#allocation107_spill] sm:$0xff] %v5816_v18  ;;  %8820 = vst [vmem:[#allocation109_spill] sm:$0xff] %v5822_v6  ;;  %v5891_v6 = vrot.slane %v1387_v13, %v4852_v28 }
 0x2c5   :  { %v359_v29 = vpop.permute.xlu1 %358  ;;  %vm8823_vm13 = vmmov %vm8822_vm5  ;;  %8824 = vst [vmem:[#allocation110_spill] sm:$0xff] %v5852_v3 }
 0x2c6   :  { %v361_v7 = vpop.permute.xlu0 %360  ;;  %8825 = vst [vmem:[#allocation111_spill] sm:$0xff] %v5855_v48  ;;  %8826 = vst [vmem:[#allocation112_spill] sm:$0xff] %v5858_v49 }
 0x2c7   :  { %1787 = vrot.lane.b32.xlu1 %v4915_v54, %s4613_s14  ;;  %v364_v1 = vsel %vm8821_vm11, %v361_v7, %v359_v29  ;;  %8828 = vst [vmem:[#allocation113_spill] sm:$0xff] %v5868_v30  ;;  %8834 = vst [vmem:[#allocation115_spill] sm:$0xff] %v5891_v6 }
 0x2c8   :  { %1789 = vrot.lane.b32.xlu0 %v4918_v52, %s4613_s14 }
 0x2c9   :  { %v408_v12 = vpop.permute.xlu1 %407 }
 0x2ca   :  { %v410_v32 = vpop.permute.xlu0 %409 }
 0x2cb   :  { %v413_v58 = vsel %vm8822_vm5, %v410_v32, %v408_v12  ;;  %v412_v23 = vsel %vm8823_vm13, %v408_v12, %v410_v32  ;;  %1834 = vrot.lane.b32.xlu1 %v4915_v54, %s4614_s7  ;;  %v363_v32 = vsel %vm8821_vm11, %v359_v29, %v361_v7  ;;  %vm8827_vm13 = vcmp.eq.s32.totalorder %v5292_v59, 1  ;;  %vm8829_vm5 = vmand %vm5020_vm9, %vm5166_vm7 }
 0x2cc   :  { %1836 = vrot.lane.b32.xlu0 %v4918_v52, %s4614_s7  ;;  %v438_v12 = vsel %vm8827_vm13, %v413_v58, 0.0  ;;  %v1473_v50 = vsel %vm8829_vm5, 1, %v8759_v36  ;;  %vm8830_vm11 = vcmp.eq.s32.totalorder %v5207_v44, 1  ;;  %v5881_v7 = vrot.slane %v1383_v20, %v4852_v28 }
 0x2cd   :  { %v459_v49 = vpop.permute.xlu1 %458  ;;  %v389_v29 = vsel %vm8830_vm11, %v364_v1, 0.0  ;;  %v1430_v58 = vrot.slane %v1426_v39, %v4852_v28  ;;  %v1434_v59 = vrot.slane %v1426_v39, %v5102_v46  ;;  %vm8832_vm13 = vcmp.lt.s32.totalorder %v4810_v61, 49 }
 0x2ce   :  { %v461_v14 = vpop.permute.xlu0 %460  ;;  %8831 = vst [vmem:[#allocation114_spill] sm:$0xff] %v5881_v7  ;;  %v439_v25 = vsel %vm8833_vm10, %v412_v23, 0.0  ;;  %v5894_v1 = vstv %s5783_s10  ;;  %vm8836_vm11 = vmmov %vm8832_vm13  ;;  %v446_v13 = vmul.f32 %v5257_v63, %v438_v12  ;;  %v1477_v39 = vrot.slane %v1473_v50, %v4852_v28  ;;  %s4618_s10 = smov 99  }
 0x2cf   :  { %v464_v30 = vsel %vm8832_vm13, %v461_v14, %v459_v49  ;;  %8835 = vst [vmem:[#allocation116_spill] sm:$0xff] %v5894_v1  ;;  %v463_v20 = vsel %vm8836_vm11, %v459_v49, %v461_v14  ;;  %1881 = vrot.lane.b32.xlu1 %v4915_v54, %s4615_s16  ;;  %vm8837_vm13 = vcmp.eq.s32.totalorder %v5210_v34, 1  ;;  %v397_v37 = vmul.f32 %v5242_v55, %v389_v29 }
 0x2d0   :  { %1883 = vrot.lane.b32.xlu0 %v4918_v52, %s4615_s16  ;;  %v390_v23 = vsel %vm8837_vm13, %v363_v32, 0.0  ;;  %vm8838_vm11 = vcmp.eq.s32.totalorder %v5377_v51, 1  ;;  %v5912_v14 = vstv %s5811_s13  ;;  %v1481_v44 = vrot.slane %v1473_v50, %v5102_v46  ;;  %s5993_s13 = sld [smem:[#allocation2 + $0x48]] }
 0x2d1   :  { %v489_v49 = vsel %vm8838_vm11, %v464_v30, 0.0  ;;  %8839 = vst [vmem:[#allocation117_spill] sm:$0xff] %v5912_v14  ;;  %v510_v5 = vpop.permute.xlu1 %509  ;;  %v447_v32 = vmul.f32 %v5257_v63, %v439_v25  ;;  %v5918_v34 = vrot.slane %v1430_v58, %v4852_v28  ;;  %v5921_v10 = vrot.slane %v1434_v59, %v4852_v28 }
 0x2d2   :  { %v512_v1 = vpop.permute.xlu0 %511  ;;  %v5924_v30 = vstv %s5825_s2  ;;  %vm8843_vm11 = vcmp.lt.s32.totalorder %v4810_v61, 48  ;;  %v398_v14 = vmul.f32 %v5242_v55, %v390_v23  ;;  %vm8845_vm10 = vcmp.eq.s32.totalorder %v5380_v9, 1  ;;  %s4619_s2 = smov 98  }
 0x2d3   :  { %8840 = vst [vmem:[#allocation118_spill] sm:$0xff] %v5918_v34  ;;  %8841 = vst [vmem:[#allocation119_spill] sm:$0xff] %v5921_v10  ;;  %v514_v51 = vsel %vm8843_vm11, %v510_v5, %v512_v1  ;;  %v490_v63 = vsel %vm8845_vm10, %v463_v20, 0.0  ;;  %1928 = vrot.lane.b32.xlu1 %v4915_v54, %s4616_s27  ;;  %vm8420_vm13 = vcmp.lt.s32.totalorder %v4810_v61, 45  ;;  %v450_v59 = vrot.slane %v446_v13, 1 }
 0x2d4   :  { %8842 = vst [vmem:[#allocation120_spill] sm:$0xff] %v5924_v30  ;;  %vm8844_vm5 = vmmov %vm8843_vm11  ;;  %1930 = vrot.lane.b32.xlu0 %v4918_v52, %s4616_s27  ;;  %v497_v58 = vmul.f32 %v5277_v24, %v489_v49  ;;  %v5940_v30 = vstv %s5860_s6  ;;  %v442_v20 = vmul.f32 %v5246_v57, %v438_v12  ;;  %v5948_v9 = vrot.slane %v1481_v44, %v4852_v28  ;;  %s8456_s6 = smov 97  }
 0x2d5   :  { %v515_v50 = vsel %vm8844_vm5, %v512_v1, %v510_v5  ;;  %8846 = vst [vmem:[#allocation121_spill] sm:$0xff] %v5940_v30  ;;  %v5943_v5 = vrot.slane %v1477_v39, %v4852_v28  ;;  %v401_v1 = vrot.slane %v397_v37, 1  ;;  %v5951_v55 = vstv %s5876_s1  ;;  %v561_v34 = vpop.permute.xlu1 %560  ;;  %s8449_s1 = smov 96  }
 0x2d6   :  { %8848 = vst [vmem:[#allocation123_spill] sm:$0xff] %v5948_v9  ;;  %8849 = vst [vmem:[#allocation124_spill] sm:$0xff] %v5951_v55  ;;  %v563_v10 = vpop.permute.xlu0 %562  ;;  %v451_v13 = vrot.slane %v447_v32, 1  ;;  %v498_v6 = vmul.f32 %v5277_v24, %v490_v63  ;;  %v540_v30 = vsel %vm8419_vm4, %v515_v50, 0.0  ;;  %v541_v37 = vsel %vm8411_vm1, %v514_v51, 0.0 }
 0x2d7   :  { %8847 = vst [vmem:[#allocation122_spill] sm:$0xff] %v5943_v5  ;;  %vm8850_vm11 = vcmp.lt.s32.totalorder %v4810_v61, 47  ;;  %v393_v39 = vmul.f32 %v5213_v42, %v389_v29  ;;  %v402_v55 = vrot.slane %v398_v14, 1  ;;  %1975 = vrot.lane.b32.xlu1 %v4915_v54, %s4617_s9  ;;  %v443_v51 = vmul.f32 %v5246_v57, %v439_v25 }
 0x2d8   :  { %v565_v12 = vsel %vm8850_vm11, %v561_v34, %v563_v10  ;;  %vm8851_vm5 = vmmov %vm8850_vm11  ;;  %1977 = vrot.lane.b32.xlu0 %v4918_v52, %s4617_s9  ;;  %v454_v32 = vadd.f32 %v450_v59, %v442_v20  ;;  %v501_v50 = vrot.slane %v497_v58, 1  ;;  %vm8852_vm11 = vcmp.eq.s32.totalorder %v5411_v2, 1 }
 0x2d9   :  { %v566_v44 = vsel %vm8851_vm5, %v563_v10, %v561_v34  ;;  %v394_v34 = vmul.f32 %v5213_v42, %v390_v23  ;;  %v405_v10 = vadd.f32 %v401_v1, %v393_v39  ;;  %v548_v29 = vmul.f32 %v5283_v43, %v540_v30  ;;  %v612_v24 = vpop.permute.xlu1 %611 }
 0x2da   :  { %v591_v31 = vsel %vm8852_vm11, %v566_v44, 0.0  ;;  %v549_v14 = vmul.f32 %v5283_v43, %v541_v37  ;;  %v614_v21 = vpop.permute.xlu0 %613  ;;  %v455_v9 = vadd.f32 %v451_v13, %v443_v51  ;;  %v493_v5 = vmul.f32 %v5266_v11, %v489_v49 }
 0x2db   :  { %v502_v7 = vrot.slane %v498_v6, 1  ;;  %vm8853_vm5 = vcmp.eq.s32.totalorder %v5424_v8, 1  ;;  %vm8854_vm4 = vcmp.lt.s32.totalorder %v4810_v61, 46  ;;  %v406_v58 = vadd.f32 %v402_v55, %v394_v34  ;;  %2022 = vrot.lane.b32.xlu1 %v4915_v54, %s4618_s10 }
 0x2dc   :  { %v592_v25 = vsel %vm8853_vm5, %v565_v12, 0.0  ;;  %v616_v59 = vsel %vm8854_vm4, %v612_v24, %v614_v21  ;;  %vm8855_vm11 = vmmov %vm8854_vm4  ;;  %v599_v1 = vmul.f32 %v5332_v60, %v591_v31  ;;  %2024 = vrot.lane.b32.xlu0 %v4918_v52, %s4618_s10  ;;  %v456_v6 = vadd.f32 %v454_v32, %v405_v10 }
 0x2dd   :  { %v617_v23 = vsel %vm8855_vm11, %v614_v21, %v612_v24  ;;  %v494_v49 = vmul.f32 %v5266_v11, %v490_v63  ;;  %v505_v24 = vadd.f32 %v501_v50, %v493_v5  ;;  %vm8856_vm4 = vcmp.eq.s32.totalorder %v5476_v26, 1  ;;  %v663_v39 = vpop.permute.xlu1 %662 }
 0x2de   :  { %v642_v55 = vsel %vm8856_vm4, %v617_v23, 0.0  ;;  %v552_v21 = vrot.slane %v548_v29, 1  ;;  %v553_v20 = vrot.slane %v549_v14, 1  ;;  %v600_v13 = vmul.f32 %v5332_v60, %v592_v25  ;;  %v665_v44 = vpop.permute.xlu0 %664  ;;  %vm1559_vm4 = vmand %vm5020_vm9, %vm5192_vm0 }
 0x2df   :  { %vm8857_vm11 = vcmp.eq.s32.totalorder %v5488_v41, 1  ;;  %v457_v63 = vadd.f32 %v455_v9, %v406_v58  ;;  %v506_v5 = vadd.f32 %v502_v7, %v494_v49  ;;  %v544_v51 = vmul.f32 %v5280_v56, %v540_v30  ;;  %2069 = vrot.lane.b32.xlu1 %v4915_v54, %s4619_s2  ;;  %v8858_v7 = vld [vmem:[#allocation42_spill] sm:$0xff]  ;;  %v8861_v49 = vld [vmem:[#allocation63_spill] sm:$0xff] }
 0x2e0   :  { %v643_v12 = vsel %vm8857_vm11, %v616_v59, 0.0  ;;  %v650_v32 = vmul.f32 %v5340_v27, %v642_v55  ;;  %v667_v50 = vsel %vm8420_vm13, %v663_v39, %v665_v44  ;;  %v668_v34 = vsel %vm8420_vm13, %v665_v44, %v663_v39  ;;  %2071 = vrot.lane.b32.xlu0 %v4918_v52, %s4619_s2 }
 0x2e1   :  { %v545_v10 = vmul.f32 %v5280_v56, %v541_v37  ;;  %v603_v29 = vrot.slane %v599_v1, 1  ;;  %v507_v9 = vadd.f32 %v505_v24, %v456_v6  ;;  %v595_v30 = vmul.f32 %v8858_v7, %v591_v31  ;;  %v714_v39 = vpop.permute.xlu1 %713 }
 0x2e2   :  { %v651_v37 = vmul.f32 %v5340_v27, %v643_v12  ;;  %vm8859_vm13 = vcmp.eq.s32.totalorder %v5391_v0, 1  ;;  %v556_v59 = vadd.f32 %v552_v21, %v544_v51  ;;  %v604_v58 = vrot.slane %v600_v13, 1  ;;  %v716_v44 = vpop.permute.xlu0 %715  ;;  %v8868_v0 = vld [vmem:[#allocation69_spill] sm:$0xff] }
 0x2e3   :  { %v693_v14 = vsel %vm8859_vm13, %v668_v34, 0.0  ;;  %v557_v23 = vadd.f32 %v553_v20, %v545_v10  ;;  %vm8860_vm5 = vcmp.eq.s32.totalorder %v5415_v47, 1  ;;  %v508_v6 = vadd.f32 %v506_v5, %v457_v63  ;;  %2116 = vrot.lane.b32.xlu1 %v4915_v54, %s8456_s6  ;;  %v8867_v47 = vld [vmem:[#allocation66_spill] sm:$0xff] }
 0x2e4   :  { %v694_v1 = vsel %vm8860_vm5, %v667_v50, 0.0  ;;  %v596_v31 = vmul.f32 %v8858_v7, %v592_v25  ;;  %v654_v24 = vrot.slane %v650_v32, 1  ;;  %v6031_v21 = vsel %vm1559_vm4, 1, %v8759_v36  ;;  %v8864_v50 = vld [vmem:[#allocation49_spill] sm:$0xff]  ;;  %2118 = vrot.lane.b32.xlu0 %v4918_v52, %s8456_s6  ;;  %v8865_v25 = vld [vmem:[#allocation44_spill] sm:$0xff]  ;;  %s8461_s6 = smov 83  }
 0x2e5   :  { %vm8862_vm13 = vcmp.lt.s32.totalorder %v4810_v61, 35  ;;  %v607_v51 = vadd.f32 %v603_v29, %v595_v30  ;;  %v701_v63 = vmul.f32 %v8864_v50, %v693_v14  ;;  %v646_v5 = vmul.f32 %v8865_v25, %v642_v55  ;;  %v761_v41 = vpop.permute.xlu1 %760 }
 0x2e6   :  { %v718_v20 = vsel %vm8862_vm13, %v714_v39, %v716_v44  ;;  %vm8863_vm5 = vmmov %vm8862_vm13  ;;  %v655_v32 = vrot.slane %v651_v37, 1  ;;  %v702_v34 = vmul.f32 %v8864_v50, %v694_v1  ;;  %v6046_v10 = vstv %s5993_s13  ;;  %v763_v27 = vpop.permute.xlu0 %762  ;;  %s8435_s13 = smov 95  }
 0x2e7   :  { %v719_v13 = vsel %vm8863_vm5, %v716_v44, %v714_v39  ;;  %8866 = vst [vmem:[#allocation42_spill] sm:$0xff] %v6046_v10  ;;  %v558_v44 = vadd.f32 %v556_v59, %v507_v9  ;;  %v559_v29 = vadd.f32 %v557_v23, %v508_v6  ;;  %v608_v30 = vadd.f32 %v604_v58, %v596_v31 }
 0x2e8   :  { %v647_v39 = vmul.f32 %v8865_v25, %v643_v12  ;;  %vm8446_vm4 = vcmp.eq.s32.totalorder %v8867_v47, 1  ;;  %v658_v26 = vadd.f32 %v654_v24, %v646_v5  ;;  %vm8869_vm5 = vcmp.eq.s32.totalorder %v5428_v40, 1  ;;  %2165 = vrot.lane.b32.xlu0 %v4918_v52, %s8449_s1  ;;  %2163 = vrot.lane.b32.xlu1 %v4915_v54, %s8449_s1  ;;  %s6136_s1 = sld [smem:[#allocation2 + $0x19]] }
 0x2e9   :  { %v740_v55 = vsel %vm8869_vm5, %v719_v13, 0.0  ;;  %vm8870_vm1 = vcmp.eq.s32.totalorder %v5431_v53, 1  ;;  %v1564_v9 = vrot.slane %v6031_v21, %v4852_v28  ;;  %vm8871_vm10 = vcmp.lt.s32.totalorder %v4810_v61, 34  ;;  %v8878_v53 = vld [vmem:[#allocation72_spill] sm:$0xff] }
 0x2ea   :  { %v741_v37 = vsel %vm8870_vm1, %v718_v20, 0.0  ;;  %v765_v59 = vsel %vm8871_vm10, %v761_v41, %v763_v27  ;;  %vm8872_vm11 = vmmov %vm8871_vm10  ;;  %v609_v23 = vadd.f32 %v607_v51, %v558_v44  ;;  %v705_v58 = vrot.slane %v701_v63, 1  ;;  %v8876_v51 = vld [vmem:[#allocation55_spill] sm:$0xff]  ;;  %v8877_v44 = vld [vmem:[#allocation70_spill] sm:$0xff]  ;;  %v810_v40 = vpop.permute.xlu0 %809 }
 0x2eb   :  { %v766_v12 = vsel %vm8872_vm11, %v763_v27, %v761_v41  ;;  %v659_v6 = vadd.f32 %v655_v32, %v647_v39  ;;  %v706_v31 = vrot.slane %v702_v34, 1  ;;  %vm8873_vm5 = vcmp.eq.s32.totalorder %v5462_v15, 1  ;;  %v8875_v41 = vld [vmem:[#allocation48_spill] sm:$0xff]  ;;  %v808_v32 = vpop.permute.xlu1 %807 }
 0x2ec   :  { %v787_v24 = vsel %vm8873_vm5, %v766_v12, 0.0  ;;  %vm8874_vm10 = vcmp.eq.s32.totalorder %v5465_v62, 1  ;;  %v610_v27 = vadd.f32 %v608_v30, %v559_v29  ;;  %v697_v13 = vmul.f32 %v8875_v41, %v693_v14  ;;  %v8879_v12 = vld [vmem:[#allocation60_spill] sm:$0xff]  ;;  %2212 = vrot.lane.b32.xlu0 %v4918_v52, %s8435_s13  ;;  %2210 = vrot.lane.b32.xlu1 %v4915_v54, %s8435_s13  ;;  %s8447_s13 = smov 94  }
 0x2ed   :  { %v788_v20 = vsel %vm8874_vm10, %v765_v59, 0.0  ;;  %v748_v63 = vmul.f32 %v8876_v51, %v740_v55  ;;  %v749_v5 = vmul.f32 %v8876_v51, %v741_v37  ;;  %v660_v34 = vadd.f32 %v658_v26, %v609_v23  ;;  %v8885_v51 = vld [vmem:[#allocation77_spill] sm:$0xff] }
 0x2ee   :  { %v698_v39 = vmul.f32 %v8875_v41, %v694_v1  ;;  %v795_v15 = vmul.f32 %v8879_v12, %v787_v24  ;;  %vm8880_vm5 = vcmp.lt.s32.totalorder %v4810_v61, 33  ;;  %v709_v59 = vadd.f32 %v705_v58, %v697_v13  ;;  %v8884_v58 = vld [vmem:[#allocation54_spill] sm:$0xff]  ;;  %v857_v50 = vpop.permute.xlu0 %856 }
 0x2ef   :  { %v812_v14 = vsel %vm8880_vm5, %v808_v32, %v810_v40  ;;  %vm8881_vm10 = vmmov %vm8880_vm5  ;;  %v796_v62 = vmul.f32 %v8879_v12, %v788_v20  ;;  %vm8459_vm13 = vcmp.lt.s32.totalorder %v4810_v61, 30  ;;  %v661_v26 = vadd.f32 %v659_v6, %v610_v27  ;;  %v855_v41 = vpop.permute.xlu1 %854 }
 0x2f0   :  { %v813_v30 = vsel %vm8881_vm10, %v810_v40, %v808_v32  ;;  %v710_v1 = vadd.f32 %v706_v31, %v698_v39  ;;  %vm8882_vm11 = vcmp.eq.s32.totalorder %v8861_v49, 1  ;;  %vm8883_vm5 = vcmp.eq.s32.totalorder %v5524_v35, 1  ;;  %v8886_v31 = vld [vmem:[#allocation64_spill] sm:$0xff]  ;;  %2259 = vrot.lane.b32.xlu0 %v4918_v52, %s8447_s13  ;;  %2257 = vrot.lane.b32.xlu1 %v4915_v54, %s8447_s13  ;;  %v8893_v49 = vld [vmem:[#allocation79_spill] sm:$0xff]  ;;  %s8454_s13 = smov 93  }
 0x2f1   :  { %v834_v23 = vsel %vm8882_vm11, %v813_v30, 0.0  ;;  %v835_v40 = vsel %vm8883_vm5, %v812_v14, 0.0  ;;  %v744_v13 = vmul.f32 %v8884_v58, %v740_v55  ;;  %v745_v32 = vmul.f32 %v8884_v58, %v741_v37  ;;  %v8894_v58 = vld [vmem:[#allocation80_spill] sm:$0xff] }
 0x2f2   :  { %v752_v29 = vrot.slane %v748_v63, 1  ;;  %v753_v12 = vrot.slane %v749_v5, 1  ;;  %vm8458_vm10 = vcmp.eq.s32.totalorder %v5593_v22, 1  ;;  %v799_v6 = vrot.slane %v795_v15, 1  ;;  %v8890_v15 = vld [vmem:[#allocation59_spill] sm:$0xff]  ;;  %v904_v25 = vpop.permute.xlu0 %903 }
 0x2f3   :  { %v842_v27 = vmul.f32 %v8886_v31, %v834_v23  ;;  %v843_v39 = vmul.f32 %v8886_v31, %v835_v40  ;;  %v6100_v30 = vrot.slane %v1564_v9, %v4852_v28  ;;  %vm8888_vm11 = vcmp.lt.s32.totalorder %v4810_v61, 32 }
 0x2f4   :  { %v859_v55 = vsel %vm8888_vm11, %v855_v41, %v857_v50  ;;  %vm8889_vm5 = vmmov %vm8888_vm11  ;;  %v711_v63 = vadd.f32 %v709_v59, %v660_v34  ;;  %v800_v5 = vrot.slane %v796_v62, 1  ;;  %v791_v9 = vmul.f32 %v8890_v15, %v787_v24  ;;  %v8892_v34 = vld [vmem:[#allocation68_spill] sm:$0xff]  ;;  %v902_v24 = vpop.permute.xlu1 %901  ;;  %2306 = vrot.lane.b32.xlu0 %v4918_v52, %s8454_s13  ;;  %2304 = vrot.lane.b32.xlu1 %v4915_v54, %s8454_s13  ;;  %s6148_s13 = sld [smem:[#allocation2 + $0x4a]] }
 0x2f5   :  { %8887 = vst [vmem:[#allocation69_spill] sm:$0xff] %v6100_v30  ;;  %v860_v37 = vsel %vm8889_vm5, %v857_v50, %v855_v41  ;;  %v792_v14 = vmul.f32 %v8890_v15, %v788_v20  ;;  %vm8891_vm11 = vcmp.eq.s32.totalorder %v8868_v0, 1  ;;  %v756_v62 = vadd.f32 %v752_v29, %v744_v13  ;;  %v8897_v13 = vld [vmem:[#allocation62_spill] sm:$0xff] }
 0x2f6   :  { %v881_v31 = vsel %vm8446_vm4, %v860_v37, 0.0  ;;  %v882_v50 = vsel %vm8891_vm11, %v859_v55, 0.0  ;;  %v757_v41 = vadd.f32 %v753_v12, %v745_v32  ;;  %v712_v60 = vadd.f32 %v710_v1, %v661_v26 }
 0x2f7   :  { %v889_v59 = vmul.f32 %v8892_v34, %v881_v31  ;;  %v890_v35 = vmul.f32 %v8892_v34, %v882_v50  ;;  %v803_v20 = vadd.f32 %v799_v6, %v791_v9  ;;  %v846_v15 = vrot.slane %v842_v27, 1  ;;  %v8901_v9 = vld [vmem:[#allocation82_spill] sm:$0xff] }
 0x2f8   :  { %v847_v47 = vrot.slane %v843_v39, 1  ;;  %vm8895_vm4 = vcmp.lt.s32.totalorder %v4810_v61, 31  ;;  %v804_v29 = vadd.f32 %v800_v5, %v792_v14  ;;  %v838_v32 = vmul.f32 %v8897_v13, %v834_v23  ;;  %v8900_v39 = vld [vmem:[#allocation67_spill] sm:$0xff]  ;;  %2353 = vrot.lane.b32.xlu0 %v4918_v52, %s8461_s6  ;;  %2351 = vrot.lane.b32.xlu1 %v4915_v54, %s8461_s6  ;;  %s4626_s6 = smov 82  }
 0x2f9   :  { %v906_v37 = vsel %vm8895_vm4, %v902_v24, %v904_v25  ;;  %vm8896_vm11 = vmmov %vm8895_vm4  ;;  %v839_v26 = vmul.f32 %v8897_v13, %v835_v40  ;;  %v893_v1 = vrot.slane %v889_v59, 1  ;;  %vm8898_vm4 = vcmp.eq.s32.totalorder %v8877_v44, 1  ;;  %v8902_v14 = vld [vmem:[#allocation83_spill] sm:$0xff]  ;;  %v949_v40 = vpop.permute.xlu1 %948  ;;  %v8903_v44 = vld [vmem:[#allocation73_spill] sm:$0xff] }
 0x2fa   :  { %v907_v12 = vsel %vm8896_vm11, %v904_v25, %v902_v24  ;;  %vm8899_vm11 = vcmp.eq.s32.totalorder %v8878_v53, 1  ;;  %v758_v23 = vadd.f32 %v756_v62, %v711_v63  ;;  %v759_v27 = vadd.f32 %v757_v41, %v712_v60  ;;  %v951_v24 = vpop.permute.xlu0 %950  ;;  %v8905_v41 = vld [vmem:[#allocation75_spill] sm:$0xff] }
 0x2fb   :  { %v928_v6 = vsel %vm8898_vm4, %v907_v12, 0.0  ;;  %v929_v25 = vsel %vm8899_vm11, %v906_v37, 0.0  ;;  %v885_v55 = vmul.f32 %v8900_v39, %v881_v31  ;;  %v894_v5 = vrot.slane %v890_v35, 1 }
 0x2fc   :  { %vm8473_vm5 = vcmp.eq.s32.totalorder %v8901_v9, 1  ;;  %vm8472_vm1 = vcmp.eq.s32.totalorder %v8902_v14, 1  ;;  %v850_v59 = vadd.f32 %v846_v15, %v838_v32  ;;  %v851_v34 = vadd.f32 %v847_v47, %v839_v26  ;;  %2400 = vrot.lane.b32.xlu0 %v4918_v52, %s4626_s6  ;;  %2398 = vrot.lane.b32.xlu1 %v4915_v54, %s4626_s6  ;;  %v8939_v9 = vld [vmem:[#allocation93_spill] sm:$0xff] }
 0x2fd   :  { %v936_v12 = vmul.f32 %v8903_v44, %v928_v6  ;;  %v937_v53 = vmul.f32 %v8903_v44, %v929_v25  ;;  %v953_v37 = vsel %vm8459_vm13, %v949_v40, %v951_v24  ;;  %v954_v60 = vsel %vm8459_vm13, %v951_v24, %v949_v40 }
 0x2fe   :  { %v805_v31 = vadd.f32 %v803_v20, %v758_v23  ;;  %v886_v35 = vmul.f32 %v8900_v39, %v882_v50  ;;  %v806_v47 = vadd.f32 %v804_v29, %v759_v27  ;;  %v897_v63 = vadd.f32 %v893_v1, %v885_v55  ;;  %v998_v24 = vpop.permute.xlu0 %997  ;;  %v996_v29 = vpop.permute.xlu1 %995 }
 0x2ff   :  { %v975_v15 = vsel %vm8458_vm10, %v954_v60, 0.0  ;;  %vm8904_vm11 = vcmp.eq.s32.totalorder %v8885_v51, 1  ;;  %v8906_v26 = vrot.slane %v6031_v21, %v5102_v46  ;;  %v940_v55 = vrot.slane %v936_v12, 1  ;;  %v8908_v60 = vld [vmem:[#allocation86_spill] sm:$0xff] }
 0x300   :  { %v976_v62 = vsel %vm8904_vm11, %v953_v37, 0.0  ;;  %v898_v50 = vadd.f32 %v894_v5, %v886_v35  ;;  %v983_v20 = vmul.f32 %v8905_v41, %v975_v15  ;;  %v852_v1 = vadd.f32 %v850_v59, %v805_v31  ;;  %v8911_v35 = vld [vmem:[#allocation71_spill] sm:$0xff]  ;;  %v8916_v12 = vld [vmem:[#allocation74_spill] sm:$0xff] }
 0x301   :  { %v984_v32 = vmul.f32 %v8905_v41, %v976_v62  ;;  %v6165_v23 = vrot.slane %v8906_v26, %v4852_v28  ;;  %v853_v27 = vadd.f32 %v851_v34, %v806_v47  ;;  %v941_v40 = vrot.slane %v937_v53, 1  ;;  %v8912_v26 = vld [vmem:[#allocation87_spill] sm:$0xff] }
 0x302   :  { %vm8909_vm10 = vcmp.lt.s32.totalorder %v4810_v61, 29  ;;  %v932_v41 = vmul.f32 %v8911_v35, %v928_v6  ;;  %v933_v21 = vmul.f32 %v8911_v35, %v929_v25  ;;  %v899_v53 = vadd.f32 %v897_v63, %v852_v1  ;;  %v1045_v51 = vpop.permute.xlu0 %1044  ;;  %v1043_v22 = vpop.permute.xlu1 %1042  ;;  %v8918_v1 = vld [vmem:[#allocation81_spill] sm:$0xff] }
 0x303   :  { %8907 = vst [vmem:[#allocation62_spill] sm:$0xff] %v6165_v23  ;;  %v1000_v5 = vsel %vm8909_vm10, %v996_v29, %v998_v24  ;;  %vm8910_vm13 = vmmov %vm8909_vm10  ;;  %vm8913_vm10 = vcmp.eq.s32.totalorder %v8893_v49, 1  ;;  %v6185_v59 = vstv %s6136_s1  ;;  %v900_v25 = vadd.f32 %v898_v50, %v853_v27  ;;  %s8484_s1 = smov 81  }
 0x304   :  { %v1001_v37 = vsel %vm8910_vm13, %v998_v24, %v996_v29  ;;  %vm8914_vm13 = vcmp.eq.s32.totalorder %v8894_v58, 1  ;;  %8915 = vst [vmem:[#allocation125_spill] sm:$0xff] %v6185_v59  ;;  %v979_v31 = vmul.f32 %v8916_v12, %v975_v15  ;;  %v987_v47 = vrot.slane %v983_v20, 1  ;;  %v8917_v29 = vld [vmem:[#allocation90_spill] sm:$0xff]  ;;  %v8919_v58 = vld [vmem:[#allocation91_spill] sm:$0xff]  ;;  %2447 = vrot.lane.b32.xlu0 %v4918_v52, %s8484_s1  ;;  %2445 = vrot.lane.b32.xlu1 %v4915_v54, %s8484_s1  ;;  %s8493_s1 = smov 78  }
 0x305   :  { %v1022_v34 = vsel %vm8913_vm10, %v1001_v37, 0.0  ;;  %v1023_v6 = vsel %vm8914_vm13, %v1000_v5, 0.0  ;;  %v988_v24 = vrot.slane %v984_v32, 1  ;;  %v944_v35 = vadd.f32 %v940_v55, %v932_v41  ;;  %vm1606_vm10 = vmand %vm5020_vm9, %vm5268_vm6 }
 0x306   :  { %v945_v63 = vadd.f32 %v941_v40, %v933_v21  ;;  %v1030_v49 = vmul.f32 %v8918_v1, %v1022_v34  ;;  %v1031_v37 = vmul.f32 %v8918_v1, %v1023_v6  ;;  %vm8920_vm13 = vcmp.lt.s32.totalorder %v4810_v61, 19  ;;  %v8925_v21 = vld [vmem:[#allocation78_spill] sm:$0xff] }
 0x307   :  { %v1047_v5 = vsel %vm8920_vm13, %v1043_v22, %v1045_v51  ;;  %vm8921_vm11 = vmmov %vm8920_vm13  ;;  %v980_v50 = vmul.f32 %v8916_v12, %v976_v62  ;;  %v6198_v20 = vstv %s6148_s13  ;;  %v991_v55 = vadd.f32 %v987_v47, %v979_v31  ;;  %v8926_v12 = vld [vmem:[#allocation85_spill] sm:$0xff]  ;;  %s8476_s13 = smov 80  }
 0x308   :  { %v1048_v15 = vsel %vm8921_vm11, %v1045_v51, %v1043_v22  ;;  %8922 = vst [vmem:[#allocation126_spill] sm:$0xff] %v6198_v20  ;;  %vm2640_vm13 = vmand %vm5083_vm12, %vm5174_vm8  ;;  %v1034_v27 = vrot.slane %v1030_v49, 1  ;;  %v1035_v22 = vrot.slane %v1031_v37, 1  ;;  %v1070_v62 = vsel %vm8472_vm1, %v1047_v5, 0.0  ;;  %v1092_v49 = vpop.permute.xlu0 %1091  ;;  %v1090_v37 = vpop.permute.xlu1 %1089  ;;  %2494 = vrot.lane.b32.xlu0 %v4918_v52, %s8476_s13  ;;  %2492 = vrot.lane.b32.xlu1 %v4915_v54, %s8476_s13  ;;  %s8482_s13 = smov 79  }
 0x309   :  { %v1069_v51 = vsel %vm8473_vm5, %v1048_v15, 0.0  ;;  %v992_v40 = vadd.f32 %v988_v24, %v980_v50  ;;  %v1026_v1 = vmul.f32 %v8925_v21, %v1022_v34  ;;  %vm8492_vm11 = vcmp.eq.s32.totalorder %v5760_v19, 1  ;;  %v8945_v19 = vld [vmem:[#allocation101_spill] sm:$0xff] }
 0x30a   :  { %v1077_v44 = vmul.f32 %v8926_v12, %v1069_v51  ;;  %v6222_v15 = vsel %vm2640_vm13, 1, %v8759_v36  ;;  %v946_v31 = vadd.f32 %v944_v35, %v899_v53  ;;  %v947_v47 = vadd.f32 %v945_v63, %v900_v25  ;;  %v8930_v53 = vld [vmem:[#allocation84_spill] sm:$0xff] }
 0x30b   :  { %v1027_v34 = vmul.f32 %v8925_v21, %v1023_v6  ;;  %vm8928_vm1 = vcmp.lt.s32.totalorder %v4810_v61, 18  ;;  %v1038_v50 = vadd.f32 %v1034_v27, %v1026_v1  ;;  %v1078_v14 = vmul.f32 %v8926_v12, %v1070_v62 }
 0x30c   :  { %v1094_v24 = vsel %vm8928_vm1, %v1090_v37, %v1092_v49  ;;  %vm8929_vm5 = vmmov %vm8928_vm1  ;;  %v1073_v6 = vmul.f32 %v8930_v53, %v1069_v51  ;;  %v1081_v25 = vrot.slane %v1077_v44, 1  ;;  %v6242_v63 = vsel %vm1606_vm10, 1, %v8759_v36  ;;  %v1137_v44 = vpop.permute.xlu1 %1136  ;;  %2541 = vrot.lane.b32.xlu0 %v4918_v52, %s8482_s13  ;;  %2539 = vrot.lane.b32.xlu1 %v4915_v54, %s8482_s13  ;;  %s6281_s13 = sld [smem:[#allocation2 + $0x30]] }
 0x30d   :  { %v1095_v5 = vsel %vm8929_vm5, %v1092_v49, %v1090_v37  ;;  %v1039_v35 = vadd.f32 %v1035_v22, %v1027_v34  ;;  %v993_v1 = vadd.f32 %v991_v55, %v946_v31  ;;  %v994_v27 = vadd.f32 %v992_v40, %v947_v47  ;;  %v1139_v22 = vpop.permute.xlu0 %1138 }
 0x30e   :  { %v1082_v49 = vrot.slane %v1078_v14, 1  ;;  %vm8931_vm1 = vcmp.eq.s32.totalorder %v8908_v60, 1  ;;  %v1074_v34 = vmul.f32 %v8930_v53, %v1070_v62  ;;  %v1085_v12 = vadd.f32 %v1081_v25, %v1073_v6 }
 0x30f   :  { %v1116_v37 = vsel %vm8931_vm1, %v1095_v5, 0.0  ;;  %vm8932_vm10 = vcmp.eq.s32.totalorder %v8912_v26, 1  ;;  %vm8933_vm4 = vcmp.lt.s32.totalorder %v4810_v61, 17  ;;  %v2649_v31 = vrot.slane %v6222_v15, %v5102_v46  ;;  %v8935_v5 = vld [vmem:[#allocation88_spill] sm:$0xff] }
 0x310   :  { %v1117_v55 = vsel %vm8932_vm10, %v1094_v24, 0.0  ;;  %v1141_v14 = vsel %vm8933_vm4, %v1137_v44, %v1139_v22  ;;  %vm8934_vm1 = vmmov %vm8933_vm4  ;;  %v1040_v47 = vadd.f32 %v1038_v50, %v993_v1  ;;  %v1041_v62 = vadd.f32 %v1039_v35, %v994_v27  ;;  %v1184_v60 = vpop.permute.xlu1 %1183  ;;  %v8940_v27 = vld [vmem:[#allocation94_spill] sm:$0xff]  ;;  %2588 = vrot.lane.b32.xlu0 %v4918_v52, %s8493_s1  ;;  %2586 = vrot.lane.b32.xlu1 %v4915_v54, %s8493_s1  ;;  %s4631_s1 = smov 77  }
 0x311   :  { %v1142_v40 = vsel %vm8934_vm1, %v1139_v22, %v1137_v44  ;;  %v1086_v24 = vadd.f32 %v1082_v49, %v1074_v34  ;;  %v1120_v6 = vmul.f32 %v8935_v5, %v1116_v37  ;;  %vm8936_vm4 = vcmp.eq.s32.totalorder %v8917_v29, 1  ;;  %v8937_v44 = vld [vmem:[#allocation89_spill] sm:$0xff]  ;;  %v1186_v26 = vpop.permute.xlu0 %1185 }
 0x312   :  { %v1163_v25 = vsel %vm8936_vm4, %v1142_v40, 0.0  ;;  %v1087_v22 = vadd.f32 %v1085_v12, %v1040_v47  ;;  %v1124_v51 = vmul.f32 %v8937_v44, %v1116_v37  ;;  %v1125_v50 = vmul.f32 %v8937_v44, %v1117_v55 }
 0x313   :  { %vm8938_vm10 = vcmp.eq.s32.totalorder %v8919_v58, 1  ;;  %v1121_v53 = vmul.f32 %v8935_v5, %v1117_v55  ;;  %v1167_v35 = vmul.f32 %v8939_v9, %v1163_v25  ;;  %v1171_v49 = vmul.f32 %v8940_v27, %v1163_v25  ;;  %v8944_v5 = vld [vmem:[#allocation98_spill] sm:$0xff] }
 0x314   :  { %v1164_v1 = vsel %vm8938_vm10, %v1141_v14, 0.0  ;;  %vm8499_vm1 = vcmp.eq.s32.totalorder %v5809_v45, 1  ;;  %vm8941_vm13 = vcmp.lt.s32.totalorder %v4810_v61, 16  ;;  %v1128_v14 = vrot.slane %v1124_v51, 1  ;;  %v1231_v29 = vpop.permute.xlu1 %1230  ;;  %2635 = vrot.lane.b32.xlu0 %v4918_v52, %s4631_s1  ;;  %2633 = vrot.lane.b32.xlu1 %v4915_v54, %s4631_s1  ;;  %v8969_v45 = vld [vmem:[#allocation123_spill] sm:$0xff] }
 0x315   :  { %v1172_v34 = vmul.f32 %v8940_v27, %v1164_v1  ;;  %v1188_v12 = vsel %vm8941_vm13, %v1184_v60, %v1186_v26  ;;  %vm8942_vm5 = vmmov %vm8941_vm13  ;;  %v1129_v55 = vrot.slane %v1125_v50, 1  ;;  %vm8500_vm10 = vcmp.lt.s32.totalorder %v4810_v61, 13  ;;  %v1233_v58 = vpop.permute.xlu0 %1232 }
 0x316   :  { %v1189_v37 = vsel %vm8942_vm5, %v1186_v26, %v1184_v60  ;;  %v1175_v40 = vrot.slane %v1171_v49, 1  ;;  %vm8943_vm13 = vcmp.eq.s32.totalorder %v5763_v16, 1  ;;  %v1088_v26 = vadd.f32 %v1086_v24, %v1041_v62 }
 0x317   :  { %v1176_v47 = vrot.slane %v1172_v34, 1  ;;  %v1210_v25 = vsel %vm8492_vm11, %v1189_v37, 0.0  ;;  %v1211_v60 = vsel %vm8943_vm13, %v1188_v12, 0.0  ;;  %v1132_v51 = vadd.f32 %v1128_v14, %v1120_v6 }
 0x318   :  { %v1133_v50 = vadd.f32 %v1129_v55, %v1121_v53  ;;  %v1168_v27 = vmul.f32 %v8939_v9, %v1164_v1  ;;  %v1214_v49 = vmul.f32 %v8944_v5, %v1210_v25  ;;  %v1215_v34 = vmul.f32 %v8944_v5, %v1211_v60  ;;  %v8953_v55 = vld [vmem:[#allocation114_spill] sm:$0xff] }
 0x319   :  { %v1218_v37 = vmul.f32 %v8945_v19, %v1210_v25  ;;  %v1219_v16 = vmul.f32 %v8945_v19, %v1211_v60  ;;  %vm8946_vm13 = vcmp.lt.s32.totalorder %v4810_v61, 15  ;;  %v1179_v24 = vadd.f32 %v1175_v40, %v1167_v35  ;;  %v1280_v40 = vpop.permute.xlu0 %1279 }
 0x31a   :  { %v1235_v62 = vsel %vm8946_vm13, %v1231_v29, %v1233_v58  ;;  %vm8947_vm11 = vmmov %vm8946_vm13  ;;  %v1180_v6 = vadd.f32 %v1176_v47, %v1168_v27  ;;  %vm8948_vm5 = vcmp.eq.s32.totalorder %v5772_v33, 1  ;;  %vm8949_vm13 = vcmp.eq.s32.totalorder %v5775_v4, 1  ;;  %v1278_v47 = vpop.permute.xlu1 %1277 }
 0x31b   :  { %v1236_v53 = vsel %vm8947_vm11, %v1233_v58, %v1231_v29  ;;  %v1222_v1 = vrot.slane %v1218_v37, 1  ;;  %v1223_v12 = vrot.slane %v1219_v16, 1  ;;  %v1258_v58 = vsel %vm8949_vm13, %v1235_v62, 0.0  ;;  %v8954_v16 = vld [vmem:[#allocation115_spill] sm:$0xff]  ;;  %v8955_v37 = vld [vmem:[#allocation104_spill] sm:$0xff] }
 0x31c   :  { %v1257_v14 = vsel %vm8948_vm5, %v1236_v53, 0.0  ;;  %v8950_v29 = vrot.slane %v6222_v15, %v4852_v28  ;;  %v6319_v52 = vrot.slane %v2649_v31, %v4852_v28  ;;  %v1134_v54 = vadd.f32 %v1132_v51, %v1087_v22  ;;  %v8958_v51 = vld [vmem:[#allocation33_spill] sm:$0xff] }
 0x31d   :  { %v1135_v27 = vadd.f32 %v1133_v50, %v1088_v26  ;;  %vm8508_vm11 = vcmp.eq.s32.totalorder %v8953_v55, 1  ;;  %v1226_v25 = vadd.f32 %v1222_v1, %v1214_v49  ;;  %v1227_v60 = vadd.f32 %v1223_v12, %v1215_v34  ;;  %2929 = vrot.lane.b32.xlu0 %v8958_v51, %s4585_s17  ;;  %v8959_v50 = vld [vmem:[#allocation32_spill] sm:$0xff]  ;;  %v8960_v34 = vld [vmem:[#allocation103_spill] sm:$0xff] }
 0x31e   :  { %v6316_v35 = vrot.slane %v8950_v29, %v4852_v28  ;;  %8952 = vst [vmem:[#allocation23_spill] sm:$0xff] %v6319_v52  ;;  %v1265_v62 = vmul.f32 %v8955_v37, %v1257_v14  ;;  %v1266_v53 = vmul.f32 %v8955_v37, %v1258_v58  ;;  %vm8956_vm5 = vcmp.lt.s32.totalorder %v4810_v61, 14  ;;  %2927 = vrot.lane.b32.xlu1 %v8959_v50, %s4585_s17  ;;  %v1325_v22 = vpop.permute.xlu1 %1324  ;;  %s6412_s17 = sld [smem:[#allocation2 + $0x1a]] }
 0x31f   :  { %v1282_v15 = vsel %vm8956_vm5, %v1278_v47, %v1280_v40  ;;  %vm8957_vm13 = vmmov %vm8956_vm5  ;;  %v1181_v26 = vadd.f32 %v1179_v24, %v1134_v54  ;;  %v1182_v49 = vadd.f32 %v1180_v6, %v1135_v27  ;;  %v1261_v1 = vmul.f32 %v8960_v34, %v1257_v14  ;;  %v8962_v27 = vld [vmem:[#allocation118_spill] sm:$0xff]  ;;  %v8963_v14 = vld [vmem:[#allocation119_spill] sm:$0xff] }
 0x320   :  { %8951 = vst [vmem:[#allocation28_spill] sm:$0xff] %v6316_v35  ;;  %v1283_v31 = vsel %vm8957_vm13, %v1280_v40, %v1278_v47  ;;  %v1269_v12 = vrot.slane %v1265_v62, 1  ;;  %v1270_v29 = vrot.slane %v1266_v53, 1  ;;  %v1262_v37 = vmul.f32 %v8960_v34, %v1258_v58  ;;  %v1327_v47 = vpop.permute.xlu0 %1326 }
 0x321   :  { %v1304_v40 = vsel %vm8499_vm1, %v1283_v31, 0.0  ;;  %vm8961_vm5 = vcmp.eq.s32.totalorder %v5816_v18, 1  ;;  %v1611_v54 = vrot.slane %v6242_v63, %v4852_v28  ;;  %v1228_v4 = vadd.f32 %v1226_v25, %v1181_v26  ;;  %2953 = vrot.lane.b32.xlu0 %v8958_v51, %s4586_s18 }
 0x322   :  { %v1305_v24 = vsel %vm8961_vm5, %v1282_v15, 0.0  ;;  %v1229_v33 = vadd.f32 %v1227_v60, %v1182_v49  ;;  %v1273_v6 = vadd.f32 %v1269_v12, %v1261_v1  ;;  %v1615_v58 = vrot.slane %v6242_v63, %v5102_v46  ;;  %v8964_v15 = vld [vmem:[#allocation109_spill] sm:$0xff]  ;;  %2951 = vrot.lane.b32.xlu1 %v8959_v50, %s4586_s18  ;;  %v8965_v63 = vld [vmem:[#allocation108_spill] sm:$0xff]  ;;  %v1372_v5 = vpop.permute.xlu1 %1371  ;;  %s6441_s18 = sld [smem:[#allocation2 + $0x4b]] }
 0x323   :  { %v1329_v62 = vsel %vm8500_vm10, %v1325_v22, %v1327_v47  ;;  %v1330_v53 = vsel %vm8500_vm10, %v1327_v47, %v1325_v22  ;;  %v1312_v31 = vmul.f32 %v8964_v15, %v1304_v40  ;;  %v1313_v18 = vmul.f32 %v8964_v15, %v1305_v24  ;;  %v8968_v15 = vld [vmem:[#allocation122_spill] sm:$0xff] }
 0x324   :  { %vm8509_vm5 = vcmp.lt.s32.totalorder %v4810_v61, 1  ;;  %v1274_v25 = vadd.f32 %v1270_v29, %v1262_v37  ;;  %v1308_v60 = vmul.f32 %v8965_v63, %v1304_v40  ;;  %vm8966_vm1 = vcmp.eq.s32.totalorder %v5852_v3, 1  ;;  %v1374_v34 = vpop.permute.xlu0 %1373  ;;  %v8970_v37 = vld [vmem:[#allocation112_spill] sm:$0xff]  ;;  %v8971_v3 = vld [vmem:[#allocation113_spill] sm:$0xff] }
 0x325   :  { %v1351_v26 = vsel %vm8966_vm1, %v1330_v53, 0.0  ;;  %vm8967_vm10 = vcmp.eq.s32.totalorder %v5855_v48, 1  ;;  %v1275_v49 = vadd.f32 %v1273_v6, %v1228_v4  ;;  %v1309_v1 = vmul.f32 %v8965_v63, %v1305_v24  ;;  %2979 = vrot.lane.b32.xlu0 %v8958_v51, %s4587_s19 }
 0x326   :  { %v1352_v22 = vsel %vm8967_vm10, %v1329_v62, 0.0  ;;  %v1316_v12 = vrot.slane %v1312_v31, 1  ;;  %v1317_v47 = vrot.slane %v1313_v18, 1  ;;  %v1355_v29 = vmul.f32 %v8970_v37, %v1351_v26  ;;  %2977 = vrot.lane.b32.xlu1 %v8959_v50, %s4587_s19  ;;  %s6459_s19 = sld [smem:[#allocation2 + $0x1b]] }
 0x327   :  { %v1356_v40 = vmul.f32 %v8970_v37, %v1352_v22  ;;  %v1359_v53 = vmul.f32 %v8971_v3, %v1351_v26  ;;  %v1360_v48 = vmul.f32 %v8971_v3, %v1352_v22  ;;  %vm8972_vm1 = vcmp.lt.s32.totalorder %v4810_v61, 3 }
 0x328   :  { %v1376_v4 = vsel %vm8972_vm1, %v1372_v5, %v1374_v34  ;;  %vm8973_vm10 = vmmov %vm8972_vm1  ;;  %v1320_v24 = vadd.f32 %v1316_v12, %v1308_v60  ;;  %v1321_v6 = vadd.f32 %v1317_v47, %v1309_v1  ;;  %vm8515_vm13 = vcmp.lt.s32.totalorder %v4810_v61, 127  ;;  %v1421_v1 = vpop.permute.xlu0 %1420 }
 0x329   :  { %v1377_v18 = vsel %vm8973_vm10, %v1374_v34, %v1372_v5  ;;  %v1363_v62 = vrot.slane %v1359_v53, 1  ;;  %v1364_v31 = vrot.slane %v1360_v48, 1  ;;  %vm8974_vm1 = vcmp.eq.s32.totalorder %v8954_v16, 1  ;;  %v1419_v48 = vpop.permute.xlu1 %1418  ;;  %v8977_v53 = vld [vmem:[#allocation117_spill] sm:$0xff]  ;;  %3005 = vrot.lane.b32.xlu0 %v8958_v51, %s4588_s20 }
 0x32a   :  { %v1398_v26 = vsel %vm8508_vm11, %v1377_v18, 0.0  ;;  %v1399_v22 = vsel %vm8974_vm1, %v1376_v4, 0.0  ;;  %v1276_v37 = vadd.f32 %v1274_v25, %v1229_v33  ;;  %v1322_v5 = vadd.f32 %v1320_v24, %v1275_v49  ;;  %vm1653_vm1 = vmand %vm5020_vm9, %vm5174_vm8  ;;  %v8980_v25 = vld [vmem:[#allocation116_spill] sm:$0xff]  ;;  %3003 = vrot.lane.b32.xlu1 %v8959_v50, %s4588_s20  ;;  %s6465_s20 = sld [smem:[#allocation2 + $0x4c]] }
 0x32b   :  { %v6386_v34 = vrot.slane %v1611_v54, %v4852_v28  ;;  %v6389_v60 = vrot.slane %v1615_v58, %v4852_v28  ;;  %v1367_v12 = vadd.f32 %v1363_v62, %v1355_v29  ;;  %v1368_v47 = vadd.f32 %v1364_v31, %v1356_v40 }
 0x32c   :  { %v1406_v18 = vmul.f32 %v8977_v53, %v1398_v26  ;;  %v1407_v4 = vmul.f32 %v8977_v53, %v1399_v22  ;;  %vm8978_vm11 = vcmp.lt.s32.totalorder %v4810_v61, 2  ;;  %v1323_v58 = vadd.f32 %v1321_v6, %v1276_v37 }
 0x32d   :  { %8975 = vst [vmem:[#allocation78_spill] sm:$0xff] %v6386_v34  ;;  %8976 = vst [vmem:[#allocation89_spill] sm:$0xff] %v6389_v60  ;;  %v1423_v33 = vsel %vm8978_vm11, %v1419_v48, %v1421_v1  ;;  %v1402_v49 = vmul.f32 %v8980_v25, %v1398_v26  ;;  %vm8518_vm10 = vcmp.lt.s32.totalorder %v4810_v61, 126  ;;  %v1369_v29 = vadd.f32 %v1367_v12, %v1322_v5  ;;  %v1468_v26 = vpop.permute.xlu0 %1467  ;;  %v8983_v12 = vld [vmem:[#allocation120_spill] sm:$0xff] }
 0x32e   :  { %vm8979_vm4 = vmmov %vm8978_vm11  ;;  %v1403_v40 = vmul.f32 %v8980_v25, %v1399_v22  ;;  %v1410_v24 = vrot.slane %v1406_v18, 1  ;;  %v1411_v62 = vrot.slane %v1407_v4, 1  ;;  %v1370_v31 = vadd.f32 %v1368_v47, %v1323_v58  ;;  %v1466_v22 = vpop.permute.xlu1 %1465  ;;  %3031 = vrot.lane.b32.xlu0 %v8958_v51, %s4589_s21  ;;  %3029 = vrot.lane.b32.xlu1 %v8959_v50, %s4589_s21  ;;  %s6496_s21 = sld [smem:[#allocation2 + $0x1c]] }
 0x32f   :  { %v1424_v54 = vsel %vm8979_vm4, %v1421_v1, %v1419_v48  ;;  %vm8981_vm11 = vcmp.eq.s32.totalorder %v8962_v27, 1  ;;  %vm8982_vm4 = vcmp.eq.s32.totalorder %v8963_v14, 1  ;;  %v1654_v6 = vsel %vm1653_vm1, 1, %v8759_v36 }
 0x330   :  { %v1445_v1 = vsel %vm8981_vm11, %v1424_v54, 0.0  ;;  %v1446_v37 = vsel %vm8982_vm4, %v1423_v33, 0.0  ;;  %v1414_v5 = vadd.f32 %v1410_v24, %v1402_v49  ;;  %v1415_v48 = vadd.f32 %v1411_v62, %v1403_v40  ;;  %v8984_v33 = vld [vmem:[#allocation121_spill] sm:$0xff] }
 0x331   :  { %v1449_v47 = vmul.f32 %v8983_v12, %v1445_v1  ;;  %v1450_v18 = vmul.f32 %v8983_v12, %v1446_v37  ;;  %vm8544_vm11 = vcmp.eq.s32.totalorder %v6386_v34, 1  ;;  %v1470_v4 = vsel %vm8509_vm5, %v1466_v22, %v1468_v26  ;;  %v1555_v12 = vpop.permute.xlu0 %1554 }
 0x332   :  { %v1471_v17 = vsel %vm8509_vm5, %v1468_v26, %v1466_v22  ;;  %v1453_v54 = vmul.f32 %v8984_v33, %v1445_v1  ;;  %v1454_v58 = vmul.f32 %v8984_v33, %v1446_v37  ;;  %vm8520_vm9 = vcmp.eq.s32.totalorder %v6389_v60, 1  ;;  %v8987_v26 = vld [vmem:[#allocation124_spill] sm:$0xff]  ;;  %v1553_v14 = vpop.permute.xlu1 %1552  ;;  %3057 = vrot.lane.b32.xlu0 %v8958_v51, %s4590_s22  ;;  %3055 = vrot.lane.b32.xlu1 %v8959_v50, %s4590_s22  ;;  %s6503_s22 = sld [smem:[#allocation2 + $0x4d]] }
 0x333   :  { %vm8519_vm1 = vcmp.lt.s32.totalorder %v4810_v61, 125  ;;  %v1416_v49 = vadd.f32 %v1414_v5, %v1369_v29  ;;  %v1417_v40 = vadd.f32 %v1415_v48, %v1370_v31  ;;  %vm8985_vm4 = vcmp.eq.s32.totalorder %v8968_v15, 1 }
 0x334   :  { %v1492_v24 = vsel %vm8985_vm4, %v1471_v17, 0.0  ;;  %vm8986_vm5 = vcmp.eq.s32.totalorder %v8969_v45, 1  ;;  %v1457_v1 = vrot.slane %v1453_v54, 1  ;;  %v1458_v37 = vrot.slane %v1454_v58, 1 }
 0x335   :  { %v1493_v62 = vsel %vm8986_vm5, %v1470_v4, 0.0  ;;  %v1496_v22 = vmul.f32 %v8987_v26, %v1492_v24  ;;  %v1500_v27 = vmul.f32 %v6046_v10, %v1492_v24  ;;  %v1658_v31 = vrot.slane %v1654_v6, %v4852_v28 }
 0x336   :  { %v1497_v33 = vmul.f32 %v8987_v26, %v1493_v62  ;;  %v1501_v29 = vmul.f32 %v6046_v10, %v1493_v62  ;;  %v1662_v5 = vrot.slane %v1654_v6, %v5102_v46  ;;  %v1557_v48 = vsel %vm8515_vm13, %v1553_v14, %v1555_v12  ;;  %3083 = vrot.lane.b32.xlu0 %v8958_v51, %s4591_s23 }
 0x337   :  { %v1558_v4 = vsel %vm8515_vm13, %v1555_v12, %v1553_v14  ;;  %v1461_v17 = vadd.f32 %v1457_v1, %v1449_v47  ;;  %v1462_v54 = vadd.f32 %v1458_v37, %v1450_v18  ;;  %v1504_v58 = vrot.slane %v1500_v27, 1  ;;  %v1602_v18 = vpop.permute.xlu0 %1601  ;;  %v1600_v1 = vpop.permute.xlu1 %1599  ;;  %3081 = vrot.lane.b32.xlu1 %v8959_v50, %s4591_s23  ;;  %s6532_s23 = sld [smem:[#allocation2 + $0x1d]] }
 0x338   :  { %v1505_v24 = vrot.slane %v1501_v29, 1  ;;  %vm8988_vm5 = vcmp.eq.s32.totalorder %v6100_v30, 1  ;;  %vm8989_vm4 = vcmp.eq.s32.totalorder %v6165_v23, 1  ;;  %v6463_v47 = vstv %s6412_s17  ;;  %s6581_s17 = sld [smem:[#allocation2 + $0x4f]] }
 0x339   :  { %v1579_v62 = vsel %vm8988_vm5, %v1557_v48, 0.0  ;;  %v1580_v6 = vsel %vm8989_vm4, %v1558_v4, 0.0  ;;  %v1463_v26 = vadd.f32 %v1461_v17, %v1416_v49  ;;  %v1464_v14 = vadd.f32 %v1462_v54, %v1417_v40  ;;  %8990 = vst [vmem:[#allocation93_spill] sm:$0xff] %v6463_v47 }
 0x33a   :  { %v1583_v12 = vmul.f32 %v6185_v59, %v1579_v62  ;;  %vm8534_vm13 = vcmp.lt.s32.totalorder %v4810_v61, 115  ;;  %v1508_v27 = vadd.f32 %v1504_v58, %v1496_v22  ;;  %v1509_v37 = vadd.f32 %v1505_v24, %v1497_v33  ;;  %3109 = vrot.lane.b32.xlu0 %v8958_v51, %s4592_s24 }
 0x33b   :  { %v1587_v29 = vmul.f32 %v6198_v20, %v1579_v62  ;;  %v1588_v48 = vmul.f32 %v6198_v20, %v1580_v6  ;;  %v1604_v49 = vsel %vm8518_vm10, %v1600_v1, %v1602_v18  ;;  %v1605_v40 = vsel %vm8518_vm10, %v1602_v18, %v1600_v1  ;;  %v1647_v18 = vpop.permute.xlu1 %1646  ;;  %v8994_v1 = vld [vmem:[#allocation92_spill] sm:$0xff]  ;;  %3107 = vrot.lane.b32.xlu1 %v8959_v50, %s4592_s24  ;;  %s6548_s24 = sld [smem:[#allocation2 + $0x4e]] }
 0x33c   :  { %v6475_v4 = vrot.slane %v1658_v31, %v4852_v28  ;;  %v6478_v17 = vrot.slane %v1662_v5, %v4852_v28  ;;  %v1510_v33 = vadd.f32 %v1508_v27, %v1463_v26  ;;  %v1511_v22 = vadd.f32 %v1509_v37, %v1464_v14  ;;  %v1649_v5 = vpop.permute.xlu0 %1648  ;;  %v8995_v37 = vld [vmem:[#allocation97_spill] sm:$0xff] }
 0x33d   :  { %v1591_v54 = vrot.slane %v1587_v29, 1  ;;  %v1592_v58 = vrot.slane %v1588_v48, 1  ;;  %vm8535_vm5 = vcmp.lt.s32.totalorder %v4810_v61, 114  ;;  %v1584_v24 = vmul.f32 %v6185_v59, %v1580_v6 }
 0x33e   :  { %8991 = vst [vmem:[#allocation101_spill] sm:$0xff] %v6475_v4  ;;  %8992 = vst [vmem:[#allocation33_spill] sm:$0xff] %v6478_v17  ;;  %v1626_v31 = vsel %vm8544_vm11, %v1604_v49, 0.0  ;;  %v6489_v62 = vstv %s6441_s18  ;;  %vm8543_vm4 = vcmp.eq.s32.totalorder %v6475_v4, 1  ;;  %v1550_v20 = vadd.f32 %v8994_v1, %v1510_v33  ;;  %3135 = vrot.lane.b32.xlu0 %v8958_v51, %s4593_s25  ;;  %s6684_s18 = sld [smem:[#allocation2 + $0x51]] }
 0x33f   :  { %8993 = vst [vmem:[#allocation32_spill] sm:$0xff] %v6489_v62  ;;  %v1595_v26 = vadd.f32 %v1591_v54, %v1583_v12  ;;  %v1627_v14 = vsel %vm8520_vm9, %v1605_v40, 0.0  ;;  %vm8529_vm10 = vcmp.eq.s32.totalorder %v6478_v17, 1  ;;  %v1651_v6 = vsel %vm8519_vm1, %v1647_v18, %v1649_v5  ;;  %v1694_v1 = vpop.permute.xlu1 %1693  ;;  %3133 = vrot.lane.b32.xlu1 %v8959_v50, %s4593_s25  ;;  %s6564_s25 = sld [smem:[#allocation2 + $0x1e]] }
 0x340   :  { %v1652_v27 = vsel %vm8519_vm1, %v1649_v5, %v1647_v18  ;;  %v1551_v29 = vadd.f32 %v8995_v37, %v1511_v22  ;;  %v1596_v48 = vadd.f32 %v1592_v58, %v1584_v24  ;;  %v1630_v12 = vmul.f32 %v6463_v47, %v1626_v31  ;;  %vm1700_vm1 = vmand %vm5088_vm2, %vm5058_vm15  ;;  %v1696_v18 = vpop.permute.xlu0 %1695 }
 0x341   :  { %v1634_v49 = vmul.f32 %v6489_v62, %v1626_v31  ;;  %v1673_v40 = vsel %vm8543_vm4, %v1651_v6, 0.0  ;;  %v6514_v33 = vstv %s6459_s19  ;;  %vm8550_vm9 = vcmp.lt.s32.totalorder %v4810_v61, 113  ;;  %s6814_s19 = sld [smem:[#allocation2 + $0x53]] }
 0x342   :  { %8996 = vst [vmem:[#allocation92_spill] sm:$0xff] %v6514_v33  ;;  %v1631_v58 = vmul.f32 %v6463_v47, %v1627_v14  ;;  %v1635_v24 = vmul.f32 %v6489_v62, %v1627_v14  ;;  %v1674_v5 = vsel %vm8529_vm10, %v1652_v27, 0.0  ;;  %v6526_v31 = vstv %s6465_s20  ;;  %vm1747_vm10 = vmand %vm5088_vm2, %vm5117_vm3  ;;  %3161 = vrot.lane.b32.xlu0 %v8958_v51, %s4594_s4  ;;  %s6828_s20 = sld [smem:[#allocation2 + $0x22]] }
 0x343   :  { %8999 = vst [vmem:[#allocation97_spill] sm:$0xff] %v6526_v31  ;;  %v1597_v6 = vadd.f32 %v1595_v26, %v1550_v20  ;;  %v1638_v37 = vrot.slane %v1634_v49, 1  ;;  %v1681_v4 = vmul.f32 %v6526_v31, %v1673_v40  ;;  %v1682_v60 = vmul.f32 %v6526_v31, %v1674_v5  ;;  %3159 = vrot.lane.b32.xlu1 %v8959_v50, %s4594_s4  ;;  %s6624_s4 = sld [smem:[#allocation2 + $0x1f]] }
 0x344   :  { %v1598_v34 = vadd.f32 %v1596_v48, %v1551_v29  ;;  %v1639_v59 = vrot.slane %v1635_v24, 1  ;;  %v1677_v23 = vmul.f32 %v6514_v33, %v1673_v40  ;;  %v1701_v47 = vsel %vm1700_vm1, 1, %v8759_v36 }
 0x345   :  { %v1642_v20 = vadd.f32 %v1638_v37, %v1630_v12  ;;  %v1685_v26 = vrot.slane %v1681_v4, 1  ;;  %v1686_v14 = vrot.slane %v1682_v60, 1  ;;  %v1705_v27 = vrot.slane %v1701_v47, %v4852_v28  ;;  %v1743_v4 = vpop.permute.xlu0 %1742  ;;  %v1741_v12 = vpop.permute.xlu1 %1740 }
 0x346   :  { %v1698_v29 = vsel %vm8534_vm13, %v1694_v1, %v1696_v18  ;;  %vm8557_vm1 = vcmp.lt.s32.totalorder %v4810_v61, 112  ;;  %v1643_v48 = vadd.f32 %v1639_v59, %v1631_v58  ;;  %v1678_v49 = vmul.f32 %v6514_v33, %v1674_v5  ;;  %3187 = vrot.lane.b32.xlu0 %v8958_v51, %s4595_s26 }
 0x347   :  { %v1709_v40 = vrot.slane %v1701_v47, %v5102_v46  ;;  %v1699_v60 = vsel %vm8534_vm13, %v1696_v18, %v1694_v1  ;;  %v1689_v37 = vadd.f32 %v1685_v26, %v1677_v23  ;;  %v6553_v31 = vrot.slane %v1705_v27, %v4852_v28  ;;  %3185 = vrot.lane.b32.xlu1 %v8959_v50, %s4595_s26  ;;  %s6640_s26 = sld [smem:[#allocation2 + $0x50]] }
 0x348   :  { %v6556_v59 = vstv %s6496_s21  ;;  %v1644_v58 = vadd.f32 %v1642_v20, %v1597_v6  ;;  %v1690_v47 = vadd.f32 %v1686_v14, %v1678_v49  ;;  %v6562_v33 = vstv %s6503_s22  ;;  %s9028_s21 = smov 17   ;;  %s9029_s22 = smov 16  }
 0x349   :  { %9001 = vst [vmem:[#allocation22_spill] sm:$0xff] %v6553_v31  ;;  %9002 = vst [vmem:[#allocation24_spill] sm:$0xff] %v6556_v59  ;;  %v6559_v5 = vrot.slane %v1709_v40, %v4852_v28  ;;  %v1745_v18 = vsel %vm8535_vm5, %v1741_v12, %v1743_v4  ;;  %v1746_v23 = vsel %vm8535_vm5, %v1743_v4, %v1741_v12  ;;  %vm8537_vm13 = vcmp.eq.s32.totalorder %v6553_v31, 1  ;;  %v1790_v14 = vpop.permute.xlu0 %1789  ;;  %v1788_v27 = vpop.permute.xlu1 %1787 }
 0x34a   :  { %9004 = vst [vmem:[#allocation127_spill] sm:$0xff] %v6562_v33  ;;  %v1748_v1 = vsel %vm1747_vm10, 1, %v8759_v36  ;;  %v1645_v6 = vadd.f32 %v1643_v48, %v1598_v34  ;;  %v1720_v20 = vsel %vm8537_vm13, %v1698_v29, 0.0  ;;  %v1691_v49 = vadd.f32 %v1689_v37, %v1644_v58  ;;  %vm1794_vm10 = vmand %vm5088_vm2, %vm5166_vm7  ;;  %3213 = vrot.lane.b32.xlu0 %v8958_v51, %s4596_s28 }
 0x34b   :  { %9003 = vst [vmem:[#allocation25_spill] sm:$0xff] %v6559_v5  ;;  %vm8538_vm5 = vcmp.eq.s32.totalorder %v6559_v5, 1  ;;  %v1752_v26 = vrot.slane %v1748_v1, %v4852_v28  ;;  %v1728_v4 = vmul.f32 %v6562_v33, %v1720_v20  ;;  %v1756_v12 = vrot.slane %v1748_v1, %v5102_v46  ;;  %3211 = vrot.lane.b32.xlu1 %v8959_v50, %s4596_s28  ;;  %s6675_s28 = sld [smem:[#allocation2 + $0x20]] }
 0x34c   :  { %v1721_v40 = vsel %vm8538_vm5, %v1699_v60, 0.0  ;;  %vm8560_vm13 = vcmp.lt.s32.totalorder %v4810_v61, 111  ;;  %v1692_v34 = vadd.f32 %v1690_v47, %v1645_v6  ;;  %v1724_v29 = vmul.f32 %v6556_v59, %v1720_v20 }
 0x34d   :  { %v1729_v48 = vmul.f32 %v6562_v33, %v1721_v40  ;;  %v6599_v37 = vstv %s6532_s23  ;;  %v1792_v60 = vsel %vm8550_vm9, %v1788_v27, %v1790_v14  ;;  %vm8571_vm5 = vcmp.lt.s32.totalorder %v4810_v61, 110  ;;  %s6876_s23 = sld [smem:[#allocation2 + $0x54]] }
 0x34e   :  { %9006 = vst [vmem:[#allocation128_spill] sm:$0xff] %v6599_v37  ;;  %v1732_v58 = vrot.slane %v1728_v4, 1  ;;  %v6609_v47 = vrot.slane %v1752_v26, %v4852_v28  ;;  %v6612_v1 = vrot.slane %v1756_v12, %v4852_v28  ;;  %v1725_v6 = vmul.f32 %v6556_v59, %v1721_v40  ;;  %v1837_v26 = vpop.permute.xlu0 %1836  ;;  %v1835_v4 = vpop.permute.xlu1 %1834  ;;  %3239 = vrot.lane.b32.xlu0 %v8958_v51, %s4597_s3 }
 0x34f   :  { %v1733_v20 = vrot.slane %v1729_v48, 1  ;;  %v6616_v33 = vstv %s6548_s24  ;;  %v1795_v5 = vsel %vm1794_vm10, 1, %v8759_v36  ;;  %v1793_v12 = vsel %vm8550_vm9, %v1790_v14, %v1788_v27  ;;  %vm1841_vm10 = vmand %vm5088_vm2, %vm5053_vm14  ;;  %3237 = vrot.lane.b32.xlu1 %v8959_v50, %s4597_s3  ;;  %s6732_s3 = sld [smem:[#allocation2 + $0x21]]  ;;  %s6893_s24 = sld [smem:[#allocation2 + $0x23]] }
 0x350   :  { %9007 = vst [vmem:[#allocation129_spill] sm:$0xff] %v6609_v47  ;;  %9008 = vst [vmem:[#allocation130_spill] sm:$0xff] %v6612_v1  ;;  %v1736_v31 = vadd.f32 %v1732_v58, %v1724_v29  ;;  %vm8570_vm4 = vcmp.eq.s32.totalorder %v6609_v47, 1  ;;  %vm8558_vm11 = vcmp.eq.s32.totalorder %v6612_v1, 1  ;;  %v1799_v40 = vrot.slane %v1795_v5, %v4852_v28 }
 0x351   :  { %9009 = vst [vmem:[#allocation131_spill] sm:$0xff] %v6616_v33  ;;  %v1737_v48 = vadd.f32 %v1733_v20, %v1725_v6  ;;  %v1767_v59 = vsel %vm8570_vm4, %v1745_v18, 0.0  ;;  %v6634_v62 = vstv %s6564_s25  ;;  %v6644_v29 = vsel %vm8557_vm1, %v1835_v4, %v1837_v26  ;;  %s6895_s25 = sld [smem:[#allocation2 + $0x24]] }
 0x352   :  { %9010 = vst [vmem:[#allocation132_spill] sm:$0xff] %v6634_v62  ;;  %v1768_v18 = vsel %vm8558_vm11, %v1746_v23, 0.0  ;;  %v1775_v14 = vmul.f32 %v6616_v33, %v1767_v59  ;;  %v6654_v27 = vstv %s6581_s17  ;;  %v1840_v58 = vsel %vm8557_vm1, %v1837_v26, %v1835_v4  ;;  %v1884_v10 = vpop.permute.xlu0 %1883  ;;  %v1882_v45 = vpop.permute.xlu1 %1881  ;;  %3265 = vrot.lane.b32.xlu0 %v8958_v51, %s4598_s29  ;;  %s9036_s17 = smov 15  }
 0x353   :  { %9012 = vst [vmem:[#allocation133_spill] sm:$0xff] %v6654_v27  ;;  %vm8580_vm9 = vcmp.lt.s32.totalorder %v4810_v61, 109  ;;  %v1738_v6 = vadd.f32 %v1736_v31, %v1691_v49  ;;  %v1776_v20 = vmul.f32 %v6616_v33, %v1768_v18  ;;  %v1803_v47 = vrot.slane %v1795_v5, %v5102_v46  ;;  %3263 = vrot.lane.b32.xlu1 %v8959_v50, %s4598_s29  ;;  %s6756_s29 = sld [smem:[#allocation2 + $0x52]] }
 0x354   :  { %v1771_v15 = vmul.f32 %v6599_v37, %v1767_v59  ;;  %v1779_v1 = vrot.slane %v1775_v14, 1  ;;  %v6663_v23 = vrot.slane %v1799_v40, %v4852_v28  ;;  %v1842_v26 = vsel %vm1841_vm10, 1, %v8759_v36 }
 0x355   :  { %v1739_v31 = vadd.f32 %v1737_v48, %v1692_v34  ;;  %v1772_v49 = vmul.f32 %v6599_v37, %v1768_v18  ;;  %v1780_v5 = vrot.slane %v1776_v20, 1  ;;  %v6673_v4 = vrot.slane %v1803_v47, %v4852_v28 }
 0x356   :  { %9013 = vst [vmem:[#allocation134_spill] sm:$0xff] %v6663_v23  ;;  %v1783_v59 = vadd.f32 %v1779_v1, %v1771_v15  ;;  %vm8559_vm1 = vcmp.eq.s32.totalorder %v6663_v23, 1  ;;  %v1846_v40 = vrot.slane %v1842_v26, %v4852_v28  ;;  %v1850_v34 = vrot.slane %v1842_v26, %v5102_v46  ;;  %v1931_v14 = vpop.permute.xlu0 %1930  ;;  %v1929_v20 = vpop.permute.xlu1 %1928  ;;  %3291 = vrot.lane.b32.xlu0 %v8958_v51, %s4599_s30 }
 0x357   :  { %9014 = vst [vmem:[#allocation135_spill] sm:$0xff] %v6673_v4  ;;  %v1784_v47 = vadd.f32 %v1780_v5, %v1772_v49  ;;  %vm8563_vm10 = vcmp.eq.s32.totalorder %v6673_v4, 1  ;;  %v1814_v48 = vsel %vm8559_vm1, %v1792_v60, 0.0  ;;  %v6690_v18 = vstv %s6624_s4  ;;  %vm1888_vm1 = vmand %vm5088_vm2, %vm5192_vm0  ;;  %3289 = vrot.lane.b32.xlu1 %v8959_v50, %s4599_s30  ;;  %s9021_s30 = smov 18   ;;  %s6932_s4 = sld [smem:[#allocation2 + $0x55]] }
 0x358   :  { %9015 = vst [vmem:[#allocation136_spill] sm:$0xff] %v6690_v18  ;;  %v6694_v15 = vsel %vm8560_vm13, %v1882_v45, %v1884_v10  ;;  %v6698_v1 = vsel %vm8560_vm13, %v1884_v10, %v1882_v45  ;;  %vm8583_vm11 = vcmp.lt.s32.totalorder %v4810_v61, 99  ;;  %v1815_v26 = vsel %vm8563_vm10, %v1793_v12, 0.0  ;;  %vm1935_vm10 = vmand %vm5088_vm2, %vm5268_vm6 }
 0x359   :  { %v1822_v49 = vmul.f32 %v6654_v27, %v1814_v48  ;;  %v6710_v60 = vsel %vm8571_vm5, %v1929_v20, %v1931_v14  ;;  %v1785_v45 = vadd.f32 %v1783_v59, %v1738_v6  ;;  %v1818_v10 = vmul.f32 %v6634_v62, %v1814_v48 }
 0x35a   :  { %v6714_v5 = vstv %s6640_s26  ;;  %vm8591_vm13 = vcmp.lt.s32.totalorder %v4810_v61, 98  ;;  %v1823_v12 = vmul.f32 %v6654_v27, %v1815_v26  ;;  %v6723_v23 = vrot.slane %v1846_v40, %v4852_v28  ;;  %v1976_v27 = vpop.permute.xlu1 %1975  ;;  %3317 = vrot.lane.b32.xlu0 %v8958_v51, %s9021_s30  ;;  %s9037_s26 = smov 14  }
 0x35b   :  { %9016 = vst [vmem:[#allocation137_spill] sm:$0xff] %v6714_v5  ;;  %v1826_v4 = vrot.slane %v1822_v49, 1  ;;  %v6726_v6 = vrot.slane %v1850_v34, %v4852_v28  ;;  %v6736_v59 = vsel %vm8571_vm5, %v1931_v14, %v1929_v20  ;;  %v1786_v48 = vadd.f32 %v1784_v47, %v1739_v31  ;;  %v1978_v34 = vpop.permute.xlu0 %1977  ;;  %3315 = vrot.lane.b32.xlu1 %v8959_v50, %s9021_s30  ;;  %s9050_s30 = smov 1  }
 0x35c   :  { %9017 = vst [vmem:[#allocation138_spill] sm:$0xff] %v6723_v23  ;;  %v1819_v49 = vmul.f32 %v6634_v62, %v1815_v26  ;;  %v1889_v40 = vsel %vm1888_vm1, 1, %v8759_v36  ;;  %v1827_v37 = vrot.slane %v1823_v12, 1  ;;  %vm8582_vm4 = vcmp.eq.s32.totalorder %v6723_v23, 1  ;;  %vm1982_vm1 = vmand %vm5088_vm2, %vm5174_vm8 }
 0x35d   :  { %9018 = vst [vmem:[#allocation139_spill] sm:$0xff] %v6726_v6  ;;  %v1830_v33 = vadd.f32 %v1826_v4, %v1818_v10  ;;  %vm8581_vm5 = vcmp.eq.s32.totalorder %v6726_v6, 1  ;;  %v1861_v31 = vsel %vm8582_vm4, %v6644_v29, 0.0  ;;  %v6753_v14 = vstv %s6675_s28  ;;  %s7003_s28 = sld [smem:[#allocation2 + $0x56]] }
 0x35e   :  { %v1862_v47 = vsel %vm8581_vm5, %v1840_v58, 0.0  ;;  %9019 = vst [vmem:[#allocation140_spill] sm:$0xff] %v6753_v14  ;;  %v1936_v20 = vsel %vm1935_vm10, 1, %v8759_v36  ;;  %v6760_v4 = vsel %vm8580_vm9, %v1976_v27, %v1978_v34  ;;  %v6764_v26 = vsel %vm8580_vm9, %v1978_v34, %v1976_v27  ;;  %v2023_v25 = vpop.permute.xlu1 %2022  ;;  %3343 = vrot.lane.b32.xlu0 %v8958_v51, %s9028_s21 }
 0x35f   :  { %v1831_v29 = vadd.f32 %v1827_v37, %v1819_v49  ;;  %v6771_v58 = vstv %s6684_s18  ;;  %v1832_v10 = vadd.f32 %v1830_v33, %v1785_v45  ;;  %v1869_v12 = vmul.f32 %v6714_v5, %v1861_v31  ;;  %v2025_v62 = vpop.permute.xlu0 %2024  ;;  %3341 = vrot.lane.b32.xlu1 %v8959_v50, %s9028_s21  ;;  %s7023_s18 = sld [smem:[#allocation2 + $0x61]]  ;;  %s9063_s21 = smov 115  }
 0x360   :  { %9020 = vst [vmem:[#allocation141_spill] sm:$0xff] %v6771_v58  ;;  %v1870_v6 = vmul.f32 %v6714_v5, %v1862_v47  ;;  %v1893_v23 = vrot.slane %v1889_v40, %v4852_v28  ;;  %v1865_v27 = vmul.f32 %v6690_v18, %v1861_v31  ;;  %v1897_v34 = vrot.slane %v1889_v40, %v5102_v46 }
 0x361   :  { %v1940_v53 = vrot.slane %v1936_v20, %v4852_v28  ;;  %v1944_v37 = vrot.slane %v1936_v20, %v5102_v46  ;;  %v1833_v33 = vadd.f32 %v1831_v29, %v1786_v48  ;;  %v1866_v45 = vmul.f32 %v6690_v18, %v1862_v47 }
 0x362   :  { %v1873_v49 = vrot.slane %v1869_v12, 1  ;;  %v1874_v5 = vrot.slane %v1870_v6, 1  ;;  %vm8599_vm10 = vcmp.lt.s32.totalorder %v4810_v61, 97  ;;  %v6791_v40 = vrot.slane %v1893_v23, %v4852_v28  ;;  %v2070_v12 = vpop.permute.xlu1 %2069  ;;  %3369 = vrot.lane.b32.xlu0 %v8958_v51, %s9029_s22 }
 0x363   :  { %v6794_v31 = vrot.slane %v1897_v34, %v4852_v28  ;;  %v6797_v22 = vrot.slane %v1940_v53, %v4852_v28  ;;  %v6800_v48 = vstv %s6732_s3  ;;  %v6804_v6 = vsel %vm8583_vm11, %v2023_v25, %v2025_v62  ;;  %v2072_v29 = vpop.permute.xlu0 %2071  ;;  %3367 = vrot.lane.b32.xlu1 %v8959_v50, %s9029_s22  ;;  %s7060_s3 = sld [smem:[#allocation2 + $0x57]]  ;;  %s9068_s22 = smov 114  }
 0x364   :  { %9022 = vst [vmem:[#allocation142_spill] sm:$0xff] %v6791_v40  ;;  %9025 = vst [vmem:[#allocation145_spill] sm:$0xff] %v6800_v48  ;;  %v1877_v47 = vadd.f32 %v1873_v49, %v1865_v27  ;;  %v6807_v20 = vrot.slane %v1944_v37, %v4852_v28  ;;  %v1983_v23 = vsel %vm1982_vm1, 1, %v8759_v36  ;;  %vm8603_vm2 = vcmp.lt.s32.totalorder %v4810_v61, 96 }
 0x365   :  { %9023 = vst [vmem:[#allocation143_spill] sm:$0xff] %v6794_v31  ;;  %9024 = vst [vmem:[#allocation144_spill] sm:$0xff] %v6797_v22  ;;  %v1878_v34 = vadd.f32 %v1874_v5, %v1866_v45  ;;  %vm8598_vm9 = vcmp.eq.s32.totalorder %v6791_v40, 1  ;;  %vm8597_vm5 = vcmp.eq.s32.totalorder %v6794_v31, 1  ;;  %vm8593_vm4 = vcmp.eq.s32.totalorder %v6797_v22, 1 }
 0x366   :  { %9026 = vst [vmem:[#allocation146_spill] sm:$0xff] %v6807_v20  ;;  %v6818_v53 = vsel %vm8583_vm11, %v2025_v62, %v2023_v25  ;;  %v6822_v27 = vsel %vm8591_vm13, %v2070_v12, %v2072_v29  ;;  %v6825_v37 = vstv %s6756_s29  ;;  %v1987_v5 = vrot.slane %v1983_v23, %v4852_v28  ;;  %v2117_v31 = vpop.permute.xlu1 %2116  ;;  %3395 = vrot.lane.b32.xlu0 %v8958_v51, %s9036_s17  ;;  %s7086_s29 = sld [smem:[#allocation2 + $0x58]] }
 0x367   :  { %9027 = vst [vmem:[#allocation147_spill] sm:$0xff] %v6825_v37  ;;  %v1908_v25 = vsel %vm8598_vm9, %v6694_v15, 0.0  ;;  %v1909_v62 = vsel %vm8597_vm5, %v6698_v1, 0.0  ;;  %vm8592_vm1 = vcmp.eq.s32.totalorder %v6807_v20, 1  ;;  %v1955_v45 = vsel %vm8593_vm4, %v6710_v60, 0.0  ;;  %v2119_v16 = vpop.permute.xlu0 %2118  ;;  %3393 = vrot.lane.b32.xlu1 %v8959_v50, %s9036_s17  ;;  %s9206_s17 = smov 79  }
 0x368   :  { %v6846_v49 = vsel %vm8591_vm13, %v2072_v29, %v2070_v12  ;;  %vm8610_vm11 = vcmp.lt.s32.totalorder %v4810_v61, 95  ;;  %v1879_v18 = vadd.f32 %v1877_v47, %v1832_v10  ;;  %v1916_v40 = vmul.f32 %v6771_v58, %v1908_v25 }
 0x369   :  { %v1917_v15 = vmul.f32 %v6771_v58, %v1909_v62  ;;  %v1880_v1 = vadd.f32 %v1878_v34, %v1833_v33  ;;  %v1956_v55 = vsel %vm8592_vm1, %v6736_v59, 0.0  ;;  %v1963_v60 = vmul.f32 %v6825_v37, %v1955_v45 }
 0x36a   :  { %v1991_v22 = vrot.slane %v1983_v23, %v5102_v46  ;;  %v1912_v29 = vmul.f32 %v6753_v14, %v1908_v25  ;;  %v1913_v12 = vmul.f32 %v6753_v14, %v1909_v62  ;;  %v1920_v10 = vrot.slane %v1916_v40, 1  ;;  %3421 = vrot.lane.b32.xlu0 %v8958_v51, %s9037_s26 }
 0x36b   :  { %v1921_v47 = vrot.slane %v1917_v15, 1  ;;  %v1959_v33 = vmul.f32 %v6800_v48, %v1955_v45  ;;  %v1964_v59 = vmul.f32 %v6825_v37, %v1956_v55  ;;  %v1967_v34 = vrot.slane %v1963_v60, 1  ;;  %v9032_v45 = vld [vmem:[#allocation26_spill] sm:$0xff]  ;;  %v2166_v60 = vpop.permute.xlu0 %2165  ;;  %3419 = vrot.lane.b32.xlu1 %v8959_v50, %s9037_s26  ;;  %s7920_s26 = sld [smem:[#allocation2 + $0x2c]] }
 0x36c   :  { %v6865_v23 = vrot.slane %v1987_v5, %v4852_v28  ;;  %vm8616_vm13 = vcmp.lt.s32.totalorder %v4810_v61, 94  ;;  %v1924_v40 = vadd.f32 %v1920_v10, %v1912_v29  ;;  %v1960_v62 = vmul.f32 %v6800_v48, %v1956_v55  ;;  %v2164_v5 = vpop.permute.xlu1 %2163 }
 0x36d   :  { %v1925_v25 = vadd.f32 %v1921_v47, %v1913_v12  ;;  %v6870_v15 = vrot.slane %v1991_v22, %v4852_v28  ;;  %vm9033_vm1 = vnez %v9032_v45  ;;  %v1968_v37 = vrot.slane %v1964_v59, 1 }
 0x36e   :  { %9030 = vst [vmem:[#allocation148_spill] sm:$0xff] %v6865_v23  ;;  %vm2029_vm4 = vmand %vm9033_vm1, %vm5058_vm15  ;;  %v1971_v20 = vadd.f32 %v1967_v34, %v1959_v33  ;;  %vm8609_vm5 = vcmp.eq.s32.totalorder %v6865_v23, 1  ;;  %v6880_v29 = vstv %s6814_s19  ;;  %v6884_v55 = vsel %vm8599_vm10, %v2117_v31, %v2119_v16  ;;  %3447 = vrot.lane.b32.xlu0 %v8958_v51, %s4605_s8  ;;  %s7196_s19 = sld [smem:[#allocation2 + $0x59]] }
 0x36f   :  { %9031 = vst [vmem:[#allocation149_spill] sm:$0xff] %v6870_v15  ;;  %9034 = vst [vmem:[#allocation26_spill] sm:$0xff] %v6880_v29  ;;  %v6888_v22 = vsel %vm8599_vm10, %v2119_v16, %v2117_v31  ;;  %v1926_v12 = vadd.f32 %v1924_v40, %v1879_v18  ;;  %v6891_v10 = vstv %s6828_s20  ;;  %v1972_v47 = vadd.f32 %v1968_v37, %v1960_v62  ;;  %v2213_v34 = vpop.permute.xlu0 %2212  ;;  %s7237_s20 = sld [smem:[#allocation2 + $0x29]] }
 0x370   :  { %9035 = vst [vmem:[#allocation150_spill] sm:$0xff] %v6891_v10  ;;  %vm8608_vm9 = vcmp.eq.s32.totalorder %v6870_v15, 1  ;;  %v2002_v16 = vsel %vm8609_vm5, %v6760_v4, 0.0  ;;  %v2030_v18 = vsel %vm2029_vm4, 1, %v8759_v36  ;;  %v6913_v31 = vsel %vm8603_vm2, %v2164_v5, %v2166_v60  ;;  %v2211_v40 = vpop.permute.xlu1 %2210  ;;  %vm2076_vm4 = vmand %vm9033_vm1, %vm5117_vm3  ;;  %3445 = vrot.lane.b32.xlu1 %v8959_v50, %s4605_s8  ;;  %s7001_s8 = sld [smem:[#allocation2 + $0x25]] }
 0x371   :  { %v1927_v33 = vadd.f32 %v1925_v25, %v1880_v1  ;;  %v2003_v37 = vsel %vm8608_vm9, %v6764_v26, 0.0  ;;  %v2010_v59 = vmul.f32 %v6880_v29, %v2002_v16  ;;  %v6921_v4 = vsel %vm8603_vm2, %v2166_v60, %v2164_v5 }
 0x372   :  { %vm8626_vm10 = vcmp.lt.s32.totalorder %v4810_v61, 93  ;;  %v1973_v62 = vadd.f32 %v1971_v20, %v1926_v12  ;;  %v2011_v23 = vmul.f32 %v6880_v29, %v2003_v37  ;;  %v2034_v48 = vrot.slane %v2030_v18, %v4852_v28  ;;  %3473 = vrot.lane.b32.xlu0 %v8958_v51, %s4606_s11 }
 0x373   :  { %v1974_v26 = vadd.f32 %v1972_v47, %v1927_v33  ;;  %v2006_v1 = vmul.f32 %v6891_v10, %v2002_v16  ;;  %v2014_v25 = vrot.slane %v2010_v59, 1  ;;  %v2038_v60 = vrot.slane %v2030_v18, %v5102_v46  ;;  %v2260_v29 = vpop.permute.xlu0 %2259 }
 0x374   :  { %v6936_v20 = vsel %vm8610_vm11, %v2211_v40, %v2213_v34  ;;  %vm8630_vm2 = vcmp.lt.s32.totalorder %v4810_v61, 83  ;;  %v2007_v5 = vmul.f32 %v6891_v10, %v2003_v37  ;;  %v2015_v12 = vrot.slane %v2011_v23, 1  ;;  %v2258_v37 = vpop.permute.xlu1 %2257  ;;  %3471 = vrot.lane.b32.xlu1 %v8959_v50, %s4606_s11  ;;  %s7058_s11 = sld [smem:[#allocation2 + $0x26]] }
 0x375   :  { %v6945_v47 = vrot.slane %v2034_v48, %v4852_v28  ;;  %v2018_v16 = vadd.f32 %v2014_v25, %v2006_v1  ;;  %v6948_v18 = vrot.slane %v2038_v60, %v4852_v28  ;;  %v6951_v33 = vstv %s6876_s23  ;;  %s9173_s23 = smov 83  }
 0x376   :  { %9040 = vst [vmem:[#allocation153_spill] sm:$0xff] %v6951_v33  ;;  %v2077_v59 = vsel %vm2076_vm4, 1, %v8759_v36  ;;  %v2019_v10 = vadd.f32 %v2015_v12, %v2007_v5  ;;  %v6964_v1 = vsel %vm8610_vm11, %v2213_v34, %v2211_v40  ;;  %v6968_v25 = vstv %s6893_s24  ;;  %vm2123_vm4 = vmand %vm9033_vm1, %vm5166_vm7  ;;  %3499 = vrot.lane.b32.xlu0 %v8958_v51, %s4607_s12  ;;  %s9198_s24 = smov 80  }
 0x377   :  { %9038 = vst [vmem:[#allocation151_spill] sm:$0xff] %v6945_v47  ;;  %9039 = vst [vmem:[#allocation152_spill] sm:$0xff] %v6948_v18  ;;  %vm8642_vm9 = vcmp.eq.s32.totalorder %v6945_v47, 1  ;;  %v2081_v48 = vrot.slane %v2077_v59, %v4852_v28  ;;  %v2085_v23 = vrot.slane %v2077_v59, %v5102_v46  ;;  %vm8619_vm5 = vcmp.eq.s32.totalorder %v6948_v18, 1 }
 0x378   :  { %9041 = vst [vmem:[#allocation154_spill] sm:$0xff] %v6968_v25  ;;  %v6971_v60 = vstv %s6895_s25  ;;  %v6979_v5 = vsel %vm8616_vm13, %v2258_v37, %v2260_v29  ;;  %v2049_v34 = vsel %vm8642_vm9, %v6804_v6, 0.0  ;;  %v2050_v40 = vsel %vm8619_vm5, %v6818_v53, 0.0  ;;  %v2307_v6 = vpop.permute.xlu0 %2306  ;;  %v2305_v53 = vpop.permute.xlu1 %2304  ;;  %3497 = vrot.lane.b32.xlu1 %v8959_v50, %s4607_s12  ;;  %s7084_s12 = sld [smem:[#allocation2 + $0x27]]  ;;  %s7645_s25 = sld [smem:[#allocation2 + $0x2b]] }
 0x379   :  { %9042 = vst [vmem:[#allocation155_spill] sm:$0xff] %v6971_v60  ;;  %v6992_v12 = vrot.slane %v2081_v48, %v4852_v28  ;;  %v6996_v59 = vsel %vm8616_vm13, %v2260_v29, %v2258_v37  ;;  %vm8635_vm11 = vcmp.lt.s32.totalorder %v4810_v61, 82  ;;  %v2020_v15 = vadd.f32 %v2018_v16, %v1973_v62 }
 0x37a   :  { %v2057_v14 = vmul.f32 %v6951_v33, %v2049_v34  ;;  %v2058_v47 = vmul.f32 %v6951_v33, %v2050_v40  ;;  %v2021_v48 = vadd.f32 %v2019_v10, %v1974_v26  ;;  %v7006_v18 = vrot.slane %v2085_v23, %v4852_v28  ;;  %3525 = vrot.lane.b32.xlu0 %v8958_v51, %s9050_s30 }
 0x37b   :  { %9043 = vst [vmem:[#allocation156_spill] sm:$0xff] %v6992_v12  ;;  %vm8641_vm13 = vcmp.eq.s32.totalorder %v6992_v12, 1  ;;  %v2124_v29 = vsel %vm2123_vm4, 1, %v8759_v36  ;;  %v2053_v62 = vmul.f32 %v6968_v25, %v2049_v34  ;;  %v7017_v33 = vstv %s6932_s4  ;;  %vm2170_vm4 = vmand %vm9033_vm1, %vm5053_vm14  ;;  %s9216_s4 = smov 78  }
 0x37c   :  { %9044 = vst [vmem:[#allocation157_spill] sm:$0xff] %v7006_v18  ;;  %v2061_v16 = vrot.slane %v2057_v14, 1  ;;  %v2062_v37 = vrot.slane %v2058_v47, 1  ;;  %9045 = vst [vmem:[#allocation158_spill] sm:$0xff] %v7017_v33  ;;  %vm8627_vm5 = vcmp.eq.s32.totalorder %v7006_v18, 1  ;;  %v2096_v10 = vsel %vm8641_vm13, %v6822_v27, 0.0  ;;  %v2354_v12 = vpop.permute.xlu0 %2353  ;;  %v2352_v27 = vpop.permute.xlu1 %2351  ;;  %3523 = vrot.lane.b32.xlu1 %v8959_v50, %s9050_s30 }
 0x37d   :  { %v2128_v26 = vrot.slane %v2124_v29, %v4852_v28  ;;  %v2132_v14 = vrot.slane %v2124_v29, %v5102_v46  ;;  %v7033_v47 = vsel %vm8626_vm10, %v2305_v53, %v2307_v6  ;;  %v7037_v23 = vsel %vm8626_vm10, %v2307_v6, %v2305_v53  ;;  %s8181_s30 = sld [smem:[#allocation2 + $0x30]] }
 0x37e   :  { %v2054_v34 = vmul.f32 %v6968_v25, %v2050_v40  ;;  %v2097_v58 = vsel %vm8627_vm5, %v6846_v49, 0.0  ;;  %v2065_v17 = vadd.f32 %v2061_v16, %v2053_v62  ;;  %v2104_v3 = vmul.f32 %v7017_v33, %v2096_v10  ;;  %3571 = vrot.lane.b32.xlu0 %v8958_v51, %s4584_s0 }
 0x37f   :  { %v2105_v29 = vmul.f32 %v7017_v33, %v2097_v58  ;;  %v7046_v63 = vrot.slane %v2128_v26, %v4852_v28  ;;  %v7050_v6 = vsel %vm8630_vm2, %v2352_v27, %v2354_v12  ;;  %v2100_v53 = vmul.f32 %v6971_v60, %v2096_v10 }
 0x380   :  { %v2066_v40 = vadd.f32 %v2062_v37, %v2054_v34  ;;  %v2101_v49 = vmul.f32 %v6971_v60, %v2097_v58  ;;  %vm8650_vm10 = vcmp.lt.s32.totalorder %v4810_v61, 81  ;;  %v2108_v62 = vrot.slane %v2104_v3, 1  ;;  %v2401_v3 = vpop.permute.xlu0 %2400  ;;  %3569 = vrot.lane.b32.xlu1 %v8959_v50, %s4584_s0  ;;  %s7182_s0 = sld [smem:[#allocation2 + $0x28]] }
 0x381   :  { %9046 = vst [vmem:[#allocation159_spill] sm:$0xff] %v7046_v63  ;;  %v2109_v16 = vrot.slane %v2105_v29, 1  ;;  %v7068_v58 = vrot.slane %v2132_v14, %v4852_v28  ;;  %vm8634_vm5 = vcmp.eq.s32.totalorder %v7046_v63, 1  ;;  %v7073_v37 = vsel %vm8630_vm2, %v2354_v12, %v2352_v27  ;;  %v2399_v14 = vpop.permute.xlu1 %2398 }
 0x382   :  { %v2143_v10 = vsel %vm8634_vm5, %v6884_v55, 0.0  ;;  %v7079_v26 = vstv %s7001_s8  ;;  %v7082_v34 = vstv %s7003_s28  ;;  %v2112_v29 = vadd.f32 %v2108_v62, %v2100_v53  ;;  %vm2217_vm5 = vmand %vm9033_vm1, %vm5192_vm0  ;;  %3597 = vrot.lane.b32.xlu0 %v8958_v51, %s4609_s15  ;;  %s7922_s8 = sld [smem:[#allocation2 + $0x5d]] }
 0x383   :  { %9047 = vst [vmem:[#allocation160_spill] sm:$0xff] %v7068_v58  ;;  %9048 = vst [vmem:[#allocation161_spill] sm:$0xff] %v7079_v26  ;;  %v2113_v60 = vadd.f32 %v2109_v16, %v2101_v49  ;;  %vm8636_vm2 = vcmp.eq.s32.totalorder %v7068_v58, 1  ;;  %v2171_v55 = vsel %vm2170_vm4, 1, %v8759_v36  ;;  %v2067_v12 = vadd.f32 %v2065_v17, %v2020_v15  ;;  %s8016_s28 = sld [smem:[#allocation2 + $0x2d]] }
 0x384   :  { %9049 = vst [vmem:[#allocation162_spill] sm:$0xff] %v7082_v34  ;;  %v2068_v27 = vadd.f32 %v2066_v40, %v2021_v48  ;;  %v2144_v63 = vsel %vm8636_vm2, %v6888_v22, 0.0  ;;  %v2151_v33 = vmul.f32 %v7082_v34, %v2143_v10  ;;  %v7105_v53 = vsel %vm8635_vm11, %v2399_v14, %v2401_v3  ;;  %v2448_v16 = vpop.permute.xlu0 %2447  ;;  %3595 = vrot.lane.b32.xlu1 %v8959_v50, %s4609_s15  ;;  %s9058_s15 = smov 125  }
 0x385   :  { %v7109_v49 = vsel %vm8635_vm11, %v2401_v3, %v2399_v14  ;;  %vm8658_vm4 = vcmp.lt.s32.totalorder %v4810_v61, 80  ;;  %v2147_v15 = vmul.f32 %v7079_v26, %v2143_v10  ;;  %v2152_v22 = vmul.f32 %v7082_v34, %v2144_v63  ;;  %vm2264_vm11 = vmand %vm9033_vm1, %vm5268_vm6  ;;  %v2446_v3 = vpop.permute.xlu1 %2445 }
 0x386   :  { %v2155_v48 = vrot.slane %v2151_v33, 1  ;;  %v2175_v40 = vrot.slane %v2171_v55, %v4852_v28  ;;  %v2179_v62 = vrot.slane %v2171_v55, %v5102_v46  ;;  %vm8672_vm2 = vcmp.lt.s32.totalorder %v4810_v61, 79  ;;  %3623 = vrot.lane.b32.xlu0 %v8958_v51, %s9058_s15 }
 0x387   :  { %v2114_v14 = vadd.f32 %v2112_v29, %v2067_v12  ;;  %v2115_v10 = vadd.f32 %v2113_v60, %v2068_v27  ;;  %v2148_v17 = vmul.f32 %v7079_v26, %v2144_v63  ;;  %v2218_v33 = vsel %vm2217_vm5, 1, %v8759_v36 }
 0x388   :  { %v2156_v55 = vrot.slane %v2152_v22, 1  ;;  %v2159_v30 = vadd.f32 %v2155_v48, %v2147_v15  ;;  %v7134_v34 = vstv %s7058_s11  ;;  %v7137_v58 = vstv %s7060_s3  ;;  %3621 = vrot.lane.b32.xlu1 %v8959_v50, %s9058_s15  ;;  %s8146_s11 = sld [smem:[#allocation2 + $0x5f]]  ;;  %s8153_s3 = sld [smem:[#allocation2 + $0x2e]] }
 0x389   :  { %9051 = vst [vmem:[#allocation163_spill] sm:$0xff] %v7137_v58  ;;  %v7144_v63 = vrot.slane %v2175_v40, %v4852_v28  ;;  %v7147_v60 = vrot.slane %v2179_v62, %v4852_v28  ;;  %v2222_v29 = vrot.slane %v2218_v33, %v4852_v28  ;;  %v2265_v12 = vsel %vm2264_vm11, 1, %v8759_v36  ;;  %v2495_v40 = vpop.permute.xlu0 %2494  ;;  %v2493_v62 = vpop.permute.xlu1 %2492 }
 0x38a   :  { %vm8671_vm5 = vcmp.lt.s32.totalorder %v4810_v61, 78  ;;  %v2226_v27 = vrot.slane %v2218_v33, %v5102_v46  ;;  %v7159_v15 = vstv %s7084_s12  ;;  %v7162_v22 = vstv %s7086_s29  ;;  %3649 = vrot.lane.b32.xlu0 %v8958_v51, %s9063_s21  ;;  %s8162_s12 = sld [smem:[#allocation2 + $0x2f]]  ;;  %s8176_s29 = sld [smem:[#allocation2 + $0x60]] }
 0x38b   :  { %9052 = vst [vmem:[#allocation164_spill] sm:$0xff] %v7147_v60  ;;  %9053 = vst [vmem:[#allocation165_spill] sm:$0xff] %v7159_v15  ;;  %v2269_v48 = vrot.slane %v2265_v12, %v4852_v28  ;;  %vm8651_vm13 = vcmp.eq.s32.totalorder %v7144_v63, 1  ;;  %vm8652_vm9 = vcmp.eq.s32.totalorder %v7147_v60, 1  ;;  %v7168_v39 = vrot.slane %v2222_v29, %v4852_v28 }
 0x38c   :  { %v2273_v38 = vrot.slane %v2265_v12, %v5102_v46  ;;  %v7173_v33 = vsel %vm8650_vm10, %v2446_v3, %v2448_v16  ;;  %v7177_v26 = vsel %vm8650_vm10, %v2448_v16, %v2446_v3  ;;  %v2160_v25 = vadd.f32 %v2156_v55, %v2148_v17  ;;  %3647 = vrot.lane.b32.xlu1 %v8959_v50, %s9063_s21 }
 0x38d   :  { %9054 = vst [vmem:[#allocation166_spill] sm:$0xff] %v7168_v39  ;;  %v2190_v18 = vsel %vm8651_vm13, %v6913_v31, 0.0  ;;  %v2161_v29 = vadd.f32 %v2159_v30, %v2114_v14  ;;  %v2191_v16 = vsel %vm8652_vm9, %v6921_v4, 0.0  ;;  %v7194_v3 = vrot.slane %v2226_v27, %v4852_v28  ;;  %v2542_v4 = vpop.permute.xlu0 %2541  ;;  %v2540_v14 = vpop.permute.xlu1 %2539 }
 0x38e   :  { %v2198_v17 = vmul.f32 %v7137_v58, %v2190_v18  ;;  %vm8670_vm10 = vcmp.eq.s32.totalorder %v6316_v35, 1  ;;  %vm8669_vm13 = vcmp.eq.s32.totalorder %v6319_v52, 1  ;;  %v2194_v31 = vmul.f32 %v7134_v34, %v2190_v18  ;;  %3675 = vrot.lane.b32.xlu0 %v8958_v51, %s9068_s22 }
 0x38f   :  { %v2199_v55 = vmul.f32 %v7137_v58, %v2191_v16  ;;  %vm8657_vm11 = vcmp.eq.s32.totalorder %v7168_v39, 1  ;;  %v7204_v30 = vrot.slane %v2269_v48, %v4852_v28  ;;  %vm8659_vm9 = vcmp.eq.s32.totalorder %v7194_v3, 1 }
 0x390   :  { %v2202_v12 = vrot.slane %v2198_v17, 1  ;;  %v2237_v27 = vsel %vm8657_vm11, %v6936_v20, 0.0  ;;  %v7211_v60 = vrot.slane %v2273_v38, %v4852_v28  ;;  %v7215_v18 = vsel %vm8658_vm4, %v2493_v62, %v2495_v40  ;;  %3673 = vrot.lane.b32.xlu1 %v8959_v50, %s9068_s22 }
 0x391   :  { %9056 = vst [vmem:[#allocation168_spill] sm:$0xff] %v7215_v18  ;;  %v7219_v48 = vsel %vm8658_vm4, %v2495_v40, %v2493_v62  ;;  %v2203_v58 = vrot.slane %v2199_v55, 1  ;;  %v2238_v17 = vsel %vm8659_vm9, %v6964_v1, 0.0  ;;  %v2162_v38 = vadd.f32 %v2160_v25, %v2115_v10  ;;  %v2589_v10 = vpop.permute.xlu0 %2588  ;;  %vm2311_vm9 = vmand %vm9033_vm1, %vm5174_vm8 }
 0x392   :  { %9055 = vst [vmem:[#allocation167_spill] sm:$0xff] %v7211_v60  ;;  %9057 = vst [vmem:[#allocation169_spill] sm:$0xff] %v7219_v48  ;;  %v2195_v20 = vmul.f32 %v7134_v34, %v2191_v16  ;;  %v2206_v39 = vadd.f32 %v2202_v12, %v2194_v31  ;;  %vm2282_vm11 = vcmp.eq.s32.totalorder %v7204_v30, 1  ;;  %v7232_v40 = vsel %vm8672_vm2, %v2540_v14, %v2542_v4  ;;  %v2587_v16 = vpop.permute.xlu1 %2586 }
 0x393   :  { %9059 = vst [vmem:[#allocation170_spill] sm:$0xff] %v7232_v40  ;;  %v2245_v62 = vmul.f32 %v7162_v22, %v2237_v27  ;;  %v2246_v1 = vmul.f32 %v7162_v22, %v2238_v17  ;;  %vm2283_vm4 = vcmp.eq.s32.totalorder %v7211_v60, 1  ;;  %v7241_v25 = vsel %vm8672_vm2, %v2542_v4, %v2540_v14  ;;  %3701 = vrot.lane.b32.xlu0 %v8958_v51, %s4613_s14 }
 0x394   :  { %9060 = vst [vmem:[#allocation171_spill] sm:$0xff] %v7241_v25  ;;  %v2241_v31 = vmul.f32 %v7159_v15, %v2237_v27  ;;  %v2284_v55 = vsel %vm2282_vm11, %v6979_v5, 0.0  ;;  %v2285_v12 = vsel %vm2283_vm4, %v6996_v59, 0.0  ;;  %v2207_v4 = vadd.f32 %v2203_v58, %v2195_v20  ;;  %3699 = vrot.lane.b32.xlu1 %v8959_v50, %s4613_s14  ;;  %s9130_s14 = smov 97  }
 0x395   :  { %v2242_v14 = vmul.f32 %v7159_v15, %v2238_v17  ;;  %v2249_v25 = vrot.slane %v2245_v62, 1  ;;  %v7256_v40 = vstv %s7182_s0  ;;  %v7260_v27 = vsel %vm8671_vm5, %v2587_v16, %v2589_v10  ;;  %v2636_v62 = vpop.permute.xlu0 %2635  ;;  %s8187_s0 = sld [smem:[#allocation2 + $0x61]] }
 0x396   :  { %9061 = vst [vmem:[#allocation172_spill] sm:$0xff] %v7256_v40  ;;  %9062 = vst [vmem:[#allocation173_spill] sm:$0xff] %v7260_v27  ;;  %v2208_v41 = vadd.f32 %v2206_v39, %v2161_v29  ;;  %v2250_v5 = vrot.slane %v2246_v1, 1  ;;  %v7267_v45 = vstv %s7196_s19  ;;  %v7271_v59 = vsel %vm8671_vm5, %v2589_v10, %v2587_v16  ;;  %v2634_v27 = vpop.permute.xlu1 %2633 }
 0x397   :  { %9064 = vst [vmem:[#allocation174_spill] sm:$0xff] %v7267_v45  ;;  %9065 = vst [vmem:[#allocation175_spill] sm:$0xff] %v7271_v59  ;;  %v2292_v58 = vmul.f32 %v7267_v45, %v2284_v55  ;;  %v2293_v17 = vmul.f32 %v7267_v45, %v2285_v12  ;;  %v2312_v20 = vsel %vm2311_vm9, 1, %v8759_v36  ;;  %v2253_v48 = vadd.f32 %v2249_v25, %v2241_v31 }
 0x398   :  { %v2288_v39 = vmul.f32 %v7256_v40, %v2284_v55  ;;  %v2316_v29 = vrot.slane %v2312_v20, %v4852_v28  ;;  %v2320_v1 = vrot.slane %v2312_v20, %v5102_v46  ;;  %vm9066_vm8 = vcmp.lt.s32.totalorder %v4810_v61, 77  ;;  %3727 = vrot.lane.b32.xlu0 %v8958_v51, %s4614_s7  ;;  %3725 = vrot.lane.b32.xlu1 %v8959_v50, %s4614_s7  ;;  %s9139_s7 = smov 96  }
 0x399   :  { %v2638_v10 = vsel %vm9066_vm8, %v2634_v27, %v2636_v62  ;;  %vm9067_vm1 = vmmov %vm9066_vm8  ;;  %v2254_v59 = vadd.f32 %v2250_v5, %v2242_v14  ;;  %v2296_v18 = vrot.slane %v2292_v58, 1  ;;  %v2289_v31 = vmul.f32 %v7256_v40, %v2285_v12 }
 0x39a   :  { %v2639_v16 = vsel %vm9067_vm1, %v2636_v62, %v2634_v27  ;;  %v2660_v45 = vsel %vm8670_vm10, %v2638_v10, 0.0  ;;  %v2297_v55 = vrot.slane %v2293_v17, 1  ;;  %v9069_v20 = vstv %s7023_s18  ;;  %v2930_v10 = vpop.permute.xlu0 %2929  ;;  %s8106_s18 = sld [smem:[#allocation2 + $0x5e]] }
 0x39b   :  { %v2661_v25 = vsel %vm8669_vm13, %v2639_v16, 0.0  ;;  %v7294_v14 = vmul.f32 %v9069_v20, %v2660_v45  ;;  %v9070_v27 = vmov %v9069_v20  ;;  %v2209_v58 = vadd.f32 %v2207_v4, %v2162_v38  ;;  %v2928_v16 = vpop.permute.xlu1 %2927 }
 0x39c   :  { %v7298_v5 = vmul.f32 %v9070_v27, %v2661_v25  ;;  %v7301_v62 = vstv %s7237_s20  ;;  %v2300_v52 = vadd.f32 %v2296_v18, %v2288_v39  ;;  %v2301_v35 = vadd.f32 %v2297_v55, %v2289_v31  ;;  %v9078_v39 = vld [vmem:[#allocation30_spill] sm:$0xff]  ;;  %v9080_v31 = vld [vmem:[#allocation31_spill] sm:$0xff]  ;;  %3753 = vrot.lane.b32.xlu0 %v8958_v51, %s4615_s16  ;;  %3751 = vrot.lane.b32.xlu1 %v8959_v50, %s4615_s16  ;;  %s9148_s16 = smov 95  }
 0x39d   :  { %9071 = vst [vmem:[#allocation176_spill] sm:$0xff] %v7301_v62  ;;  %v7304_v15 = vrot.slane %v2316_v29, %v4852_v28  ;;  %v7307_v12 = vrot.slane %v2320_v1, %v4852_v28  ;;  %vm9074_vm9 = vcmp.lt.s32.totalorder %v4810_v61, 51  ;;  %v2255_v27 = vadd.f32 %v2253_v48, %v2208_v41 }
 0x39e   :  { %v2931_v17 = vsel %vm9074_vm9, %v2928_v16, %v2930_v10  ;;  %vm9075_vm8 = vmmov %vm9074_vm9  ;;  %v2256_v38 = vadd.f32 %v2254_v59, %v2209_v58  ;;  %v9076_v4 = vstv %s6281_s13  ;;  %vm9079_vm1 = vcmp.eq.s32.totalorder %v9078_v39, 1  ;;  %s7335_s13 = sld [smem:[#allocation2 + $0x5a]]  ;;  %v9082_v59 = vld [vmem:[#allocation34_spill] sm:$0xff]  ;;  %v2954_v58 = vpop.permute.xlu0 %2953  ;;  %v9087_v39 = vld [vmem:[#allocation41_spill] sm:$0xff] }
 0x39f   :  { %9072 = vst [vmem:[#allocation177_spill] sm:$0xff] %v7304_v15  ;;  %9073 = vst [vmem:[#allocation178_spill] sm:$0xff] %v7307_v12  ;;  %v2932_v20 = vsel %vm9075_vm8, %v2930_v10, %v2928_v16  ;;  %v7315_v40 = vmul.f32 %v9076_v4, %v2660_v45  ;;  %v9077_v60 = vmov %v9076_v4  ;;  %vm9081_vm13 = vcmp.eq.s32.totalorder %v9080_v31, 1  ;;  %v2952_v10 = vpop.permute.xlu1 %2951 }
 0x3a0   :  { %v7319_v18 = vmul.f32 %v9077_v60, %v2661_v25  ;;  %v2933_v29 = vsel %vm9079_vm1, %v2932_v20, 0.0  ;;  %v2934_v1 = vsel %vm9081_vm13, %v2931_v17, 0.0  ;;  %v7331_v45 = vadd.f32 %v2300_v52, %v2255_v27  ;;  %3779 = vrot.lane.b32.xlu0 %v8958_v51, %s4616_s27  ;;  %3777 = vrot.lane.b32.xlu1 %v8959_v50, %s4616_s27  ;;  %s7529_s27 = sld [smem:[#allocation2 + $0x2a]] }
 0x3a1   :  { %v7333_v60 = vadd.f32 %v2301_v35, %v2256_v38  ;;  %v2941_v25 = vmul.f32 %v2933_v29, %v9082_v59  ;;  %v2942_v55 = vmul.f32 %v2934_v1, %v9082_v59  ;;  %vm2329_vm13 = vcmp.eq.s32.totalorder %v7304_v15, 1  ;;  %v9085_v38 = vld [vmem:[#allocation38_spill] sm:$0xff] }
 0x3a2   :  { %vm2330_vm9 = vcmp.eq.s32.totalorder %v7307_v12, 1  ;;  %v2937_v16 = vmul.f32 %v2933_v29, %v5213_v42  ;;  %v2938_v17 = vmul.f32 %v2934_v1, %v5213_v42  ;;  %vm9083_vm8 = vcmp.lt.s32.totalorder %v4810_v61, 50  ;;  %v9089_v42 = vld [vmem:[#allocation35_spill] sm:$0xff] }
 0x3a3   :  { %v2955_v35 = vsel %vm9083_vm8, %v2952_v10, %v2954_v58  ;;  %vm9084_vm1 = vmmov %vm9083_vm8  ;;  %v2945_v20 = vrot.slane %v2941_v25, 1  ;;  %v2946_v27 = vrot.slane %v2942_v55, 1  ;;  %vm9086_vm10 = vcmp.eq.s32.totalorder %v9085_v38, 1  ;;  %v2978_v38 = vpop.permute.xlu1 %2977  ;;  %v9099_v12 = vld [vmem:[#allocation39_spill] sm:$0xff] }
 0x3a4   :  { %v2956_v52 = vsel %vm9084_vm1, %v2954_v58, %v2952_v10  ;;  %vm9088_vm5 = vcmp.eq.s32.totalorder %v9087_v39, 1  ;;  %v2331_v59 = vsel %vm2329_vm13, %v7033_v47, 0.0  ;;  %v2332_v25 = vsel %vm2330_vm9, %v7037_v23, 0.0  ;;  %3805 = vrot.lane.b32.xlu0 %v8958_v51, %s4617_s9  ;;  %3803 = vrot.lane.b32.xlu1 %v8959_v50, %s4617_s9  ;;  %s7531_s9 = sld [smem:[#allocation2 + $0x5b]] }
 0x3a5   :  { %v2957_v4 = vsel %vm9086_vm10, %v2956_v52, 0.0  ;;  %v2958_v31 = vsel %vm9088_vm5, %v2955_v35, 0.0  ;;  %v2949_v55 = vadd.f32 %v2945_v20, %v2937_v16  ;;  %v2950_v58 = vadd.f32 %v2946_v27, %v2938_v17  ;;  %v2980_v52 = vpop.permute.xlu0 %2979  ;;  %vm2358_vm10 = vmand %vm5083_vm12, %vm5058_vm15  ;;  %v9092_v16 = vld [vmem:[#allocation46_spill] sm:$0xff] }
 0x3a6   :  { %v2965_v29 = vmul.f32 %v2957_v4, %v9089_v42  ;;  %v2966_v1 = vmul.f32 %v2958_v31, %v9089_v42  ;;  %v2961_v10 = vmul.f32 %v2957_v4, %v5246_v57  ;;  %v2962_v35 = vmul.f32 %v2958_v31, %v5246_v57  ;;  %v9094_v57 = vld [vmem:[#allocation47_spill] sm:$0xff] }
 0x3a7   :  { %vm9090_vm5 = vcmp.lt.s32.totalorder %v4810_v61, 49  ;;  %vm9093_vm1 = vcmp.eq.s32.totalorder %v9092_v16, 1  ;;  %vm9095_vm2 = vcmp.eq.s32.totalorder %v9094_v57, 1  ;;  %v7382_v54 = vmul.f32 %v7301_v62, %v2331_v59  ;;  %v3004_v41 = vpop.permute.xlu1 %3003 }
 0x3a8   :  { %v2969_v39 = vrot.slane %v2965_v29, 1  ;;  %v2970_v47 = vrot.slane %v2966_v1, 1  ;;  %v2981_v42 = vsel %vm9090_vm5, %v2978_v38, %v2980_v52  ;;  %vm9091_vm8 = vmmov %vm9090_vm5  ;;  %v7385_v27 = vmul.f32 %v7301_v62, %v2332_v25  ;;  %3831 = vrot.lane.b32.xlu0 %v8958_v51, %s4618_s10  ;;  %3829 = vrot.lane.b32.xlu1 %v8959_v50, %s4618_s10  ;;  %s9155_s10 = smov 94  }
 0x3a9   :  { %v2982_v23 = vsel %vm9091_vm8, %v2980_v52, %v2978_v38  ;;  %v2984_v20 = vsel %vm9095_vm2, %v2981_v42, 0.0  ;;  %v7388_v29 = vstv %s7335_s13  ;;  %v7391_v1 = vsel %vm2358_vm10, 1, %v8759_v36  ;;  %v9096_v42 = vld [vmem:[#allocation37_spill] sm:$0xff]  ;;  %v3006_v57 = vpop.permute.xlu0 %3005 }
 0x3aa   :  { %v2983_v17 = vsel %vm9093_vm1, %v2982_v23, 0.0  ;;  %v2973_v4 = vadd.f32 %v2969_v39, %v2961_v10  ;;  %v2974_v31 = vadd.f32 %v2970_v47, %v2962_v35  ;;  %v2988_v38 = vmul.f32 %v2984_v20, %v5266_v11 }
 0x3ab   :  { %v2987_v52 = vmul.f32 %v2983_v17, %v5266_v11  ;;  %v2991_v23 = vmul.f32 %v2983_v17, %v9096_v42  ;;  %v2992_v16 = vmul.f32 %v2984_v20, %v9096_v42  ;;  %vm9097_vm15 = vcmp.lt.s32.totalorder %v4810_v61, 48  ;;  %v9101_v11 = vld [vmem:[#allocation40_spill] sm:$0xff] }
 0x3ac   :  { %v2975_v48 = vadd.f32 %v2973_v4, %v2949_v55  ;;  %v2976_v62 = vadd.f32 %v2974_v31, %v2950_v58  ;;  %v3007_v10 = vsel %vm9097_vm15, %v3004_v41, %v3006_v57  ;;  %vm9098_vm2 = vmmov %vm9097_vm15  ;;  %vm9100_vm10 = vcmp.eq.s32.totalorder %v9099_v12, 1  ;;  %3857 = vrot.lane.b32.xlu0 %v8958_v51, %s4619_s2  ;;  %3855 = vrot.lane.b32.xlu1 %v8959_v50, %s4619_s2  ;;  %s9164_s2 = smov 93  }
 0x3ad   :  { %v3008_v35 = vsel %vm9098_vm2, %v3006_v57, %v3004_v41  ;;  %v2995_v39 = vrot.slane %v2991_v23, 1  ;;  %v2996_v47 = vrot.slane %v2992_v16, 1  ;;  %vm9102_vm5 = vcmp.eq.s32.totalorder %v9101_v11, 1  ;;  %v3032_v23 = vpop.permute.xlu0 %3031  ;;  %v3030_v16 = vpop.permute.xlu1 %3029 }
 0x3ae   :  { %v3009_v15 = vsel %vm9100_vm10, %v3008_v35, 0.0  ;;  %v3010_v17 = vsel %vm9102_vm5, %v3007_v10, 0.0  ;;  %v2339_v41 = vmul.f32 %v7388_v29, %v2331_v59  ;;  %v2340_v20 = vmul.f32 %v7388_v29, %v2332_v25 }
 0x3af   :  { %v3017_v55 = vmul.f32 %v3009_v15, %v5283_v43  ;;  %v3018_v58 = vmul.f32 %v3010_v17, %v5283_v43  ;;  %v2999_v4 = vadd.f32 %v2995_v39, %v2987_v52  ;;  %v3000_v12 = vadd.f32 %v2996_v47, %v2988_v38 }
 0x3b0   :  { %v3013_v31 = vmul.f32 %v3009_v15, %v5280_v56  ;;  %v3014_v42 = vmul.f32 %v3010_v17, %v5280_v56  ;;  %vm9103_vm8 = vcmp.lt.s32.totalorder %v4810_v61, 47  ;;  %vm9105_vm15 = vcmp.eq.s32.totalorder %v5411_v2, 1  ;;  %3883 = vrot.lane.b32.xlu0 %v8958_v51, %s9130_s14  ;;  %3881 = vrot.lane.b32.xlu1 %v8959_v50, %s9130_s14 }
 0x3b1   :  { %v3021_v57 = vrot.slane %v3017_v55, 1  ;;  %v3022_v10 = vrot.slane %v3018_v58, 1  ;;  %v3033_v35 = vsel %vm9103_vm8, %v3030_v16, %v3032_v23  ;;  %vm9104_vm1 = vmmov %vm9103_vm8  ;;  %v3001_v11 = vadd.f32 %v2999_v4, %v2975_v48  ;;  %v9107_v48 = vld [vmem:[#allocation43_spill] sm:$0xff]  ;;  %v3056_v55 = vpop.permute.xlu1 %3055 }
 0x3b2   :  { %v3034_v43 = vsel %vm9104_vm1, %v3032_v23, %v3030_v16  ;;  %v3002_v59 = vadd.f32 %v3000_v12, %v2976_v62  ;;  %vm9106_vm2 = vcmp.eq.s32.totalorder %v5424_v8, 1  ;;  %v2343_v38 = vrot.slane %v2339_v41, 1  ;;  %v3058_v8 = vpop.permute.xlu0 %3057 }
 0x3b3   :  { %v3035_v25 = vsel %vm9105_vm15, %v3034_v43, 0.0  ;;  %v3036_v15 = vsel %vm9106_vm2, %v3033_v35, 0.0  ;;  %v3025_v56 = vadd.f32 %v3021_v57, %v3013_v31  ;;  %v3026_v52 = vadd.f32 %v3022_v10, %v3014_v42  ;;  %v9110_v42 = vld [vmem:[#allocation58_spill] sm:$0xff]  ;;  %v9114_v57 = vld [vmem:[#allocation45_spill] sm:$0xff] }
 0x3b4   :  { %v2344_v39 = vrot.slane %v2340_v20, 1  ;;  %v3039_v47 = vmul.f32 %v3035_v25, %v8858_v7  ;;  %v3040_v62 = vmul.f32 %v3036_v15, %v8858_v7  ;;  %v3043_v2 = vmul.f32 %v3035_v25, %v9107_v48  ;;  %v9112_v7 = vld [vmem:[#allocation61_spill] sm:$0xff]  ;;  %3909 = vrot.lane.b32.xlu0 %v8958_v51, %s9139_s7  ;;  %3907 = vrot.lane.b32.xlu1 %v8959_v50, %s9139_s7 }
 0x3b5   :  { %v3044_v17 = vmul.f32 %v3036_v15, %v9107_v48  ;;  %v3027_v58 = vadd.f32 %v3025_v56, %v3001_v11  ;;  %v3028_v4 = vadd.f32 %v3026_v52, %v3002_v59  ;;  %vm9108_vm10 = vcmp.lt.s32.totalorder %v4810_v61, 46  ;;  %v9115_v15 = vld [vmem:[#allocation44_spill] sm:$0xff] }
 0x3b6   :  { %v3059_v12 = vsel %vm9108_vm10, %v3056_v55, %v3058_v8  ;;  %vm9109_vm5 = vmmov %vm9108_vm10  ;;  %v3047_v41 = vrot.slane %v3043_v2, 1  ;;  %vm9111_vm8 = vcmp.eq.s32.totalorder %v9110_v42, 1  ;;  %vm9113_vm1 = vcmp.eq.s32.totalorder %v9112_v7, 1  ;;  %v3084_v48 = vpop.permute.xlu0 %3083  ;;  %v3082_v2 = vpop.permute.xlu1 %3081  ;;  %v9123_v7 = vld [vmem:[#allocation49_spill] sm:$0xff] }
 0x3b7   :  { %v3060_v31 = vsel %vm9109_vm5, %v3058_v8, %v3056_v55  ;;  %v3048_v20 = vrot.slane %v3044_v17, 1  ;;  %v3062_v16 = vsel %vm9113_vm1, %v3059_v12, 0.0  ;;  %v2347_v43 = vadd.f32 %v2343_v38, %v7382_v54  ;;  %v9118_v38 = vld [vmem:[#allocation50_spill] sm:$0xff] }
 0x3b8   :  { %v3061_v23 = vsel %vm9111_vm8, %v3060_v31, 0.0  ;;  %v3070_v35 = vmul.f32 %v3062_v16, %v9114_v57  ;;  %v2348_v11 = vadd.f32 %v2344_v39, %v7385_v27  ;;  %v3051_v59 = vadd.f32 %v3047_v41, %v3039_v47  ;;  %v9120_v39 = vld [vmem:[#allocation51_spill] sm:$0xff]  ;;  %3935 = vrot.lane.b32.xlu0 %v8958_v51, %s9148_s16  ;;  %3933 = vrot.lane.b32.xlu1 %v8959_v50, %s9148_s16 }
 0x3b9   :  { %v3069_v10 = vmul.f32 %v3061_v23, %v9114_v57  ;;  %v3052_v25 = vadd.f32 %v3048_v20, %v3040_v62  ;;  %v3065_v56 = vmul.f32 %v3061_v23, %v9115_v15  ;;  %v3066_v52 = vmul.f32 %v3062_v16, %v9115_v15 }
 0x3ba   :  { %v3074_v8 = vrot.slane %v3070_v35, 1  ;;  %vm9116_vm15 = vcmp.lt.s32.totalorder %v4810_v61, 45  ;;  %v3053_v31 = vadd.f32 %v3051_v59, %v3027_v58  ;;  %vm9119_vm10 = vcmp.eq.s32.totalorder %v9118_v38, 1  ;;  %v3108_v35 = vpop.permute.xlu1 %3107  ;;  %v9132_v38 = vld [vmem:[#allocation54_spill] sm:$0xff] }
 0x3bb   :  { %v3073_v17 = vrot.slane %v3069_v10, 1  ;;  %v3085_v55 = vsel %vm9116_vm15, %v3082_v2, %v3084_v48  ;;  %vm9117_vm2 = vmmov %vm9116_vm15  ;;  %v3054_v54 = vadd.f32 %v3052_v25, %v3028_v4  ;;  %vm9121_vm5 = vcmp.eq.s32.totalorder %v9120_v39, 1  ;;  %v9122_v4 = vld [vmem:[#allocation48_spill] sm:$0xff]  ;;  %v3110_v10 = vpop.permute.xlu0 %3109 }
 0x3bc   :  { %v3086_v12 = vsel %vm9117_vm2, %v3084_v48, %v3082_v2  ;;  %v3088_v47 = vsel %vm9121_vm5, %v3085_v55, 0.0  ;;  %v3078_v41 = vadd.f32 %v3074_v8, %v3066_v52  ;;  %v7462_v20 = vadd.f32 %v2347_v43, %v7331_v45  ;;  %v9128_v52 = vld [vmem:[#allocation53_spill] sm:$0xff]  ;;  %v9131_v2 = vld [vmem:[#allocation55_spill] sm:$0xff]  ;;  %3961 = vrot.lane.b32.xlu0 %v8958_v51, %s9155_s10  ;;  %3959 = vrot.lane.b32.xlu1 %v8959_v50, %s9155_s10 }
 0x3bd   :  { %v3087_v27 = vsel %vm9119_vm10, %v3086_v12, 0.0  ;;  %v3077_v62 = vadd.f32 %v3073_v17, %v3065_v56  ;;  %v7465_v58 = vadd.f32 %v2348_v11, %v7333_v60  ;;  %v3092_v23 = vmul.f32 %v3088_v47, %v9122_v4  ;;  %v9126_v11 = vld [vmem:[#allocation52_spill] sm:$0xff] }
 0x3be   :  { %v3091_v42 = vmul.f32 %v3087_v27, %v9122_v4  ;;  %v3095_v16 = vmul.f32 %v3087_v27, %v9123_v7  ;;  %v3096_v57 = vmul.f32 %v3088_v47, %v9123_v7  ;;  %v3080_v25 = vadd.f32 %v3078_v41, %v3054_v54 }
 0x3bf   :  { %v3079_v59 = vadd.f32 %v3077_v62, %v3053_v31  ;;  %vm9124_vm8 = vcmp.lt.s32.totalorder %v4810_v61, 35  ;;  %vm9127_vm15 = vcmp.eq.s32.totalorder %v9126_v11, 1  ;;  %vm9129_vm2 = vcmp.eq.s32.totalorder %v9128_v52, 1  ;;  %v3136_v47 = vpop.permute.xlu0 %3135  ;;  %v3134_v62 = vpop.permute.xlu1 %3133 }
 0x3c0   :  { %v3111_v15 = vsel %vm9124_vm8, %v3108_v35, %v3110_v10  ;;  %vm9125_vm1 = vmmov %vm9124_vm8  ;;  %v3099_v60 = vrot.slane %v3095_v16, 1  ;;  %v3100_v43 = vrot.slane %v3096_v57, 1  ;;  %v2363_v55 = vrot.slane %v7391_v1, %v4852_v28  ;;  %3987 = vrot.lane.b32.xlu0 %v8958_v51, %s9164_s2  ;;  %3985 = vrot.lane.b32.xlu1 %v8959_v50, %s9164_s2 }
 0x3c1   :  { %v3112_v45 = vsel %vm9125_vm1, %v3110_v10, %v3108_v35  ;;  %v3114_v48 = vsel %vm9129_vm2, %v3111_v15, 0.0  ;;  %v2367_v12 = vrot.slane %v7391_v1, %v5102_v46  ;;  %vm9133_vm10 = vcmp.lt.s32.totalorder %v4810_v61, 34  ;;  %v9135_v35 = vld [vmem:[#allocation56_spill] sm:$0xff] }
 0x3c2   :  { %v3113_v56 = vsel %vm9127_vm15, %v3112_v45, 0.0  ;;  %v3122_v8 = vmul.f32 %v3114_v48, %v9131_v2  ;;  %v3103_v31 = vadd.f32 %v3099_v60, %v3091_v42  ;;  %v3104_v54 = vadd.f32 %v3100_v43, %v3092_v23  ;;  %vm9134_vm5 = vmmov %vm9133_vm10  ;;  %v9137_v42 = vld [vmem:[#allocation57_spill] sm:$0xff] }
 0x3c3   :  { %v3121_v17 = vmul.f32 %v3113_v56, %v9131_v2  ;;  %v3117_v27 = vmul.f32 %v3113_v56, %v9132_v38  ;;  %v3118_v39 = vmul.f32 %v3114_v48, %v9132_v38  ;;  %v3137_v7 = vsel %vm9133_vm10, %v3134_v62, %v3136_v47  ;;  %v9141_v56 = vld [vmem:[#allocation60_spill] sm:$0xff]  ;;  %v3162_v2 = vpop.permute.xlu0 %3161 }
 0x3c4   :  { %v3126_v4 = vrot.slane %v3122_v8, 1  ;;  %v3138_v16 = vsel %vm9134_vm5, %v3136_v47, %v3134_v62  ;;  %v3105_v57 = vadd.f32 %v3103_v31, %v3079_v59  ;;  %v3106_v10 = vadd.f32 %v3104_v54, %v3080_v25  ;;  %v9140_v25 = vld [vmem:[#allocation59_spill] sm:$0xff]  ;;  %v9146_v47 = vld [vmem:[#allocation65_spill] sm:$0xff]  ;;  %4013 = vrot.lane.b32.xlu0 %v8958_v51, %s9173_s23  ;;  %4011 = vrot.lane.b32.xlu1 %v8959_v50, %s9173_s23 }
 0x3c5   :  { %v3125_v41 = vrot.slane %v3121_v17, 1  ;;  %vm9136_vm8 = vcmp.eq.s32.totalorder %v9135_v35, 1  ;;  %vm9138_vm1 = vcmp.eq.s32.totalorder %v9137_v42, 1  ;;  %v7504_v60 = vrot.slane %v2363_v55, %v4852_v28  ;;  %v3160_v17 = vpop.permute.xlu1 %3159 }
 0x3c6   :  { %v3139_v1 = vsel %vm9136_vm8, %v3138_v16, 0.0  ;;  %v3140_v23 = vsel %vm9138_vm1, %v3137_v7, 0.0  ;;  %v3130_v45 = vadd.f32 %v3126_v4, %v3118_v39  ;;  %v7507_v59 = vrot.slane %v2367_v12, %v4852_v28 }
 0x3c7   :  { %v3129_v15 = vadd.f32 %v3125_v41, %v3117_v27  ;;  %v3143_v43 = vmul.f32 %v3139_v1, %v9140_v25  ;;  %v3144_v11 = vmul.f32 %v3140_v23, %v9140_v25  ;;  %v3147_v52 = vmul.f32 %v3139_v1, %v9141_v56  ;;  %v9144_v27 = vld [vmem:[#allocation63_spill] sm:$0xff]  ;;  %v9149_v41 = vld [vmem:[#allocation64_spill] sm:$0xff]  ;;  %v3188_v1 = vpop.permute.xlu0 %3187 }
 0x3c8   :  { %v3148_v48 = vmul.f32 %v3140_v23, %v9141_v56  ;;  %v3132_v31 = vadd.f32 %v3130_v45, %v3106_v10  ;;  %vm9142_vm15 = vcmp.lt.s32.totalorder %v4810_v61, 33  ;;  %vm9145_vm10 = vcmp.eq.s32.totalorder %v9144_v27, 1  ;;  %4039 = vrot.lane.b32.xlu0 %v8958_v51, %s4626_s6  ;;  %4037 = vrot.lane.b32.xlu1 %v8959_v50, %s4626_s6  ;;  %s9189_s6 = smov 81  }
 0x3c9   :  { %v3131_v8 = vadd.f32 %v3129_v15, %v3105_v57  ;;  %v3163_v54 = vsel %vm9142_vm15, %v3160_v17, %v3162_v2  ;;  %vm9143_vm2 = vmmov %vm9142_vm15  ;;  %v3151_v12 = vrot.slane %v3147_v52, 1  ;;  %vm9147_vm5 = vcmp.eq.s32.totalorder %v9146_v47, 1  ;;  %v3186_v42 = vpop.permute.xlu1 %3185 }
 0x3ca   :  { %v3164_v55 = vsel %vm9143_vm2, %v3162_v2, %v3160_v17  ;;  %v3152_v38 = vrot.slane %v3148_v48, 1  ;;  %v3166_v62 = vsel %vm9147_vm5, %v3163_v54, 0.0  ;;  %vm2376_vm8 = vcmp.eq.s32.totalorder %v7504_v60, 1  ;;  %v9152_v48 = vld [vmem:[#allocation66_spill] sm:$0xff] }
 0x3cb   :  { %v3165_v39 = vsel %vm9145_vm10, %v3164_v55, 0.0  ;;  %v3174_v7 = vmul.f32 %v3166_v62, %v9149_v41  ;;  %vm8677_vm1 = vcmp.eq.s32.totalorder %v7507_v59, 1  ;;  %v3155_v16 = vadd.f32 %v3151_v12, %v3143_v43  ;;  %v9157_v55 = vld [vmem:[#allocation68_spill] sm:$0xff]  ;;  %v3214_v27 = vpop.permute.xlu0 %3213 }
 0x3cc   :  { %v3173_v4 = vmul.f32 %v3165_v39, %v9149_v41  ;;  %v3156_v57 = vadd.f32 %v3152_v38, %v3144_v11  ;;  %v3169_v10 = vmul.f32 %v3165_v39, %v8897_v13  ;;  %v3170_v35 = vmul.f32 %v3166_v62, %v8897_v13  ;;  %4065 = vrot.lane.b32.xlu0 %v8958_v51, %s9189_s6 }
 0x3cd   :  { %v3178_v15 = vrot.slane %v3174_v7, 1  ;;  %vm9150_vm15 = vcmp.lt.s32.totalorder %v4810_v61, 32  ;;  %v3157_v56 = vadd.f32 %v3155_v16, %v3131_v8  ;;  %vm9153_vm10 = vcmp.eq.s32.totalorder %v9152_v48, 1  ;;  %v3212_v39 = vpop.permute.xlu1 %3211  ;;  %v9160_v7 = vld [vmem:[#allocation70_spill] sm:$0xff]  ;;  %4063 = vrot.lane.b32.xlu1 %v8959_v50, %s9189_s6 }
 0x3ce   :  { %v3177_v23 = vrot.slane %v3173_v4, 1  ;;  %v3189_v45 = vsel %vm9150_vm15, %v3186_v42, %v3188_v1  ;;  %vm9151_vm2 = vmmov %vm9150_vm15  ;;  %v3158_v52 = vadd.f32 %v3156_v57, %v3132_v31  ;;  %vm9154_vm5 = vcmp.eq.s32.totalorder %v8868_v0, 1  ;;  %v9156_v31 = vld [vmem:[#allocation67_spill] sm:$0xff]  ;;  %v9162_v57 = vld [vmem:[#allocation72_spill] sm:$0xff] }
 0x3cf   :  { %v3190_v25 = vsel %vm9151_vm2, %v3188_v1, %v3186_v42  ;;  %v3192_v11 = vsel %vm9154_vm5, %v3189_v45, 0.0  ;;  %v3182_v2 = vadd.f32 %v3178_v15, %v3170_v35  ;;  %v2378_v17 = vsel %vm2376_vm8, %v7050_v6, 0.0  ;;  %v9165_v35 = vld [vmem:[#allocation73_spill] sm:$0xff] }
 0x3d0   :  { %v3191_v43 = vsel %vm9153_vm10, %v3190_v25, 0.0  ;;  %v3181_v13 = vadd.f32 %v3177_v23, %v3169_v10  ;;  %v2379_v8 = vsel %vm8677_vm1, %v7073_v37, 0.0  ;;  %v3196_v0 = vmul.f32 %v3192_v11, %v9156_v31  ;;  %4091 = vrot.lane.b32.xlu0 %v8958_v51, %s9198_s24 }
 0x3d1   :  { %v3195_v54 = vmul.f32 %v3191_v43, %v9156_v31  ;;  %v3199_v12 = vmul.f32 %v3191_v43, %v9157_v55  ;;  %v3200_v38 = vmul.f32 %v3192_v11, %v9157_v55  ;;  %v3184_v62 = vadd.f32 %v3182_v2, %v3158_v52  ;;  %v3240_v43 = vpop.permute.xlu0 %3239  ;;  %v3238_v11 = vpop.permute.xlu1 %3237  ;;  %4089 = vrot.lane.b32.xlu1 %v8959_v50, %s9198_s24 }
 0x3d2   :  { %v3183_v47 = vadd.f32 %v3181_v13, %v3157_v56  ;;  %vm9158_vm15 = vcmp.lt.s32.totalorder %v4810_v61, 31  ;;  %vm9161_vm10 = vcmp.eq.s32.totalorder %v9160_v7, 1  ;;  %vm9163_vm5 = vcmp.eq.s32.totalorder %v9162_v57, 1  ;;  %v9166_v56 = vld [vmem:[#allocation71_spill] sm:$0xff] }
 0x3d3   :  { %v3215_v6 = vsel %vm9158_vm15, %v3212_v39, %v3214_v27  ;;  %vm9159_vm2 = vmmov %vm9158_vm15  ;;  %v3203_v41 = vrot.slane %v3199_v12, 1  ;;  %v3204_v4 = vrot.slane %v3200_v38, 1  ;;  %v7572_v23 = vstv %s7529_s27 }
 0x3d4   :  { %v3216_v37 = vsel %vm9159_vm2, %v3214_v27, %v3212_v39  ;;  %v3218_v10 = vsel %vm9163_vm5, %v3215_v6, 0.0  ;;  %v7575_v15 = vstv %s7531_s9  ;;  %vm9167_vm15 = vcmp.lt.s32.totalorder %v4810_v61, 30  ;;  %v9169_v27 = vld [vmem:[#allocation76_spill] sm:$0xff]  ;;  %4117 = vrot.lane.b32.xlu0 %v8958_v51, %s9206_s17 }
 0x3d5   :  { %v3217_v16 = vsel %vm9161_vm10, %v3216_v37, 0.0  ;;  %v3226_v42 = vmul.f32 %v3218_v10, %v9165_v35  ;;  %v3207_v45 = vadd.f32 %v3203_v41, %v3195_v54  ;;  %v3208_v25 = vadd.f32 %v3204_v4, %v3196_v0  ;;  %vm9168_vm2 = vmmov %vm9167_vm15  ;;  %v9171_v0 = vld [vmem:[#allocation77_spill] sm:$0xff]  ;;  %4115 = vrot.lane.b32.xlu1 %v8959_v50, %s9206_s17 }
 0x3d6   :  { %v3225_v1 = vmul.f32 %v3217_v16, %v9165_v35  ;;  %v3221_v52 = vmul.f32 %v3217_v16, %v9166_v56  ;;  %v3222_v48 = vmul.f32 %v3218_v10, %v9166_v56  ;;  %v3241_v31 = vsel %vm9167_vm15, %v3238_v11, %v3240_v43  ;;  %v9175_v16 = vld [vmem:[#allocation75_spill] sm:$0xff]  ;;  %v3266_v35 = vpop.permute.xlu0 %3265 }
 0x3d7   :  { %v3230_v2 = vrot.slane %v3226_v42, 1  ;;  %v3242_v55 = vsel %vm9168_vm2, %v3240_v43, %v3238_v11  ;;  %v3209_v12 = vadd.f32 %v3207_v45, %v3183_v47  ;;  %v3210_v38 = vadd.f32 %v3208_v25, %v3184_v62  ;;  %v9174_v47 = vld [vmem:[#allocation74_spill] sm:$0xff]  ;;  %v9178_v43 = vld [vmem:[#allocation79_spill] sm:$0xff] }
 0x3d8   :  { %v3229_v13 = vrot.slane %v3225_v1, 1  ;;  %vm9170_vm10 = vcmp.eq.s32.totalorder %v9169_v27, 1  ;;  %vm9172_vm5 = vcmp.eq.s32.totalorder %v9171_v0, 1  ;;  %v2382_v41 = vmul.f32 %v7572_v23, %v2378_v17  ;;  %v3264_v1 = vpop.permute.xlu1 %3263  ;;  %4143 = vrot.lane.b32.xlu0 %v8958_v51, %s9216_s4 }
 0x3d9   :  { %v3243_v54 = vsel %vm9170_vm10, %v3242_v55, 0.0  ;;  %v3244_v39 = vsel %vm9172_vm5, %v3241_v31, 0.0  ;;  %v3234_v37 = vadd.f32 %v3230_v2, %v3222_v48  ;;  %v2383_v4 = vmul.f32 %v7572_v23, %v2379_v8  ;;  %v9182_v31 = vld [vmem:[#allocation81_spill] sm:$0xff]  ;;  %4141 = vrot.lane.b32.xlu1 %v8959_v50, %s9216_s4 }
 0x3da   :  { %v3233_v6 = vadd.f32 %v3229_v13, %v3221_v52  ;;  %v3247_v62 = vmul.f32 %v3243_v54, %v9174_v47  ;;  %v3248_v7 = vmul.f32 %v3244_v39, %v9174_v47  ;;  %v3251_v57 = vmul.f32 %v3243_v54, %v9175_v16  ;;  %v9180_v13 = vld [vmem:[#allocation80_spill] sm:$0xff] }
 0x3db   :  { %v3252_v10 = vmul.f32 %v3244_v39, %v9175_v16  ;;  %v3236_v45 = vadd.f32 %v3234_v37, %v3210_v38  ;;  %vm9176_vm15 = vcmp.lt.s32.totalorder %v4810_v61, 29  ;;  %vm9179_vm10 = vcmp.eq.s32.totalorder %v9178_v43, 1  ;;  %v3292_v37 = vpop.permute.xlu0 %3291  ;;  %v9190_v43 = vld [vmem:[#allocation84_spill] sm:$0xff] }
 0x3dc   :  { %v3235_v42 = vadd.f32 %v3233_v6, %v3209_v12  ;;  %v3267_v25 = vsel %vm9176_vm15, %v3264_v1, %v3266_v35  ;;  %vm9177_vm2 = vmmov %vm9176_vm15  ;;  %v3255_v52 = vrot.slane %v3251_v57, 1  ;;  %vm9181_vm5 = vcmp.eq.s32.totalorder %v9180_v13, 1  ;;  %v3290_v47 = vpop.permute.xlu1 %3289  ;;  %4169 = vrot.lane.b32.xlu0 %v8958_v51, %s4631_s1 }
 0x3dd   :  { %v3268_v56 = vsel %vm9177_vm2, %v3266_v35, %v3264_v1  ;;  %v3256_v48 = vrot.slane %v3252_v10, 1  ;;  %v3270_v2 = vsel %vm9181_vm5, %v3267_v25, 0.0  ;;  %v2386_v38 = vmul.f32 %v7575_v15, %v2378_v17  ;;  %v9185_v25 = vld [vmem:[#allocation82_spill] sm:$0xff]  ;;  %4167 = vrot.lane.b32.xlu1 %v8959_v50, %s4631_s1  ;;  %s7759_s1 = sld [smem:[#allocation2 + $0x5c]] }
 0x3de   :  { %v3269_v11 = vsel %vm9179_vm10, %v3268_v56, 0.0  ;;  %v3278_v12 = vmul.f32 %v3270_v2, %v9182_v31  ;;  %v2387_v27 = vmul.f32 %v7575_v15, %v2379_v8  ;;  %v3259_v54 = vadd.f32 %v3255_v52, %v3247_v62  ;;  %v9187_v62 = vld [vmem:[#allocation83_spill] sm:$0xff] }
 0x3df   :  { %v3277_v55 = vmul.f32 %v3269_v11, %v9182_v31  ;;  %v3260_v0 = vadd.f32 %v3256_v48, %v3248_v7  ;;  %v3273_v39 = vmul.f32 %v3269_v11, %v8925_v21  ;;  %v3274_v6 = vmul.f32 %v3270_v2, %v8925_v21  ;;  %v3318_v31 = vpop.permute.xlu0 %3317 }
 0x3e0   :  { %v3282_v57 = vrot.slane %v3278_v12, 1  ;;  %vm9183_vm15 = vcmp.lt.s32.totalorder %v4810_v61, 19  ;;  %v3261_v1 = vadd.f32 %v3259_v54, %v3235_v42  ;;  %vm9186_vm10 = vcmp.eq.s32.totalorder %v9185_v25, 1 }
 0x3e1   :  { %v3281_v16 = vrot.slane %v3277_v55, 1  ;;  %v3293_v10 = vsel %vm9183_vm15, %v3290_v47, %v3292_v37  ;;  %vm9184_vm2 = vmmov %vm9183_vm15  ;;  %v3262_v17 = vadd.f32 %v3260_v0, %v3236_v45  ;;  %vm9188_vm5 = vcmp.eq.s32.totalorder %v9187_v62, 1  ;;  %v9191_v45 = vld [vmem:[#allocation85_spill] sm:$0xff]  ;;  %v3316_v55 = vpop.permute.xlu1 %3315 }
 0x3e2   :  { %v3294_v35 = vsel %vm9184_vm2, %v3292_v37, %v3290_v47  ;;  %v3296_v7 = vsel %vm9188_vm5, %v3293_v10, 0.0  ;;  %v3286_v56 = vadd.f32 %v3282_v57, %v3274_v6  ;;  %v2390_v52 = vrot.slane %v2386_v38, 1  ;;  %v9194_v6 = vld [vmem:[#allocation86_spill] sm:$0xff]  ;;  %v9196_v47 = vld [vmem:[#allocation87_spill] sm:$0xff] }
 0x3e3   :  { %v3295_v8 = vsel %vm9186_vm10, %v3294_v35, 0.0  ;;  %v3285_v21 = vadd.f32 %v3281_v16, %v3273_v39  ;;  %v2391_v48 = vrot.slane %v2387_v27, 1  ;;  %v3300_v42 = vmul.f32 %v3296_v7, %v9190_v43 }
 0x3e4   :  { %v3299_v11 = vmul.f32 %v3295_v8, %v9190_v43  ;;  %v3303_v13 = vmul.f32 %v3295_v8, %v9191_v45  ;;  %v3304_v2 = vmul.f32 %v3296_v7, %v9191_v45  ;;  %v3288_v54 = vadd.f32 %v3286_v56, %v3262_v17  ;;  %v9199_v8 = vld [vmem:[#allocation88_spill] sm:$0xff] }
 0x3e5   :  { %v3287_v12 = vadd.f32 %v3285_v21, %v3261_v1  ;;  %vm9192_vm15 = vcmp.lt.s32.totalorder %v4810_v61, 18  ;;  %vm9195_vm10 = vcmp.eq.s32.totalorder %v9194_v6, 1  ;;  %vm9197_vm5 = vcmp.eq.s32.totalorder %v9196_v47, 1  ;;  %v3344_v21 = vpop.permute.xlu0 %3343  ;;  %v3342_v56 = vpop.permute.xlu1 %3341 }
 0x3e6   :  { %v3319_v0 = vsel %vm9192_vm15, %v3316_v55, %v3318_v31  ;;  %vm9193_vm2 = vmmov %vm9192_vm15  ;;  %v3307_v38 = vrot.slane %v3303_v13, 1  ;;  %v3308_v27 = vrot.slane %v3304_v2, 1  ;;  %v2394_v35 = vadd.f32 %v2390_v52, %v2382_v41  ;;  %v9202_v52 = vld [vmem:[#allocation90_spill] sm:$0xff] }
 0x3e7   :  { %v3320_v39 = vsel %vm9193_vm2, %v3318_v31, %v3316_v55  ;;  %v3322_v16 = vsel %vm9197_vm5, %v3319_v0, 0.0  ;;  %v2395_v1 = vadd.f32 %v2391_v48, %v2383_v4  ;;  %vm9200_vm15 = vcmp.lt.s32.totalorder %v4810_v61, 17 }
 0x3e8   :  { %v3321_v37 = vsel %vm9195_vm10, %v3320_v39, 0.0  ;;  %v3330_v10 = vmul.f32 %v3322_v16, %v8937_v44  ;;  %v3311_v17 = vadd.f32 %v3307_v38, %v3299_v11  ;;  %v3312_v25 = vadd.f32 %v3308_v27, %v3300_v42  ;;  %vm9201_vm2 = vmmov %vm9200_vm15  ;;  %v9204_v11 = vld [vmem:[#allocation91_spill] sm:$0xff]  ;;  %v9209_v27 = vld [vmem:[#allocation94_spill] sm:$0xff] }
 0x3e9   :  { %v3329_v57 = vmul.f32 %v3321_v37, %v8937_v44  ;;  %v3325_v62 = vmul.f32 %v3321_v37, %v9199_v8  ;;  %v3326_v7 = vmul.f32 %v3322_v16, %v9199_v8  ;;  %v3345_v13 = vsel %vm9200_vm15, %v3342_v56, %v3344_v21  ;;  %vm2405_vm15 = vmand %vm5083_vm12, %vm5117_vm3 }
 0x3ea   :  { %v3334_v45 = vrot.slane %v3330_v10, 1  ;;  %v3346_v44 = vsel %vm9201_vm2, %v3344_v21, %v3342_v56  ;;  %v3313_v41 = vadd.f32 %v3311_v17, %v3287_v12  ;;  %v3314_v4 = vadd.f32 %v3312_v25, %v3288_v54 }
 0x3eb   :  { %v3333_v43 = vrot.slane %v3329_v57, 1  ;;  %vm9203_vm10 = vcmp.eq.s32.totalorder %v9202_v52, 1  ;;  %vm9205_vm5 = vcmp.eq.s32.totalorder %v9204_v11, 1  ;;  %v9207_v2 = vrot.slane %v7294_v14, 1  ;;  %v3370_v14 = vpop.permute.xlu0 %3369  ;;  %v9212_v57 = vld [vmem:[#allocation95_spill] sm:$0xff] }
 0x3ec   :  { %v3347_v48 = vsel %vm9203_vm10, %v3346_v44, 0.0  ;;  %v3348_v42 = vsel %vm9205_vm5, %v3345_v13, 0.0  ;;  %v9208_v55 = vrot.slane %v7298_v5, 1  ;;  %v7672_v54 = vadd.f32 %v2394_v35, %v7462_v20  ;;  %v9214_v35 = vld [vmem:[#allocation96_spill] sm:$0xff] }
 0x3ed   :  { %v7664_v31 = vadd.f32 %v9207_v2, %v7315_v40  ;;  %v7675_v0 = vadd.f32 %v2395_v1, %v7465_v58  ;;  %v3337_v39 = vadd.f32 %v3333_v43, %v3325_v62  ;;  %v3338_v38 = vadd.f32 %v3334_v45, %v3326_v7  ;;  %v3368_v40 = vpop.permute.xlu1 %3367 }
 0x3ee   :  { %v7669_v12 = vadd.f32 %v9208_v55, %v7319_v18  ;;  %v3355_v6 = vmul.f32 %v3347_v48, %v9209_v27  ;;  %v3356_v37 = vmul.f32 %v3348_v42, %v9209_v27  ;;  %v3351_v5 = vmul.f32 %v3347_v48, %v8939_v9  ;;  %v9219_v48 = vld [vmem:[#allocation98_spill] sm:$0xff] }
 0x3ef   :  { %v3352_v18 = vmul.f32 %v3348_v42, %v8939_v9  ;;  %vm9210_vm2 = vcmp.lt.s32.totalorder %v4810_v61, 16  ;;  %vm9213_vm5 = vcmp.eq.s32.totalorder %v9212_v57, 1  ;;  %vm9215_vm1 = vcmp.eq.s32.totalorder %v9214_v35, 1  ;;  %v3396_v56 = vpop.permute.xlu0 %3395  ;;  %v9220_v42 = vld [vmem:[#allocation99_spill] sm:$0xff]  ;;  %v9228_v35 = vld [vmem:[#allocation105_spill] sm:$0xff] }
 0x3f0   :  { %v3371_v20 = vsel %vm9210_vm2, %v3368_v40, %v3370_v14  ;;  %vm9211_vm10 = vmmov %vm9210_vm2  ;;  %v3359_v47 = vrot.slane %v3355_v6, 1  ;;  %v3360_v16 = vrot.slane %v3356_v37, 1  ;;  %v2406_v17 = vsel %vm2405_vm15, 1, %v8759_v36 }
 0x3f1   :  { %v3372_v58 = vsel %vm9211_vm10, %v3370_v14, %v3368_v40  ;;  %v3374_v24 = vsel %vm9215_vm1, %v3371_v20, 0.0  ;;  %v7701_v25 = vstv %s7645_s25  ;;  %v3339_v8 = vadd.f32 %v3337_v39, %v3313_v41  ;;  %v3394_v43 = vpop.permute.xlu1 %3393  ;;  %v9224_v14 = vld [vmem:[#allocation104_spill] sm:$0xff] }
 0x3f2   :  { %v3373_v10 = vsel %vm9213_vm5, %v3372_v58, 0.0  ;;  %v3382_v1 = vmul.f32 %v3374_v24, %v8945_v19  ;;  %v3340_v62 = vadd.f32 %v3338_v38, %v3314_v4  ;;  %v3363_v7 = vadd.f32 %v3359_v47, %v3351_v5  ;;  %v9222_v4 = vld [vmem:[#allocation100_spill] sm:$0xff]  ;;  %v9225_v58 = vld [vmem:[#allocation103_spill] sm:$0xff] }
 0x3f3   :  { %v3381_v9 = vmul.f32 %v3373_v10, %v8945_v19  ;;  %v3364_v21 = vadd.f32 %v3360_v16, %v3352_v18  ;;  %vm9217_vm3 = vcmp.lt.s32.totalorder %v4810_v61, 15  ;;  %v3377_v19 = vmul.f32 %v3373_v10, %v9219_v48  ;;  %v3422_v18 = vpop.permute.xlu0 %3421 }
 0x3f4   :  { %v3386_v13 = vrot.slane %v3382_v1, 1  ;;  %v3397_v44 = vsel %vm9217_vm3, %v3394_v43, %v3396_v56  ;;  %vm9218_vm1 = vmmov %vm9217_vm3  ;;  %v3378_v11 = vmul.f32 %v3374_v24, %v9219_v48  ;;  %vm9221_vm15 = vcmp.eq.s32.totalorder %v9220_v42, 1 }
 0x3f5   :  { %v3385_v45 = vrot.slane %v3381_v9, 1  ;;  %v3398_v52 = vsel %vm9218_vm1, %v3396_v56, %v3394_v43  ;;  %vm9223_vm2 = vcmp.eq.s32.totalorder %v9222_v4, 1  ;;  %v3365_v55 = vadd.f32 %v3363_v7, %v3339_v8  ;;  %v3420_v20 = vpop.permute.xlu1 %3419  ;;  %v9230_v9 = vld [vmem:[#allocation107_spill] sm:$0xff] }
 0x3f6   :  { %v3399_v41 = vsel %vm9221_vm15, %v3398_v52, 0.0  ;;  %v3400_v2 = vsel %vm9223_vm2, %v3397_v44, 0.0  ;;  %v3366_v39 = vadd.f32 %v3364_v21, %v3340_v62  ;;  %v2410_v38 = vrot.slane %v2406_v17, %v4852_v28 }
 0x3f7   :  { %v2414_v27 = vrot.slane %v2406_v17, %v5102_v46  ;;  %v3389_v6 = vadd.f32 %v3385_v45, %v3377_v19  ;;  %v3390_v37 = vadd.f32 %v3386_v13, %v3378_v11  ;;  %v3407_v40 = vmul.f32 %v3399_v41, %v9224_v14  ;;  %v9232_v17 = vld [vmem:[#allocation109_spill] sm:$0xff]  ;;  %v9233_v13 = vld [vmem:[#allocation108_spill] sm:$0xff]  ;;  %v3448_v52 = vpop.permute.xlu0 %3447 }
 0x3f8   :  { %v3408_v5 = vmul.f32 %v3400_v2, %v9224_v14  ;;  %v3403_v47 = vmul.f32 %v3399_v41, %v9225_v58  ;;  %v3404_v51 = vmul.f32 %v3400_v2, %v9225_v58  ;;  %vm9226_vm10 = vcmp.lt.s32.totalorder %v4810_v61, 14 }
 0x3f9   :  { %v3423_v50 = vsel %vm9226_vm10, %v3420_v20, %v3422_v18  ;;  %vm9227_vm5 = vmmov %vm9226_vm10  ;;  %v3411_v57 = vrot.slane %v3407_v40, 1  ;;  %vm9229_vm3 = vcmp.eq.s32.totalorder %v9228_v35, 1  ;;  %vm9231_vm1 = vcmp.eq.s32.totalorder %v9230_v9, 1  ;;  %v3446_v48 = vpop.permute.xlu1 %3445  ;;  %v9244_v9 = vld [vmem:[#allocation114_spill] sm:$0xff] }
 0x3fa   :  { %v3424_v16 = vsel %vm9227_vm5, %v3422_v18, %v3420_v20  ;;  %v3412_v10 = vrot.slane %v3408_v5, 1  ;;  %v3426_v1 = vsel %vm9231_vm1, %v3423_v50, 0.0  ;;  %v7734_v7 = vrot.slane %v2410_v38, %v4852_v28  ;;  %v9236_v38 = vld [vmem:[#allocation110_spill] sm:$0xff]  ;;  %v9240_v20 = vld [vmem:[#allocation113_spill] sm:$0xff] }
 0x3fb   :  { %v3425_v24 = vsel %vm9229_vm3, %v3424_v16, 0.0  ;;  %v3434_v62 = vmul.f32 %v3426_v1, %v9232_v17  ;;  %v7737_v21 = vrot.slane %v2414_v27, %v4852_v28  ;;  %v3391_v56 = vadd.f32 %v3389_v6, %v3365_v55  ;;  %v9238_v27 = vld [vmem:[#allocation111_spill] sm:$0xff] }
 0x3fc   :  { %v3433_v8 = vmul.f32 %v3425_v24, %v9232_v17  ;;  %v3415_v43 = vadd.f32 %v3411_v57, %v3403_v47  ;;  %v3416_v45 = vadd.f32 %v3412_v10, %v3404_v51  ;;  %v3429_v44 = vmul.f32 %v3425_v24, %v9233_v13  ;;  %v9241_v51 = vld [vmem:[#allocation112_spill] sm:$0xff]  ;;  %v9246_v17 = vld [vmem:[#allocation115_spill] sm:$0xff] }
 0x3fd   :  { %v3438_v11 = vrot.slane %v3434_v62, 1  ;;  %vm9234_vm15 = vcmp.lt.s32.totalorder %v4810_v61, 13  ;;  %v3392_v4 = vadd.f32 %v3390_v37, %v3366_v39  ;;  %v3430_v2 = vmul.f32 %v3426_v1, %v9233_v13  ;;  %v3474_v37 = vpop.permute.xlu0 %3473  ;;  %v3472_v47 = vpop.permute.xlu1 %3471 }
 0x3fe   :  { %v3437_v19 = vrot.slane %v3433_v8, 1  ;;  %v3449_v42 = vsel %vm9234_vm15, %v3446_v48, %v3448_v52  ;;  %vm9235_vm2 = vmmov %vm9234_vm15  ;;  %vm9237_vm10 = vcmp.eq.s32.totalorder %v9236_v38, 1  ;;  %vm9239_vm5 = vcmp.eq.s32.totalorder %v9238_v27, 1 }
 0x3ff   :  { %v3450_v41 = vsel %vm9235_vm2, %v3448_v52, %v3446_v48  ;;  %v3452_v6 = vsel %vm9239_vm5, %v3449_v42, 0.0  ;;  %v3417_v14 = vadd.f32 %v3415_v43, %v3391_v56  ;;  %vm2423_vm3 = vcmp.eq.s32.totalorder %v7734_v7, 1  ;;  %v9248_v56 = vld [vmem:[#allocation117_spill] sm:$0xff]  ;;  %v9249_v48 = vld [vmem:[#allocation116_spill] sm:$0xff] }
 0x400   :  { %v3451_v55 = vsel %vm9237_vm10, %v3450_v41, 0.0  ;;  %v3441_v40 = vadd.f32 %v3437_v19, %v3429_v44  ;;  %vm8678_vm1 = vcmp.eq.s32.totalorder %v7737_v21, 1  ;;  %v3418_v5 = vadd.f32 %v3416_v45, %v3392_v4 }
 0x401   :  { %v3442_v18 = vadd.f32 %v3438_v11, %v3430_v2  ;;  %v3459_v58 = vmul.f32 %v3451_v55, %v9240_v20  ;;  %v3460_v39 = vmul.f32 %v3452_v6, %v9240_v20  ;;  %v3455_v50 = vmul.f32 %v3451_v55, %v9241_v51  ;;  %v3500_v42 = vpop.permute.xlu0 %3499  ;;  %v3498_v41 = vpop.permute.xlu1 %3497 }
 0x402   :  { %v3456_v16 = vmul.f32 %v3452_v6, %v9241_v51  ;;  %vm9242_vm15 = vcmp.lt.s32.totalorder %v4810_v61, 3  ;;  %vm9245_vm10 = vcmp.eq.s32.totalorder %v9244_v9, 1  ;;  %vm9247_vm5 = vcmp.eq.s32.totalorder %v9246_v17, 1  ;;  %v9252_v6 = vld [vmem:[#allocation118_spill] sm:$0xff] }
 0x403   :  { %v3475_v57 = vsel %vm9242_vm15, %v3472_v47, %v3474_v37  ;;  %vm9243_vm2 = vmmov %vm9242_vm15  ;;  %v3463_v35 = vrot.slane %v3459_v58, 1  ;;  %v3464_v24 = vrot.slane %v3460_v39, 1  ;;  %v3443_v62 = vadd.f32 %v3441_v40, %v3417_v14  ;;  %v9254_v14 = vld [vmem:[#allocation119_spill] sm:$0xff] }
 0x404   :  { %v3476_v10 = vsel %vm9243_vm2, %v3474_v37, %v3472_v47  ;;  %v3478_v8 = vsel %vm9247_vm5, %v3475_v57, 0.0  ;;  %v2425_v13 = vsel %vm2423_vm3, %v7105_v53, 0.0  ;;  %vm9250_vm15 = vcmp.lt.s32.totalorder %v4810_v61, 2 }
 0x405   :  { %v3477_v1 = vsel %vm9245_vm10, %v3476_v10, 0.0  ;;  %v3486_v45 = vmul.f32 %v3478_v8, %v9248_v56  ;;  %v3467_v44 = vadd.f32 %v3463_v35, %v3455_v50  ;;  %v3468_v52 = vadd.f32 %v3464_v24, %v3456_v16  ;;  %vm9251_vm2 = vmmov %vm9250_vm15  ;;  %v9256_v50 = vld [vmem:[#allocation120_spill] sm:$0xff]  ;;  %v3526_v10 = vpop.permute.xlu0 %3525  ;;  %v3524_v35 = vpop.permute.xlu1 %3523 }
 0x406   :  { %v3485_v43 = vmul.f32 %v3477_v1, %v9248_v56  ;;  %v3481_v19 = vmul.f32 %v3477_v1, %v9249_v48  ;;  %v3482_v11 = vmul.f32 %v3478_v8, %v9249_v48  ;;  %v3501_v38 = vsel %vm9250_vm15, %v3498_v41, %v3500_v42  ;;  %v9264_v48 = vld [vmem:[#allocation42_spill] sm:$0xff] }
 0x407   :  { %v3490_v2 = vrot.slane %v3486_v45, 1  ;;  %v3502_v55 = vsel %vm9251_vm2, %v3500_v42, %v3498_v41  ;;  %v3444_v27 = vadd.f32 %v3442_v18, %v3418_v5  ;;  %vm9253_vm10 = vcmp.eq.s32.totalorder %v9252_v6, 1  ;;  %v9257_v18 = vld [vmem:[#allocation121_spill] sm:$0xff] }
 0x408   :  { %v3489_v4 = vrot.slane %v3485_v43, 1  ;;  %v3503_v53 = vsel %vm9253_vm10, %v3502_v55, 0.0  ;;  %vm9255_vm5 = vcmp.eq.s32.totalorder %v9254_v14, 1  ;;  %v2426_v20 = vsel %vm8678_vm1, %v7109_v49, 0.0  ;;  %v9262_v43 = vld [vmem:[#allocation123_spill] sm:$0xff] }
 0x409   :  { %v3504_v40 = vsel %vm9255_vm5, %v3501_v38, 0.0  ;;  %v3469_v58 = vadd.f32 %v3467_v44, %v3443_v62  ;;  %v3494_v37 = vadd.f32 %v3490_v2, %v3482_v11  ;;  %v7784_v47 = vmul.f32 %v7701_v25, %v2425_v13  ;;  %v9260_v62 = vld [vmem:[#allocation122_spill] sm:$0xff]  ;;  %v3572_v55 = vpop.permute.xlu0 %3571 }
 0x40a   :  { %v3493_v39 = vadd.f32 %v3489_v4, %v3481_v19  ;;  %v3470_v51 = vadd.f32 %v3468_v52, %v3444_v27  ;;  %v3507_v5 = vmul.f32 %v3503_v53, %v9256_v50  ;;  %v3511_v16 = vmul.f32 %v3503_v53, %v9257_v18  ;;  %v9265_v4 = vld [vmem:[#allocation124_spill] sm:$0xff]  ;;  %v3570_v27 = vpop.permute.xlu1 %3569 }
 0x40b   :  { %v3512_v57 = vmul.f32 %v3504_v40, %v9257_v18  ;;  %v3508_v24 = vmul.f32 %v3504_v40, %v9256_v50  ;;  %vm9258_vm15 = vcmp.lt.s32.totalorder %v4810_v61, 1  ;;  %v7795_v1 = vstv %s7759_s1 }
 0x40c   :  { %v3527_v49 = vsel %vm9258_vm15, %v3524_v35, %v3526_v10  ;;  %vm9259_vm2 = vmmov %vm9258_vm15  ;;  %v3515_v17 = vrot.slane %v3511_v16, 1  ;;  %vm9261_vm10 = vcmp.eq.s32.totalorder %v9260_v62, 1  ;;  %vm9263_vm5 = vcmp.eq.s32.totalorder %v9262_v43, 1 }
 0x40d   :  { %v3528_v9 = vsel %vm9259_vm2, %v3526_v10, %v3524_v35  ;;  %v3516_v8 = vrot.slane %v3512_v57, 1  ;;  %v3530_v45 = vsel %vm9263_vm5, %v3527_v49, 0.0  ;;  %v3495_v44 = vadd.f32 %v3493_v39, %v3469_v58  ;;  %v9268_v58 = vld [vmem:[#allocation69_spill] sm:$0xff]  ;;  %v3598_v62 = vpop.permute.xlu0 %3597 }
 0x40e   :  { %v3529_v56 = vsel %vm9261_vm10, %v3528_v9, 0.0  ;;  %v3496_v52 = vadd.f32 %v3494_v37, %v3470_v51  ;;  %v3538_v11 = vmul.f32 %v3530_v45, %v9264_v48  ;;  %v3519_v42 = vadd.f32 %v3515_v17, %v3507_v5  ;;  %v9270_v37 = vld [vmem:[#allocation62_spill] sm:$0xff]  ;;  %v9272_v35 = vld [vmem:[#allocation125_spill] sm:$0xff] }
 0x40f   :  { %v3537_v19 = vmul.f32 %v3529_v56, %v9264_v48  ;;  %v3520_v41 = vadd.f32 %v3516_v8, %v3508_v24  ;;  %v3533_v2 = vmul.f32 %v3529_v56, %v9265_v4  ;;  %v3534_v38 = vmul.f32 %v3530_v45, %v9265_v4  ;;  %v9273_v9 = vld [vmem:[#allocation126_spill] sm:$0xff]  ;;  %v3596_v56 = vpop.permute.xlu1 %3595 }
 0x410   :  { %v3542_v53 = vrot.slane %v3538_v11, 1  ;;  %vm9266_vm15 = vcmp.lt.s32.totalorder %v4810_v61, 127  ;;  %vm9269_vm10 = vcmp.eq.s32.totalorder %v9268_v58, 1  ;;  %vm9271_vm5 = vcmp.eq.s32.totalorder %v9270_v37, 1  ;;  %v9277_v11 = vld [vmem:[#allocation78_spill] sm:$0xff]  ;;  %v9283_v58 = vld [vmem:[#allocation32_spill] sm:$0xff] }
 0x411   :  { %v3541_v6 = vrot.slane %v3537_v19, 1  ;;  %v3573_v14 = vsel %vm9266_vm15, %v3570_v27, %v3572_v55  ;;  %vm9267_vm2 = vmmov %vm9266_vm15  ;;  %v7814_v50 = vmul.f32 %v7795_v1, %v2425_v13  ;;  %v7817_v5 = vmul.f32 %v7795_v1, %v2426_v20 }
 0x412   :  { %v3574_v40 = vsel %vm9267_vm2, %v3572_v55, %v3570_v27  ;;  %v3575_v39 = vsel %vm9269_vm10, %v3573_v14, 0.0  ;;  %v3521_v18 = vadd.f32 %v3519_v42, %v3495_v44  ;;  %v3522_v16 = vadd.f32 %v3520_v41, %v3496_v52  ;;  %vm2452_vm15 = vmand %vm5083_vm12, %vm5166_vm7  ;;  %v9279_v41 = vld [vmem:[#allocation89_spill] sm:$0xff]  ;;  %v9282_v55 = vld [vmem:[#allocation106_spill] sm:$0xff] }
 0x413   :  { %v3576_v51 = vsel %vm9271_vm5, %v3574_v40, 0.0  ;;  %v3545_v57 = vadd.f32 %v3541_v6, %v3533_v2  ;;  %v3546_v10 = vadd.f32 %v3542_v53, %v3534_v38  ;;  %v3579_v24 = vmul.f32 %v3575_v39, %v9272_v35  ;;  %v9281_v2 = vld [vmem:[#allocation102_spill] sm:$0xff] }
 0x414   :  { %v3580_v49 = vmul.f32 %v3576_v51, %v9272_v35  ;;  %v3583_v17 = vmul.f32 %v3575_v39, %v9273_v9  ;;  %v3584_v8 = vmul.f32 %v3576_v51, %v9273_v9  ;;  %vm9275_vm2 = vcmp.lt.s32.totalorder %v4810_v61, 126  ;;  %v3624_v51 = vpop.permute.xlu0 %3623  ;;  %v9286_v35 = vld [vmem:[#allocation93_spill] sm:$0xff] }
 0x415   :  { %v3547_v13 = vadd.f32 %v3545_v57, %v3521_v18  ;;  %v3548_v45 = vadd.f32 %v3546_v10, %v3522_v16  ;;  %v3599_v44 = vsel %vm9275_vm2, %v3596_v56, %v3598_v62  ;;  %vm9276_vm10 = vmmov %vm9275_vm2  ;;  %vm9278_vm5 = vcmp.eq.s32.totalorder %v9277_v11, 1  ;;  %v3622_v18 = vpop.permute.xlu1 %3621 }
 0x416   :  { %v3600_v52 = vsel %vm9276_vm10, %v3598_v62, %v3596_v56  ;;  %v3587_v48 = vrot.slane %v3583_v17, 1  ;;  %v3588_v19 = vrot.slane %v3584_v8, 1  ;;  %v3601_v42 = vsel %vm9278_vm5, %v3599_v44, 0.0  ;;  %v9287_v56 = vld [vmem:[#allocation101_spill] sm:$0xff] }
 0x417   :  { %vm9280_vm1 = vcmp.eq.s32.totalorder %v9279_v41, 1  ;;  %v3567_v38 = vadd.f32 %v9281_v2, %v3547_v13  ;;  %v3568_v27 = vadd.f32 %v9282_v55, %v3548_v45  ;;  %v2430_v6 = vmul.f32 %v7701_v25, %v2426_v20  ;;  %v9289_v13 = vld [vmem:[#allocation33_spill] sm:$0xff] }
 0x418   :  { %v3602_v4 = vsel %vm9280_vm1, %v3600_v52, 0.0  ;;  %v7839_v53 = vsel %vm2452_vm15, 1, %v8759_v36  ;;  %v3591_v14 = vadd.f32 %v3587_v48, %v3579_v24  ;;  %v3592_v40 = vadd.f32 %v3588_v19, %v3580_v49  ;;  %v9291_v48 = vld [vmem:[#allocation92_spill] sm:$0xff]  ;;  %v3650_v19 = vpop.permute.xlu0 %3649 }
 0x419   :  { %v3609_v39 = vmul.f32 %v3601_v42, %v9283_v58  ;;  %v3610_v37 = vmul.f32 %v3602_v4, %v9283_v58  ;;  %vm9284_vm7 = vcmp.lt.s32.totalorder %v4810_v61, 125  ;;  %v2437_v10 = vrot.slane %v7814_v50, 1  ;;  %v3648_v11 = vpop.permute.xlu1 %3647  ;;  %v9297_v58 = vld [vmem:[#allocation25_spill] sm:$0xff] }
 0x41a   :  { %v3625_v16 = vsel %vm9284_vm7, %v3622_v18, %v3624_v51  ;;  %vm9285_vm1 = vmmov %vm9284_vm7  ;;  %v2438_v20 = vrot.slane %v7817_v5, 1  ;;  %v3605_v9 = vmul.f32 %v3601_v42, %v9286_v35  ;;  %v3606_v24 = vmul.f32 %v3602_v4, %v9286_v35  ;;  %v9292_v42 = vld [vmem:[#allocation97_spill] sm:$0xff]  ;;  %v9300_v35 = vld [vmem:[#allocation127_spill] sm:$0xff] }
 0x41b   :  { %v3626_v57 = vsel %vm9285_vm1, %v3624_v51, %v3622_v18  ;;  %v3613_v49 = vrot.slane %v3609_v39, 1  ;;  %v3614_v17 = vrot.slane %v3610_v37, 1  ;;  %v3593_v8 = vadd.f32 %v3591_v14, %v3567_v38  ;;  %v9295_v14 = vld [vmem:[#allocation22_spill] sm:$0xff]  ;;  %v9299_v18 = vld [vmem:[#allocation24_spill] sm:$0xff] }
 0x41c   :  { %v3594_v62 = vadd.f32 %v3592_v40, %v3568_v27  ;;  %vm9288_vm15 = vcmp.eq.s32.totalorder %v9287_v56, 1  ;;  %vm9290_vm2 = vcmp.eq.s32.totalorder %v9289_v13, 1  ;;  %vm9293_vm10 = vcmp.lt.s32.totalorder %v4810_v61, 115 }
 0x41d   :  { %v3627_v43 = vsel %vm9288_vm15, %v3625_v16, 0.0  ;;  %v3628_v45 = vsel %vm9290_vm2, %v3626_v57, 0.0  ;;  %v3617_v44 = vadd.f32 %v3613_v49, %v3605_v9  ;;  %v3618_v52 = vadd.f32 %v3614_v17, %v3606_v24  ;;  %vm9294_vm5 = vmmov %vm9293_vm10  ;;  %v3676_v49 = vpop.permute.xlu0 %3675  ;;  %v3674_v17 = vpop.permute.xlu1 %3673 }
 0x41e   :  { %v3631_v50 = vmul.f32 %v3627_v43, %v9291_v48  ;;  %v3632_v5 = vmul.f32 %v3628_v45, %v9291_v48  ;;  %v3635_v41 = vmul.f32 %v3627_v43, %v9292_v42  ;;  %v3636_v4 = vmul.f32 %v3628_v45, %v9292_v42  ;;  %v9303_v48 = vld [vmem:[#allocation129_spill] sm:$0xff] }
 0x41f   :  { %v3651_v2 = vsel %vm9293_vm10, %v3648_v11, %v3650_v19  ;;  %v3652_v38 = vsel %vm9294_vm5, %v3650_v19, %v3648_v11  ;;  %v3619_v55 = vadd.f32 %v3617_v44, %v3593_v8  ;;  %v3620_v27 = vadd.f32 %v3618_v52, %v3594_v62  ;;  %v9305_v11 = vld [vmem:[#allocation130_spill] sm:$0xff] }
 0x420   :  { %vm9296_vm7 = vcmp.eq.s32.totalorder %v9295_v14, 1  ;;  %vm9298_vm1 = vcmp.eq.s32.totalorder %v9297_v58, 1  ;;  %v3639_v37 = vrot.slane %v3635_v41, 1  ;;  %v3640_v51 = vrot.slane %v3636_v4, 1 }
 0x421   :  { %v3653_v40 = vsel %vm9296_vm7, %v3651_v2, 0.0  ;;  %v3654_v39 = vsel %vm9298_vm1, %v3652_v38, 0.0  ;;  %v2457_v8 = vrot.slane %v7839_v53, %v4852_v28  ;;  %v2461_v62 = vrot.slane %v7839_v53, %v5102_v46  ;;  %v9307_v38 = vld [vmem:[#allocation131_spill] sm:$0xff]  ;;  %v3702_v58 = vpop.permute.xlu0 %3701 }
 0x422   :  { %v3657_v16 = vmul.f32 %v3653_v40, %v9299_v18  ;;  %v3658_v57 = vmul.f32 %v3654_v39, %v9299_v18  ;;  %v3661_v9 = vmul.f32 %v3653_v40, %v9300_v35  ;;  %v3662_v24 = vmul.f32 %v3654_v39, %v9300_v35  ;;  %v3700_v39 = vpop.permute.xlu1 %3699  ;;  %v9311_v35 = vld [vmem:[#allocation134_spill] sm:$0xff] }
 0x423   :  { %v3643_v56 = vadd.f32 %v3639_v37, %v3631_v50  ;;  %v3644_v43 = vadd.f32 %v3640_v51, %v3632_v5  ;;  %vm9301_vm15 = vcmp.lt.s32.totalorder %v4810_v61, 114  ;;  %vm9304_vm10 = vcmp.eq.s32.totalorder %v9303_v48, 1  ;;  %v9318_v48 = vld [vmem:[#allocation132_spill] sm:$0xff] }
 0x424   :  { %v3677_v13 = vsel %vm9301_vm15, %v3674_v17, %v3676_v49  ;;  %vm9302_vm2 = vmmov %vm9301_vm15  ;;  %v3665_v44 = vrot.slane %v3661_v9, 1  ;;  %v3666_v52 = vrot.slane %v3662_v24, 1  ;;  %vm9306_vm5 = vcmp.eq.s32.totalorder %v9305_v11, 1  ;;  %v9313_v24 = vld [vmem:[#allocation135_spill] sm:$0xff] }
 0x425   :  { %v3678_v45 = vsel %vm9302_vm2, %v3676_v49, %v3674_v17  ;;  %v3679_v19 = vsel %vm9304_vm10, %v3677_v13, 0.0  ;;  %v3645_v41 = vadd.f32 %v3643_v56, %v3619_v55  ;;  %v3646_v4 = vadd.f32 %v3644_v43, %v3620_v27  ;;  %v3728_v56 = vpop.permute.xlu0 %3727 }
 0x426   :  { %v3680_v42 = vsel %vm9306_vm5, %v3678_v45, 0.0  ;;  %v7884_v53 = vadd.f32 %v2437_v10, %v7784_v47  ;;  %v7886_v50 = vadd.f32 %v2438_v20, %v2430_v6  ;;  %v3669_v5 = vadd.f32 %v3665_v44, %v3657_v16  ;;  %v9310_v6 = vld [vmem:[#allocation128_spill] sm:$0xff]  ;;  %v3726_v43 = vpop.permute.xlu1 %3725 }
 0x427   :  { %v3670_v2 = vadd.f32 %v3666_v52, %v3658_v57  ;;  %v3687_v14 = vmul.f32 %v3679_v19, %v9307_v38  ;;  %v3688_v40 = vmul.f32 %v3680_v42, %v9307_v38  ;;  %vm9308_vm7 = vcmp.lt.s32.totalorder %v4810_v61, 113 }
 0x428   :  { %v3703_v37 = vsel %vm9308_vm7, %v3700_v39, %v3702_v58  ;;  %vm9309_vm1 = vmmov %vm9308_vm7  ;;  %v7895_v27 = vrot.slane %v2457_v8, %v4852_v28  ;;  %v7898_v47 = vrot.slane %v2461_v62, %v4852_v28  ;;  %v3683_v10 = vmul.f32 %v3679_v19, %v9310_v6  ;;  %v9315_v62 = vld [vmem:[#allocation133_spill] sm:$0xff] }
 0x429   :  { %v3704_v55 = vsel %vm9309_vm1, %v3702_v58, %v3700_v39  ;;  %v3684_v20 = vmul.f32 %v3680_v42, %v9310_v6  ;;  %v3691_v51 = vrot.slane %v3687_v14, 1  ;;  %v3692_v18 = vrot.slane %v3688_v40, 1  ;;  %v9319_v42 = vld [vmem:[#allocation138_spill] sm:$0xff]  ;;  %v9323_v58 = vld [vmem:[#allocation136_spill] sm:$0xff] }
 0x42a   :  { %v3671_v16 = vadd.f32 %v3669_v5, %v3645_v41  ;;  %v3672_v57 = vadd.f32 %v3670_v2, %v3646_v4  ;;  %vm9312_vm15 = vcmp.eq.s32.totalorder %v9311_v35, 1  ;;  %vm9314_vm2 = vcmp.eq.s32.totalorder %v9313_v24, 1  ;;  %v9321_v4 = vld [vmem:[#allocation139_spill] sm:$0xff] }
 0x42b   :  { %v3705_v9 = vsel %vm9312_vm15, %v3703_v37, 0.0  ;;  %v3706_v49 = vsel %vm9314_vm2, %v3704_v55, 0.0  ;;  %v3695_v17 = vadd.f32 %v3691_v51, %v3683_v10  ;;  %v3696_v8 = vadd.f32 %v3692_v18, %v3684_v20  ;;  %v9324_v55 = vld [vmem:[#allocation137_spill] sm:$0xff]  ;;  %v3754_v20 = vpop.permute.xlu0 %3753  ;;  %v3752_v51 = vpop.permute.xlu1 %3751 }
 0x42c   :  { %vm2470_vm10 = vcmp.eq.s32.totalorder %v7895_v27, 1  ;;  %vm8679_vm5 = vcmp.eq.s32.totalorder %v7898_v47, 1  ;;  %v3713_v13 = vmul.f32 %v3705_v9, %v9315_v62  ;;  %v3714_v45 = vmul.f32 %v3706_v49, %v9315_v62 }
 0x42d   :  { %vm9316_vm7 = vcmp.lt.s32.totalorder %v4810_v61, 112  ;;  %v3709_v19 = vmul.f32 %v3705_v9, %v9318_v48  ;;  %v3710_v11 = vmul.f32 %v3706_v49, %v9318_v48  ;;  %vm9320_vm15 = vcmp.eq.s32.totalorder %v9319_v42, 1  ;;  %v9327_v49 = vld [vmem:[#allocation142_spill] sm:$0xff]  ;;  %v9331_v48 = vld [vmem:[#allocation141_spill] sm:$0xff] }
 0x42e   :  { %v3729_v44 = vsel %vm9316_vm7, %v3726_v43, %v3728_v56  ;;  %vm9317_vm1 = vmmov %vm9316_vm7  ;;  %vm9322_vm2 = vcmp.eq.s32.totalorder %v9321_v4, 1  ;;  %v3697_v2 = vadd.f32 %v3695_v17, %v3671_v16  ;;  %v3698_v38 = vadd.f32 %v3696_v8, %v3672_v57  ;;  %v9329_v8 = vld [vmem:[#allocation143_spill] sm:$0xff]  ;;  %v9332_v4 = vld [vmem:[#allocation140_spill] sm:$0xff] }
 0x42f   :  { %v3730_v52 = vsel %vm9317_vm1, %v3728_v56, %v3726_v43  ;;  %v3731_v41 = vsel %vm9320_vm15, %v3729_v44, 0.0  ;;  %v3717_v14 = vrot.slane %v3713_v13, 1  ;;  %v3718_v40 = vrot.slane %v3714_v45, 1  ;;  %v3780_v42 = vpop.permute.xlu0 %3779 }
 0x430   :  { %v3732_v5 = vsel %vm9322_vm2, %v3730_v52, 0.0  ;;  %v3735_v39 = vmul.f32 %v3731_v41, %v9323_v58  ;;  %v3739_v6 = vmul.f32 %v3731_v41, %v9324_v55  ;;  %vm9325_vm7 = vcmp.lt.s32.totalorder %v4810_v61, 111  ;;  %v3778_v41 = vpop.permute.xlu1 %3777 }
 0x431   :  { %v3736_v37 = vmul.f32 %v3732_v5, %v9323_v58  ;;  %v3740_v10 = vmul.f32 %v3732_v5, %v9324_v55  ;;  %v3721_v18 = vadd.f32 %v3717_v14, %v3709_v19  ;;  %v3722_v35 = vadd.f32 %v3718_v40, %v3710_v11  ;;  %vm9326_vm1 = vmmov %vm9325_vm7  ;;  %v9335_v55 = vld [vmem:[#allocation144_spill] sm:$0xff] }
 0x432   :  { %v3755_v9 = vsel %vm9325_vm7, %v3752_v51, %v3754_v20  ;;  %v3756_v16 = vsel %vm9326_vm1, %v3754_v20, %v3752_v51  ;;  %v3743_v57 = vrot.slane %v3739_v6, 1  ;;  %vm9328_vm15 = vcmp.eq.s32.totalorder %v9327_v49, 1  ;;  %v9340_v49 = vld [vmem:[#allocation147_spill] sm:$0xff] }
 0x433   :  { %v3744_v24 = vrot.slane %v3740_v10, 1  ;;  %v3757_v17 = vsel %vm9328_vm15, %v3755_v9, 0.0  ;;  %vm9330_vm2 = vcmp.eq.s32.totalorder %v9329_v8, 1  ;;  %v3723_v43 = vadd.f32 %v3721_v18, %v3697_v2  ;;  %v9337_v10 = vld [vmem:[#allocation146_spill] sm:$0xff] }
 0x434   :  { %v3758_v56 = vsel %vm9330_vm2, %v3756_v16, 0.0  ;;  %v3724_v62 = vadd.f32 %v3722_v35, %v3698_v38  ;;  %v2472_v13 = vsel %vm2470_vm10, %v7173_v33, 0.0  ;;  %v2473_v45 = vsel %vm8679_vm5, %v7177_v26, 0.0  ;;  %v9339_v35 = vld [vmem:[#allocation145_spill] sm:$0xff]  ;;  %vm2499_vm5 = vmand %vm5083_vm12, %vm5053_vm14 }
 0x435   :  { %v3747_v44 = vadd.f32 %v3743_v57, %v3735_v39  ;;  %v3748_v52 = vadd.f32 %v3744_v24, %v3736_v37  ;;  %v3765_v19 = vmul.f32 %v3757_v17, %v9331_v48  ;;  %v3766_v11 = vmul.f32 %v3758_v56, %v9331_v48  ;;  %v3806_v57 = vpop.permute.xlu0 %3805  ;;  %v3804_v24 = vpop.permute.xlu1 %3803 }
 0x436   :  { %v3761_v5 = vmul.f32 %v3757_v17, %v9332_v4  ;;  %v3762_v2 = vmul.f32 %v3758_v56, %v9332_v4  ;;  %vm9333_vm7 = vcmp.lt.s32.totalorder %v4810_v61, 110  ;;  %v7951_v40 = vstv %s7920_s26  ;;  %v9347_v4 = vld [vmem:[#allocation150_spill] sm:$0xff] }
 0x437   :  { %v3781_v38 = vsel %vm9333_vm7, %v3778_v41, %v3780_v42  ;;  %vm9334_vm1 = vmmov %vm9333_vm7  ;;  %v3769_v14 = vrot.slane %v3765_v19, 1  ;;  %v3770_v26 = vrot.slane %v3766_v11, 1  ;;  %v7954_v58 = vstv %s7922_s8  ;;  %v9345_v19 = vld [vmem:[#allocation149_spill] sm:$0xff] }
 0x438   :  { %v3782_v33 = vsel %vm9334_vm1, %v3780_v42, %v3778_v41  ;;  %v3749_v39 = vadd.f32 %v3747_v44, %v3723_v43  ;;  %v3750_v37 = vadd.f32 %v3748_v52, %v3724_v62  ;;  %vm9336_vm15 = vcmp.eq.s32.totalorder %v9335_v55, 1  ;;  %v9343_v52 = vld [vmem:[#allocation148_spill] sm:$0xff] }
 0x439   :  { %v3783_v6 = vsel %vm9336_vm15, %v3781_v38, 0.0  ;;  %vm9338_vm2 = vcmp.eq.s32.totalorder %v9337_v10, 1  ;;  %v3773_v51 = vadd.f32 %v3769_v14, %v3761_v5  ;;  %v3774_v18 = vadd.f32 %v3770_v26, %v3762_v2  ;;  %v9348_v38 = vld [vmem:[#allocation26_spill] sm:$0xff]  ;;  %v3832_v26 = vpop.permute.xlu0 %3831  ;;  %v3830_v55 = vpop.permute.xlu1 %3829 }
 0x43a   :  { %v3784_v20 = vsel %vm9338_vm2, %v3782_v33, 0.0  ;;  %v3787_v9 = vmul.f32 %v3783_v6, %v9339_v35  ;;  %v3791_v17 = vmul.f32 %v3783_v6, %v9340_v49  ;;  %vm9341_vm7 = vcmp.lt.s32.totalorder %v4810_v61, 109 }
 0x43b   :  { %v3788_v16 = vmul.f32 %v3784_v20, %v9339_v35  ;;  %v3792_v8 = vmul.f32 %v3784_v20, %v9340_v49  ;;  %v3807_v56 = vsel %vm9341_vm7, %v3804_v24, %v3806_v57  ;;  %vm9342_vm1 = vmmov %vm9341_vm7  ;;  %v3775_v62 = vadd.f32 %v3773_v51, %v3749_v39  ;;  %v9353_v49 = vld [vmem:[#allocation152_spill] sm:$0xff] }
 0x43c   :  { %v3808_v43 = vsel %vm9342_vm1, %v3806_v57, %v3804_v24  ;;  %v3776_v44 = vadd.f32 %v3774_v18, %v3750_v37  ;;  %vm9344_vm15 = vcmp.eq.s32.totalorder %v9343_v52, 1  ;;  %vm9346_vm2 = vcmp.eq.s32.totalorder %v9345_v19, 1  ;;  %v9351_v57 = vld [vmem:[#allocation151_spill] sm:$0xff] }
 0x43d   :  { %v3809_v48 = vsel %vm9344_vm15, %v3807_v56, 0.0  ;;  %v3810_v11 = vsel %vm9346_vm2, %v3808_v43, 0.0  ;;  %v3795_v42 = vrot.slane %v3791_v17, 1  ;;  %v3796_v41 = vrot.slane %v3792_v8, 1 }
 0x43e   :  { %v3813_v5 = vmul.f32 %v3809_v48, %v9347_v4  ;;  %v3814_v2 = vmul.f32 %v3810_v11, %v9347_v4  ;;  %v3817_v33 = vmul.f32 %v3809_v48, %v9348_v38  ;;  %v3818_v14 = vmul.f32 %v3810_v11, %v9348_v38  ;;  %v9355_v48 = vld [vmem:[#allocation153_spill] sm:$0xff] }
 0x43f   :  { %v2480_v39 = vmul.f32 %v7954_v58, %v2472_v13  ;;  %v2481_v37 = vmul.f32 %v7954_v58, %v2473_v45  ;;  %v3799_v6 = vadd.f32 %v3795_v42, %v3787_v9  ;;  %v3800_v10 = vadd.f32 %v3796_v41, %v3788_v16  ;;  %v3858_v42 = vpop.permute.xlu0 %3857  ;;  %v3856_v41 = vpop.permute.xlu1 %3855 }
 0x440   :  { %vm9349_vm7 = vcmp.lt.s32.totalorder %v4810_v61, 99  ;;  %v3821_v18 = vrot.slane %v3817_v33, 1  ;;  %v3822_v35 = vrot.slane %v3818_v14, 1  ;;  %vm9352_vm15 = vcmp.eq.s32.totalorder %v9351_v57, 1 }
 0x441   :  { %v3833_v20 = vsel %vm9349_vm7, %v3830_v55, %v3832_v26  ;;  %vm9350_vm1 = vmmov %vm9349_vm7  ;;  %vm9354_vm2 = vcmp.eq.s32.totalorder %v9353_v49, 1  ;;  %v3801_v8 = vadd.f32 %v3799_v6, %v3775_v62  ;;  %v3802_v56 = vadd.f32 %v3800_v10, %v3776_v44  ;;  %v9363_v49 = vld [vmem:[#allocation158_spill] sm:$0xff] }
 0x442   :  { %v3834_v51 = vsel %vm9350_vm1, %v3832_v26, %v3830_v55  ;;  %v3835_v24 = vsel %vm9352_vm15, %v3833_v20, 0.0  ;;  %v2476_v43 = vmul.f32 %v7951_v40, %v2472_v13  ;;  %v2477_v9 = vmul.f32 %v7951_v40, %v2473_v45  ;;  %v9360_v26 = vld [vmem:[#allocation157_spill] sm:$0xff]  ;;  %v9362_v20 = vld [vmem:[#allocation154_spill] sm:$0xff] }
 0x443   :  { %v3836_v17 = vsel %vm9354_vm2, %v3834_v51, 0.0  ;;  %v3825_v16 = vadd.f32 %v3821_v18, %v3813_v5  ;;  %v3826_v52 = vadd.f32 %v3822_v35, %v3814_v2  ;;  %v3843_v19 = vmul.f32 %v3835_v24, %v9355_v48  ;;  %v9358_v5 = vld [vmem:[#allocation156_spill] sm:$0xff]  ;;  %v3882_v18 = vpop.permute.xlu1 %3881 }
 0x444   :  { %v3844_v11 = vmul.f32 %v3836_v17, %v9355_v48  ;;  %vm9356_vm7 = vcmp.lt.s32.totalorder %v4810_v61, 98  ;;  %v2484_v62 = vrot.slane %v2480_v39, 1  ;;  %v2485_v44 = vrot.slane %v2481_v37, 1  ;;  %v3884_v37 = vpop.permute.xlu0 %3883 }
 0x445   :  { %v3859_v4 = vsel %vm9356_vm7, %v3856_v41, %v3858_v42  ;;  %vm9357_vm1 = vmmov %vm9356_vm7  ;;  %v3827_v33 = vadd.f32 %v3825_v16, %v3801_v8  ;;  %v3828_v13 = vadd.f32 %v3826_v52, %v3802_v56  ;;  %v3847_v14 = vrot.slane %v3843_v19, 1 }
 0x446   :  { %v3860_v38 = vsel %vm9357_vm1, %v3858_v42, %v3856_v41  ;;  %v3848_v45 = vrot.slane %v3844_v11, 1  ;;  %vm9359_vm15 = vcmp.eq.s32.totalorder %v9358_v5, 1  ;;  %vm9361_vm2 = vcmp.eq.s32.totalorder %v9360_v26, 1  ;;  %v9371_v42 = vld [vmem:[#allocation161_spill] sm:$0xff] }
 0x447   :  { %v3861_v2 = vsel %vm9359_vm15, %v3859_v4, 0.0  ;;  %v3862_v55 = vsel %vm9361_vm2, %v3860_v38, 0.0  ;;  %v2443_v6 = vadd.f32 %v7884_v53, %v7672_v54  ;;  %v2444_v10 = vadd.f32 %v7886_v50, %v7675_v0  ;;  %v9366_v50 = vld [vmem:[#allocation159_spill] sm:$0xff]  ;;  %v9372_v38 = vld [vmem:[#allocation162_spill] sm:$0xff] }
 0x448   :  { %v3839_v51 = vmul.f32 %v3835_v24, %v9362_v20  ;;  %v3840_v39 = vmul.f32 %v3836_v17, %v9362_v20  ;;  %v2488_v35 = vadd.f32 %v2484_v62, %v2476_v43  ;;  %v2489_v57 = vadd.f32 %v2485_v44, %v2477_v9  ;;  %v9368_v17 = vld [vmem:[#allocation160_spill] sm:$0xff]  ;;  %v9370_v43 = vld [vmem:[#allocation155_spill] sm:$0xff] }
 0x449   :  { %v3869_v8 = vmul.f32 %v3861_v2, %v9363_v49  ;;  %v3870_v56 = vmul.f32 %v3862_v55, %v9363_v49  ;;  %vm9364_vm7 = vcmp.lt.s32.totalorder %v4810_v61, 97  ;;  %vm9367_vm15 = vcmp.eq.s32.totalorder %v9366_v50, 1 }
 0x44a   :  { %v3885_v16 = vsel %vm9364_vm7, %v3882_v18, %v3884_v37  ;;  %vm9365_vm1 = vmmov %vm9364_vm7  ;;  %v3851_v53 = vadd.f32 %v3847_v14, %v3839_v51  ;;  %v3852_v0 = vadd.f32 %v3848_v45, %v3840_v39  ;;  %vm9369_vm2 = vcmp.eq.s32.totalorder %v9368_v17, 1  ;;  %v3910_v14 = vpop.permute.xlu0 %3909  ;;  %v3908_v45 = vpop.permute.xlu1 %3907  ;;  %v9379_v17 = vld [vmem:[#allocation163_spill] sm:$0xff] }
 0x44b   :  { %v3886_v54 = vsel %vm9365_vm1, %v3884_v37, %v3882_v18  ;;  %v3887_v24 = vsel %vm9367_vm15, %v3885_v16, 0.0  ;;  %v3865_v9 = vmul.f32 %v3861_v2, %v9370_v43  ;;  %v3866_v48 = vmul.f32 %v3862_v55, %v9370_v43  ;;  %v9376_v37 = vld [vmem:[#allocation164_spill] sm:$0xff] }
 0x44c   :  { %v3888_v52 = vsel %vm9369_vm2, %v3886_v54, 0.0  ;;  %v3873_v19 = vrot.slane %v3869_v8, 1  ;;  %v3874_v11 = vrot.slane %v3870_v56, 1  ;;  %v3891_v41 = vmul.f32 %v3887_v24, %v9371_v42 }
 0x44d   :  { %v3892_v4 = vmul.f32 %v3888_v52, %v9371_v42  ;;  %v3895_v62 = vmul.f32 %v3887_v24, %v9372_v38  ;;  %v3896_v44 = vmul.f32 %v3888_v52, %v9372_v38  ;;  %vm9373_vm7 = vcmp.lt.s32.totalorder %v4810_v61, 96 }
 0x44e   :  { %v3877_v5 = vadd.f32 %v3873_v19, %v3865_v9  ;;  %v3878_v26 = vadd.f32 %v3874_v11, %v3866_v48  ;;  %v3911_v2 = vsel %vm9373_vm7, %v3908_v45, %v3910_v14  ;;  %vm9374_vm1 = vmmov %vm9373_vm7  ;;  %vm9375_vm15 = vcmp.eq.s32.totalorder %v7144_v63, 1  ;;  %v3936_v43 = vpop.permute.xlu0 %3935  ;;  %v3934_v9 = vpop.permute.xlu1 %3933 }
 0x44f   :  { %v3912_v55 = vsel %vm9374_vm1, %v3910_v14, %v3908_v45  ;;  %v3899_v20 = vrot.slane %v3895_v62, 1  ;;  %v3900_v51 = vrot.slane %v3896_v44, 1  ;;  %v3913_v39 = vsel %vm9375_vm15, %v3911_v2, 0.0 }
 0x450   :  { %vm9377_vm2 = vcmp.eq.s32.totalorder %v9376_v37, 1  ;;  %v3853_v8 = vadd.f32 %v3851_v53, %v3827_v33  ;;  %v3854_v56 = vadd.f32 %v3852_v0, %v3828_v13  ;;  %v8034_v16 = vadd.f32 %v2488_v35, %v2443_v6  ;;  %v9382_v0 = vld [vmem:[#allocation166_spill] sm:$0xff]  ;;  %v9388_v37 = vld [vmem:[#allocation165_spill] sm:$0xff] }
 0x451   :  { %v3914_v18 = vsel %vm9377_vm2, %v3912_v55, 0.0  ;;  %v8036_v54 = vadd.f32 %v2489_v57, %v2444_v10  ;;  %v3903_v50 = vadd.f32 %v3899_v20, %v3891_v41  ;;  %v3904_v24 = vadd.f32 %v3900_v51, %v3892_v4 }
 0x452   :  { %v3921_v63 = vmul.f32 %v3913_v39, %v9379_v17  ;;  %v3922_v52 = vmul.f32 %v3914_v18, %v9379_v17  ;;  %v3879_v48 = vadd.f32 %v3877_v5, %v3853_v8  ;;  %vm9380_vm7 = vcmp.lt.s32.totalorder %v4810_v61, 95  ;;  %v3962_v62 = vpop.permute.xlu0 %3961  ;;  %v3960_v44 = vpop.permute.xlu1 %3959  ;;  %v9390_v17 = vld [vmem:[#allocation174_spill] sm:$0xff] }
 0x453   :  { %v3937_v19 = vsel %vm9380_vm7, %v3934_v9, %v3936_v43  ;;  %vm9381_vm14 = vmmov %vm9380_vm7  ;;  %v2500_v13 = vsel %vm2499_vm5, 1, %v8759_v36  ;;  %v3880_v6 = vadd.f32 %v3878_v26, %v3854_v56  ;;  %v3917_v10 = vmul.f32 %v3913_v39, %v7134_v34  ;;  %v9389_v56 = vld [vmem:[#allocation172_spill] sm:$0xff] }
 0x454   :  { %v3938_v33 = vsel %vm9381_vm14, %v3936_v43, %v3934_v9  ;;  %v3925_v35 = vrot.slane %v3921_v63, 1  ;;  %v3926_v57 = vrot.slane %v3922_v52, 1  ;;  %v3918_v53 = vmul.f32 %v3914_v18, %v7134_v34 }
 0x455   :  { %vm9383_vm1 = vcmp.eq.s32.totalorder %v9382_v0, 1  ;;  %vm9384_vm15 = vcmp.eq.s32.totalorder %v7194_v3, 1  ;;  %v8052_v41 = vstv %s8016_s28  ;;  %v3905_v4 = vadd.f32 %v3903_v50, %v3879_v48 }
 0x456   :  { %v3939_v11 = vsel %vm9383_vm1, %v3937_v19, 0.0  ;;  %v3940_v42 = vsel %vm9384_vm15, %v3938_v33, 0.0  ;;  %v3906_v38 = vadd.f32 %v3904_v24, %v3880_v6  ;;  %v2504_v14 = vrot.slane %v2500_v13, %v4852_v28  ;;  %v3988_v43 = vpop.permute.xlu0 %3987  ;;  %v3986_v30 = vpop.permute.xlu1 %3985 }
 0x457   :  { %v2508_v45 = vrot.slane %v2500_v13, %v5102_v46  ;;  %v3947_v5 = vmul.f32 %v3939_v11, %v7162_v22  ;;  %v3948_v34 = vmul.f32 %v3940_v42, %v7162_v22  ;;  %vm9385_vm5 = vcmp.lt.s32.totalorder %v4810_v61, 94 }
 0x458   :  { %v3963_v26 = vsel %vm9385_vm5, %v3960_v44, %v3962_v62  ;;  %vm9386_vm2 = vmmov %vm9385_vm5  ;;  %v3929_v2 = vadd.f32 %v3925_v35, %v3917_v10  ;;  %v3930_v55 = vadd.f32 %v3926_v57, %v3918_v53  ;;  %v3943_v18 = vmul.f32 %v3939_v11, %v9388_v37 }
 0x459   :  { %v3964_v3 = vsel %vm9386_vm2, %v3962_v62, %v3960_v44  ;;  %v3965_v20 = vsel %vm2282_vm11, %v3963_v26, 0.0  ;;  %v3944_v49 = vmul.f32 %v3940_v42, %v9388_v37  ;;  %v3951_v8 = vrot.slane %v3947_v5, 1 }
 0x45a   :  { %v3966_v39 = vsel %vm2283_vm4, %v3964_v3, 0.0  ;;  %v3952_v22 = vrot.slane %v3948_v34, 1  ;;  %v3969_v50 = vmul.f32 %v3965_v20, %v9389_v56  ;;  %v3973_v63 = vmul.f32 %v3965_v20, %v9390_v17  ;;  %v4014_v3 = vpop.permute.xlu0 %4013  ;;  %v4012_v20 = vpop.permute.xlu1 %4011 }
 0x45b   :  { %v3970_v24 = vmul.f32 %v3966_v39, %v9389_v56  ;;  %v3974_v52 = vmul.f32 %v3966_v39, %v9390_v17  ;;  %v3955_v9 = vadd.f32 %v3951_v8, %v3943_v18  ;;  %vm9391_vm4 = vcmp.lt.s32.totalorder %v4810_v61, 93 }
 0x45c   :  { %v3956_v48 = vadd.f32 %v3952_v22, %v3944_v49  ;;  %v3989_v19 = vsel %vm9391_vm4, %v3986_v30, %v3988_v43  ;;  %vm9392_vm11 = vmmov %vm9391_vm4  ;;  %v3977_v13 = vrot.slane %v3973_v63, 1  ;;  %v3931_v0 = vadd.f32 %v3929_v2, %v3905_v4 }
 0x45d   :  { %v3990_v33 = vsel %vm9392_vm11, %v3988_v43, %v3986_v30  ;;  %v3978_v6 = vrot.slane %v3974_v52, 1  ;;  %v3991_v35 = vsel %vm2329_vm13, %v3989_v19, 0.0  ;;  %v3932_v11 = vadd.f32 %v3930_v55, %v3906_v38  ;;  %v9402_v30 = vld [vmem:[#allocation168_spill] sm:$0xff]  ;;  %vm2546_vm11 = vmand %vm5083_vm12, %vm5192_vm0 }
 0x45e   :  { %v3992_v53 = vsel %vm2330_vm9, %v3990_v33, 0.0  ;;  %v8081_v42 = vrot.slane %v2504_v14, %v4852_v28  ;;  %v8084_v62 = vrot.slane %v2508_v45, %v4852_v28  ;;  %v3981_v44 = vadd.f32 %v3977_v13, %v3969_v50  ;;  %v9397_v14 = vld [vmem:[#allocation176_spill] sm:$0xff]  ;;  %v4040_v50 = vpop.permute.xlu0 %4039 }
 0x45f   :  { %v3982_v5 = vadd.f32 %v3978_v6, %v3970_v24  ;;  %v3999_v34 = vmul.f32 %v3991_v35, %v7388_v29  ;;  %v4000_v26 = vmul.f32 %v3992_v53, %v7388_v29  ;;  %v3957_v51 = vadd.f32 %v3955_v9, %v3931_v0  ;;  %v4038_v24 = vpop.permute.xlu1 %4037 }
 0x460   :  { %v3958_v39 = vadd.f32 %v3956_v48, %v3932_v11  ;;  %vm9395_vm13 = vcmp.lt.s32.totalorder %v4810_v61, 83  ;;  %v3995_v2 = vmul.f32 %v3991_v35, %v9397_v14  ;;  %v3996_v45 = vmul.f32 %v3992_v53, %v9397_v14  ;;  %v9403_v48 = vld [vmem:[#allocation169_spill] sm:$0xff] }
 0x461   :  { %v4015_v4 = vsel %vm9395_vm13, %v4012_v20, %v4014_v3  ;;  %vm9396_vm9 = vmmov %vm9395_vm13  ;;  %v4003_v55 = vrot.slane %v3999_v34, 1  ;;  %v4004_v37 = vrot.slane %v4000_v26, 1  ;;  %vm9398_vm7 = vcmp.eq.s32.totalorder %v7507_v59, 1 }
 0x462   :  { %v4016_v38 = vsel %vm9396_vm9, %v4014_v3, %v4012_v20  ;;  %v4017_v18 = vsel %vm2376_vm8, %v4015_v4, 0.0  ;;  %vm2517_vm14 = vcmp.eq.s32.totalorder %v8081_v42, 1  ;;  %vm2518_vm1 = vcmp.eq.s32.totalorder %v8084_v62, 1  ;;  %v4066_v57 = vpop.permute.xlu0 %4065 }
 0x463   :  { %v4018_v29 = vsel %vm9398_vm7, %v4016_v38, 0.0  ;;  %v3983_v49 = vadd.f32 %v3981_v44, %v3957_v51  ;;  %v3984_v8 = vadd.f32 %v3982_v5, %v3958_v39  ;;  %v4007_v22 = vadd.f32 %v4003_v55, %v3995_v2  ;;  %v4064_v53 = vpop.permute.xlu1 %4063 }
 0x464   :  { %v4008_v56 = vadd.f32 %v4004_v37, %v3996_v45  ;;  %v4025_v17 = vmul.f32 %v4017_v18, %v7575_v15  ;;  %v4026_v63 = vmul.f32 %v4018_v29, %v7575_v15  ;;  %vm9399_vm15 = vcmp.lt.s32.totalorder %v4810_v61, 82 }
 0x465   :  { %v4041_v60 = vsel %vm9399_vm15, %v4038_v24, %v4040_v50  ;;  %vm9400_vm8 = vmmov %vm9399_vm15  ;;  %vm9401_vm5 = vcmp.eq.s32.totalorder %v7737_v21, 1  ;;  %v2519_v9 = vsel %vm2517_vm14, %v9402_v30, 0.0  ;;  %v2520_v15 = vsel %vm2518_vm1, %v9403_v48, 0.0 }
 0x466   :  { %v4042_v59 = vsel %vm9400_vm8, %v4040_v50, %v4038_v24  ;;  %v4043_v52 = vsel %vm2423_vm3, %v4041_v60, 0.0  ;;  %v4021_v19 = vmul.f32 %v4017_v18, %v7572_v23  ;;  %v4022_v33 = vmul.f32 %v4018_v29, %v7572_v23 }
 0x467   :  { %v4044_v43 = vsel %vm9401_vm5, %v4042_v59, 0.0  ;;  %v4029_v13 = vrot.slane %v4025_v17, 1  ;;  %v4030_v6 = vrot.slane %v4026_v63, 1  ;;  %v4009_v10 = vadd.f32 %v4007_v22, %v3983_v49  ;;  %v4090_v45 = vpop.permute.xlu1 %4089 }
 0x468   :  { %v4010_v7 = vadd.f32 %v4008_v56, %v3984_v8  ;;  %v4051_v35 = vmul.f32 %v4043_v52, %v7795_v1  ;;  %v4052_v21 = vmul.f32 %v4044_v43, %v7795_v1  ;;  %v4047_v11 = vmul.f32 %v4043_v52, %v7701_v25 }
 0x469   :  { %v4033_v0 = vadd.f32 %v4029_v13, %v4021_v19  ;;  %vm9404_vm3 = vcmp.lt.s32.totalorder %v4810_v61, 81  ;;  %vm9406_vm4 = vcmp.eq.s32.totalorder %v7898_v47, 1  ;;  %v4034_v3 = vadd.f32 %v4030_v6, %v4022_v33  ;;  %v4092_v47 = vpop.permute.xlu0 %4091 }
 0x46a   :  { %v4067_v44 = vsel %vm9404_vm3, %v4064_v53, %v4066_v57  ;;  %vm9405_vm2 = vmmov %vm9404_vm3  ;;  %v4055_v23 = vrot.slane %v4051_v35, 1  ;;  %v4056_v34 = vrot.slane %v4052_v21, 1  ;;  %v4048_v20 = vmul.f32 %v4044_v43, %v7701_v25 }
 0x46b   :  { %v4068_v5 = vsel %vm9405_vm2, %v4066_v57, %v4064_v53  ;;  %v4069_v26 = vsel %vm2470_vm10, %v4067_v44, 0.0  ;;  %v2523_v51 = vmul.f32 %v8052_v41, %v2519_v9  ;;  %v2524_v39 = vmul.f32 %v8052_v41, %v2520_v15 }
 0x46c   :  { %v4070_v1 = vsel %vm9406_vm4, %v4068_v5, 0.0  ;;  %v4035_v38 = vadd.f32 %v4033_v0, %v4009_v10  ;;  %v4059_v14 = vadd.f32 %v4055_v23, %v4047_v11  ;;  %v4077_v27 = vmul.f32 %v4069_v26, %v7954_v58 }
 0x46d   :  { %v4078_v2 = vmul.f32 %v4070_v1, %v7954_v58  ;;  %v4073_v55 = vmul.f32 %v4069_v26, %v7951_v40  ;;  %v2526_v25 = vstv %s8106_s18  ;;  %vm9408_vm10 = vcmp.lt.s32.totalorder %v4810_v61, 80  ;;  %v4118_v10 = vpop.permute.xlu0 %4117  ;;  %v9413_v26 = vld [vmem:[#allocation170_spill] sm:$0xff] }
 0x46e   :  { %v4093_v37 = vsel %vm9408_vm10, %v4090_v45, %v4092_v47  ;;  %vm9409_vm13 = vmmov %vm9408_vm10  ;;  %v4060_v29 = vadd.f32 %v4056_v34, %v4048_v20  ;;  %v4081_v49 = vrot.slane %v4077_v27, 1  ;;  %v2547_v22 = vsel %vm2546_vm11, 1, %v8759_v36 }
 0x46f   :  { %v4094_v18 = vsel %vm9409_vm13, %v4092_v47, %v4090_v45  ;;  %v4082_v8 = vrot.slane %v4078_v2, 1  ;;  %v2527_v56 = vmul.f32 %v2526_v25, %v2519_v9  ;;  %v2528_v58 = vmul.f32 %v2526_v25, %v2520_v15 }
 0x470   :  { %v4095_v50 = vsel %vm2517_vm14, %v4093_v37, 0.0  ;;  %v4096_v24 = vsel %vm2518_vm1, %v4094_v18, 0.0  ;;  %v4036_v17 = vadd.f32 %v4034_v3, %v4010_v7  ;;  %v4061_v63 = vadd.f32 %v4059_v14, %v4035_v38  ;;  %vm2593_vm1 = vmand %vm5083_vm12, %vm5268_vm6  ;;  %v9414_v3 = vld [vmem:[#allocation171_spill] sm:$0xff] }
 0x471   :  { %v4074_v60 = vmul.f32 %v4070_v1, %v7951_v40  ;;  %v4085_v59 = vadd.f32 %v4081_v49, %v4073_v55  ;;  %v2531_v52 = vrot.slane %v2527_v56, 1  ;;  %v2532_v43 = vrot.slane %v2528_v58, 1  ;;  %v4116_v40 = vpop.permute.xlu1 %4115  ;;  %v4144_v32 = vpop.permute.xlu0 %4143 }
 0x472   :  { %v4103_v30 = vmul.f32 %v4095_v50, %v2526_v25  ;;  %v4104_v48 = vmul.f32 %v4096_v24, %v2526_v25  ;;  %v4062_v19 = vadd.f32 %v4060_v29, %v4036_v17  ;;  %v2551_v15 = vrot.slane %v2547_v22, %v4852_v28 }
 0x473   :  { %v4086_v9 = vadd.f32 %v4082_v8, %v4074_v60  ;;  %v2555_v42 = vrot.slane %v2547_v22, %v5102_v46  ;;  %v4099_v62 = vmul.f32 %v4095_v50, %v8052_v41  ;;  %v4100_v33 = vmul.f32 %v4096_v24, %v8052_v41 }
 0x474   :  { %v4107_v13 = vrot.slane %v4103_v30, 1  ;;  %v4108_v6 = vrot.slane %v4104_v48, 1  ;;  %v2535_v7 = vadd.f32 %v2531_v52, %v2523_v51  ;;  %v2536_v35 = vadd.f32 %v2532_v43, %v2524_v39  ;;  %v9417_v48 = vld [vmem:[#allocation173_spill] sm:$0xff] }
 0x475   :  { %v2559_v21 = vrot.slane %v2551_v15, %v4852_v28  ;;  %v2563_v57 = vrot.slane %v2555_v42, %v4852_v28  ;;  %v4087_v53 = vadd.f32 %v4085_v59, %v4061_v63  ;;  %v2573_v44 = vstv %s8146_s11  ;;  %v4142_v55 = vpop.permute.xlu1 %4141 }
 0x476   :  { %v4111_v0 = vadd.f32 %v4107_v13, %v4099_v62  ;;  %v4112_v11 = vadd.f32 %v4108_v6, %v4100_v33  ;;  %vm9410_vm7 = vcmp.lt.s32.totalorder %v4810_v61, 79  ;;  %v4088_v34 = vadd.f32 %v4086_v9, %v4062_v19  ;;  %v9418_v9 = vld [vmem:[#allocation175_spill] sm:$0xff]  ;;  %v4170_v33 = vpop.permute.xlu0 %4169 }
 0x477   :  { %vm2564_vm0 = vcmp.eq.s32.totalorder %v2559_v21, 1  ;;  %vm2565_vm9 = vcmp.eq.s32.totalorder %v2563_v57, 1  ;;  %v4119_v41 = vsel %vm9410_vm7, %v4116_v40, %v4118_v10  ;;  %vm9411_vm14 = vmmov %vm9410_vm7  ;;  %v2569_v51 = vstv %s8153_s3 }
 0x478   :  { %v4120_v5 = vsel %vm9411_vm14, %v4118_v10, %v4116_v40  ;;  %v2566_v1 = vsel %vm2564_vm0, %v9413_v26, 0.0  ;;  %v2567_v20 = vsel %vm2565_vm9, %v9414_v3, 0.0  ;;  %v2537_v39 = vadd.f32 %v2535_v7, %v8034_v16  ;;  %v9421_v26 = vld [vmem:[#allocation28_spill] sm:$0xff] }
 0x479   :  { %v2538_v4 = vadd.f32 %v2536_v35, %v8036_v54  ;;  %v2574_v38 = vmul.f32 %v2573_v44, %v2566_v1  ;;  %v2575_v14 = vmul.f32 %v2573_v44, %v2567_v20  ;;  %v4113_v27 = vadd.f32 %v4111_v0, %v4087_v53  ;;  %v4168_v13 = vpop.permute.xlu1 %4167 }
 0x47a   :  { %v4121_v2 = vsel %vm2564_vm0, %v4119_v41, 0.0  ;;  %v4122_v47 = vsel %vm2565_vm9, %v4120_v5, 0.0  ;;  %v2594_v45 = vsel %vm2593_vm1, 1, %v8759_v36  ;;  %v8183_v25 = vadd.f32 %v4112_v11, %v4088_v34 }
 0x47b   :  { %v2570_v37 = vmul.f32 %v2569_v51, %v2566_v1  ;;  %v2578_v18 = vrot.slane %v2574_v38, 1  ;;  %v2579_v29 = vrot.slane %v2575_v14, 1  ;;  %v4129_v16 = vmul.f32 %v4121_v2, %v2573_v44 }
 0x47c   :  { %v4130_v49 = vmul.f32 %v4122_v47, %v2573_v44  ;;  %v2598_v54 = vrot.slane %v2594_v45, %v4852_v28  ;;  %v2602_v8 = vrot.slane %v2594_v45, %v5102_v46  ;;  %v2571_v22 = vmul.f32 %v2569_v51, %v2567_v20 }
 0x47d   :  { %v2582_v56 = vadd.f32 %v2578_v18, %v2570_v37  ;;  %v2616_v36 = vstv %s8162_s12  ;;  %vm9415_vm12 = vcmp.lt.s32.totalorder %v4810_v61, 78  ;;  %v4133_v50 = vrot.slane %v4129_v16, 1 }
 0x47e   :  { %v4145_v58 = vsel %vm9415_vm12, %v4142_v55, %v4144_v32  ;;  %v4134_v24 = vrot.slane %v4130_v49, 1  ;;  %v2606_v17 = vrot.slane %v2598_v54, %v4852_v28  ;;  %v2610_v63 = vrot.slane %v2602_v8, %v4852_v28  ;;  %vm9416_vm6 = vmmov %vm9415_vm12 }
 0x47f   :  { %v2583_v60 = vadd.f32 %v2579_v29, %v2571_v22  ;;  %v4125_v59 = vmul.f32 %v4121_v2, %v2569_v51  ;;  %v4126_v52 = vmul.f32 %v4122_v47, %v2569_v51  ;;  %v4146_v46 = vsel %vm9416_vm6, %v4144_v32, %v4142_v55 }
 0x480   :  { %v2584_v43 = vadd.f32 %v2582_v56, %v2537_v39  ;;  %vm2611_vm15 = vcmp.eq.s32.totalorder %v2606_v17, 1  ;;  %vm2612_vm8 = vcmp.eq.s32.totalorder %v2610_v63, 1  ;;  %v2620_v30 = vstv %s8176_s29  ;;  %v9423_v39 = vld [vmem:[#allocation23_spill] sm:$0xff] }
 0x481   :  { %v2613_v19 = vsel %vm2611_vm15, %v9417_v48, 0.0  ;;  %v2614_v15 = vsel %vm2612_vm8, %v9418_v9, 0.0  ;;  %v4147_v42 = vsel %vm2611_vm15, %v4145_v58, 0.0  ;;  %v4148_v62 = vsel %vm2612_vm8, %v4146_v46, 0.0 }
 0x482   :  { %v4137_v6 = vadd.f32 %v4133_v50, %v4125_v59  ;;  %v4138_v10 = vadd.f32 %v4134_v24, %v4126_v52  ;;  %v2617_v40 = vmul.f32 %v2616_v36, %v2613_v19  ;;  %v4176_v7 = vstv %s8181_s30 }
 0x483   :  { %v2618_v35 = vmul.f32 %v2616_v36, %v2614_v15  ;;  %v2621_v21 = vmul.f32 %v2620_v30, %v2613_v19  ;;  %v2622_v57 = vmul.f32 %v2620_v30, %v2614_v15  ;;  %v4151_v53 = vmul.f32 %v4147_v42, %v2616_v36 }
 0x484   :  { %v4155_v0 = vmul.f32 %v4147_v42, %v2620_v30  ;;  %v4156_v11 = vmul.f32 %v4148_v62, %v2620_v30  ;;  %v4180_v44 = vstv %s8187_s0  ;;  %vm9419_vm5 = vcmp.lt.s32.totalorder %v4810_v61, 77 }
 0x485   :  { %v4171_v41 = vsel %vm9419_vm5, %v4168_v13, %v4170_v33  ;;  %v2625_v5 = vrot.slane %v2621_v21, 1  ;;  %v2626_v23 = vrot.slane %v2622_v57, 1  ;;  %vm9420_vm3 = vmmov %vm9419_vm5  ;;  %vm9422_vm2 = vcmp.eq.s32.totalorder %v9421_v26, 1  ;;  %v9428_v57 = vld [vmem:[#allocation11_spill] sm:$0xff] }
 0x486   :  { %v4172_v34 = vsel %vm9420_vm3, %v4170_v33, %v4168_v13  ;;  %v4173_v1 = vsel %vm9422_vm2, %v4171_v41, 0.0  ;;  %v4152_v3 = vmul.f32 %v4148_v62, %v2616_v36  ;;  %v4159_v20 = vrot.slane %v4155_v0, 1  ;;  %v9429_v0 = vld [vmem:[#allocation6_spill] sm:$0xff] }
 0x487   :  { %v4160_v51 = vrot.slane %v4156_v11, 1  ;;  %vm9424_vm4 = vcmp.eq.s32.totalorder %v9423_v39, 1  ;;  %v2585_v14 = vadd.f32 %v2583_v60, %v2538_v4  ;;  %v2629_v2 = vadd.f32 %v2625_v5, %v2617_v40  ;;  %v9426_v40 = vld [vmem:[#allocation7_spill] sm:$0xff]  ;;  %v9431_v5 = vld [vmem:[#allocation10_spill] sm:$0xff]  ;;  %v9434_v39 = vld [vmem:[#allocation16_spill] sm:$0xff] }
 0x488   :  { %v4174_v38 = vsel %vm9424_vm4, %v4172_v34, 0.0  ;;  %v2630_v47 = vadd.f32 %v2626_v23, %v2618_v35  ;;  %v4181_v32 = vmul.f32 %v4180_v44, %v4173_v1  ;;  %v4139_v45 = vadd.f32 %v4137_v6, %v4113_v27  ;;  %v9425_v6 = vld [vmem:[#allocation5_spill] sm:$0xff]  ;;  %v9432_v34 = vld [vmem:[#allocation12_spill] sm:$0xff] }
 0x489   :  { %v4163_v55 = vadd.f32 %v4159_v20, %v4151_v53  ;;  %v4164_v37 = vadd.f32 %v4160_v51, %v4152_v3  ;;  %v4182_v18 = vmul.f32 %v4180_v44, %v4174_v38  ;;  %v2631_v29 = vadd.f32 %v2629_v2, %v2584_v43  ;;  %v9427_v35 = vld [vmem:[#allocation9_spill] sm:$0xff]  ;;  %v9430_v44 = vld [vmem:[#allocation8_spill] sm:$0xff]  ;;  %v9433_v20 = vld [vmem:[#allocation15_spill] sm:$0xff] }
 0x48a   :  { %v2632_v61 = vadd.f32 %v2630_v47, %v2585_v14  ;;  %v4177_v16 = vmul.f32 %v4176_v7, %v4173_v1  ;;  %v4185_v49 = vrot.slane %v4181_v32, 1  ;;  %v4140_v54 = vadd.f32 %v4138_v10, %v8183_v25  ;;  %v9436_v2 = vld [vmem:[#allocation14_spill] sm:$0xff]  ;;  %v9437_v32 = vld [vmem:[#allocation17_spill] sm:$0xff] }
 0x48b   :  { %v4178_v8 = vmul.f32 %v4176_v7, %v4174_v38  ;;  %v4186_v22 = vrot.slane %v4182_v18, 1  ;;  %v2678_v56 = vadd.f32 %v7664_v31, %v2631_v29  ;;  %v4165_v4 = vadd.f32 %v4163_v55, %v4139_v45  ;;  %v9435_v38 = vld [vmem:[#allocation13_spill] sm:$0xff]  ;;  %v9438_v55 = vld [vmem:[#allocation18_spill] sm:$0xff]  ;;  %v9439_v18 = vld [vmem:[#allocation19_spill] sm:$0xff] }
 0x48c   :  { %v2679_v36 = vadd.f32 %v7669_v12, %v2632_v61  ;;  %v4189_v58 = vadd.f32 %v4185_v49, %v4177_v16  ;;  %v4166_v50 = vadd.f32 %v4164_v37, %v4140_v54  ;;  %v9440_v61 = vld [vmem:[#allocation20_spill] sm:$0xff] }
 0x48d   :  { %v4190_v24 = vadd.f32 %v4186_v22, %v4178_v8  ;;  %v4343_v27 = vmul.f32 -1.442695, %v2678_v56 }
 0x48e   :  { %v4344_v17 = vmul.f32 -1.442695, %v2679_v36  ;;  %v4191_v63 = vadd.f32 %v4189_v58, %v4165_v4 }
 0x48f   :  { %v4192_v60 = vadd.f32 %v4190_v24, %v4166_v50  ;;  %4551 = vpow2.f32 %v4343_v27 }
 0x490   :  { %v4454_v59 = vmul.f32 -1.442695, %v4191_v63  ;;  %4553 = vpow2.f32 %v4344_v17 }
 0x491   :  { %v4455_v52 = vmul.f32 -1.442695, %v4192_v60 }
 0x492   :  { %4555 = vpow2.f32 %v4454_v59 }
 0x493   :  { %4557 = vpow2.f32 %v4455_v52 }
 0x499   :  { %v4552_v25 = vpop.eup %4551 }
 0x49a   :  { %v4554_v46 = vpop.eup %4553  ;;  %v2686_v43 = vadd.f32 1.0, %v4552_v25 }
 0x49b   :  { %v2687_v30 = vadd.f32 1.0, %v4554_v46 }
 0x49c   :  { %v4556_v31 = vpop.eup %4555  ;;  %4559 = vrcp.f32 %v2686_v43 }
 0x49d   :  { %v4558_v12 = vpop.eup %4557  ;;  %v4199_v48 = vadd.f32 1.0, %v4556_v31  ;;  %4561 = vrcp.f32 %v2687_v30 }
 0x49e   :  { %v4200_v19 = vadd.f32 1.0, %v4558_v12 }
 0x49f   :  { %4563 = vrcp.f32 %v4199_v48 }
 0x4a0   :  { %4565 = vrcp.f32 %v4200_v19 }
 0x4a6   :  { %v4560_v9 = vpop.eup %4559 }
 0x4a7   :  { %v4562_v15 = vpop.eup %4561  ;;  %v2695_v42 = vrot.slane %v4560_v9, %v4852_v28 }
 0x4a8   :  { %v2699_v33 = vrot.slane %v4562_v15, %v4852_v28 }
 0x4a9   :  { %v4564_v62 = vpop.eup %4563  ;;  %v2700_v10 = vmul.f32 %v2695_v42, %v9425_v6  ;;  %v2702_v7 = vmul.f32 %v2695_v42, %v9426_v40  ;;  %v2704_v21 = vmul.f32 %v2695_v42, %v9427_v35  ;;  %v2706_v53 = vmul.f32 %v2695_v42, %v9428_v57 }
 0x4aa   :  { %v4566_v13 = vpop.eup %4565  ;;  %v2701_v11 = vmul.f32 %v2699_v33, %v9429_v0  ;;  %v2703_v41 = vmul.f32 %v2699_v33, %v9430_v44  ;;  %v2705_v23 = vmul.f32 %v2699_v33, %v9431_v5  ;;  %v2707_v26 = vmul.f32 %v2699_v33, %v9432_v34 }
 0x4ab   :  { %2708 = vst [vmem:[%s8285_s5] sm:$0xff] %v2700_v10  ;;  %2710 = vst [vmem:[%s8285_s5 + $0x10] sm:$0xff] %v2702_v7  ;;  %v4208_v1 = vrot.slane %v4564_v62, %v4852_v28  ;;  %v4212_v3 = vrot.slane %v4566_v13, %v4852_v28 }
 0x4ac   :  { %2712 = vst [vmem:[%s8285_s5 + $0x20] sm:$0xff] %v2704_v21  ;;  %2714 = vst [vmem:[%s8285_s5 + $0x30] sm:$0xff] %v2706_v53 }
 0x4ad   :  { %2709 = vst [vmem:[%s8285_s5 + $0x8] sm:$0xff] %v2701_v11  ;;  %2711 = vst [vmem:[%s8285_s5 + $0x18] sm:$0xff] %v2703_v41  ;;  %v4213_v51 = vmul.f32 %v4208_v1, %v9433_v20  ;;  %v4214_v28 = vmul.f32 %v4212_v3, %v9434_v39  ;;  %v4215_v14 = vmul.f32 %v4208_v1, %v9435_v38 }
 0x4ae   :  { %2713 = vst [vmem:[%s8285_s5 + $0x28] sm:$0xff] %v2705_v23  ;;  %2715 = vst [vmem:[%s8285_s5 + $0x38] sm:$0xff] %v2707_v26  ;;  %v4216_v47 = vmul.f32 %v4212_v3, %v9436_v2  ;;  %v4217_v45 = vmul.f32 %v4208_v1, %v9437_v32  ;;  %v4218_v37 = vmul.f32 %v4212_v3, %v9438_v55 }
 0x4af   :  { %v4219_v29 = vmul.f32 %v4208_v1, %v9439_v18  ;;  %v4220_v16 = vmul.f32 %v4212_v3, %v9440_v61  ;;  %4456 = vst [vmem:[%s8285_s5 + $0x40] sm:$0xff] %v4213_v51  ;;  %4457 = vst [vmem:[%s8285_s5 + $0x48] sm:$0xff] %v4214_v28 }
 0x4b0   :  { %4458 = vst [vmem:[%s8285_s5 + $0x50] sm:$0xff] %v4215_v14  ;;  %4459 = vst [vmem:[%s8285_s5 + $0x58] sm:$0xff] %v4216_v47 }
 0x4b1   :  { %4460 = vst [vmem:[%s8285_s5 + $0x60] sm:$0xff] %v4217_v45  ;;  %4461 = vst [vmem:[%s8285_s5 + $0x68] sm:$0xff] %v4218_v37 }
 0x4b2   :  { %4462 = vst [vmem:[%s8285_s5 + $0x70] sm:$0xff] %v4219_v29  ;;  %4463 = vst [vmem:[%s8285_s5 + $0x78] sm:$0xff] %v4220_v16 }
 0x4b3   :  { %4234 = vsyncpa [#allocation3], 1 }

</bundles_post_ra>
